<compile_context>
chip_gen: v7x
topology: tpu7x:2x2x1
jax: 0.10.0
libtpu: 0.0.40
codegen_flags: <defaults>
</compile_context>

<pallas_src>
from functools import partial

import numpy as np
import jax
import jax.numpy as jnp
from jax.experimental import pallas as pl
from jax.experimental.pallas import tpu as pltpu


# ----------------------------- deterministic parameter construction -----------------------------

def _hz2mel(f):
    return 2595.0 * np.log10(1.0 + np.asarray(f, np.float64) / 700.0)


def _mel2hz(m):
    return 700.0 * (10.0 ** (np.asarray(m, np.float64) / 2595.0) - 1.0)


def mel_filter_params(n_filters, min_freq, max_freq, sample_rate):
    peaks_mel = np.linspace(_hz2mel(min_freq), _hz2mel(max_freq), n_filters + 2)
    peaks_hz = _mel2hz(peaks_mel)
    center_freqs = peaks_hz[1:-1] * (2.0 * np.pi / sample_rate)      # rad / sample
    sigmas = (sample_rate / 2.0) / (peaks_hz[2:] - peaks_hz[:-2])    # time-domain sigma (samples)
    return center_freqs.astype(np.float32), sigmas.astype(np.float32)


def init_grouped_frontend(n_filters=40, num_groups=4, min_freq=60.0, max_freq=7800.0,
                          sample_rate=16000, window_len=25.0, window_stride=10.0,
                          conv_win_factor=4.77, stride_factor=1.0, pool_init=0.4):
    pool_size = int(sample_rate * window_len / 1000)
    pool_size += 1 - pool_size % 2                       # 401
    pool_stride = int(sample_rate * window_stride / 1000)  # 160
    assert int(stride_factor) == 1, "default GroupedFrontend uses stride_factor=1 (conv stride 1)"

    center_freqs, sigmas = mel_filter_params(n_filters, min_freq, max_freq, sample_rate)
    center_freqs = np.clip(center_freqs, 0.0, np.pi)

    # per-group kernel size: widest (largest-sigma) filter in the group decides the length
    gsize = n_filters // num_groups
    ksizes = []
    for g in range(num_groups):
        k = int(np.ceil(float(sigmas[g * gsize:(g + 1) * gsize].max()) * conv_win_factor))
        k += 1 - k % 2                                   # make odd
        ksizes.append(k)
    kmax = max(ksizes)                                   # 403 with defaults
    kp = ((kmax + 7) // 8) * 8                           # 408
    kp8 = kp + 8                                         # 416: room for 8 within-block time offsets
    flanes = 128                                         # lane-dense filter axis (40 real + 88 zero)

    # dense per-filter Gabor kernels, (Kp, 128); embedding each group's shorter (centered) kernel
    # in the common length kmax is mathematically identical to the grouped per-group convolutions.
    w_cos = np.zeros((kp, flanes), np.float32)
    w_sin = np.zeros((kp, flanes), np.float32)
    for g in range(num_groups):
        k = ksizes[g]
        t = np.arange(k, dtype=np.float64) - (k // 2)
        off = kmax // 2 - k // 2
        for j in range(gsize):
            f = g * gsize + j
            s = float(sigmas[f])
            c = float(center_freqs[f])
            env = np.exp(-(t ** 2) / (2.0 * s * s)) / (np.sqrt(2.0 * np.pi) * s)
            w_cos[off:off + k, f] = (env * np.cos(c * t)).astype(np.float32)
            w_sin[off:off + k, f] = (env * np.sin(c * t)).astype(np.float32)

    # fused cos|sin weights expanded over the 8 within-block time offsets r:
    #   W8[k', r*128 + f]        = w_cos[k' - r, f]
    #   W8[k', 1024 + r*128 + f] = w_sin[k' - r, f]
    w8 = np.zeros((kp8, 16 * flanes), np.float32)
    for r in range(8):
        w8[r:r + kp, r * flanes:(r + 1) * flanes] = w_cos
        w8[r:r + kp, 8 * flanes + r * flanes:8 * flanes + (r + 1) * flanes] = w_sin

    # per-filter Gaussian low-pass pooling window (pooling width init 0.4, clamped to [2/P, 0.5])
    pwidth = np.clip(np.full((n_filters,), float(pool_init)), 2.0 / pool_size, 0.5)
    tt = np.arange(pool_size, dtype=np.float64) * (2.0 / (pool_size - 1)) - 1.0
    pool_win = np.zeros((pool_size, flanes), np.float32)
    pool_win[:, :n_filters] = np.exp(-0.5 * (tt[:, None] / pwidth[None, :]) ** 2)

    # window zero-extended to n_seg * stride taps for the stride-segment decomposition
    n_seg = -(-pool_size // pool_stride)                 # 3 with defaults
    pool_win_ext = np.zeros((n_seg * pool_stride, flanes), np.float32)
    pool_win_ext[:pool_size] = pool_win

    return dict(
        n_filters=n_filters, kmax=kmax, kp=kp, kp8=kp8,
        pool_size=pool_size, pool_stride=pool_stride, n_seg=n_seg,
        w_cos=w_cos, w_sin=w_sin, pool_win=pool_win,     # numpy copies for the reference check
        w8=jnp.asarray(w8), pool_win_ext=jnp.asarray(pool_win_ext),
    )


# ----------------------------------------- Pallas kernels ----------------------------------------

def _gabor_modsq_kernel(p_ref, w_ref, o_ref):
    """Gabor conv (single fused MXU matmul for cos|sin x 8 time offsets) + squared modulus.

    p_ref : (row_tile, Kp8) waveform patches at 8-sample granularity
    w_ref : (Kp8, 2048)     expanded [cos | sin] Gabor weights
    o_ref : (row_tile, 1024) squared modulus; column layout r*128 + f (r = within-block offset)
    """
    y = jnp.dot(p_ref[...], w_ref[...], preferred_element_type=jnp.float32)
    half = y.shape[1] // 2                              # 1024: vreg-aligned split
    c = y[:, :half]
    s = y[:, half:]
    o_ref[...] = c * c + s * s


def _gauss_pool_kernel(m_ref, w_ref, o_ref, *, fc, n_seg, stride):
    """Per-filter Gaussian low-pass pooling for one chunk of `fc` output frames.

    m_ref : (1, (fc + n_seg - 1) * stride, 128)  squared-modulus chunk (incl. halo, pre-padded)
    w_ref : (n_seg * stride, 128)                zero-extended Gaussian window
    o_ref : (1, fc, 128)
    """
    acc = None
    for c in range(n_seg):                              # n_seg = 3 static segments of the window
        seg = m_ref[0, c * stride:(c + fc) * stride, :].reshape(fc, stride, 128)
        win = w_ref[c * stride:(c + 1) * stride, :]
        term = jnp.sum(seg * win[None, :, :], axis=1)   # (fc, 128)
        acc = term if acc is None else acc + term
    o_ref[0] = acc                                      # single unmasked (fc, 128) store


# --------------------------------------------- wrapper -------------------------------------------

def grouped_frontend(x, params, row_tile=256, frames_per_chunk=16):
    """Forward pass of GroupedFrontend (compression=None). Returns (B, n_filters, n_frames)."""
    x = jnp.asarray(x, jnp.float32)
    if x.ndim == 1:
        x = x[None, :]
    if x.ndim == 3:
        assert x.shape[1] == 1, "GroupedFrontend expects a single input channel"
        x = x[:, 0, :]
    B, T = x.shape

    F = params["n_filters"]
    kmax, kp8 = params["kmax"], params["kp8"]
    psize, pstride, n_seg = params["pool_size"], params["pool_stride"], params["n_seg"]
    fc = frames_per_chunk
    assert fc % 8 == 0

    # ---- stage 1: Gabor conv + squared modulus -------------------------------------------------
    pad_l = kmax // 2
    tb_total = -(-T // 8)                                # 8-sample blocks per batch item
    l8 = 8 * tb_total + kp8
    x_ext = jnp.pad(x, ((0, 0), (pad_l, l8 - pad_l - T)))
    # 8-sample-granularity patches (52x less HBM than per-sample im2col): P8[b,tb,c] = x_ext[8tb+c]
    idx8 = (8 * jnp.arange(tb_total))[:, None] + jnp.arange(kp8)[None, :]
    p8 = x_ext[:, idx8].reshape(B * tb_total, kp8)

    rows = B * tb_total
    rows_pad = -(-rows // row_tile) * row_tile
    if rows_pad != rows:
        p8 = jnp.pad(p8, ((0, rows_pad - rows), (0, 0)))

    modsq = pl.pallas_call(
        _gabor_modsq_kernel,
        out_shape=jax.ShapeDtypeStruct((rows_pad, 1024), jnp.float32),
        grid_spec=pltpu.PrefetchScalarGridSpec(
            num_scalar_prefetch=0,
            grid=(rows_pad // row_tile,),
            in_specs=[pl.BlockSpec((row_tile, kp8), lambda i: (i, 0)),
                      pl.BlockSpec((kp8, 2048), lambda i: (0, 0))],
            out_specs=pl.BlockSpec((row_tile, 1024), lambda i: (i, 0)),
        ),
        compiler_params=pltpu.CompilerParams(
            dimension_semantics=("parallel",),
            vmem_limit_bytes=32 * 1024 * 1024),
    )(p8, params["w8"])

    # free row-major reshape to time-major (B, t, filter-lane); drop the <8-sample tail
    msq = modsq[:rows].reshape(B, tb_total * 8, 128)[:, :T, :]

    # ---- stage 2: Gaussian low-pass pooling (stride pstride, "same") ----------------------------
    n_frames = (T - 1) // pstride + 1
    nc = -(-n_frames // fc)                              # chunks of fc frames
    nf = nc * fc
    lb = (fc + n_seg - 1) * pstride                      # chunk length incl. halo (2880 with fc=16)
    t_pool = (nc - 1) * fc * pstride + lb
    msq_pool = jnp.pad(msq, ((0, 0), (psize // 2, t_pool - psize // 2 - T), (0, 0)))
    # overlapping per-chunk strips (halo = (n_seg-1)*stride; ~1.1x duplication only)
    idxp = (fc * pstride * jnp.arange(nc))[:, None] + jnp.arange(lb)[None, :]
    msq_chunks = msq_pool[:, idxp, :].reshape(B * nc, lb, 128)

    pooled = pl.pallas_call(
        partial(_gauss_pool_kernel, fc=fc, n_seg=n_seg, stride=pstride),
        out_shape=jax.ShapeDtypeStruct((B * nc, fc, 128), jnp.float32),
        grid_spec=pltpu.PrefetchScalarGridSpec(
            num_scalar_prefetch=0,
            grid=(B * nc,),
            in_specs=[pl.BlockSpec((1, lb, 128), lambda i: (i, 0, 0)),
                      pl.BlockSpec((n_seg * pstride, 128), lambda i: (0, 0))],
            out_specs=pl.BlockSpec((1, fc, 128), lambda i: (i, 0, 0)),
        ),
        compiler_params=pltpu.CompilerParams(
            dimension_semantics=("parallel",),
            vmem_limit_bytes=32 * 1024 * 1024),
    )(msq_chunks, params["pool_win_ext"])

    pooled = pooled.reshape(B, nf, 128)[:, :n_frames, :F]
    return jnp.transpose(pooled, (0, 2, 1))             # (B, F, n_frames), channel-first


# --------------------------------------- pure-numpy reference ------------------------------------

def _reference(x, params):
    x = np.asarray(x, np.float64)
    B, T = x.shape
    F = params["n_filters"]
    kmax = params["kmax"]
    wc = np.asarray(params["w_cos"], np.float64)[:kmax, :F]
    ws = np.asarray(params["w_sin"], np.float64)[:kmax, :F]
    pad = kmax // 2
    xp = np.pad(x, ((0, 0), (pad, pad)))
    idx = np.arange(T)[:, None] + np.arange(kmax)[None, :]
    P = xp[:, idx]                                       # (B, T, kmax)
    c = P @ wc
    s = P @ ws
    m = c * c + s * s                                    # (B, T, F)

    psize, pstride = params["pool_size"], params["pool_stride"]
    win = np.asarray(params["pool_win"], np.float64)[:, :F]
    n_out = (T - 1) // pstride + 1
    mp = np.pad(m, ((0, 0), (psize // 2, psize // 2), (0, 0)))
    out = np.zeros((B, n_out, F), np.float64)
    for n in range(n_out):
        seg = mp[:, n * pstride:n * pstride + psize, :]
        out[:, n, :] = (seg * win[None]).sum(axis=1)
    return out.transpose(0, 2, 1).astype(np.float32)


# ------------------------------------------------ main -------------------------------------------

if __name__ == "__main__":
    params = init_grouped_frontend()                     # defaults: 40 filters, 4 groups, 16 kHz

    key = jax.random.PRNGKey(0)
    B, T = 2, 4096                                       # 0.256 s of audio per item
    x = jax.random.normal(key, (B, 1, T), dtype=jnp.float32)   # PyTorch NCW layout, C=1

    out = grouped_frontend(x, params)
    out = jax.block_until_ready(out)

    n_out = (T - 1) // params["pool_stride"] + 1
    assert out.shape == (B, params["n_filters"], n_out), out.shape
    assert np.isfinite(np.asarray(out)).all()

    ref = _reference(np.asarray(x)[:, 0, :], params)
    err = np.max(np.abs(np.asarray(out) - ref))
    assert np.allclose(np.asarray(out), ref, rtol=1e-3, atol=1e-4), f"max abs err {err}"

    print("KERNEL_OK")
</pallas_src>

<mosaic_0001>
module attributes {stable_mosaic.version = 11 : i64} {
  func.func @_gabor_modsq_kernel(%arg0: i32, %arg1: memref<256x416xf32, #tpu.memory_space<vmem>>, %arg2: memref<416x2048xf32, #tpu.memory_space<vmem>>, %arg3: memref<256x1024xf32, #tpu.memory_space<vmem>>) attributes {dimension_semantics = [#tpu.dimension_semantics<parallel>], iteration_bounds = array<i64: 4>, scalar_prefetch = 0 : i64, scratch_operands = 0 : i64, tpu.core_type = #tpu.core_type<tc>, window_params = [{transform_indices = @transform_0, window_bounds = array<i64: 256, 416>}, {pipeline_mode = #tpu.pipeline_mode<synchronous>, transform_indices = @transform_1, window_bounds = array<i64: 416, 2048>}, {transform_indices = @transform_2, window_bounds = array<i64: 256, 1024>}]} {
    %c0 = arith.constant 0 : index
    %c0_0 = arith.constant 0 : index
    %0 = vector.load %arg1[%c0, %c0_0] : memref<256x416xf32, #tpu.memory_space<vmem>>, vector<256x416xf32>
    %c0_1 = arith.constant 0 : index
    %c0_2 = arith.constant 0 : index
    %1 = vector.load %arg2[%c0_1, %c0_2] : memref<416x2048xf32, #tpu.memory_space<vmem>>, vector<416x2048xf32>
    %cst = arith.constant dense<0.000000e+00> : vector<256x2048xf32>
    %2 = tpu.matmul %0, %1, %cst {dimension_numbers = #tpu.dot_dimension_numbers<[1], [0], [0], [1], [0, 0, 1, 1], [], []>} : vector<256x416xf32>, vector<416x2048xf32>, vector<256x2048xf32> -> vector<256x2048xf32>
    %3 = vector.extract_strided_slice %2 {offsets = [0, 0], sizes = [256, 1024], strides = [1, 1]} : vector<256x2048xf32> to vector<256x1024xf32>
    %4 = vector.extract_strided_slice %2 {offsets = [0, 1024], sizes = [256, 1024], strides = [1, 1]} : vector<256x2048xf32> to vector<256x1024xf32>
    %5 = arith.mulf %3, %3 : vector<256x1024xf32>
    %6 = arith.mulf %4, %4 : vector<256x1024xf32>
    %7 = arith.addf %5, %6 : vector<256x1024xf32>
    %c0_3 = arith.constant 0 : index
    %c0_4 = arith.constant 0 : index
    %8 = vector.load %arg3[%c0_3, %c0_4] : memref<256x1024xf32, #tpu.memory_space<vmem>>, vector<256x1024xf32>
    tpu.vector_store %arg3[%c0_3, %c0_4], %7 {strides = array<i32>} : memref<256x1024xf32, #tpu.memory_space<vmem>>, vector<256x1024xf32>,
    return
  }
  func.func @transform_0(%arg0: i32) -> (i32, i32) {
    %c0_i32 = arith.constant 0 : i32
    %c0_i32_0 = arith.constant 0 : i32
    return %arg0, %c0_i32 : i32, i32
  }
  func.func @transform_1(%arg0: i32) -> (i32, i32) {
    %c0_i32 = arith.constant 0 : i32
    %c0_i32_0 = arith.constant 0 : i32
    %c0_i32_1 = arith.constant 0 : i32
    return %c0_i32, %c0_i32_0 : i32, i32
  }
  func.func @transform_2(%arg0: i32) -> (i32, i32) {
    %c0_i32 = arith.constant 0 : i32
    %c0_i32_0 = arith.constant 0 : i32
    return %arg0, %c0_i32 : i32, i32
  }
}

</mosaic_0001>

<bundles_post_ra>
// kernel: tpu_custom_call.1
= control target key start
LH: loop header
LB: loop body
LE: loop exit
PB: predicated region body
PF: predicated region fallthrough
CT: control target
= control target key end

     0   :  { %7 = vsyncpa [#allocation3], 0  ;;  %s13206_s0 = inlined_call_operand.vmem [shape: f32[1024,416], index: 0, kind: input, shape index: {}]   ;;  %s13207_s1 = inlined_call_operand.vmem [shape: f32[416,2048], index: 1, kind: input, shape index: {}]   ;;  %s13208_s2 = inlined_call_operand.hbm [shape: f32[1024,1024], index: 2, kind: output, shape index: {}]  }
   0x1   :  { %9 = vsyncpa [#allocation3 + $0x1], 0  ;;  %s8542_s9 = smov 0   ;;  %s8544_s10 = smov 0  }
   0x2   :  { %s8546_s11 = smov 0   ;;  %s8548_s12 = smov 0  }
   0x3 LB: > { %s8563_s13 = sadd.s32 4294967295, %s8522_s12   ;;  %s6418_s14 = sadd.s32 4294967294, %s8522_s12   ;;  %s8522_s12 = sphi %s8548_s12, %s13637_s12   ;;  %s8518_s11 = sphi %s8546_s11, %s13636_s11   ;;  %s8514_s10 = sphi %s8544_s10, %s13635_s10   ;;  %s8510_s9 = sphi %s8542_s9, %s13634_s9  }
   0x4   : > { %s8567_s15 = sadd.s32 1, %s8522_s12   ;;  %s69_s16 = sadd.s32 1, %s8518_s11 }
   0x5   : > { %s66_s17 = ssub.s32 %s8522_s12, %s8567_s15  ;;  %p79_p0 = scmp.ne.s32.totalorder %s8518_s11, %s8514_s10 }
   0x6   : > { %p67_p1 = scmp.eq.s32.totalorder %s66_s17, 0  ;;  %p80_p2 = scmp.eq.s32.totalorder %s8563_s13, 3 }
   0x7   : > { %p85_p3 = scmp.ne.s32.totalorder %s8514_s10, %s8510_s9  ;;  %p86_p4 = scmp.eq.s32.totalorder %s6418_s14, 3 }
   0x8   : > { %s8578_s18 = scalar_select %p67_p1, %s8518_s11, %s69_s16  }
   0x9   : > { %p8580_p5 = por %p80_p2, %p79_p0  ;;  %p8584_p6 = por %p86_p4, %p85_p3 }
   0xa   : > { %p6421_p7 = scmp.ge.s32.totalorder %s8522_s12, 1  ;;  %p117_p8 = scmp.lt.s32.totalorder %s8522_s12, 5 }
   0xc   : > { %p118_p9 = pnand %p6421_p7, %p117_p8 }
   0xe   : > { %121 = sbr.rel (%p118_p9) target bundleno = 1342 (0x53e), region = 28 }
  0x15   : > { %v277_v0 = vld [vmem:[%s13207_s1 + $0x8] sm:$0xff]  ;;  %v279_v2 = vld [vmem:[%s13207_s1 + $0x18] sm:$0xff]  ;;  %v276_v5 = vld [vmem:[%s13207_s1] sm:$0xff]  ;;  %s6423_s5 = sshll.u32 %s8563_s13, 5  ;;  %vm1108_vm0 = vcmask 261120   ;;  %s137_s29 = sand.u32 1, %s8514_s10  }
  0x16   : > { %v293_v1 = vld [vmem:[%s13207_s1 + $0x88] sm:$0xff]  ;;  %v295_v4 = vld [vmem:[%s13207_s1 + $0x98] sm:$0xff]  ;;  %v292_v6 = vld [vmem:[%s13207_s1 + $0x80] sm:$0xff]  ;;  %p8795_p10 = scmp.lt.s32.totalorder %s6423_s5, 127  ;;  %s6422_s30 = sshll.u32 %s137_s29, 11 }
  0x17   : > { %v6691_v3 = vpack.c.bf16 %v293_v1, %v277_v0  ;;  %v6795_v7 = vpack.c.bf16 %v295_v4, %v279_v2  ;;  %v6693_v8 = vpack.c.bf16 %v292_v6, %v276_v5  ;;  %v278_v9 = vld [vmem:[%s13207_s1 + $0x10] sm:$0xff]  ;;  %v309_v11 = vld [vmem:[%s13207_s1 + $0x108] sm:$0xff]  ;;  %v311_v14 = vld [vmem:[%s13207_s1 + $0x118] sm:$0xff]  ;;  %s13165_s4 = scalar_lea.sflag [#allocation3], %s137_s29  ;;  %s8524_s7 = smov [#allocation2]  }
  0x18   : > { %v294_v10 = vld [vmem:[%s13207_s1 + $0x90] sm:$0xff]  ;;  %v325_v13 = vld [vmem:[%s13207_s1 + $0x188] sm:$0xff]  ;;  %v327_v15 = vld [vmem:[%s13207_s1 + $0x198] sm:$0xff]  ;;  %s13639_s5 = smov (!%p8795_p10, %s6423_s5), 127  ;;  %s8464_s8 = sshll.u32 %s8524_s7, 4  ;;  %s8465_s8 = int_to_ptr.vmem [resolvable:$false] %s8464_s8 }
  0x19   : > { %6692 = vmatprep.subr.bf16.mxu0 %v6691_v3  ;;  %v6797_v12 = vpack.c.bf16 %v294_v10, %v278_v9  ;;  %6796 = vmatprep.subr.bf16.mxu1 %v6795_v7  ;;  %v6695_v16 = vpack.c.bf16 %v325_v13, %v309_v11  ;;  %v6799_v17 = vpack.c.bf16 %v327_v15, %v311_v14  ;;  %v308_v18 = vld [vmem:[%s13207_s1 + $0x100] sm:$0xff]  ;;  %v310_v20 = vld [vmem:[%s13207_s1 + $0x110] sm:$0xff]  ;;  %v341_v23 = vld [vmem:[%s13207_s1 + $0x208] sm:$0xff]  ;;  %s6688_s22 = sshll.u32 %s13639_s5, 5  ;;  %s8466_s14 = scalar_lea.vmem %s8465_s8, 65536 }
  0x1a   : > { %6694 = vmatpush1.bf16.msra.mxu0 %v6693_v8  ;;  %v324_v19 = vld [vmem:[%s13207_s1 + $0x180] sm:$0xff]  ;;  %v326_v22 = vld [vmem:[%s13207_s1 + $0x190] sm:$0xff]  ;;  %v357_v24 = vld [vmem:[%s13207_s1 + $0x288] sm:$0xff]  ;;  %s8879_s23 = scalar_lea.vmem %s13206_s0, %s6688_s22  ;;  %s12249_s22 = scalar_lea.vmem [#allocation2], %s6422_s30 }
  0x1b   : > { %6798 = vmatpush1.bf16.msra.mxu1 %v6797_v12  ;;  %v6697_v21 = vpack.c.bf16 %v324_v19, %v308_v18  ;;  %6696 = vmatprep.subr.bf16.mxu0 %v6695_v16  ;;  %v6801_v25 = vpack.c.bf16 %v326_v22, %v310_v20  ;;  %v6699_v26 = vpack.c.bf16 %v357_v24, %v341_v23  ;;  %v343_v27 = vld [vmem:[%s13207_s1 + $0x218] sm:$0xff]  ;;  %v340_v29 = vld [vmem:[%s13207_s1 + $0x200] sm:$0xff]  ;;  %v342_v32 = vld [vmem:[%s13207_s1 + $0x210] sm:$0xff]  ;;  %s6356_s5 = sshll.u32 %s12249_s22, 4  ;;  %s13157_s5 = int_to_ptr.vmem [resolvable:$true] %s6356_s5 }
  0x1c   : > { %6800 = vmatprep.subr.bf16.mxu1 %v6799_v17  ;;  %v359_v28 = vld [vmem:[%s13207_s1 + $0x298] sm:$0xff]  ;;  %v356_v31 = vld [vmem:[%s13207_s1 + $0x280] sm:$0xff]  ;;  %v358_v33 = vld [vmem:[%s13207_s1 + $0x290] sm:$0xff]  ;;  %s8460_s6 = scalar_lea.vmem %s13157_s5, 32768  ;;  %p8467_p0 = scmp.lt.s32.totalorder %s13157_s5, %s8465_s8 }
  0x1d   : > { %v6803_v30 = vpack.c.bf16 %v359_v28, %v343_v27  ;;  %v6701_v34 = vpack.c.bf16 %v356_v31, %v340_v29  ;;  %v373_v35 = vld [vmem:[%s13207_s1 + $0x308] sm:$0xff]  ;;  %v375_v37 = vld [vmem:[%s13207_s1 + $0x318] sm:$0xff]  ;;  %v6805_v38 = vpack.c.bf16 %v358_v33, %v342_v32  ;;  %v372_v41 = vld [vmem:[%s13207_s1 + $0x300] sm:$0xff]  ;;  %p8461_p11 = scmp.ne.s32.totalorder %s13157_s5, %s8460_s6  ;;  %p8468_p1 = scmp.lt.s32.totalorder %s8466_s14, %s8460_s6 }
  0x1e   : > { %6698 = vmatpush1.bf16.msra.mxu0 %v6697_v21  ;;  %v389_v36 = vld [vmem:[%s13207_s1 + $0x388] sm:$0xff]  ;;  %v391_v40 = vld [vmem:[%s13207_s1 + $0x398] sm:$0xff]  ;;  %v388_v42 = vld [vmem:[%s13207_s1 + $0x380] sm:$0xff] }
  0x1f   : > { %6802 = vmatpush1.bf16.msra.mxu1 %v6801_v25  ;;  %6700 = vmatprep.subr.bf16.mxu0 %v6699_v26  ;;  %v6703_v39 = vpack.c.bf16 %v389_v36, %v373_v35  ;;  %v6807_v43 = vpack.c.bf16 %v391_v40, %v375_v37  ;;  %v374_v44 = vld [vmem:[%s13207_s1 + $0x310] sm:$0xff]  ;;  %v405_v46 = vld [vmem:[%s13207_s1 + $0x408] sm:$0xff]  ;;  %v407_v48 = vld [vmem:[%s13207_s1 + $0x418] sm:$0xff]  ;;  %v6705_v50 = vpack.c.bf16 %v388_v42, %v372_v41  ;;  %p8462_p12 = pnand %p8461_p11, %p8580_p5  ;;  %p8469_p2 = por %p8468_p1, %p8467_p0 }
  0x20   : > { %6804 = vmatprep.subr.bf16.mxu1 %v6803_v30  ;;  %v390_v45 = vld [vmem:[%s13207_s1 + $0x390] sm:$0xff]  ;;  %v421_v47 = vld [vmem:[%s13207_s1 + $0x488] sm:$0xff]  ;;  %v423_v49 = vld [vmem:[%s13207_s1 + $0x498] sm:$0xff] }
  0x21   : > { %v6809_v51 = vpack.c.bf16 %v390_v45, %v374_v44  ;;  %v6707_v52 = vpack.c.bf16 %v421_v47, %v405_v46  ;;  %v404_v53 = vld [vmem:[%s13207_s1 + $0x400] sm:$0xff]  ;;  %v406_v55 = vld [vmem:[%s13207_s1 + $0x410] sm:$0xff]  ;;  %v6811_v56 = vpack.c.bf16 %v423_v49, %v407_v48  ;;  %v437_v58 = vld [vmem:[%s13207_s1 + $0x508] sm:$0xff]  ;;  %p8463_p13 = pneg %p8462_p12 }
  0x22   : > { %6702 = vmatpush1.bf16.msra.mxu0 %v6701_v34  ;;  %v420_v54 = vld [vmem:[%s13207_s1 + $0x480] sm:$0xff]  ;;  %v422_v57 = vld [vmem:[%s13207_s1 + $0x490] sm:$0xff]  ;;  %v453_v59 = vld [vmem:[%s13207_s1 + $0x588] sm:$0xff] }
  0x23   : > { %6806 = vmatpush1.bf16.msra.mxu1 %v6805_v38  ;;  %6704 = vmatprep.subr.bf16.mxu0 %v6703_v39  ;;  %v439_v60 = vld [vmem:[%s13207_s1 + $0x518] sm:$0xff]  ;;  %v6709_v62 = vpack.c.bf16 %v420_v54, %v404_v53  ;;  %v6813_v63 = vpack.c.bf16 %v422_v57, %v406_v55  ;;  %v6711_v0 = vpack.c.bf16 %v453_v59, %v437_v58  ;;  %v436_v1 = vld [vmem:[%s13207_s1 + $0x500] sm:$0xff]  ;;  %v438_v3 = vld [vmem:[%s13207_s1 + $0x510] sm:$0xff]  ;;  %p8470_p3 = pnand %p8469_p2, %p8463_p13 }
  0x24   : > { %6808 = vmatprep.subr.bf16.mxu1 %v6807_v43  ;;  %v455_v61 = vld [vmem:[%s13207_s1 + $0x598] sm:$0xff]  ;;  %v452_v2 = vld [vmem:[%s13207_s1 + $0x580] sm:$0xff]  ;;  %v454_v5 = vld [vmem:[%s13207_s1 + $0x590] sm:$0xff] }
  0x25   : > { %v6815_v4 = vpack.c.bf16 %v455_v61, %v439_v60  ;;  %v469_v6 = vld [vmem:[%s13207_s1 + $0x608] sm:$0xff]  ;;  %v471_v8 = vld [vmem:[%s13207_s1 + $0x618] sm:$0xff]  ;;  %v6713_v10 = vpack.c.bf16 %v452_v2, %v436_v1  ;;  %v6817_v11 = vpack.c.bf16 %v454_v5, %v438_v3  ;;  %v468_v13 = vld [vmem:[%s13207_s1 + $0x600] sm:$0xff] }
  0x26   : > { %6706 = vmatpush1.bf16.msra.mxu0 %v6705_v50  ;;  %v485_v7 = vld [vmem:[%s13207_s1 + $0x688] sm:$0xff]  ;;  %v487_v9 = vld [vmem:[%s13207_s1 + $0x698] sm:$0xff]  ;;  %v484_v14 = vld [vmem:[%s13207_s1 + $0x680] sm:$0xff] }
  0x27   : > { %6810 = vmatpush1.bf16.msra.mxu1 %v6809_v51  ;;  %6708 = vmatprep.subr.bf16.mxu0 %v6707_v52  ;;  %v6715_v12 = vpack.c.bf16 %v485_v7, %v469_v6  ;;  %v470_v15 = vld [vmem:[%s13207_s1 + $0x610] sm:$0xff]  ;;  %v6819_v16 = vpack.c.bf16 %v487_v9, %v471_v8  ;;  %v501_v18 = vld [vmem:[%s13207_s1 + $0x708] sm:$0xff]  ;;  %v503_v20 = vld [vmem:[%s13207_s1 + $0x718] sm:$0xff]  ;;  %v6717_v22 = vpack.c.bf16 %v484_v14, %v468_v13 }
  0x28   : > { %6812 = vmatprep.subr.bf16.mxu1 %v6811_v56  ;;  %v486_v17 = vld [vmem:[%s13207_s1 + $0x690] sm:$0xff]  ;;  %v517_v19 = vld [vmem:[%s13207_s1 + $0x788] sm:$0xff]  ;;  %v519_v21 = vld [vmem:[%s13207_s1 + $0x798] sm:$0xff] }
  0x29   : > { %v6821_v23 = vpack.c.bf16 %v486_v17, %v470_v15  ;;  %v6719_v24 = vpack.c.bf16 %v517_v19, %v501_v18  ;;  %v500_v25 = vld [vmem:[%s13207_s1 + $0x700] sm:$0xff]  ;;  %v502_v27 = vld [vmem:[%s13207_s1 + $0x710] sm:$0xff]  ;;  %v6823_v28 = vpack.c.bf16 %v519_v21, %v503_v20  ;;  %v533_v30 = vld [vmem:[%s13207_s1 + $0x808] sm:$0xff] }
  0x2a   : > { %6710 = vmatpush1.bf16.msra.mxu0 %v6709_v62  ;;  %v516_v26 = vld [vmem:[%s13207_s1 + $0x780] sm:$0xff]  ;;  %v518_v29 = vld [vmem:[%s13207_s1 + $0x790] sm:$0xff]  ;;  %v549_v31 = vld [vmem:[%s13207_s1 + $0x888] sm:$0xff] }
  0x2b   : > { %6814 = vmatpush1.bf16.msra.mxu1 %v6813_v63  ;;  %6712 = vmatprep.subr.bf16.mxu0 %v6711_v0  ;;  %v535_v32 = vld [vmem:[%s13207_s1 + $0x818] sm:$0xff]  ;;  %v6721_v34 = vpack.c.bf16 %v516_v26, %v500_v25  ;;  %v6825_v35 = vpack.c.bf16 %v518_v29, %v502_v27  ;;  %v6723_v36 = vpack.c.bf16 %v549_v31, %v533_v30  ;;  %v532_v37 = vld [vmem:[%s13207_s1 + $0x800] sm:$0xff]  ;;  %v534_v39 = vld [vmem:[%s13207_s1 + $0x810] sm:$0xff] }
  0x2c   : > { %6816 = vmatprep.subr.bf16.mxu1 %v6815_v4  ;;  %v551_v33 = vld [vmem:[%s13207_s1 + $0x898] sm:$0xff]  ;;  %v548_v38 = vld [vmem:[%s13207_s1 + $0x880] sm:$0xff]  ;;  %v550_v41 = vld [vmem:[%s13207_s1 + $0x890] sm:$0xff] }
  0x2d   : > { %v6827_v40 = vpack.c.bf16 %v551_v33, %v535_v32  ;;  %v565_v42 = vld [vmem:[%s13207_s1 + $0x908] sm:$0xff]  ;;  %v567_v44 = vld [vmem:[%s13207_s1 + $0x918] sm:$0xff]  ;;  %v6725_v46 = vpack.c.bf16 %v548_v38, %v532_v37  ;;  %v6829_v47 = vpack.c.bf16 %v550_v41, %v534_v39  ;;  %v564_v49 = vld [vmem:[%s13207_s1 + $0x900] sm:$0xff] }
  0x2e   : > { %6714 = vmatpush1.bf16.msra.mxu0 %v6713_v10  ;;  %v581_v43 = vld [vmem:[%s13207_s1 + $0x988] sm:$0xff]  ;;  %v583_v45 = vld [vmem:[%s13207_s1 + $0x998] sm:$0xff]  ;;  %v580_v50 = vld [vmem:[%s13207_s1 + $0x980] sm:$0xff] }
  0x2f   : > { %6818 = vmatpush1.bf16.msra.mxu1 %v6817_v11  ;;  %6716 = vmatprep.subr.bf16.mxu0 %v6715_v12  ;;  %v6727_v48 = vpack.c.bf16 %v581_v43, %v565_v42  ;;  %v566_v51 = vld [vmem:[%s13207_s1 + $0x910] sm:$0xff]  ;;  %v6831_v52 = vpack.c.bf16 %v583_v45, %v567_v44  ;;  %v597_v54 = vld [vmem:[%s13207_s1 + $0xa08] sm:$0xff]  ;;  %v599_v56 = vld [vmem:[%s13207_s1 + $0xa18] sm:$0xff]  ;;  %v6729_v58 = vpack.c.bf16 %v580_v50, %v564_v49 }
  0x30   : > { %6820 = vmatprep.subr.bf16.mxu1 %v6819_v16  ;;  %v582_v53 = vld [vmem:[%s13207_s1 + $0x990] sm:$0xff]  ;;  %v613_v55 = vld [vmem:[%s13207_s1 + $0xa88] sm:$0xff]  ;;  %v615_v57 = vld [vmem:[%s13207_s1 + $0xa98] sm:$0xff] }
  0x31   : > { %v6833_v59 = vpack.c.bf16 %v582_v53, %v566_v51  ;;  %v6731_v60 = vpack.c.bf16 %v613_v55, %v597_v54  ;;  %v596_v61 = vld [vmem:[%s13207_s1 + $0xa00] sm:$0xff]  ;;  %v598_v63 = vld [vmem:[%s13207_s1 + $0xa10] sm:$0xff]  ;;  %v6835_v0 = vpack.c.bf16 %v615_v57, %v599_v56  ;;  %v629_v2 = vld [vmem:[%s13207_s1 + $0xb08] sm:$0xff] }
  0x32   : > { %6718 = vmatpush1.bf16.msra.mxu0 %v6717_v22  ;;  %v612_v62 = vld [vmem:[%s13207_s1 + $0xa80] sm:$0xff]  ;;  %v614_v1 = vld [vmem:[%s13207_s1 + $0xa90] sm:$0xff]  ;;  %v645_v3 = vld [vmem:[%s13207_s1 + $0xb88] sm:$0xff] }
  0x33   : > { %6822 = vmatpush1.bf16.msra.mxu1 %v6821_v23  ;;  %6720 = vmatprep.subr.bf16.mxu0 %v6719_v24  ;;  %v631_v4 = vld [vmem:[%s13207_s1 + $0xb18] sm:$0xff]  ;;  %v6733_v6 = vpack.c.bf16 %v612_v62, %v596_v61  ;;  %v628_v7 = vld [vmem:[%s13207_s1 + $0xb00] sm:$0xff]  ;;  %v6837_v8 = vpack.c.bf16 %v614_v1, %v598_v63  ;;  %v6735_v9 = vpack.c.bf16 %v645_v3, %v629_v2  ;;  %v630_v11 = vld [vmem:[%s13207_s1 + $0xb10] sm:$0xff] }
  0x34   : > { %6824 = vmatprep.subr.bf16.mxu1 %v6823_v28  ;;  %v647_v5 = vld [vmem:[%s13207_s1 + $0xb98] sm:$0xff]  ;;  %v644_v10 = vld [vmem:[%s13207_s1 + $0xb80] sm:$0xff]  ;;  %v646_v12 = vld [vmem:[%s13207_s1 + $0xb90] sm:$0xff] }
  0x35   : > { %v6839_v13 = vpack.c.bf16 %v647_v5, %v631_v4  ;;  %v661_v14 = vld [vmem:[%s13207_s1 + $0xc08] sm:$0xff]  ;;  %v663_v17 = vld [vmem:[%s13207_s1 + $0xc18] sm:$0xff]  ;;  %v6737_v19 = vpack.c.bf16 %v644_v10, %v628_v7  ;;  %v6841_v20 = vpack.c.bf16 %v646_v12, %v630_v11  ;;  %v660_v22 = vld [vmem:[%s13207_s1 + $0xc00] sm:$0xff] }
  0x36   : > { %6722 = vmatpush1.bf16.msra.mxu0 %v6721_v34  ;;  %v677_v15 = vld [vmem:[%s13207_s1 + $0xc88] sm:$0xff]  ;;  %v679_v18 = vld [vmem:[%s13207_s1 + $0xc98] sm:$0xff]  ;;  %v676_v23 = vld [vmem:[%s13207_s1 + $0xc80] sm:$0xff] }
  0x37   : > { %6826 = vmatpush1.bf16.msra.mxu1 %v6825_v35  ;;  %6724 = vmatprep.subr.bf16.mxu0 %v6723_v36  ;;  %v149_v16 = vld [vmem:[%s8879_s23 + $0x8] sm:$0xff]  ;;  %v6739_v21 = vpack.c.bf16 %v677_v15, %v661_v14  ;;  %v662_v24 = vld [vmem:[%s13207_s1 + $0xc10] sm:$0xff]  ;;  %v6843_v25 = vpack.c.bf16 %v679_v18, %v663_v17  ;;  %v695_v29 = vld [vmem:[%s13207_s1 + $0xd18] sm:$0xff]  ;;  %v6741_v31 = vpack.c.bf16 %v676_v23, %v660_v22 }
  0x38   : > { %6828 = vmatprep.subr.bf16.mxu1 %v6827_v40  ;;  %1269 = vmatprep.mubr.f32.mxu0 %v149_v16  ;;  %v678_v26 = vld [vmem:[%s13207_s1 + $0xc90] sm:$0xff]  ;;  %v693_v27 = vld [vmem:[%s13207_s1 + $0xd08] sm:$0xff]  ;;  %v711_v30 = vld [vmem:[%s13207_s1 + $0xd98] sm:$0xff] }
  0x39   : > { %1783 = vmatprep.mubr.f32.mxu1 %v149_v16  ;;  %v709_v28 = vld [vmem:[%s13207_s1 + $0xd88] sm:$0xff]  ;;  %v6845_v32 = vpack.c.bf16 %v678_v26, %v662_v24  ;;  %v692_v34 = vld [vmem:[%s13207_s1 + $0xd00] sm:$0xff]  ;;  %v694_v36 = vld [vmem:[%s13207_s1 + $0xd10] sm:$0xff]  ;;  %v6847_v37 = vpack.c.bf16 %v711_v30, %v695_v29 }
  0x3a   : > { %6726 = vmatpush1.bf16.msra.mxu0 %v6725_v46  ;;  %v6743_v33 = vpack.c.bf16 %v709_v28, %v693_v27  ;;  %v708_v35 = vld [vmem:[%s13207_s1 + $0xd80] sm:$0xff]  ;;  %v710_v38 = vld [vmem:[%s13207_s1 + $0xd90] sm:$0xff]  ;;  %v725_v39 = vld [vmem:[%s13207_s1 + $0xe08] sm:$0xff] }
  0x3b   : > { %6830 = vmatpush1.bf16.msra.mxu1 %v6829_v47  ;;  %6728 = vmatprep.subr.bf16.mxu0 %v6727_v48  ;;  %v741_v40 = vld [vmem:[%s13207_s1 + $0xe88] sm:$0xff]  ;;  %v727_v41 = vld [vmem:[%s13207_s1 + $0xe18] sm:$0xff]  ;;  %v6745_v43 = vpack.c.bf16 %v708_v35, %v692_v34  ;;  %v6849_v44 = vpack.c.bf16 %v710_v38, %v694_v36  ;;  %v724_v46 = vld [vmem:[%s13207_s1 + $0xe00] sm:$0xff] }
  0x3c   : > { %6832 = vmatprep.subr.bf16.mxu1 %v6831_v52  ;;  %v743_v42 = vld [vmem:[%s13207_s1 + $0xe98] sm:$0xff]  ;;  %v6747_v45 = vpack.c.bf16 %v741_v40, %v725_v39  ;;  %v740_v47 = vld [vmem:[%s13207_s1 + $0xe80] sm:$0xff]  ;;  %v726_v48 = vld [vmem:[%s13207_s1 + $0xe10] sm:$0xff] }
  0x3d   : > { %v6851_v49 = vpack.c.bf16 %v743_v42, %v727_v41  ;;  %v742_v50 = vld [vmem:[%s13207_s1 + $0xe90] sm:$0xff]  ;;  %v757_v51 = vld [vmem:[%s13207_s1 + $0xf08] sm:$0xff]  ;;  %v759_v53 = vld [vmem:[%s13207_s1 + $0xf18] sm:$0xff]  ;;  %v6749_v55 = vpack.c.bf16 %v740_v47, %v724_v46 }
  0x3e   : > { %6730 = vmatpush1.bf16.msra.mxu0 %v6729_v58  ;;  %v773_v52 = vld [vmem:[%s13207_s1 + $0xf88] sm:$0xff]  ;;  %v775_v54 = vld [vmem:[%s13207_s1 + $0xf98] sm:$0xff]  ;;  %v6853_v56 = vpack.c.bf16 %v742_v50, %v726_v48  ;;  %v756_v58 = vld [vmem:[%s13207_s1 + $0xf00] sm:$0xff] }
  0x3f   : > { %6834 = vmatpush1.bf16.msra.mxu1 %v6833_v59  ;;  %6732 = vmatprep.subr.bf16.mxu0 %v6731_v60  ;;  %v6751_v57 = vpack.c.bf16 %v773_v52, %v757_v51  ;;  %v772_v59 = vld [vmem:[%s13207_s1 + $0xf80] sm:$0xff]  ;;  %v758_v60 = vld [vmem:[%s13207_s1 + $0xf10] sm:$0xff]  ;;  %v6855_v61 = vpack.c.bf16 %v775_v54, %v759_v53  ;;  %v789_v63 = vld [vmem:[%s13207_s1 + $0x1008] sm:$0xff] }
  0x40   : > { %6836 = vmatprep.subr.bf16.mxu1 %v6835_v0  ;;  %v774_v62 = vld [vmem:[%s13207_s1 + $0xf90] sm:$0xff]  ;;  %v805_v0 = vld [vmem:[%s13207_s1 + $0x1088] sm:$0xff]  ;;  %v791_v1 = vld [vmem:[%s13207_s1 + $0x1018] sm:$0xff]  ;;  %v6753_v3 = vpack.c.bf16 %v772_v59, %v756_v58 }
  0x41   : > { %v807_v2 = vld [vmem:[%s13207_s1 + $0x1098] sm:$0xff]  ;;  %v6857_v4 = vpack.c.bf16 %v774_v62, %v758_v60  ;;  %v6755_v5 = vpack.c.bf16 %v805_v0, %v789_v63  ;;  %v804_v7 = vld [vmem:[%s13207_s1 + $0x1080] sm:$0xff]  ;;  %v806_v10 = vld [vmem:[%s13207_s1 + $0x1090] sm:$0xff] }
  0x42   : > { %6734 = vmatpush1.bf16.msra.mxu0 %v6733_v6  ;;  %v788_v6 = vld [vmem:[%s13207_s1 + $0x1000] sm:$0xff]  ;;  %v821_v11 = vld [vmem:[%s13207_s1 + $0x1108] sm:$0xff]  ;;  %v823_v15 = vld [vmem:[%s13207_s1 + $0x1118] sm:$0xff] }
  0x43   : > { %6838 = vmatpush1.bf16.msra.mxu1 %v6837_v8  ;;  %6736 = vmatprep.subr.bf16.mxu0 %v6735_v9  ;;  %v6859_v8 = vpack.c.bf16 %v807_v2, %v791_v1  ;;  %v790_v9 = vld [vmem:[%s13207_s1 + $0x1010] sm:$0xff]  ;;  %v837_v12 = vld [vmem:[%s13207_s1 + $0x1188] sm:$0xff]  ;;  %v6757_v14 = vpack.c.bf16 %v804_v7, %v788_v6  ;;  %v839_v16 = vld [vmem:[%s13207_s1 + $0x1198] sm:$0xff] }
  0x44   : > { %6840 = vmatprep.subr.bf16.mxu1 %v6839_v13  ;;  %v148_v13 = vld [vmem:[%s8879_s23] sm:$0xff]  ;;  %v6861_v17 = vpack.c.bf16 %v806_v10, %v790_v9  ;;  %v153_v18 = vld [vmem:[%s8879_s23 + $0x28] sm:$0xff]  ;;  %v822_v22 = vld [vmem:[%s13207_s1 + $0x1110] sm:$0xff]  ;;  %v6863_v23 = vpack.c.bf16 %v839_v16, %v823_v15 }
  0x45   : > { %v838_v24 = vld [vmem:[%s13207_s1 + $0x1190] sm:$0xff]  ;;  %v869_v26 = vld [vmem:[%s13207_s1 + $0x1288] sm:$0xff]  ;;  %v152_v27 = vld [vmem:[%s8879_s23 + $0x20] sm:$0xff] }
  0x46   : > { %6738 = vmatpush1.bf16.msra.mxu0 %v6737_v19  ;;  %v6759_v19 = vpack.c.bf16 %v837_v12, %v821_v11  ;;  %v855_v28 = vld [vmem:[%s13207_s1 + $0x1218] sm:$0xff]  ;;  %v157_v30 = vld [vmem:[%s8879_s23 + $0x48] sm:$0xff]  ;;  %v852_v34 = vld [vmem:[%s13207_s1 + $0x1200] sm:$0xff] }
  0x47   : > { %6842 = vmatpush1.bf16.msra.mxu1 %v6841_v20  ;;  %6740 = vmatprep.subr.bf16.mxu0 %v6739_v21  ;;  %v820_v20 = vld [vmem:[%s13207_s1 + $0x1100] sm:$0xff]  ;;  %v871_v29 = vld [vmem:[%s13207_s1 + $0x1298] sm:$0xff]  ;;  %v854_v36 = vld [vmem:[%s13207_s1 + $0x1210] sm:$0xff] }
  0x48   : > { %6844 = vmatprep.subr.bf16.mxu1 %v6843_v25  ;;  %v836_v21 = vld [vmem:[%s13207_s1 + $0x1180] sm:$0xff]  ;;  %v853_v25 = vld [vmem:[%s13207_s1 + $0x1208] sm:$0xff]  ;;  %v870_v38 = vld [vmem:[%s13207_s1 + $0x1290] sm:$0xff] }
  0x49   : > { %v868_v35 = vld [vmem:[%s13207_s1 + $0x1280] sm:$0xff]  ;;  %v885_v39 = vld [vmem:[%s13207_s1 + $0x1308] sm:$0xff]  ;;  %v887_v42 = vld [vmem:[%s13207_s1 + $0x1318] sm:$0xff]  ;;  %v6869_v46 = vpack.c.bf16 %v870_v38, %v854_v36 }
  0x4a   : > { %6742 = vmatpush1.bf16.msra.mxu0 %v6741_v31  ;;  %v6761_v31 = vpack.c.bf16 %v836_v21, %v820_v20  ;;  %v901_v40 = vld [vmem:[%s13207_s1 + $0x1388] sm:$0xff]  ;;  %v156_v41 = vld [vmem:[%s8879_s23 + $0x40] sm:$0xff]  ;;  %v886_v50 = vld [vmem:[%s13207_s1 + $0x1310] sm:$0xff] }
  0x4b   : > { %6846 = vmatpush1.bf16.msra.mxu1 %v6845_v32  ;;  %6744 = vmatprep.subr.bf16.mxu0 %v6743_v33  ;;  %v6865_v32 = vpack.c.bf16 %v838_v24, %v822_v22  ;;  %v6763_v33 = vpack.c.bf16 %v869_v26, %v853_v25  ;;  %v6767_v47 = vpack.c.bf16 %v901_v40, %v885_v39  ;;  %v884_v48 = vld [vmem:[%s13207_s1 + $0x1300] sm:$0xff]  ;;  %v902_v52 = vld [vmem:[%s13207_s1 + $0x1390] sm:$0xff]  ;;  %v917_v53 = vld [vmem:[%s13207_s1 + $0x1408] sm:$0xff] }
  0x4c   : > { %6848 = vmatprep.subr.bf16.mxu1 %v6847_v37  ;;  %v6867_v37 = vpack.c.bf16 %v871_v29, %v855_v28  ;;  %v933_v54 = vld [vmem:[%s13207_s1 + $0x1488] sm:$0xff]  ;;  %v6873_v60 = vpack.c.bf16 %v902_v52, %v886_v50  ;;  %v916_v62 = vld [vmem:[%s13207_s1 + $0x1400] sm:$0xff]  ;;  %v918_v0 = vld [vmem:[%s13207_s1 + $0x1410] sm:$0xff] }
  0x4d   : > { %v165_v58 = vld [vmem:[%s8879_s23 + $0x88] sm:$0xff]  ;;  %v932_v63 = vld [vmem:[%s13207_s1 + $0x1480] sm:$0xff]  ;;  %v934_v2 = vld [vmem:[%s13207_s1 + $0x1490] sm:$0xff] }
  0x4e   : > { %6746 = vmatpush1.bf16.msra.mxu0 %v6745_v43  ;;  %v903_v43 = vld [vmem:[%s13207_s1 + $0x1398] sm:$0xff]  ;;  %v6773_v9 = vpack.c.bf16 %v932_v63, %v916_v62  ;;  %v6877_v10 = vpack.c.bf16 %v934_v2, %v918_v0  ;;  %v948_v12 = vld [vmem:[%s13207_s1 + $0x1500] sm:$0xff]  ;;  %v966_v16 = vld [vmem:[%s13207_s1 + $0x1590] sm:$0xff] }
  0x4f   : > { %6850 = vmatpush1.bf16.msra.mxu1 %v6849_v44  ;;  %6748 = vmatprep.subr.bf16.mxu0 %v6747_v45  ;;  %v161_v44 = vld [vmem:[%s8879_s23 + $0x68] sm:$0xff]  ;;  %v6765_v45 = vpack.c.bf16 %v868_v35, %v852_v34  ;;  %v6871_v51 = vpack.c.bf16 %v903_v43, %v887_v42  ;;  %v951_v6 = vld [vmem:[%s13207_s1 + $0x1518] sm:$0xff]  ;;  %v980_v26 = vld [vmem:[%s13207_s1 + $0x1600] sm:$0xff] }
  0x50   : > { %6852 = vmatprep.subr.bf16.mxu1 %v6851_v49  ;;  %v900_v49 = vld [vmem:[%s13207_s1 + $0x1380] sm:$0xff]  ;;  %v967_v7 = vld [vmem:[%s13207_s1 + $0x1598] sm:$0xff]  ;;  %v173_v22 = vld [vmem:[%s8879_s23 + $0xc8] sm:$0xff] }
  0x51   : > { %v6769_v59 = vpack.c.bf16 %v900_v49, %v884_v48  ;;  %v6879_v15 = vpack.c.bf16 %v967_v7, %v951_v6  ;;  %v983_v20 = vld [vmem:[%s13207_s1 + $0x1618] sm:$0xff]  ;;  %v982_v28 = vld [vmem:[%s13207_s1 + $0x1610] sm:$0xff]  ;;  %v177_v36 = vld [vmem:[%s8879_s23 + $0xe8] sm:$0xff] }
  0x52   : > { %6750 = vmatpush1.bf16.msra.mxu0 %v6749_v55  ;;  %v160_v55 = vld [vmem:[%s8879_s23 + $0x60] sm:$0xff]  ;;  %v999_v21 = vld [vmem:[%s13207_s1 + $0x1698] sm:$0xff]  ;;  %v1014_v42 = vld [vmem:[%s13207_s1 + $0x1710] sm:$0xff] }
  0x53   : > { %6854 = vmatpush1.bf16.msra.mxu1 %v6853_v56  ;;  %6752 = vmatprep.subr.bf16.mxu0 %v6751_v57  ;;  %v919_v56 = vld [vmem:[%s13207_s1 + $0x1418] sm:$0xff]  ;;  %v6883_v29 = vpack.c.bf16 %v999_v21, %v983_v20  ;;  %v1012_v40 = vld [vmem:[%s13207_s1 + $0x1700] sm:$0xff]  ;;  %v181_v50 = vld [vmem:[%s8879_s23 + $0x108] sm:$0xff] }
  0x54   : > { %6856 = vmatprep.subr.bf16.mxu1 %v6855_v61  ;;  %v935_v57 = vld [vmem:[%s13207_s1 + $0x1498] sm:$0xff]  ;;  %v6771_v61 = vpack.c.bf16 %v933_v54, %v917_v53  ;;  %v1044_v54 = vld [vmem:[%s13207_s1 + $0x1800] sm:$0xff]  ;;  %v185_v0 = vld [vmem:[%s8879_s23 + $0x128] sm:$0xff] }
  0x55   : > { %v6875_v1 = vpack.c.bf16 %v935_v57, %v919_v56  ;;  %v1015_v34 = vld [vmem:[%s13207_s1 + $0x1718] sm:$0xff]  ;;  %v1046_v56 = vld [vmem:[%s13207_s1 + $0x1810] sm:$0xff]  ;;  %v193_v20 = vld [vmem:[%s8879_s23 + $0x168] sm:$0xff] }
  0x56   : > { %6754 = vmatpush1.bf16.msra.mxu0 %v6753_v3  ;;  %v949_v3 = vld [vmem:[%s13207_s1 + $0x1508] sm:$0xff]  ;;  %v1031_v35 = vld [vmem:[%s13207_s1 + $0x1798] sm:$0xff]  ;;  %v1078_v6 = vld [vmem:[%s13207_s1 + $0x1910] sm:$0xff] }
  0x57   : > { %6858 = vmatpush1.bf16.msra.mxu1 %v6857_v4  ;;  %6756 = vmatprep.subr.bf16.mxu0 %v6755_v5  ;;  %v965_v4 = vld [vmem:[%s13207_s1 + $0x1588] sm:$0xff]  ;;  %v164_v5 = vld [vmem:[%s8879_s23 + $0x80] sm:$0xff]  ;;  %v6887_v43 = vpack.c.bf16 %v1031_v35, %v1015_v34  ;;  %v1047_v48 = vld [vmem:[%s13207_s1 + $0x1818] sm:$0xff] }
  0x58   : > { %6860 = vmatprep.subr.bf16.mxu1 %v6859_v8  ;;  %v169_v8 = vld [vmem:[%s8879_s23 + $0xa8] sm:$0xff]  ;;  %v6775_v11 = vpack.c.bf16 %v965_v4, %v949_v3  ;;  %v1063_v49 = vld [vmem:[%s13207_s1 + $0x1898] sm:$0xff]  ;;  %v1076_v4 = vld [vmem:[%s13207_s1 + $0x1900] sm:$0xff] }
  0x59   : > { %1270 = vmatmul.mubr.f32.vlgmr.msra.gmra.mrb[0].mxu0 %v148_v13  ;;  %v6891_v57 = vpack.c.bf16 %v1063_v49, %v1047_v48  ;;  %v1079_v62 = vld [vmem:[%s13207_s1 + $0x1918] sm:$0xff]  ;;  %v192_v21 = vld [vmem:[%s8879_s23 + $0x160] sm:$0xff]  ;;  %v221_v34 = vld [vmem:[%s8879_s23 + $0x248] sm:$0xff] }
  0x5a   : > { %1784 = vmatmul.mubr.f32.vlgmr.msra.gmra.mrb[0].mxu1 %v148_v13  ;;  %6758 = vmatpush1.bf16.msra.mxu0 %v6757_v14  ;;  %v964_v13 = vld [vmem:[%s13207_s1 + $0x1580] sm:$0xff]  ;;  %v950_v14 = vld [vmem:[%s13207_s1 + $0x1510] sm:$0xff]  ;;  %v1095_v63 = vld [vmem:[%s13207_s1 + $0x1998] sm:$0xff] }
  0x5b   : > { %6862 = vmatpush1.bf16.msra.mxu1 %v6861_v17  ;;  %1275 = vmatprep.mubr.f32.mxu0 %v153_v18  ;;  %v981_v17 = vld [vmem:[%s13207_s1 + $0x1608] sm:$0xff]  ;;  %v6881_v24 = vpack.c.bf16 %v966_v16, %v950_v14  ;;  %v6895_v7 = vpack.c.bf16 %v1095_v63, %v1079_v62  ;;  %v220_v35 = vld [vmem:[%s8879_s23 + $0x240] sm:$0xff]  ;;  %v151_v62 = vld [vmem:[%s8879_s23 + $0x18] sm:$0xff] }
  0x5c   : > { %1789 = vmatprep.mubr.f32.mxu1 %v153_v18  ;;  %6760 = vmatprep.subr.bf16.mxu0 %v6759_v19  ;;  %v997_v18 = vld [vmem:[%s13207_s1 + $0x1688] sm:$0xff]  ;;  %v168_v19 = vld [vmem:[%s8879_s23 + $0xa0] sm:$0xff] }
  0x5d   : > { %1276 = vmatmul.mubr.f32.gmra.mrb[2].mxu0 %v152_v27  ;;  %6864 = vmatprep.subr.bf16.mxu1 %v6863_v23  ;;  %v6777_v23 = vpack.c.bf16 %v964_v13, %v948_v12  ;;  %v6779_v25 = vpack.c.bf16 %v997_v18, %v981_v17  ;;  %v283_v12 = vld [vmem:[%s13207_s1 + $0x38] sm:$0xff]  ;;  %v189_v14 = vld [vmem:[%s8879_s23 + $0x148] sm:$0xff]  ;;  %v248_v49 = vld [vmem:[%s8879_s23 + $0x320] sm:$0xff] }
  0x5e   : > { %1790 = vmatmul.mubr.f32.gmra.mrb[2].mxu1 %v152_v27  ;;  %1281 = vmatprep.mubr.f32.mxu0 %v157_v30  ;;  %v996_v27 = vld [vmem:[%s13207_s1 + $0x1680] sm:$0xff]  ;;  %v299_v13 = vld [vmem:[%s13207_s1 + $0xb8] sm:$0xff]  ;;  %v249_v48 = vld [vmem:[%s8879_s23 + $0x328] sm:$0xff] }
  0x5f   : > { %1795 = vmatprep.mubr.f32.mxu1 %v157_v30  ;;  %6762 = vmatpush1.bf16.msra.mxu0 %v6761_v31  ;;  %v998_v30 = vld [vmem:[%s13207_s1 + $0x1690] sm:$0xff]  ;;  %v1013_v31 = vld [vmem:[%s13207_s1 + $0x1708] sm:$0xff]  ;;  %v7003_v18 = vpack.c.bf16 %v299_v13, %v283_v12  ;;  %v280_v63 = vld [vmem:[%s13207_s1 + $0x20] sm:$0xff] }
  0x60   : > { %6866 = vmatpush1.bf16.msra.mxu1 %v6865_v32  ;;  %6764 = vmatprep.subr.bf16.mxu0 %v6763_v33  ;;  %v1029_v32 = vld [vmem:[%s13207_s1 + $0x1788] sm:$0xff]  ;;  %v172_v33 = vld [vmem:[%s8879_s23 + $0xc0] sm:$0xff]  ;;  %v6885_v38 = vpack.c.bf16 %v998_v30, %v982_v28 }
  0x61   : > { %1282 = vmatmul.mubr.f32.gmra.mrb[4].mxu0 %v156_v41  ;;  %6868 = vmatprep.subr.bf16.mxu1 %v6867_v37  ;;  %v6781_v37 = vpack.c.bf16 %v996_v27, %v980_v26  ;;  %v6783_v39 = vpack.c.bf16 %v1029_v32, %v1013_v31  ;;  %v205_v26 = vld [vmem:[%s8879_s23 + $0x1c8] sm:$0xff]  ;;  %v204_v27 = vld [vmem:[%s8879_s23 + $0x1c0] sm:$0xff] }
  0x62   : > { %1796 = vmatmul.mubr.f32.gmra.mrb[4].mxu1 %v156_v41  ;;  %1287 = vmatprep.mubr.f32.mxu0 %v161_v44  ;;  %v1028_v41 = vld [vmem:[%s13207_s1 + $0x1780] sm:$0xff]  ;;  %v209_v28 = vld [vmem:[%s8879_s23 + $0x1e8] sm:$0xff] }
  0x63   : > { %1801 = vmatprep.mubr.f32.mxu1 %v161_v44  ;;  %6766 = vmatpush1.bf16.msra.mxu0 %v6765_v45  ;;  %v1030_v44 = vld [vmem:[%s13207_s1 + $0x1790] sm:$0xff]  ;;  %v1045_v45 = vld [vmem:[%s13207_s1 + $0x1808] sm:$0xff]  ;;  %v212_v31 = vld [vmem:[%s8879_s23 + $0x200] sm:$0xff] }
  0x64   : > { %6870 = vmatpush1.bf16.msra.mxu1 %v6869_v46  ;;  %6768 = vmatprep.subr.bf16.mxu0 %v6767_v47  ;;  %v1061_v46 = vld [vmem:[%s13207_s1 + $0x1888] sm:$0xff]  ;;  %v176_v47 = vld [vmem:[%s8879_s23 + $0xe0] sm:$0xff]  ;;  %v6889_v52 = vpack.c.bf16 %v1030_v44, %v1014_v42 }
  0x65   : > { %1288 = vmatmul.mubr.f32.gmra.mrb[6].mxu0 %v160_v55  ;;  %6872 = vmatprep.subr.bf16.mxu1 %v6871_v51  ;;  %v6785_v51 = vpack.c.bf16 %v1028_v41, %v1012_v40  ;;  %v6787_v53 = vpack.c.bf16 %v1061_v46, %v1045_v45  ;;  %v213_v30 = vld [vmem:[%s8879_s23 + $0x208] sm:$0xff]  ;;  %v232_v41 = vld [vmem:[%s8879_s23 + $0x2a0] sm:$0xff] }
  0x66   : > { %1802 = vmatmul.mubr.f32.gmra.mrb[6].mxu1 %v160_v55  ;;  %1293 = vmatprep.mubr.f32.mxu0 %v165_v58  ;;  %v1060_v55 = vld [vmem:[%s13207_s1 + $0x1880] sm:$0xff]  ;;  %v217_v32 = vld [vmem:[%s8879_s23 + $0x228] sm:$0xff] }
  0x67   : > { %1807 = vmatprep.mubr.f32.mxu1 %v165_v58  ;;  %6770 = vmatpush1.bf16.msra.mxu0 %v6769_v59  ;;  %v1062_v58 = vld [vmem:[%s13207_s1 + $0x1890] sm:$0xff]  ;;  %v1077_v59 = vld [vmem:[%s13207_s1 + $0x1908] sm:$0xff]  ;;  %v240_v45 = vld [vmem:[%s8879_s23 + $0x2e0] sm:$0xff] }
  0x68   : > { %6874 = vmatpush1.bf16.msra.mxu1 %v6873_v60  ;;  %6772 = vmatprep.subr.bf16.mxu0 %v6771_v61  ;;  %v1093_v60 = vld [vmem:[%s13207_s1 + $0x1988] sm:$0xff]  ;;  %v180_v61 = vld [vmem:[%s8879_s23 + $0x100] sm:$0xff]  ;;  %v6893_v2 = vpack.c.bf16 %v1062_v58, %v1046_v56 }
  0x69   : > { %1294 = vmatmul.mubr.f32.gmra.mrb[8].mxu0 %v164_v5  ;;  %6876 = vmatprep.subr.bf16.mxu1 %v6875_v1  ;;  %v6789_v1 = vpack.c.bf16 %v1060_v55, %v1044_v54  ;;  %v6791_v3 = vpack.c.bf16 %v1093_v60, %v1077_v59  ;;  %v233_v40 = vld [vmem:[%s8879_s23 + $0x2a8] sm:$0xff]  ;;  %v260_v55 = vld [vmem:[%s8879_s23 + $0x380] sm:$0xff] }
  0x6a   : > { %1808 = vmatmul.mubr.f32.gmra.mrb[8].mxu1 %v164_v5  ;;  %1299 = vmatprep.mubr.f32.mxu0 %v169_v8  ;;  %v1092_v5 = vld [vmem:[%s13207_s1 + $0x1980] sm:$0xff]  ;;  %v237_v42 = vld [vmem:[%s8879_s23 + $0x2c8] sm:$0xff] }
  0x6b   : > { %1813 = vmatprep.mubr.f32.mxu1 %v169_v8  ;;  %6774 = vmatpush1.bf16.msra.mxu0 %v6773_v9  ;;  %v1094_v8 = vld [vmem:[%s13207_s1 + $0x1990] sm:$0xff]  ;;  %v281_v9 = vld [vmem:[%s13207_s1 + $0x28] sm:$0xff]  ;;  %v268_v59 = vld [vmem:[%s8879_s23 + $0x3c0] sm:$0xff] }
  0x6c   : > { %6878 = vmatpush1.bf16.msra.mxu1 %v6877_v10  ;;  %6776 = vmatprep.subr.bf16.mxu0 %v6775_v11  ;;  %v297_v10 = vld [vmem:[%s13207_s1 + $0xa8] sm:$0xff]  ;;  %v184_v11 = vld [vmem:[%s8879_s23 + $0x120] sm:$0xff]  ;;  %v6897_v16 = vpack.c.bf16 %v1094_v8, %v1078_v6  ;;  %v331_v8 = vld [vmem:[%s13207_s1 + $0x1b8] sm:$0xff] }
  0x6d   : > { %1300 = vmatmul.mubr.f32.gmra.mrb[10].mxu0 %v168_v19  ;;  %6880 = vmatprep.subr.bf16.mxu1 %v6879_v15  ;;  %v6793_v15 = vpack.c.bf16 %v1092_v5, %v1076_v4  ;;  %v6899_v17 = vpack.c.bf16 %v297_v10, %v281_v9  ;;  %v241_v44 = vld [vmem:[%s8879_s23 + $0x2e8] sm:$0xff]  ;;  %v150_v5 = vld [vmem:[%s8879_s23 + $0x10] sm:$0xff]  ;;  %v155_v10 = vld [vmem:[%s8879_s23 + $0x38] sm:$0xff] }
  0x6e   : > { %1814 = vmatmul.mubr.f32.gmra.mrb[10].mxu1 %v168_v19  ;;  %1305 = vmatprep.mubr.f32.mxu0 %v173_v22  ;;  %v188_v19 = vld [vmem:[%s8879_s23 + $0x140] sm:$0xff]  ;;  %v245_v46 = vld [vmem:[%s8879_s23 + $0x308] sm:$0xff] }
  0x6f   : > { %1819 = vmatprep.mubr.f32.mxu1 %v173_v22  ;;  %6778 = vmatpush1.bf16.msra.mxu0 %v6777_v23  ;;  %v197_v22 = vld [vmem:[%s8879_s23 + $0x188] sm:$0xff]  ;;  %v196_v23 = vld [vmem:[%s8879_s23 + $0x180] sm:$0xff] }
  0x70   : > { %6882 = vmatpush1.bf16.msra.mxu1 %v6881_v24  ;;  %6780 = vmatprep.subr.bf16.mxu0 %v6779_v25  ;;  %v201_v24 = vld [vmem:[%s8879_s23 + $0x1a8] sm:$0xff]  ;;  %v200_v25 = vld [vmem:[%s8879_s23 + $0x1a0] sm:$0xff] }
  0x71   : > { %1306 = vmatmul.mubr.f32.gmra.mrb[12].mxu0 %v172_v33  ;;  %6884 = vmatprep.subr.bf16.mxu1 %v6883_v29  ;;  %v208_v29 = vld [vmem:[%s8879_s23 + $0x1e0] sm:$0xff]  ;;  %v261_v54 = vld [vmem:[%s8879_s23 + $0x388] sm:$0xff] }
  0x72   : > { %1820 = vmatmul.mubr.f32.gmra.mrb[12].mxu1 %v172_v33  ;;  %1311 = vmatprep.mubr.f32.mxu0 %v177_v36  ;;  %v216_v33 = vld [vmem:[%s8879_s23 + $0x220] sm:$0xff]  ;;  %v265_v56 = vld [vmem:[%s8879_s23 + $0x3a8] sm:$0xff] }
  0x73   : > { %1825 = vmatprep.mubr.f32.mxu1 %v177_v36  ;;  %6782 = vmatpush1.bf16.msra.mxu0 %v6781_v37  ;;  %v225_v36 = vld [vmem:[%s8879_s23 + $0x268] sm:$0xff]  ;;  %v224_v37 = vld [vmem:[%s8879_s23 + $0x260] sm:$0xff] }
  0x74   : > { %6886 = vmatpush1.bf16.msra.mxu1 %v6885_v38  ;;  %6784 = vmatprep.subr.bf16.mxu0 %v6783_v39  ;;  %v229_v38 = vld [vmem:[%s8879_s23 + $0x288] sm:$0xff]  ;;  %v228_v39 = vld [vmem:[%s8879_s23 + $0x280] sm:$0xff] }
  0x75   : > { %1312 = vmatmul.mubr.f32.gmra.mrb[14].mxu0 %v176_v47  ;;  %6888 = vmatprep.subr.bf16.mxu1 %v6887_v43  ;;  %v236_v43 = vld [vmem:[%s8879_s23 + $0x2c0] sm:$0xff]  ;;  %v269_v58 = vld [vmem:[%s8879_s23 + $0x3c8] sm:$0xff] }
  0x76   : > { %1826 = vmatmul.mubr.f32.gmra.mrb[14].mxu1 %v176_v47  ;;  %1317 = vmatprep.mubr.f32.mxu0 %v181_v50  ;;  %v244_v47 = vld [vmem:[%s8879_s23 + $0x300] sm:$0xff]  ;;  %v273_v60 = vld [vmem:[%s8879_s23 + $0x3e8] sm:$0xff] }
  0x77   : > { %1831 = vmatprep.mubr.f32.mxu1 %v181_v50  ;;  %6786 = vmatpush1.bf16.msra.mxu0 %v6785_v51  ;;  %v253_v50 = vld [vmem:[%s8879_s23 + $0x348] sm:$0xff]  ;;  %v252_v51 = vld [vmem:[%s8879_s23 + $0x340] sm:$0xff] }
  0x78   : > { %6890 = vmatpush1.bf16.msra.mxu1 %v6889_v52  ;;  %6788 = vmatprep.subr.bf16.mxu0 %v6787_v53  ;;  %v257_v52 = vld [vmem:[%s8879_s23 + $0x368] sm:$0xff]  ;;  %v256_v53 = vld [vmem:[%s8879_s23 + $0x360] sm:$0xff] }
  0x79   : > { %1318 = vmatmul.mubr.f32.gmra.mrb[16].mxu0 %v180_v61  ;;  %6892 = vmatprep.subr.bf16.mxu1 %v6891_v57  ;;  %v264_v57 = vld [vmem:[%s8879_s23 + $0x3a0] sm:$0xff]  ;;  %v329_v4 = vld [vmem:[%s13207_s1 + $0x1a8] sm:$0xff] }
  0x7a   : > { %1832 = vmatmul.mubr.f32.gmra.mrb[16].mxu1 %v180_v61  ;;  %1323 = vmatprep.mubr.f32.mxu0 %v185_v0  ;;  %v272_v61 = vld [vmem:[%s8879_s23 + $0x3e0] sm:$0xff] }
  0x7b   : > { %1837 = vmatprep.mubr.f32.mxu1 %v185_v0  ;;  %6790 = vmatpush1.bf16.msra.mxu0 %v6789_v1  ;;  %v296_v0 = vld [vmem:[%s13207_s1 + $0xa0] sm:$0xff]  ;;  %v282_v1 = vld [vmem:[%s13207_s1 + $0x30] sm:$0xff] }
  0x7c   : > { %6894 = vmatpush1.bf16.msra.mxu1 %v6893_v2  ;;  %6792 = vmatprep.subr.bf16.mxu0 %v6791_v3  ;;  %v298_v2 = vld [vmem:[%s13207_s1 + $0xb0] sm:$0xff]  ;;  %v313_v3 = vld [vmem:[%s13207_s1 + $0x128] sm:$0xff]  ;;  %v6901_v6 = vpack.c.bf16 %v296_v0, %v280_v63  ;;  %v312_v12 = vld [vmem:[%s13207_s1 + $0x120] sm:$0xff] }
  0x7d   : > { %1324 = vmatmul.mubr.f32.gmra.mrb[18].mxu0 %v184_v11  ;;  %6896 = vmatprep.subr.bf16.mxu1 %v6895_v7  ;;  %v315_v7 = vld [vmem:[%s13207_s1 + $0x138] sm:$0xff]  ;;  %v7005_v9 = vpack.c.bf16 %v298_v2, %v282_v1  ;;  %v328_v13 = vld [vmem:[%s13207_s1 + $0x1a0] sm:$0xff] }
  0x7e   : > { %1838 = vmatmul.mubr.f32.gmra.mrb[18].mxu1 %v184_v11  ;;  %1329 = vmatprep.mubr.f32.mxu0 %v189_v14  ;;  %v6903_v11 = vpack.c.bf16 %v329_v4, %v313_v3  ;;  %v459_v63 = vld [vmem:[%s13207_s1 + $0x5b8] sm:$0xff]  ;;  %v440_v4 = vld [vmem:[%s13207_s1 + $0x520] sm:$0xff] }
  0x7f   : > { %1843 = vmatprep.mubr.f32.mxu1 %v189_v14  ;;  %6794 = vmatpush1.bf16.msra.mxu0 %v6793_v15  ;;  %v314_v14 = vld [vmem:[%s13207_s1 + $0x130] sm:$0xff]  ;;  %v7007_v15 = vpack.c.bf16 %v331_v8, %v315_v7  ;;  %v171_v0 = vld [vmem:[%s8879_s23 + $0xb8] sm:$0xff] }
  0x80   : > { %6898 = vmatpush1.bf16.msra.mxu1 %v6897_v16  ;;  %6900 = vmatprep.subr.bf16.mxu0 %v6899_v17  ;;  %v330_v16 = vld [vmem:[%s13207_s1 + $0x1b0] sm:$0xff]  ;;  %v345_v17 = vld [vmem:[%s13207_s1 + $0x228] sm:$0xff] }
  0x81   : > { %1330 = vmatmul.mubr.f32.gmra.mrb[20].mxu0 %v188_v19  ;;  %7004 = vmatprep.subr.bf16.mxu1 %v7003_v18  ;;  %v361_v18 = vld [vmem:[%s13207_s1 + $0x2a8] sm:$0xff]  ;;  %v458_v8 = vld [vmem:[%s13207_s1 + $0x5b0] sm:$0xff] }
  0x82   : > { %1844 = vmatmul.mubr.f32.gmra.mrb[20].mxu1 %v188_v19  ;;  %1335 = vmatprep.mubr.f32.mxu0 %v193_v20  ;;  %v154_v19 = vld [vmem:[%s8879_s23 + $0x30] sm:$0xff] }
  0x83   : > { %1849 = vmatprep.mubr.f32.mxu1 %v193_v20  ;;  %v347_v20 = vld [vmem:[%s13207_s1 + $0x238] sm:$0xff] }
  0x85   : > { %1336 = vmatmul.mubr.f32.gmra.mrb[22].mxu0 %v192_v21 }
  0x86   : > { %1850 = vmatmul.mubr.f32.gmra.mrb[22].mxu1 %v192_v21  ;;  %1341 = vmatprep.mubr.f32.mxu0 %v197_v22  ;;  %v363_v21 = vld [vmem:[%s13207_s1 + $0x2b8] sm:$0xff] }
  0x87   : > { %1855 = vmatprep.mubr.f32.mxu1 %v197_v22  ;;  %v159_v22 = vld [vmem:[%s8879_s23 + $0x58] sm:$0xff] }
  0x89   : > { %1342 = vmatmul.mubr.f32.gmra.mrb[24].mxu0 %v196_v23 }
  0x8a   : > { %1856 = vmatmul.mubr.f32.gmra.mrb[24].mxu1 %v196_v23  ;;  %1347 = vmatprep.mubr.f32.mxu0 %v201_v24  ;;  %v6905_v23 = vpack.c.bf16 %v328_v13, %v312_v12  ;;  %v475_v12 = vld [vmem:[%s13207_s1 + $0x638] sm:$0xff] }
  0x8b   : > { %1861 = vmatprep.mubr.f32.mxu1 %v201_v24  ;;  %v7009_v24 = vpack.c.bf16 %v330_v16, %v314_v14  ;;  %v491_v13 = vld [vmem:[%s13207_s1 + $0x6b8] sm:$0xff] }
  0x8c   : > { %v175_v14 = vld [vmem:[%s8879_s23 + $0xd8] sm:$0xff] }
  0x8d   : > { %1348 = vmatmul.mubr.f32.gmra.mrb[26].mxu0 %v200_v25 }
  0x8e   : > { %1862 = vmatmul.mubr.f32.gmra.mrb[26].mxu1 %v200_v25  ;;  %1353 = vmatprep.mubr.f32.mxu0 %v205_v26  ;;  %v6907_v25 = vpack.c.bf16 %v361_v18, %v345_v17  ;;  %v472_v18 = vld [vmem:[%s13207_s1 + $0x620] sm:$0xff] }
  0x8f   : > { %1867 = vmatprep.mubr.f32.mxu1 %v205_v26  ;;  %v344_v26 = vld [vmem:[%s13207_s1 + $0x220] sm:$0xff] }
  0x91   : > { %1354 = vmatmul.mubr.f32.gmra.mrb[28].mxu0 %v204_v27 }
  0x92   : > { %1868 = vmatmul.mubr.f32.gmra.mrb[28].mxu1 %v204_v27  ;;  %1359 = vmatprep.mubr.f32.mxu0 %v209_v28  ;;  %v360_v27 = vld [vmem:[%s13207_s1 + $0x2a0] sm:$0xff] }
  0x93   : > { %1873 = vmatprep.mubr.f32.mxu1 %v209_v28  ;;  %v346_v28 = vld [vmem:[%s13207_s1 + $0x230] sm:$0xff] }
  0x95   : > { %1360 = vmatmul.mubr.f32.gmra.mrb[30].mxu0 %v208_v29 }
  0x96   : > { %1874 = vmatmul.mubr.f32.gmra.mrb[30].mxu1 %v208_v29  ;;  %1365 = vmatprep.mubr.f32.mxu0 %v213_v30  ;;  %v7011_v29 = vpack.c.bf16 %v363_v21, %v347_v20  ;;  %v474_v20 = vld [vmem:[%s13207_s1 + $0x630] sm:$0xff]  ;;  %v7027_v21 = vpack.c.bf16 %v491_v13, %v475_v12 }
  0x97   : > { %1879 = vmatprep.mubr.f32.mxu1 %v213_v30  ;;  %v362_v30 = vld [vmem:[%s13207_s1 + $0x2b0] sm:$0xff] }
  0x98   : > { %v602_v12 = vld [vmem:[%s13207_s1 + $0xa30] sm:$0xff] }
  0x99   : > { %1366 = vmatmul.mubr.f32.gmra.mrb[32].mxu0 %v212_v31 }
  0x9a   : > { %1880 = vmatmul.mubr.f32.gmra.mrb[32].mxu1 %v212_v31  ;;  %1371 = vmatprep.mubr.f32.mxu0 %v217_v32  ;;  %v377_v31 = vld [vmem:[%s13207_s1 + $0x328] sm:$0xff] }
  0x9b   : > { %1885 = vmatprep.mubr.f32.mxu1 %v217_v32  ;;  %v393_v32 = vld [vmem:[%s13207_s1 + $0x3a8] sm:$0xff] }
  0x9d   : > { %1372 = vmatmul.mubr.f32.gmra.mrb[34].mxu0 %v216_v33 }
  0x9e   : > { %1886 = vmatmul.mubr.f32.gmra.mrb[34].mxu1 %v216_v33  ;;  %1377 = vmatprep.mubr.f32.mxu0 %v221_v34  ;;  %v158_v33 = vld [vmem:[%s8879_s23 + $0x50] sm:$0xff] }
  0x9f   : > { %1891 = vmatprep.mubr.f32.mxu1 %v221_v34  ;;  %v379_v34 = vld [vmem:[%s13207_s1 + $0x338] sm:$0xff] }
  0xa1   : > { %1378 = vmatmul.mubr.f32.gmra.mrb[36].mxu0 %v220_v35 }
  0xa2   : > { %1892 = vmatmul.mubr.f32.gmra.mrb[36].mxu1 %v220_v35  ;;  %1383 = vmatprep.mubr.f32.mxu0 %v225_v36  ;;  %v395_v35 = vld [vmem:[%s13207_s1 + $0x3b8] sm:$0xff] }
  0xa3   : > { %1897 = vmatprep.mubr.f32.mxu1 %v225_v36  ;;  %v163_v36 = vld [vmem:[%s8879_s23 + $0x78] sm:$0xff] }
  0xa5   : > { %1384 = vmatmul.mubr.f32.gmra.mrb[38].mxu0 %v224_v37 }
  0xa6   : > { %1898 = vmatmul.mubr.f32.gmra.mrb[38].mxu1 %v224_v37  ;;  %1389 = vmatprep.mubr.f32.mxu0 %v229_v38  ;;  %v6909_v37 = vpack.c.bf16 %v360_v27, %v344_v26  ;;  %v507_v26 = vld [vmem:[%s13207_s1 + $0x738] sm:$0xff] }
  0xa7   : > { %1903 = vmatprep.mubr.f32.mxu1 %v229_v38  ;;  %v7013_v38 = vpack.c.bf16 %v362_v30, %v346_v28  ;;  %v523_v27 = vld [vmem:[%s13207_s1 + $0x7b8] sm:$0xff] }
  0xa8   : > { %v179_v28 = vld [vmem:[%s8879_s23 + $0xf8] sm:$0xff] }
  0xa9   : > { %1390 = vmatmul.mubr.f32.gmra.mrb[40].mxu0 %v228_v39 }
  0xaa   : > { %1904 = vmatmul.mubr.f32.gmra.mrb[40].mxu1 %v228_v39  ;;  %1395 = vmatprep.mubr.f32.mxu0 %v233_v40  ;;  %v6911_v39 = vpack.c.bf16 %v393_v32, %v377_v31  ;;  %v504_v32 = vld [vmem:[%s13207_s1 + $0x720] sm:$0xff] }
  0xab   : > { %1909 = vmatprep.mubr.f32.mxu1 %v233_v40  ;;  %v376_v40 = vld [vmem:[%s13207_s1 + $0x320] sm:$0xff] }
  0xad   : > { %1396 = vmatmul.mubr.f32.gmra.mrb[42].mxu0 %v232_v41 }
  0xae   : > { %1910 = vmatmul.mubr.f32.gmra.mrb[42].mxu1 %v232_v41  ;;  %1401 = vmatprep.mubr.f32.mxu0 %v237_v42  ;;  %v392_v41 = vld [vmem:[%s13207_s1 + $0x3a0] sm:$0xff] }
  0xaf   : > { %1915 = vmatprep.mubr.f32.mxu1 %v237_v42  ;;  %v378_v42 = vld [vmem:[%s13207_s1 + $0x330] sm:$0xff] }
  0xb1   : > { %1402 = vmatmul.mubr.f32.gmra.mrb[44].mxu0 %v236_v43 }
  0xb2   : > { %1916 = vmatmul.mubr.f32.gmra.mrb[44].mxu1 %v236_v43  ;;  %1407 = vmatprep.mubr.f32.mxu0 %v241_v44  ;;  %v7015_v43 = vpack.c.bf16 %v395_v35, %v379_v34  ;;  %v506_v34 = vld [vmem:[%s13207_s1 + $0x730] sm:$0xff]  ;;  %v7031_v35 = vpack.c.bf16 %v523_v27, %v507_v26 }
  0xb3   : > { %1921 = vmatprep.mubr.f32.mxu1 %v241_v44  ;;  %v394_v44 = vld [vmem:[%s13207_s1 + $0x3b0] sm:$0xff] }
  0xb4   : > { %v634_v26 = vld [vmem:[%s13207_s1 + $0xb30] sm:$0xff] }
  0xb5   : > { %1408 = vmatmul.mubr.f32.gmra.mrb[46].mxu0 %v240_v45 }
  0xb6   : > { %1922 = vmatmul.mubr.f32.gmra.mrb[46].mxu1 %v240_v45  ;;  %1413 = vmatprep.mubr.f32.mxu0 %v245_v46  ;;  %v409_v45 = vld [vmem:[%s13207_s1 + $0x428] sm:$0xff] }
  0xb7   : > { %1927 = vmatprep.mubr.f32.mxu1 %v245_v46  ;;  %v425_v46 = vld [vmem:[%s13207_s1 + $0x4a8] sm:$0xff] }
  0xb9   : > { %1414 = vmatmul.mubr.f32.gmra.mrb[48].mxu0 %v244_v47 }
  0xba   : > { %1928 = vmatmul.mubr.f32.gmra.mrb[48].mxu1 %v244_v47  ;;  %1419 = vmatprep.mubr.f32.mxu0 %v249_v48  ;;  %v162_v47 = vld [vmem:[%s8879_s23 + $0x70] sm:$0xff] }
  0xbb   : > { %1933 = vmatprep.mubr.f32.mxu1 %v249_v48  ;;  %v411_v48 = vld [vmem:[%s13207_s1 + $0x438] sm:$0xff] }
  0xbd   : > { %1420 = vmatmul.mubr.f32.gmra.mrb[50].mxu0 %v248_v49 }
  0xbe   : > { %1934 = vmatmul.mubr.f32.gmra.mrb[50].mxu1 %v248_v49  ;;  %1425 = vmatprep.mubr.f32.mxu0 %v253_v50  ;;  %v427_v49 = vld [vmem:[%s13207_s1 + $0x4b8] sm:$0xff] }
  0xbf   : > { %1939 = vmatprep.mubr.f32.mxu1 %v253_v50  ;;  %v167_v50 = vld [vmem:[%s8879_s23 + $0x98] sm:$0xff] }
  0xc1   : > { %1426 = vmatmul.mubr.f32.gmra.mrb[52].mxu0 %v252_v51 }
  0xc2   : > { %1940 = vmatmul.mubr.f32.gmra.mrb[52].mxu1 %v252_v51  ;;  %1431 = vmatprep.mubr.f32.mxu0 %v257_v52  ;;  %v6913_v51 = vpack.c.bf16 %v392_v41, %v376_v40  ;;  %v539_v40 = vld [vmem:[%s13207_s1 + $0x838] sm:$0xff] }
  0xc3   : > { %1945 = vmatprep.mubr.f32.mxu1 %v257_v52  ;;  %v7017_v52 = vpack.c.bf16 %v394_v44, %v378_v42  ;;  %v555_v41 = vld [vmem:[%s13207_s1 + $0x8b8] sm:$0xff] }
  0xc4   : > { %v183_v42 = vld [vmem:[%s8879_s23 + $0x118] sm:$0xff] }
  0xc5   : > { %1432 = vmatmul.mubr.f32.gmra.mrb[54].mxu0 %v256_v53 }
  0xc6   : > { %1946 = vmatmul.mubr.f32.gmra.mrb[54].mxu1 %v256_v53  ;;  %1437 = vmatprep.mubr.f32.mxu0 %v261_v54  ;;  %v6915_v53 = vpack.c.bf16 %v425_v46, %v409_v45  ;;  %v536_v46 = vld [vmem:[%s13207_s1 + $0x820] sm:$0xff] }
  0xc7   : > { %1951 = vmatprep.mubr.f32.mxu1 %v261_v54  ;;  %v408_v54 = vld [vmem:[%s13207_s1 + $0x420] sm:$0xff] }
  0xc9   : > { %1438 = vmatmul.mubr.f32.gmra.mrb[56].mxu0 %v260_v55 }
  0xca   : > { %1952 = vmatmul.mubr.f32.gmra.mrb[56].mxu1 %v260_v55  ;;  %1443 = vmatprep.mubr.f32.mxu0 %v265_v56  ;;  %v424_v55 = vld [vmem:[%s13207_s1 + $0x4a0] sm:$0xff] }
  0xcb   : > { %1957 = vmatprep.mubr.f32.mxu1 %v265_v56  ;;  %v410_v56 = vld [vmem:[%s13207_s1 + $0x430] sm:$0xff]  ;;  %v6917_v1 = vpack.c.bf16 %v424_v55, %v408_v54  ;;  %v571_v54 = vld [vmem:[%s13207_s1 + $0x938] sm:$0xff] }
  0xcc   : > { %v587_v55 = vld [vmem:[%s13207_s1 + $0x9b8] sm:$0xff] }
  0xcd   : > { %1444 = vmatmul.mubr.f32.gmra.mrb[58].mxu0 %v264_v57 }
  0xce   : > { %1958 = vmatmul.mubr.f32.gmra.mrb[58].mxu1 %v264_v57  ;;  %1449 = vmatprep.mubr.f32.mxu0 %v269_v58  ;;  %v7019_v57 = vpack.c.bf16 %v427_v49, %v411_v48  ;;  %v538_v48 = vld [vmem:[%s13207_s1 + $0x830] sm:$0xff]  ;;  %v7035_v49 = vpack.c.bf16 %v555_v41, %v539_v40 }
  0xcf   : > { %1963 = vmatprep.mubr.f32.mxu1 %v269_v58  ;;  %v426_v58 = vld [vmem:[%s13207_s1 + $0x4b0] sm:$0xff] }
  0xd0   : > { %v7021_v2 = vpack.c.bf16 %v426_v58, %v410_v56  ;;  %v187_v56 = vld [vmem:[%s8879_s23 + $0x138] sm:$0xff]  ;;  %v666_v40 = vld [vmem:[%s13207_s1 + $0xc30] sm:$0xff] }
  0xd1   : > { %1450 = vmatmul.mubr.f32.gmra.mrb[60].mxu0 %v268_v59 }
  0xd2   : > { %1964 = vmatmul.mubr.f32.gmra.mrb[60].mxu1 %v268_v59  ;;  %1455 = vmatprep.mubr.f32.mxu0 %v273_v60  ;;  %v441_v59 = vld [vmem:[%s13207_s1 + $0x528] sm:$0xff] }
  0xd3   : > { %1969 = vmatprep.mubr.f32.mxu1 %v273_v60  ;;  %v457_v60 = vld [vmem:[%s13207_s1 + $0x5a8] sm:$0xff] }
  0xd4   : > { %v6919_v3 = vpack.c.bf16 %v457_v60, %v441_v59  ;;  %v568_v60 = vld [vmem:[%s13207_s1 + $0x920] sm:$0xff] }
  0xd5   : > { %1456 = vmatmul.mubr.f32.gmra.mrb[62].mxu0 %v272_v61 }
  0xd6   : > { %1970 = vmatmul.mubr.f32.gmra.mrb[62].mxu1 %v272_v61  ;;  %6426 = vmatprep.mubr.msk.f32.mxu0 %vm1108_vm0, %v151_v62  ;;  %v166_v61 = vld [vmem:[%s8879_s23 + $0x90] sm:$0xff] }
  0xd7   : > { %6458 = vmatprep.mubr.msk.f32.mxu1 %vm1108_vm0, %v151_v62  ;;  %v443_v62 = vld [vmem:[%s13207_s1 + $0x538] sm:$0xff] }
  0xd8   : > { %v7023_v7 = vpack.c.bf16 %v459_v63, %v443_v62  ;;  %v570_v62 = vld [vmem:[%s13207_s1 + $0x930] sm:$0xff]  ;;  %v7039_v63 = vpack.c.bf16 %v587_v55, %v571_v54 }
  0xd9   : > { %1527 = vmatmul.mubr.f32.vlgmr.msra.gmra.mrb[0].mxu0 %v150_v5  ;;  %v698_v54 = vld [vmem:[%s13207_s1 + $0xd30] sm:$0xff] }
  0xda   : > { %2041 = vmatmul.mubr.f32.vlgmr.msra.gmra.mrb[0].mxu1 %v150_v5  ;;  %6902 = vmatpush1.bf16.msra.mxu0 %v6901_v6  ;;  %v456_v5 = vld [vmem:[%s13207_s1 + $0x5a0] sm:$0xff]  ;;  %v442_v6 = vld [vmem:[%s13207_s1 + $0x530] sm:$0xff] }
  0xdb   : > { %7006 = vmatpush1.bf16.msra.mxu1 %v7005_v9  ;;  %6427 = vmatprep.mubr.msk.f32.mxu0 %vm1108_vm0, %v155_v10  ;;  %v473_v9 = vld [vmem:[%s13207_s1 + $0x628] sm:$0xff]  ;;  %v7025_v16 = vpack.c.bf16 %v458_v8, %v442_v6  ;;  %v191_v6 = vld [vmem:[%s8879_s23 + $0x158] sm:$0xff] }
  0xdc   : > { %6459 = vmatprep.mubr.msk.f32.mxu1 %vm1108_vm0, %v155_v10  ;;  %6904 = vmatprep.subr.bf16.mxu0 %v6903_v11  ;;  %v489_v10 = vld [vmem:[%s13207_s1 + $0x6a8] sm:$0xff]  ;;  %v170_v11 = vld [vmem:[%s8879_s23 + $0xb0] sm:$0xff] }
  0xdd   : > { %1533 = vmatmul.mubr.f32.gmra.mrb[2].mxu0 %v154_v19  ;;  %7008 = vmatprep.subr.bf16.mxu1 %v7007_v15  ;;  %v6921_v15 = vpack.c.bf16 %v456_v5, %v440_v4  ;;  %v6923_v17 = vpack.c.bf16 %v489_v10, %v473_v9  ;;  %v603_v4 = vld [vmem:[%s13207_s1 + $0xa38] sm:$0xff]  ;;  %v600_v10 = vld [vmem:[%s13207_s1 + $0xa20] sm:$0xff] }
  0xde   : > { %2047 = vmatmul.mubr.f32.gmra.mrb[2].mxu1 %v154_v19  ;;  %6428 = vmatprep.mubr.msk.f32.mxu0 %vm1108_vm0, %v159_v22  ;;  %v488_v19 = vld [vmem:[%s13207_s1 + $0x6a0] sm:$0xff]  ;;  %v619_v5 = vld [vmem:[%s13207_s1 + $0xab8] sm:$0xff] }
  0xdf   : > { %6460 = vmatprep.mubr.msk.f32.mxu1 %vm1108_vm0, %v159_v22  ;;  %6906 = vmatpush1.bf16.msra.mxu0 %v6905_v23  ;;  %v490_v22 = vld [vmem:[%s13207_s1 + $0x6b0] sm:$0xff]  ;;  %v505_v23 = vld [vmem:[%s13207_s1 + $0x728] sm:$0xff]  ;;  %v7043_v13 = vpack.c.bf16 %v619_v5, %v603_v4 }
  0xe0   : > { %7010 = vmatpush1.bf16.msra.mxu1 %v7009_v24  ;;  %6908 = vmatprep.subr.bf16.mxu0 %v6907_v25  ;;  %v521_v24 = vld [vmem:[%s13207_s1 + $0x7a8] sm:$0xff]  ;;  %v174_v25 = vld [vmem:[%s8879_s23 + $0xd0] sm:$0xff]  ;;  %v7029_v30 = vpack.c.bf16 %v490_v22, %v474_v20  ;;  %v195_v20 = vld [vmem:[%s8879_s23 + $0x178] sm:$0xff] }
  0xe1   : > { %1539 = vmatmul.mubr.f32.gmra.mrb[4].mxu0 %v158_v33  ;;  %7012 = vmatprep.subr.bf16.mxu1 %v7011_v29  ;;  %v6925_v29 = vpack.c.bf16 %v488_v19, %v472_v18  ;;  %v6927_v31 = vpack.c.bf16 %v521_v24, %v505_v23  ;;  %v635_v18 = vld [vmem:[%s13207_s1 + $0xb38] sm:$0xff]  ;;  %v632_v24 = vld [vmem:[%s13207_s1 + $0xb20] sm:$0xff]  ;;  %v730_v4 = vld [vmem:[%s13207_s1 + $0xe30] sm:$0xff] }
  0xe2   : > { %2053 = vmatmul.mubr.f32.gmra.mrb[4].mxu1 %v158_v33  ;;  %6429 = vmatprep.mubr.msk.f32.mxu0 %vm1108_vm0, %v163_v36  ;;  %v520_v33 = vld [vmem:[%s13207_s1 + $0x7a0] sm:$0xff]  ;;  %v651_v19 = vld [vmem:[%s13207_s1 + $0xbb8] sm:$0xff] }
  0xe3   : > { %6461 = vmatprep.mubr.msk.f32.mxu1 %vm1108_vm0, %v163_v36  ;;  %6910 = vmatpush1.bf16.msra.mxu0 %v6909_v37  ;;  %v522_v36 = vld [vmem:[%s13207_s1 + $0x7b0] sm:$0xff]  ;;  %v537_v37 = vld [vmem:[%s13207_s1 + $0x828] sm:$0xff]  ;;  %v7047_v27 = vpack.c.bf16 %v651_v19, %v635_v18 }
  0xe4   : > { %7014 = vmatpush1.bf16.msra.mxu1 %v7013_v38  ;;  %6912 = vmatprep.subr.bf16.mxu0 %v6911_v39  ;;  %v553_v38 = vld [vmem:[%s13207_s1 + $0x8a8] sm:$0xff]  ;;  %v178_v39 = vld [vmem:[%s8879_s23 + $0xf0] sm:$0xff]  ;;  %v7033_v44 = vpack.c.bf16 %v522_v36, %v506_v34  ;;  %v199_v34 = vld [vmem:[%s8879_s23 + $0x198] sm:$0xff] }
  0xe5   : > { %1545 = vmatmul.mubr.f32.gmra.mrb[6].mxu0 %v162_v47  ;;  %7016 = vmatprep.subr.bf16.mxu1 %v7015_v43  ;;  %v6929_v43 = vpack.c.bf16 %v520_v33, %v504_v32  ;;  %v6931_v45 = vpack.c.bf16 %v553_v38, %v537_v37  ;;  %v667_v32 = vld [vmem:[%s13207_s1 + $0xc38] sm:$0xff]  ;;  %v664_v38 = vld [vmem:[%s13207_s1 + $0xc20] sm:$0xff]  ;;  %v762_v18 = vld [vmem:[%s13207_s1 + $0xf30] sm:$0xff] }
  0xe6   : > { %2059 = vmatmul.mubr.f32.gmra.mrb[6].mxu1 %v162_v47  ;;  %6430 = vmatprep.mubr.msk.f32.mxu0 %vm1108_vm0, %v167_v50  ;;  %v552_v47 = vld [vmem:[%s13207_s1 + $0x8a0] sm:$0xff]  ;;  %v683_v33 = vld [vmem:[%s13207_s1 + $0xcb8] sm:$0xff] }
  0xe7   : > { %6462 = vmatprep.mubr.msk.f32.mxu1 %vm1108_vm0, %v167_v50  ;;  %6914 = vmatpush1.bf16.msra.mxu0 %v6913_v51  ;;  %v554_v50 = vld [vmem:[%s13207_s1 + $0x8b0] sm:$0xff]  ;;  %v569_v51 = vld [vmem:[%s13207_s1 + $0x928] sm:$0xff]  ;;  %v7051_v41 = vpack.c.bf16 %v683_v33, %v667_v32  ;;  %v219_v32 = vld [vmem:[%s8879_s23 + $0x238] sm:$0xff] }
  0xe8   : > { %7018 = vmatpush1.bf16.msra.mxu1 %v7017_v52  ;;  %6916 = vmatprep.subr.bf16.mxu0 %v6915_v53  ;;  %v585_v52 = vld [vmem:[%s13207_s1 + $0x9a8] sm:$0xff]  ;;  %v182_v53 = vld [vmem:[%s8879_s23 + $0x110] sm:$0xff]  ;;  %v7037_v58 = vpack.c.bf16 %v554_v50, %v538_v48  ;;  %v203_v48 = vld [vmem:[%s8879_s23 + $0x1b8] sm:$0xff] }
  0xe9   : > { %1551 = vmatmul.mubr.f32.gmra.mrb[8].mxu0 %v166_v61  ;;  %7020 = vmatprep.subr.bf16.mxu1 %v7019_v57  ;;  %v6933_v57 = vpack.c.bf16 %v552_v47, %v536_v46  ;;  %v6935_v59 = vpack.c.bf16 %v585_v52, %v569_v51  ;;  %v699_v46 = vld [vmem:[%s13207_s1 + $0xd38] sm:$0xff]  ;;  %v696_v52 = vld [vmem:[%s13207_s1 + $0xd20] sm:$0xff]  ;;  %v218_v33 = vld [vmem:[%s8879_s23 + $0x230] sm:$0xff] }
  0xea   : > { %2065 = vmatmul.mubr.f32.gmra.mrb[8].mxu1 %v166_v61  ;;  %6431 = vmatprep.mubr.msk.f32.mxu0 %vm1108_vm0, %v171_v0  ;;  %v584_v61 = vld [vmem:[%s13207_s1 + $0x9a0] sm:$0xff]  ;;  %v715_v47 = vld [vmem:[%s13207_s1 + $0xdb8] sm:$0xff] }
  0xeb   : > { %6463 = vmatprep.mubr.msk.f32.mxu1 %vm1108_vm0, %v171_v0  ;;  %6918 = vmatpush1.bf16.msra.mxu0 %v6917_v1  ;;  %v586_v0 = vld [vmem:[%s13207_s1 + $0x9b0] sm:$0xff]  ;;  %v601_v1 = vld [vmem:[%s13207_s1 + $0xa28] sm:$0xff]  ;;  %v7055_v55 = vpack.c.bf16 %v715_v47, %v699_v46  ;;  %v247_v46 = vld [vmem:[%s8879_s23 + $0x318] sm:$0xff] }
  0xec   : > { %7022 = vmatpush1.bf16.msra.mxu1 %v7021_v2  ;;  %6920 = vmatprep.subr.bf16.mxu0 %v6919_v3  ;;  %v617_v2 = vld [vmem:[%s13207_s1 + $0xaa8] sm:$0xff]  ;;  %v186_v3 = vld [vmem:[%s8879_s23 + $0x130] sm:$0xff]  ;;  %v7041_v8 = vpack.c.bf16 %v586_v0, %v570_v62  ;;  %v207_v62 = vld [vmem:[%s8879_s23 + $0x1d8] sm:$0xff] }
  0xed   : > { %1557 = vmatmul.mubr.f32.gmra.mrb[10].mxu0 %v170_v11  ;;  %7024 = vmatprep.subr.bf16.mxu1 %v7023_v7  ;;  %v6937_v7 = vpack.c.bf16 %v584_v61, %v568_v60  ;;  %v6939_v9 = vpack.c.bf16 %v617_v2, %v601_v1  ;;  %v731_v60 = vld [vmem:[%s13207_s1 + $0xe38] sm:$0xff]  ;;  %v728_v2 = vld [vmem:[%s13207_s1 + $0xe20] sm:$0xff]  ;;  %v246_v47 = vld [vmem:[%s8879_s23 + $0x310] sm:$0xff] }
  0xee   : > { %2071 = vmatmul.mubr.f32.gmra.mrb[10].mxu1 %v170_v11  ;;  %6432 = vmatprep.mubr.msk.f32.mxu0 %vm1108_vm0, %v175_v14  ;;  %v616_v11 = vld [vmem:[%s13207_s1 + $0xaa0] sm:$0xff]  ;;  %v747_v61 = vld [vmem:[%s13207_s1 + $0xeb8] sm:$0xff] }
  0xef   : > { %6464 = vmatprep.mubr.msk.f32.mxu1 %vm1108_vm0, %v175_v14  ;;  %6922 = vmatpush1.bf16.msra.mxu0 %v6921_v15  ;;  %v618_v14 = vld [vmem:[%s13207_s1 + $0xab0] sm:$0xff]  ;;  %v633_v15 = vld [vmem:[%s13207_s1 + $0xb28] sm:$0xff]  ;;  %v7059_v5 = vpack.c.bf16 %v747_v61, %v731_v60  ;;  %v275_v60 = vld [vmem:[%s8879_s23 + $0x3f8] sm:$0xff] }
  0xf0   : > { %7026 = vmatpush1.bf16.msra.mxu1 %v7025_v16  ;;  %6924 = vmatprep.subr.bf16.mxu0 %v6923_v17  ;;  %v649_v16 = vld [vmem:[%s13207_s1 + $0xba8] sm:$0xff]  ;;  %v190_v17 = vld [vmem:[%s8879_s23 + $0x150] sm:$0xff]  ;;  %v7045_v22 = vpack.c.bf16 %v618_v14, %v602_v12  ;;  %v211_v12 = vld [vmem:[%s8879_s23 + $0x1f8] sm:$0xff] }
  0xf1   : > { %1563 = vmatmul.mubr.f32.gmra.mrb[12].mxu0 %v174_v25  ;;  %7028 = vmatprep.subr.bf16.mxu1 %v7027_v21  ;;  %v6941_v21 = vpack.c.bf16 %v616_v11, %v600_v10  ;;  %v6943_v23 = vpack.c.bf16 %v649_v16, %v633_v15  ;;  %v763_v10 = vld [vmem:[%s13207_s1 + $0xf38] sm:$0xff]  ;;  %v760_v16 = vld [vmem:[%s13207_s1 + $0xf20] sm:$0xff]  ;;  %v274_v61 = vld [vmem:[%s8879_s23 + $0x3f0] sm:$0xff] }
  0xf2   : > { %2077 = vmatmul.mubr.f32.gmra.mrb[12].mxu1 %v174_v25  ;;  %6433 = vmatprep.mubr.msk.f32.mxu0 %vm1108_vm0, %v179_v28  ;;  %v648_v25 = vld [vmem:[%s13207_s1 + $0xba0] sm:$0xff]  ;;  %v779_v11 = vld [vmem:[%s13207_s1 + $0xfb8] sm:$0xff] }
  0xf3   : > { %6465 = vmatprep.mubr.msk.f32.mxu1 %vm1108_vm0, %v179_v28  ;;  %6926 = vmatpush1.bf16.msra.mxu0 %v6925_v29  ;;  %v650_v28 = vld [vmem:[%s13207_s1 + $0xbb0] sm:$0xff]  ;;  %v665_v29 = vld [vmem:[%s13207_s1 + $0xc28] sm:$0xff]  ;;  %v7063_v19 = vpack.c.bf16 %v779_v11, %v763_v10  ;;  %v824_v10 = vld [vmem:[%s13207_s1 + $0x1120] sm:$0xff] }
  0xf4   : > { %7030 = vmatpush1.bf16.msra.mxu1 %v7029_v30  ;;  %6928 = vmatprep.subr.bf16.mxu0 %v6927_v31  ;;  %v681_v30 = vld [vmem:[%s13207_s1 + $0xca8] sm:$0xff]  ;;  %v194_v31 = vld [vmem:[%s8879_s23 + $0x170] sm:$0xff]  ;;  %v7049_v36 = vpack.c.bf16 %v650_v28, %v634_v26  ;;  %v215_v26 = vld [vmem:[%s8879_s23 + $0x218] sm:$0xff] }
  0xf5   : > { %1569 = vmatmul.mubr.f32.gmra.mrb[14].mxu0 %v178_v39  ;;  %7032 = vmatprep.subr.bf16.mxu1 %v7031_v35  ;;  %v6945_v35 = vpack.c.bf16 %v648_v25, %v632_v24  ;;  %v6947_v37 = vpack.c.bf16 %v681_v30, %v665_v29  ;;  %v795_v24 = vld [vmem:[%s13207_s1 + $0x1038] sm:$0xff]  ;;  %v840_v11 = vld [vmem:[%s13207_s1 + $0x11a0] sm:$0xff] }
  0xf6   : > { %2083 = vmatmul.mubr.f32.gmra.mrb[14].mxu1 %v178_v39  ;;  %6434 = vmatprep.mubr.msk.f32.mxu0 %vm1108_vm0, %v183_v42  ;;  %v680_v39 = vld [vmem:[%s13207_s1 + $0xca0] sm:$0xff]  ;;  %v811_v25 = vld [vmem:[%s13207_s1 + $0x10b8] sm:$0xff] }
  0xf7   : > { %6466 = vmatprep.mubr.msk.f32.mxu1 %vm1108_vm0, %v183_v42  ;;  %6930 = vmatpush1.bf16.msra.mxu0 %v6929_v43  ;;  %v682_v42 = vld [vmem:[%s13207_s1 + $0xcb0] sm:$0xff]  ;;  %v697_v43 = vld [vmem:[%s13207_s1 + $0xd28] sm:$0xff]  ;;  %v7067_v30 = vpack.c.bf16 %v811_v25, %v795_v24  ;;  %v856_v24 = vld [vmem:[%s13207_s1 + $0x1220] sm:$0xff] }
  0xf8   : > { %7034 = vmatpush1.bf16.msra.mxu1 %v7033_v44  ;;  %6932 = vmatprep.subr.bf16.mxu0 %v6931_v45  ;;  %v713_v44 = vld [vmem:[%s13207_s1 + $0xda8] sm:$0xff]  ;;  %v198_v45 = vld [vmem:[%s8879_s23 + $0x190] sm:$0xff]  ;;  %v7053_v50 = vpack.c.bf16 %v682_v42, %v666_v40  ;;  %v235_v40 = vld [vmem:[%s8879_s23 + $0x2b8] sm:$0xff] }
  0xf9   : > { %1575 = vmatmul.mubr.f32.gmra.mrb[16].mxu0 %v182_v53  ;;  %7036 = vmatprep.subr.bf16.mxu1 %v7035_v49  ;;  %v6949_v49 = vpack.c.bf16 %v680_v39, %v664_v38  ;;  %v6951_v51 = vpack.c.bf16 %v713_v44, %v697_v43  ;;  %v231_v38 = vld [vmem:[%s8879_s23 + $0x298] sm:$0xff]  ;;  %v230_v39 = vld [vmem:[%s8879_s23 + $0x290] sm:$0xff]  ;;  %v872_v25 = vld [vmem:[%s13207_s1 + $0x12a0] sm:$0xff] }
  0xfa   : > { %2089 = vmatmul.mubr.f32.gmra.mrb[16].mxu1 %v182_v53  ;;  %6435 = vmatprep.mubr.msk.f32.mxu0 %vm1108_vm0, %v187_v56  ;;  %v712_v53 = vld [vmem:[%s13207_s1 + $0xda0] sm:$0xff]  ;;  %v239_v42 = vld [vmem:[%s8879_s23 + $0x2d8] sm:$0xff]  ;;  %v238_v43 = vld [vmem:[%s8879_s23 + $0x2d0] sm:$0xff] }
  0xfb   : > { %6467 = vmatprep.mubr.msk.f32.mxu1 %vm1108_vm0, %v187_v56  ;;  %6934 = vmatpush1.bf16.msra.mxu0 %v6933_v57  ;;  %v714_v56 = vld [vmem:[%s13207_s1 + $0xdb0] sm:$0xff]  ;;  %v729_v57 = vld [vmem:[%s13207_s1 + $0xe28] sm:$0xff]  ;;  %v243_v44 = vld [vmem:[%s8879_s23 + $0x2f8] sm:$0xff] }
  0xfc   : > { %7038 = vmatpush1.bf16.msra.mxu1 %v7037_v58  ;;  %6936 = vmatprep.subr.bf16.mxu0 %v6935_v59  ;;  %v745_v58 = vld [vmem:[%s13207_s1 + $0xea8] sm:$0xff]  ;;  %v202_v59 = vld [vmem:[%s8879_s23 + $0x1b0] sm:$0xff]  ;;  %v7057_v0 = vpack.c.bf16 %v714_v56, %v698_v54  ;;  %v263_v54 = vld [vmem:[%s8879_s23 + $0x398] sm:$0xff] }
  0xfd   : > { %1581 = vmatmul.mubr.f32.gmra.mrb[18].mxu0 %v186_v3  ;;  %7040 = vmatprep.subr.bf16.mxu1 %v7039_v63  ;;  %v6953_v63 = vpack.c.bf16 %v712_v53, %v696_v52  ;;  %v6955_v1 = vpack.c.bf16 %v745_v58, %v729_v57  ;;  %v259_v52 = vld [vmem:[%s8879_s23 + $0x378] sm:$0xff]  ;;  %v258_v53 = vld [vmem:[%s8879_s23 + $0x370] sm:$0xff] }
  0xfe   : > { %2095 = vmatmul.mubr.f32.gmra.mrb[18].mxu1 %v186_v3  ;;  %6436 = vmatprep.mubr.msk.f32.mxu0 %vm1108_vm0, %v191_v6  ;;  %v744_v3 = vld [vmem:[%s13207_s1 + $0xea0] sm:$0xff]  ;;  %v267_v56 = vld [vmem:[%s8879_s23 + $0x3b8] sm:$0xff]  ;;  %v266_v57 = vld [vmem:[%s8879_s23 + $0x3b0] sm:$0xff] }
  0xff   : > { %6468 = vmatprep.mubr.msk.f32.mxu1 %vm1108_vm0, %v191_v6  ;;  %6938 = vmatpush1.bf16.msra.mxu0 %v6937_v7  ;;  %v746_v6 = vld [vmem:[%s13207_s1 + $0xeb0] sm:$0xff]  ;;  %v761_v7 = vld [vmem:[%s13207_s1 + $0xf28] sm:$0xff]  ;;  %v271_v58 = vld [vmem:[%s8879_s23 + $0x3d8] sm:$0xff] }
 0x100   : > { %7042 = vmatpush1.bf16.msra.mxu1 %v7041_v8  ;;  %6940 = vmatprep.subr.bf16.mxu0 %v6939_v9  ;;  %v777_v8 = vld [vmem:[%s13207_s1 + $0xfa8] sm:$0xff]  ;;  %v206_v9 = vld [vmem:[%s8879_s23 + $0x1d0] sm:$0xff]  ;;  %v7061_v14 = vpack.c.bf16 %v746_v6, %v730_v4  ;;  %v827_v6 = vld [vmem:[%s13207_s1 + $0x1138] sm:$0xff] }
 0x101   : > { %1587 = vmatmul.mubr.f32.gmra.mrb[20].mxu0 %v190_v17  ;;  %7044 = vmatprep.subr.bf16.mxu1 %v7043_v13  ;;  %v6957_v13 = vpack.c.bf16 %v744_v3, %v728_v2  ;;  %v6959_v15 = vpack.c.bf16 %v777_v8, %v761_v7  ;;  %v825_v2 = vld [vmem:[%s13207_s1 + $0x1128] sm:$0xff]  ;;  %v843_v7 = vld [vmem:[%s13207_s1 + $0x11b8] sm:$0xff] }
 0x102   : > { %2101 = vmatmul.mubr.f32.gmra.mrb[20].mxu1 %v190_v17  ;;  %6437 = vmatprep.mubr.msk.f32.mxu0 %vm1108_vm0, %v195_v20  ;;  %v776_v17 = vld [vmem:[%s13207_s1 + $0xfa0] sm:$0xff]  ;;  %v841_v3 = vld [vmem:[%s13207_s1 + $0x11a8] sm:$0xff] }
 0x103   : > { %6469 = vmatprep.mubr.msk.f32.mxu1 %vm1108_vm0, %v195_v20  ;;  %6942 = vmatpush1.bf16.msra.mxu0 %v6941_v21  ;;  %v778_v20 = vld [vmem:[%s13207_s1 + $0xfb0] sm:$0xff]  ;;  %v793_v21 = vld [vmem:[%s13207_s1 + $0x1028] sm:$0xff] }
 0x104   : > { %7046 = vmatpush1.bf16.msra.mxu1 %v7045_v22  ;;  %6944 = vmatprep.subr.bf16.mxu0 %v6943_v23  ;;  %v809_v22 = vld [vmem:[%s13207_s1 + $0x10a8] sm:$0xff]  ;;  %v210_v23 = vld [vmem:[%s8879_s23 + $0x1f0] sm:$0xff]  ;;  %v7065_v28 = vpack.c.bf16 %v778_v20, %v762_v18  ;;  %v859_v18 = vld [vmem:[%s13207_s1 + $0x1238] sm:$0xff] }
 0x105   : > { %1593 = vmatmul.mubr.f32.gmra.mrb[22].mxu0 %v194_v31  ;;  %7048 = vmatprep.subr.bf16.mxu1 %v7047_v27  ;;  %v6961_v27 = vpack.c.bf16 %v776_v17, %v760_v16  ;;  %v6963_v29 = vpack.c.bf16 %v809_v22, %v793_v21  ;;  %v8076_v4 = vld [vmem:[%s8879_s23 + $0x8] sm:$0xff]  ;;  %v6969_v21 = vpack.c.bf16 %v840_v11, %v824_v10  ;;  %v987_v11 = vld [vmem:[%s13207_s1 + $0x1638] sm:$0xff] }
 0x106   : > { %2107 = vmatmul.mubr.f32.gmra.mrb[22].mxu1 %v194_v31  ;;  %6438 = vmatprep.mubr.msk.f32.mxu0 %vm1108_vm0, %v199_v34  ;;  %v214_v31 = vld [vmem:[%s8879_s23 + $0x210] sm:$0xff]  ;;  %v857_v16 = vld [vmem:[%s13207_s1 + $0x1228] sm:$0xff] }
 0x107   : > { %6470 = vmatprep.mubr.msk.f32.mxu1 %vm1108_vm0, %v199_v34  ;;  %6946 = vmatpush1.bf16.msra.mxu0 %v6945_v35  ;;  %v223_v34 = vld [vmem:[%s8879_s23 + $0x258] sm:$0xff]  ;;  %v222_v35 = vld [vmem:[%s8879_s23 + $0x250] sm:$0xff]  ;;  %v873_v17 = vld [vmem:[%s13207_s1 + $0x12a8] sm:$0xff] }
 0x108   : > { %7050 = vmatpush1.bf16.msra.mxu1 %v7049_v36  ;;  %6948 = vmatprep.subr.bf16.mxu0 %v6947_v37  ;;  %v227_v36 = vld [vmem:[%s8879_s23 + $0x278] sm:$0xff]  ;;  %v226_v37 = vld [vmem:[%s8879_s23 + $0x270] sm:$0xff]  ;;  %v8078_v20 = vld [vmem:[%s8879_s23 + $0x28] sm:$0xff] }
 0x109   : > { %1599 = vmatmul.mubr.f32.gmra.mrb[24].mxu0 %v198_v45  ;;  %7052 = vmatprep.subr.bf16.mxu1 %v7051_v41  ;;  %v234_v41 = vld [vmem:[%s8879_s23 + $0x2b0] sm:$0xff]  ;;  %v8086_v10 = vld [vmem:[%s8879_s23 + $0xa8] sm:$0xff] }
 0x10a   : > { %2113 = vmatmul.mubr.f32.gmra.mrb[24].mxu1 %v198_v45  ;;  %6439 = vmatprep.mubr.msk.f32.mxu0 %vm1108_vm0, %v203_v48  ;;  %v242_v45 = vld [vmem:[%s8879_s23 + $0x2f0] sm:$0xff] }
 0x10b   : > { %6471 = vmatprep.mubr.msk.f32.mxu1 %vm1108_vm0, %v203_v48  ;;  %6950 = vmatpush1.bf16.msra.mxu0 %v6949_v49  ;;  %v251_v48 = vld [vmem:[%s8879_s23 + $0x338] sm:$0xff]  ;;  %v250_v49 = vld [vmem:[%s8879_s23 + $0x330] sm:$0xff] }
 0x10c   : > { %7054 = vmatpush1.bf16.msra.mxu1 %v7053_v50  ;;  %6952 = vmatprep.subr.bf16.mxu0 %v6951_v51  ;;  %v255_v50 = vld [vmem:[%s8879_s23 + $0x358] sm:$0xff]  ;;  %v254_v51 = vld [vmem:[%s8879_s23 + $0x350] sm:$0xff] }
 0x10d   : > { %1605 = vmatmul.mubr.f32.gmra.mrb[26].mxu0 %v202_v59  ;;  %7056 = vmatprep.subr.bf16.mxu1 %v7055_v55  ;;  %v262_v55 = vld [vmem:[%s8879_s23 + $0x390] sm:$0xff] }
 0x10e   : > { %2119 = vmatmul.mubr.f32.gmra.mrb[26].mxu1 %v202_v59  ;;  %6440 = vmatprep.mubr.msk.f32.mxu0 %vm1108_vm0, %v207_v62  ;;  %v270_v59 = vld [vmem:[%s8879_s23 + $0x3d0] sm:$0xff] }
 0x10f   : > { %6472 = vmatprep.mubr.msk.f32.mxu1 %vm1108_vm0, %v207_v62  ;;  %6954 = vmatpush1.bf16.msra.mxu0 %v6953_v63  ;;  %v792_v62 = vld [vmem:[%s13207_s1 + $0x1020] sm:$0xff] }
 0x110   : > { %7058 = vmatpush1.bf16.msra.mxu1 %v7057_v0  ;;  %6956 = vmatprep.subr.bf16.mxu0 %v6955_v1  ;;  %v808_v63 = vld [vmem:[%s13207_s1 + $0x10a0] sm:$0xff]  ;;  %v794_v0 = vld [vmem:[%s13207_s1 + $0x1030] sm:$0xff] }
 0x111   : > { %1611 = vmatmul.mubr.f32.gmra.mrb[28].mxu0 %v206_v9  ;;  %7060 = vmatprep.subr.bf16.mxu1 %v7059_v5  ;;  %v810_v1 = vld [vmem:[%s13207_s1 + $0x10b0] sm:$0xff]  ;;  %v6965_v5 = vpack.c.bf16 %v808_v63, %v792_v62  ;;  %v971_v62 = vld [vmem:[%s13207_s1 + $0x15b8] sm:$0xff] }
 0x112   : > { %2125 = vmatmul.mubr.f32.gmra.mrb[28].mxu1 %v206_v9  ;;  %6441 = vmatprep.mubr.msk.f32.mxu0 %vm1108_vm0, %v211_v12  ;;  %v7069_v8 = vpack.c.bf16 %v810_v1, %v794_v0  ;;  %v6967_v9 = vpack.c.bf16 %v841_v3, %v825_v2  ;;  %v952_v2 = vld [vmem:[%s13207_s1 + $0x1520] sm:$0xff] }
 0x113   : > { %6473 = vmatprep.mubr.msk.f32.mxu1 %vm1108_vm0, %v211_v12  ;;  %6958 = vmatpush1.bf16.msra.mxu0 %v6957_v13  ;;  %v826_v12 = vld [vmem:[%s13207_s1 + $0x1130] sm:$0xff]  ;;  %v8077_v13 = vld [vmem:[%s8879_s23] sm:$0xff] }
 0x114   : > { %7062 = vmatpush1.bf16.msra.mxu1 %v7061_v14  ;;  %6960 = vmatprep.subr.bf16.mxu0 %v6959_v15  ;;  %v7071_v14 = vpack.c.bf16 %v843_v7, %v827_v6  ;;  %v842_v15 = vld [vmem:[%s13207_s1 + $0x11b0] sm:$0xff]  ;;  %v968_v3 = vld [vmem:[%s13207_s1 + $0x15a0] sm:$0xff] }
 0x115   : > { %1617 = vmatmul.mubr.f32.gmra.mrb[30].mxu0 %v210_v23  ;;  %7064 = vmatprep.subr.bf16.mxu1 %v7063_v19  ;;  %v875_v19 = vld [vmem:[%s13207_s1 + $0x12b8] sm:$0xff]  ;;  %v7073_v22 = vpack.c.bf16 %v842_v15, %v826_v12  ;;  %v970_v7 = vld [vmem:[%s13207_s1 + $0x15b0] sm:$0xff] }
 0x116   : > { %2131 = vmatmul.mubr.f32.gmra.mrb[30].mxu1 %v210_v23  ;;  %6442 = vmatprep.mubr.msk.f32.mxu0 %vm1108_vm0, %v215_v26  ;;  %v6971_v23 = vpack.c.bf16 %v873_v17, %v857_v16  ;;  %v1003_v12 = vld [vmem:[%s13207_s1 + $0x16b8] sm:$0xff]  ;;  %v984_v16 = vld [vmem:[%s13207_s1 + $0x1620] sm:$0xff] }
 0x117   : > { %6474 = vmatprep.mubr.msk.f32.mxu1 %vm1108_vm0, %v215_v26  ;;  %6962 = vmatpush1.bf16.msra.mxu0 %v6961_v27  ;;  %v858_v26 = vld [vmem:[%s13207_s1 + $0x1230] sm:$0xff]  ;;  %v8079_v27 = vld [vmem:[%s8879_s23 + $0x20] sm:$0xff] }
 0x118   : > { %7066 = vmatpush1.bf16.msra.mxu1 %v7065_v28  ;;  %6964 = vmatprep.subr.bf16.mxu0 %v6963_v29  ;;  %v7075_v28 = vpack.c.bf16 %v875_v19, %v859_v18  ;;  %v874_v29 = vld [vmem:[%s13207_s1 + $0x12b0] sm:$0xff]  ;;  %v1000_v17 = vld [vmem:[%s13207_s1 + $0x16a0] sm:$0xff] }
 0x119   : > { %1623 = vmatmul.mubr.f32.gmra.mrb[32].mxu0 %v214_v31  ;;  %7068 = vmatprep.subr.bf16.mxu1 %v7067_v30  ;;  %v889_v30 = vld [vmem:[%s13207_s1 + $0x1328] sm:$0xff]  ;;  %v986_v18 = vld [vmem:[%s13207_s1 + $0x1630] sm:$0xff]  ;;  %v8087_v19 = vld [vmem:[%s8879_s23 + $0xa0] sm:$0xff] }
 0x11a   : > { %2137 = vmatmul.mubr.f32.gmra.mrb[32].mxu1 %v214_v31  ;;  %6443 = vmatprep.mubr.msk.f32.mxu0 %vm1108_vm0, %v219_v32  ;;  %v905_v31 = vld [vmem:[%s13207_s1 + $0x13a8] sm:$0xff] }
 0x11b   : > { %6475 = vmatprep.mubr.msk.f32.mxu1 %vm1108_vm0, %v219_v32  ;;  %v8080_v32 = vld [vmem:[%s8879_s23 + $0x48] sm:$0xff] }
 0x11d   : > { %1629 = vmatmul.mubr.f32.gmra.mrb[34].mxu0 %v218_v33 }
 0x11e   : > { %2143 = vmatmul.mubr.f32.gmra.mrb[34].mxu1 %v218_v33  ;;  %6444 = vmatprep.mubr.msk.f32.mxu0 %vm1108_vm0, %v223_v34  ;;  %v891_v33 = vld [vmem:[%s13207_s1 + $0x1338] sm:$0xff] }
 0x11f   : > { %6476 = vmatprep.mubr.msk.f32.mxu1 %vm1108_vm0, %v223_v34  ;;  %v907_v34 = vld [vmem:[%s13207_s1 + $0x13b8] sm:$0xff] }
 0x121   : > { %1635 = vmatmul.mubr.f32.gmra.mrb[36].mxu0 %v222_v35 }
 0x122   : > { %2149 = vmatmul.mubr.f32.gmra.mrb[36].mxu1 %v222_v35  ;;  %6445 = vmatprep.mubr.msk.f32.mxu0 %vm1108_vm0, %v227_v36  ;;  %v6973_v35 = vpack.c.bf16 %v872_v25, %v856_v24  ;;  %v8088_v24 = vld [vmem:[%s8879_s23 + $0xc8] sm:$0xff]  ;;  %v1019_v25 = vld [vmem:[%s13207_s1 + $0x1738] sm:$0xff] }
 0x123   : > { %6477 = vmatprep.mubr.msk.f32.mxu1 %vm1108_vm0, %v227_v36  ;;  %v7077_v36 = vpack.c.bf16 %v874_v29, %v858_v26  ;;  %v1035_v26 = vld [vmem:[%s13207_s1 + $0x17b8] sm:$0xff] }
 0x125   : > { %1641 = vmatmul.mubr.f32.gmra.mrb[38].mxu0 %v226_v37 }
 0x126   : > { %2155 = vmatmul.mubr.f32.gmra.mrb[38].mxu1 %v226_v37  ;;  %6446 = vmatprep.mubr.msk.f32.mxu0 %vm1108_vm0, %v231_v38  ;;  %v6975_v37 = vpack.c.bf16 %v905_v31, %v889_v30  ;;  %v1016_v30 = vld [vmem:[%s13207_s1 + $0x1720] sm:$0xff] }
 0x127   : > { %6478 = vmatprep.mubr.msk.f32.mxu1 %vm1108_vm0, %v231_v38  ;;  %v888_v38 = vld [vmem:[%s13207_s1 + $0x1320] sm:$0xff] }
 0x128   : > { %v1032_v31 = vld [vmem:[%s13207_s1 + $0x17a0] sm:$0xff] }
 0x129   : > { %1647 = vmatmul.mubr.f32.gmra.mrb[40].mxu0 %v230_v39 }
 0x12a   : > { %2161 = vmatmul.mubr.f32.gmra.mrb[40].mxu1 %v230_v39  ;;  %6447 = vmatprep.mubr.msk.f32.mxu0 %vm1108_vm0, %v235_v40  ;;  %v904_v39 = vld [vmem:[%s13207_s1 + $0x13a0] sm:$0xff] }
 0x12b   : > { %6479 = vmatprep.mubr.msk.f32.mxu1 %vm1108_vm0, %v235_v40  ;;  %v890_v40 = vld [vmem:[%s13207_s1 + $0x1330] sm:$0xff] }
 0x12d   : > { %1653 = vmatmul.mubr.f32.gmra.mrb[42].mxu0 %v234_v41 }
 0x12e   : > { %2167 = vmatmul.mubr.f32.gmra.mrb[42].mxu1 %v234_v41  ;;  %6448 = vmatprep.mubr.msk.f32.mxu0 %vm1108_vm0, %v239_v42  ;;  %v8081_v41 = vld [vmem:[%s8879_s23 + $0x40] sm:$0xff] }
 0x12f   : > { %6480 = vmatprep.mubr.msk.f32.mxu1 %vm1108_vm0, %v239_v42  ;;  %v7079_v42 = vpack.c.bf16 %v907_v34, %v891_v33  ;;  %v8089_v33 = vld [vmem:[%s8879_s23 + $0xc0] sm:$0xff]  ;;  %v7095_v34 = vpack.c.bf16 %v1035_v26, %v1019_v25  ;;  %v8112_v26 = vld [vmem:[%s8879_s23 + $0x248] sm:$0xff] }
 0x130   : > { %v8111_v25 = vld [vmem:[%s8879_s23 + $0x220] sm:$0xff] }
 0x131   : > { %1659 = vmatmul.mubr.f32.gmra.mrb[44].mxu0 %v238_v43 }
 0x132   : > { %2173 = vmatmul.mubr.f32.gmra.mrb[44].mxu1 %v238_v43  ;;  %6449 = vmatprep.mubr.msk.f32.mxu0 %vm1108_vm0, %v243_v44  ;;  %v906_v43 = vld [vmem:[%s13207_s1 + $0x13b0] sm:$0xff] }
 0x133   : > { %6481 = vmatprep.mubr.msk.f32.mxu1 %vm1108_vm0, %v243_v44  ;;  %v921_v44 = vld [vmem:[%s13207_s1 + $0x1428] sm:$0xff] }
 0x135   : > { %1665 = vmatmul.mubr.f32.gmra.mrb[46].mxu0 %v242_v45 }
 0x136   : > { %2179 = vmatmul.mubr.f32.gmra.mrb[46].mxu1 %v242_v45  ;;  %6450 = vmatprep.mubr.msk.f32.mxu0 %vm1108_vm0, %v247_v46  ;;  %v937_v45 = vld [vmem:[%s13207_s1 + $0x14a8] sm:$0xff] }
 0x137   : > { %6482 = vmatprep.mubr.msk.f32.mxu1 %vm1108_vm0, %v247_v46  ;;  %v8082_v46 = vld [vmem:[%s8879_s23 + $0x68] sm:$0xff] }
 0x139   : > { %1671 = vmatmul.mubr.f32.gmra.mrb[48].mxu0 %v246_v47 }
 0x13a   : > { %2185 = vmatmul.mubr.f32.gmra.mrb[48].mxu1 %v246_v47  ;;  %6451 = vmatprep.mubr.msk.f32.mxu0 %vm1108_vm0, %v251_v48  ;;  %v923_v47 = vld [vmem:[%s13207_s1 + $0x1438] sm:$0xff] }
 0x13b   : > { %6483 = vmatprep.mubr.msk.f32.mxu1 %vm1108_vm0, %v251_v48  ;;  %v939_v48 = vld [vmem:[%s13207_s1 + $0x14b8] sm:$0xff] }
 0x13d   : > { %1677 = vmatmul.mubr.f32.gmra.mrb[50].mxu0 %v250_v49 }
 0x13e   : > { %2191 = vmatmul.mubr.f32.gmra.mrb[50].mxu1 %v250_v49  ;;  %6452 = vmatprep.mubr.msk.f32.mxu0 %vm1108_vm0, %v255_v50  ;;  %v6977_v49 = vpack.c.bf16 %v904_v39, %v888_v38  ;;  %v8090_v38 = vld [vmem:[%s8879_s23 + $0xe8] sm:$0xff]  ;;  %v1051_v39 = vld [vmem:[%s13207_s1 + $0x1838] sm:$0xff] }
 0x13f   : > { %6484 = vmatprep.mubr.msk.f32.mxu1 %vm1108_vm0, %v255_v50  ;;  %v7081_v50 = vpack.c.bf16 %v906_v43, %v890_v40  ;;  %v1067_v40 = vld [vmem:[%s13207_s1 + $0x18b8] sm:$0xff] }
 0x141   : > { %1683 = vmatmul.mubr.f32.gmra.mrb[52].mxu0 %v254_v51 }
 0x142   : > { %2197 = vmatmul.mubr.f32.gmra.mrb[52].mxu1 %v254_v51  ;;  %6453 = vmatprep.mubr.msk.f32.mxu0 %vm1108_vm0, %v259_v52  ;;  %v6979_v51 = vpack.c.bf16 %v937_v45, %v921_v44  ;;  %v1048_v44 = vld [vmem:[%s13207_s1 + $0x1820] sm:$0xff] }
 0x143   : > { %6485 = vmatprep.mubr.msk.f32.mxu1 %vm1108_vm0, %v259_v52  ;;  %v920_v52 = vld [vmem:[%s13207_s1 + $0x1420] sm:$0xff] }
 0x144   : > { %v1064_v45 = vld [vmem:[%s13207_s1 + $0x18a0] sm:$0xff] }
 0x145   : > { %1689 = vmatmul.mubr.f32.gmra.mrb[54].mxu0 %v258_v53 }
 0x146   : > { %2203 = vmatmul.mubr.f32.gmra.mrb[54].mxu1 %v258_v53  ;;  %6454 = vmatprep.mubr.msk.f32.mxu0 %vm1108_vm0, %v263_v54  ;;  %v936_v53 = vld [vmem:[%s13207_s1 + $0x14a0] sm:$0xff] }
 0x147   : > { %6486 = vmatprep.mubr.msk.f32.mxu1 %vm1108_vm0, %v263_v54  ;;  %v922_v54 = vld [vmem:[%s13207_s1 + $0x1430] sm:$0xff]  ;;  %v6981_v63 = vpack.c.bf16 %v936_v53, %v920_v52  ;;  %v8092_v52 = vld [vmem:[%s8879_s23 + $0x108] sm:$0xff]  ;;  %v1083_v53 = vld [vmem:[%s13207_s1 + $0x1938] sm:$0xff] }
 0x149   : > { %1695 = vmatmul.mubr.f32.gmra.mrb[56].mxu0 %v262_v55 }
 0x14a   : > { %2209 = vmatmul.mubr.f32.gmra.mrb[56].mxu1 %v262_v55  ;;  %6455 = vmatprep.mubr.msk.f32.mxu0 %vm1108_vm0, %v267_v56  ;;  %v8083_v55 = vld [vmem:[%s8879_s23 + $0x60] sm:$0xff] }
 0x14b   : > { %6487 = vmatprep.mubr.msk.f32.mxu1 %vm1108_vm0, %v267_v56  ;;  %v7083_v56 = vpack.c.bf16 %v939_v48, %v923_v47  ;;  %v8091_v47 = vld [vmem:[%s8879_s23 + $0xe0] sm:$0xff]  ;;  %v7099_v48 = vpack.c.bf16 %v1067_v40, %v1051_v39 }
 0x14d   : > { %1701 = vmatmul.mubr.f32.gmra.mrb[58].mxu0 %v266_v57 }
 0x14e   : > { %2215 = vmatmul.mubr.f32.gmra.mrb[58].mxu1 %v266_v57  ;;  %6456 = vmatprep.mubr.msk.f32.mxu0 %vm1108_vm0, %v271_v58  ;;  %v938_v57 = vld [vmem:[%s13207_s1 + $0x14b0] sm:$0xff] }
 0x14f   : > { %6488 = vmatprep.mubr.msk.f32.mxu1 %vm1108_vm0, %v271_v58  ;;  %v953_v58 = vld [vmem:[%s13207_s1 + $0x1528] sm:$0xff]  ;;  %v7085_v0 = vpack.c.bf16 %v938_v57, %v922_v54  ;;  %v1099_v54 = vld [vmem:[%s13207_s1 + $0x19b8] sm:$0xff] }
 0x151   : > { %1707 = vmatmul.mubr.f32.gmra.mrb[60].mxu0 %v270_v59 }
 0x152   : > { %2221 = vmatmul.mubr.f32.gmra.mrb[60].mxu1 %v270_v59  ;;  %6457 = vmatprep.mubr.msk.f32.mxu0 %vm1108_vm0, %v275_v60  ;;  %v969_v59 = vld [vmem:[%s13207_s1 + $0x15a8] sm:$0xff] }
 0x153   : > { %6489 = vmatprep.mubr.msk.f32.mxu1 %vm1108_vm0, %v275_v60  ;;  %v8084_v60 = vld [vmem:[%s8879_s23 + $0x88] sm:$0xff]  ;;  %v6983_v1 = vpack.c.bf16 %v969_v59, %v953_v58  ;;  %v1080_v58 = vld [vmem:[%s13207_s1 + $0x1920] sm:$0xff] }
 0x154   : > { %v1096_v59 = vld [vmem:[%s13207_s1 + $0x19a0] sm:$0xff] }
 0x155   : > { %1713 = vmatmul.mubr.f32.gmra.mrb[62].mxu0 %v274_v61 }
 0x156   : > { %2227 = vmatmul.mubr.f32.gmra.mrb[62].mxu1 %v274_v61  ;;  %2297 = vmatprep.mubr.f32.mxu0 %v8076_v4  ;;  %v955_v61 = vld [vmem:[%s13207_s1 + $0x1538] sm:$0xff] }
 0x157   : > { %2811 = vmatprep.mubr.f32.mxu1 %v8076_v4  ;;  %v954_v4 = vld [vmem:[%s13207_s1 + $0x1530] sm:$0xff]  ;;  %v7087_v6 = vpack.c.bf16 %v971_v62, %v955_v61  ;;  %v8093_v61 = vld [vmem:[%s8879_s23 + $0x100] sm:$0xff]  ;;  %v7103_v62 = vpack.c.bf16 %v1099_v54, %v1083_v53 }
 0x158   : > { %v8125_v54 = vld [vmem:[%s8879_s23 + $0x300] sm:$0xff] }
 0x159   : > { %2298 = vmatmul.mubr.f32.vlgmr.msra.gmra.mrb[64].mxu0 %v8077_v13 }
 0x15a   : > { %2812 = vmatmul.mubr.f32.vlgmr.msra.gmra.mrb[64].mxu1 %v8077_v13  ;;  %6966 = vmatpush1.bf16.msra.mxu0 %v6965_v5  ;;  %v8085_v5 = vld [vmem:[%s8879_s23 + $0x80] sm:$0xff]  ;;  %v6985_v13 = vpack.c.bf16 %v968_v3, %v952_v2  ;;  %v8094_v2 = vld [vmem:[%s8879_s23 + $0x128] sm:$0xff]  ;;  %v287_v3 = vld [vmem:[%s13207_s1 + $0x58] sm:$0xff] }
 0x15b   : > { %7070 = vmatpush1.bf16.msra.mxu1 %v7069_v8  ;;  %2303 = vmatprep.mubr.f32.mxu0 %v8078_v20  ;;  %v985_v8 = vld [vmem:[%s13207_s1 + $0x1628] sm:$0xff] }
 0x15c   : > { %2817 = vmatprep.mubr.f32.mxu1 %v8078_v20  ;;  %6968 = vmatprep.subr.bf16.mxu0 %v6967_v9  ;;  %v1001_v9 = vld [vmem:[%s13207_s1 + $0x16a8] sm:$0xff]  ;;  %v7091_v20 = vpack.c.bf16 %v1003_v12, %v987_v11  ;;  %v8097_v11 = vld [vmem:[%s8879_s23 + $0x140] sm:$0xff] }
 0x15d   : > { %2304 = vmatmul.mubr.f32.gmra.mrb[66].mxu0 %v8079_v27  ;;  %7072 = vmatprep.subr.bf16.mxu1 %v7071_v14  ;;  %v7089_v14 = vpack.c.bf16 %v970_v7, %v954_v4  ;;  %v6987_v15 = vpack.c.bf16 %v1001_v9, %v985_v8  ;;  %v303_v4 = vld [vmem:[%s13207_s1 + $0xd8] sm:$0xff]  ;;  %v8095_v8 = vld [vmem:[%s8879_s23 + $0x120] sm:$0xff]  ;;  %v8098_v12 = vld [vmem:[%s8879_s23 + $0x168] sm:$0xff] }
 0x15e   : > { %2818 = vmatmul.mubr.f32.gmra.mrb[66].mxu1 %v8079_v27  ;;  %2309 = vmatprep.mubr.f32.mxu0 %v8080_v32  ;;  %v6989_v27 = vpack.c.bf16 %v1000_v17, %v984_v16  ;;  %v7211_v9 = vpack.c.bf16 %v303_v4, %v287_v3  ;;  %v8102_v16 = vld [vmem:[%s8879_s23 + $0x1a8] sm:$0xff]  ;;  %v8103_v17 = vld [vmem:[%s8879_s23 + $0x1a0] sm:$0xff] }
 0x15f   : > { %2823 = vmatprep.mubr.f32.mxu1 %v8080_v32  ;;  %6970 = vmatpush1.bf16.msra.mxu0 %v6969_v21  ;;  %v1002_v21 = vld [vmem:[%s13207_s1 + $0x16b0] sm:$0xff]  ;;  %v8130_v4 = vld [vmem:[%s8879_s23 + $0x368] sm:$0xff] }
 0x160   : > { %7074 = vmatpush1.bf16.msra.mxu1 %v7073_v22  ;;  %6972 = vmatprep.subr.bf16.mxu0 %v6971_v23  ;;  %v1017_v22 = vld [vmem:[%s13207_s1 + $0x1728] sm:$0xff]  ;;  %v1018_v32 = vld [vmem:[%s13207_s1 + $0x1730] sm:$0xff] }
 0x161   : > { %2310 = vmatmul.mubr.f32.gmra.mrb[68].mxu0 %v8081_v41  ;;  %7076 = vmatprep.subr.bf16.mxu1 %v7075_v28  ;;  %v1033_v23 = vld [vmem:[%s13207_s1 + $0x17a8] sm:$0xff]  ;;  %v7093_v28 = vpack.c.bf16 %v1002_v21, %v986_v18  ;;  %v8107_v21 = vld [vmem:[%s8879_s23 + $0x1e0] sm:$0xff] }
 0x162   : > { %2824 = vmatmul.mubr.f32.gmra.mrb[68].mxu1 %v8081_v41  ;;  %2315 = vmatprep.mubr.f32.mxu0 %v8082_v46  ;;  %v6991_v29 = vpack.c.bf16 %v1033_v23, %v1017_v22  ;;  %v6993_v41 = vpack.c.bf16 %v1032_v31, %v1016_v30  ;;  %v8104_v18 = vld [vmem:[%s8879_s23 + $0x1c8] sm:$0xff]  ;;  %v8109_v23 = vld [vmem:[%s8879_s23 + $0x200] sm:$0xff] }
 0x163   : > { %2829 = vmatprep.mubr.f32.mxu1 %v8082_v46  ;;  %6974 = vmatpush1.bf16.msra.mxu0 %v6973_v35  ;;  %v1034_v35 = vld [vmem:[%s13207_s1 + $0x17b0] sm:$0xff]  ;;  %v8108_v22 = vld [vmem:[%s8879_s23 + $0x208] sm:$0xff]  ;;  %v8117_v31 = vld [vmem:[%s8879_s23 + $0x280] sm:$0xff] }
 0x164   : > { %7078 = vmatpush1.bf16.msra.mxu1 %v7077_v36  ;;  %6976 = vmatprep.subr.bf16.mxu0 %v6975_v37  ;;  %v1049_v36 = vld [vmem:[%s13207_s1 + $0x1828] sm:$0xff]  ;;  %v1050_v46 = vld [vmem:[%s13207_s1 + $0x1830] sm:$0xff] }
 0x165   : > { %2316 = vmatmul.mubr.f32.gmra.mrb[70].mxu0 %v8083_v55  ;;  %7080 = vmatprep.subr.bf16.mxu1 %v7079_v42  ;;  %v1065_v37 = vld [vmem:[%s13207_s1 + $0x18a8] sm:$0xff]  ;;  %v7097_v42 = vpack.c.bf16 %v1034_v35, %v1018_v32 }
 0x166   : > { %2830 = vmatmul.mubr.f32.gmra.mrb[70].mxu1 %v8083_v55  ;;  %2321 = vmatprep.mubr.f32.mxu0 %v8084_v60  ;;  %v6995_v43 = vpack.c.bf16 %v1065_v37, %v1049_v36  ;;  %v6997_v55 = vpack.c.bf16 %v1064_v45, %v1048_v44  ;;  %v8116_v30 = vld [vmem:[%s8879_s23 + $0x288] sm:$0xff]  ;;  %v8119_v36 = vld [vmem:[%s8879_s23 + $0x2a0] sm:$0xff] }
 0x167   : > { %2835 = vmatprep.mubr.f32.mxu1 %v8084_v60  ;;  %6978 = vmatpush1.bf16.msra.mxu0 %v6977_v49  ;;  %v1066_v49 = vld [vmem:[%s13207_s1 + $0x18b0] sm:$0xff]  ;;  %v8118_v32 = vld [vmem:[%s8879_s23 + $0x2a8] sm:$0xff] }
 0x168   : > { %7082 = vmatpush1.bf16.msra.mxu1 %v7081_v50  ;;  %6980 = vmatprep.subr.bf16.mxu0 %v6979_v51  ;;  %v1081_v50 = vld [vmem:[%s13207_s1 + $0x1928] sm:$0xff]  ;;  %v1082_v60 = vld [vmem:[%s13207_s1 + $0x1930] sm:$0xff] }
 0x169   : > { %2322 = vmatmul.mubr.f32.gmra.mrb[72].mxu0 %v8085_v5  ;;  %7084 = vmatprep.subr.bf16.mxu1 %v7083_v56  ;;  %v1097_v51 = vld [vmem:[%s13207_s1 + $0x19a8] sm:$0xff]  ;;  %v7101_v56 = vpack.c.bf16 %v1066_v49, %v1050_v46 }
 0x16a   : > { %2836 = vmatmul.mubr.f32.gmra.mrb[72].mxu1 %v8085_v5  ;;  %2327 = vmatprep.mubr.f32.mxu0 %v8086_v10  ;;  %v6999_v57 = vpack.c.bf16 %v1097_v51, %v1081_v50  ;;  %v7001_v5 = vpack.c.bf16 %v1096_v59, %v1080_v58  ;;  %v8122_v44 = vld [vmem:[%s8879_s23 + $0x2e8] sm:$0xff] }
 0x16b   : > { %2841 = vmatprep.mubr.f32.mxu1 %v8086_v10  ;;  %6982 = vmatpush1.bf16.msra.mxu0 %v6981_v63  ;;  %v1098_v63 = vld [vmem:[%s13207_s1 + $0x19b0] sm:$0xff]  ;;  %v8096_v10 = vld [vmem:[%s8879_s23 + $0x148] sm:$0xff] }
 0x16c   : > { %7086 = vmatpush1.bf16.msra.mxu1 %v7085_v0  ;;  %6984 = vmatprep.subr.bf16.mxu0 %v6983_v1  ;;  %v285_v0 = vld [vmem:[%s13207_s1 + $0x48] sm:$0xff] }
 0x16d   : > { %2328 = vmatmul.mubr.f32.gmra.mrb[74].mxu0 %v8087_v19  ;;  %7088 = vmatprep.subr.bf16.mxu1 %v7087_v6  ;;  %v301_v1 = vld [vmem:[%s13207_s1 + $0xc8] sm:$0xff]  ;;  %v7105_v6 = vpack.c.bf16 %v1098_v63, %v1082_v60  ;;  %v8127_v60 = vld [vmem:[%s8879_s23 + $0x320] sm:$0xff] }
 0x16e   : > { %2842 = vmatmul.mubr.f32.gmra.mrb[74].mxu1 %v8087_v19  ;;  %2333 = vmatprep.mubr.f32.mxu0 %v8088_v24  ;;  %v7107_v7 = vpack.c.bf16 %v301_v1, %v285_v0  ;;  %v8105_v19 = vld [vmem:[%s8879_s23 + $0x1c0] sm:$0xff]  ;;  %v8124_v50 = vld [vmem:[%s8879_s23 + $0x308] sm:$0xff] }
 0x16f   : > { %2847 = vmatprep.mubr.f32.mxu1 %v8088_v24  ;;  %6986 = vmatpush1.bf16.msra.mxu0 %v6985_v13  ;;  %v8099_v13 = vld [vmem:[%s8879_s23 + $0x160] sm:$0xff]  ;;  %v8110_v24 = vld [vmem:[%s8879_s23 + $0x228] sm:$0xff] }
 0x170   : > { %7090 = vmatpush1.bf16.msra.mxu1 %v7089_v14  ;;  %6988 = vmatprep.subr.bf16.mxu0 %v6987_v15  ;;  %v8100_v14 = vld [vmem:[%s8879_s23 + $0x188] sm:$0xff]  ;;  %v8101_v15 = vld [vmem:[%s8879_s23 + $0x180] sm:$0xff] }
 0x171   : > { %2334 = vmatmul.mubr.f32.gmra.mrb[76].mxu0 %v8089_v33  ;;  %7092 = vmatprep.subr.bf16.mxu1 %v7091_v20  ;;  %v8106_v20 = vld [vmem:[%s8879_s23 + $0x1e8] sm:$0xff] }
 0x172   : > { %2848 = vmatmul.mubr.f32.gmra.mrb[76].mxu1 %v8089_v33  ;;  %2339 = vmatprep.mubr.f32.mxu0 %v8090_v38 }
 0x173   : > { %2853 = vmatprep.mubr.f32.mxu1 %v8090_v38  ;;  %6990 = vmatpush1.bf16.msra.mxu0 %v6989_v27  ;;  %v8113_v27 = vld [vmem:[%s8879_s23 + $0x240] sm:$0xff]  ;;  %v8120_v38 = vld [vmem:[%s8879_s23 + $0x2c8] sm:$0xff] }
 0x174   : > { %7094 = vmatpush1.bf16.msra.mxu1 %v7093_v28  ;;  %6992 = vmatprep.subr.bf16.mxu0 %v6991_v29  ;;  %v8114_v28 = vld [vmem:[%s8879_s23 + $0x268] sm:$0xff]  ;;  %v8115_v29 = vld [vmem:[%s8879_s23 + $0x260] sm:$0xff] }
 0x175   : > { %2340 = vmatmul.mubr.f32.gmra.mrb[78].mxu0 %v8091_v47  ;;  %7096 = vmatprep.subr.bf16.mxu1 %v7095_v34 }
 0x176   : > { %2854 = vmatmul.mubr.f32.gmra.mrb[78].mxu1 %v8091_v47  ;;  %2345 = vmatprep.mubr.f32.mxu0 %v8092_v52 }
 0x177   : > { %2859 = vmatprep.mubr.f32.mxu1 %v8092_v52  ;;  %6994 = vmatpush1.bf16.msra.mxu0 %v6993_v41 }
 0x178   : > { %7098 = vmatpush1.bf16.msra.mxu1 %v7097_v42  ;;  %6996 = vmatprep.subr.bf16.mxu0 %v6995_v43  ;;  %v8121_v42 = vld [vmem:[%s8879_s23 + $0x2c0] sm:$0xff] }
 0x179   : > { %2346 = vmatmul.mubr.f32.gmra.mrb[80].mxu0 %v8093_v61  ;;  %7100 = vmatprep.subr.bf16.mxu1 %v7099_v48  ;;  %v8123_v48 = vld [vmem:[%s8879_s23 + $0x2e0] sm:$0xff] }
 0x17a   : > { %2860 = vmatmul.mubr.f32.gmra.mrb[80].mxu1 %v8093_v61  ;;  %2351 = vmatprep.mubr.f32.mxu0 %v8094_v2 }
 0x17b   : > { %2865 = vmatprep.mubr.f32.mxu1 %v8094_v2  ;;  %6998 = vmatpush1.bf16.msra.mxu0 %v6997_v55  ;;  %v8129_v2 = vld [vmem:[%s8879_s23 + $0x340] sm:$0xff] }
 0x17c   : > { %7102 = vmatpush1.bf16.msra.mxu1 %v7101_v56  ;;  %7000 = vmatprep.subr.bf16.mxu0 %v6999_v57  ;;  %v8126_v56 = vld [vmem:[%s8879_s23 + $0x328] sm:$0xff] }
 0x17d   : > { %2352 = vmatmul.mubr.f32.gmra.mrb[82].mxu0 %v8095_v8  ;;  %7104 = vmatprep.subr.bf16.mxu1 %v7103_v62  ;;  %v8128_v62 = vld [vmem:[%s8879_s23 + $0x348] sm:$0xff] }
 0x17e   : > { %2866 = vmatmul.mubr.f32.gmra.mrb[82].mxu1 %v8095_v8  ;;  %2357 = vmatprep.mubr.f32.mxu0 %v8096_v10  ;;  %v8131_v8 = vld [vmem:[%s8879_s23 + $0x360] sm:$0xff] }
 0x17f   : > { %2871 = vmatprep.mubr.f32.mxu1 %v8096_v10  ;;  %7002 = vmatpush1.bf16.msra.mxu0 %v7001_v5  ;;  %v8132_v10 = vld [vmem:[%s8879_s23 + $0x388] sm:$0xff] }
 0x180   : > { %7106 = vmatpush1.bf16.msra.mxu1 %v7105_v6  ;;  %7108 = vmatprep.subr.bf16.mxu0 %v7107_v7 }
 0x181   : > { %2358 = vmatmul.mubr.f32.gmra.mrb[84].mxu0 %v8097_v11  ;;  %7212 = vmatprep.subr.bf16.mxu1 %v7211_v9 }
 0x182   : > { %2872 = vmatmul.mubr.f32.gmra.mrb[84].mxu1 %v8097_v11  ;;  %2363 = vmatprep.mubr.f32.mxu0 %v8098_v12 }
 0x183   : > { %2877 = vmatprep.mubr.f32.mxu1 %v8098_v12 }
 0x185   : > { %2364 = vmatmul.mubr.f32.gmra.mrb[86].mxu0 %v8099_v13 }
 0x186   : > { %2878 = vmatmul.mubr.f32.gmra.mrb[86].mxu1 %v8099_v13  ;;  %2369 = vmatprep.mubr.f32.mxu0 %v8100_v14 }
 0x187   : > { %2883 = vmatprep.mubr.f32.mxu1 %v8100_v14  ;;  %v8133_v14 = vld [vmem:[%s8879_s23 + $0x380] sm:$0xff] }
 0x189   : > { %2370 = vmatmul.mubr.f32.gmra.mrb[88].mxu0 %v8101_v15 }
 0x18a   : > { %2884 = vmatmul.mubr.f32.gmra.mrb[88].mxu1 %v8101_v15  ;;  %2375 = vmatprep.mubr.f32.mxu0 %v8102_v16 }
 0x18b   : > { %2889 = vmatprep.mubr.f32.mxu1 %v8102_v16  ;;  %v8134_v16 = vld [vmem:[%s8879_s23 + $0x3a8] sm:$0xff] }
 0x18d   : > { %2376 = vmatmul.mubr.f32.gmra.mrb[90].mxu0 %v8103_v17 }
 0x18e   : > { %2890 = vmatmul.mubr.f32.gmra.mrb[90].mxu1 %v8103_v17  ;;  %2381 = vmatprep.mubr.f32.mxu0 %v8104_v18 }
 0x18f   : > { %2895 = vmatprep.mubr.f32.mxu1 %v8104_v18 }
 0x191   : > { %2382 = vmatmul.mubr.f32.gmra.mrb[92].mxu0 %v8105_v19 }
 0x192   : > { %2896 = vmatmul.mubr.f32.gmra.mrb[92].mxu1 %v8105_v19  ;;  %2387 = vmatprep.mubr.f32.mxu0 %v8106_v20 }
 0x193   : > { %2901 = vmatprep.mubr.f32.mxu1 %v8106_v20  ;;  %v8135_v20 = vld [vmem:[%s8879_s23 + $0x3a0] sm:$0xff] }
 0x195   : > { %2388 = vmatmul.mubr.f32.gmra.mrb[94].mxu0 %v8107_v21 }
 0x196   : > { %2902 = vmatmul.mubr.f32.gmra.mrb[94].mxu1 %v8107_v21  ;;  %2393 = vmatprep.mubr.f32.mxu0 %v8108_v22 }
 0x197   : > { %2907 = vmatprep.mubr.f32.mxu1 %v8108_v22  ;;  %v8136_v22 = vld [vmem:[%s8879_s23 + $0x3c8] sm:$0xff] }
 0x199   : > { %2394 = vmatmul.mubr.f32.gmra.mrb[96].mxu0 %v8109_v23 }
 0x19a   : > { %2908 = vmatmul.mubr.f32.gmra.mrb[96].mxu1 %v8109_v23  ;;  %2399 = vmatprep.mubr.f32.mxu0 %v8110_v24 }
 0x19b   : > { %2913 = vmatprep.mubr.f32.mxu1 %v8110_v24 }
 0x19d   : > { %2400 = vmatmul.mubr.f32.gmra.mrb[98].mxu0 %v8111_v25 }
 0x19e   : > { %2914 = vmatmul.mubr.f32.gmra.mrb[98].mxu1 %v8111_v25  ;;  %2405 = vmatprep.mubr.f32.mxu0 %v8112_v26 }
 0x19f   : > { %2919 = vmatprep.mubr.f32.mxu1 %v8112_v26  ;;  %v8137_v26 = vld [vmem:[%s8879_s23 + $0x3c0] sm:$0xff] }
 0x1a1   : > { %2406 = vmatmul.mubr.f32.gmra.mrb[100].mxu0 %v8113_v27 }
 0x1a2   : > { %2920 = vmatmul.mubr.f32.gmra.mrb[100].mxu1 %v8113_v27  ;;  %2411 = vmatprep.mubr.f32.mxu0 %v8114_v28 }
 0x1a3   : > { %2925 = vmatprep.mubr.f32.mxu1 %v8114_v28  ;;  %v8138_v28 = vld [vmem:[%s8879_s23 + $0x3e8] sm:$0xff] }
 0x1a5   : > { %2412 = vmatmul.mubr.f32.gmra.mrb[102].mxu0 %v8115_v29 }
 0x1a6   : > { %2926 = vmatmul.mubr.f32.gmra.mrb[102].mxu1 %v8115_v29  ;;  %2417 = vmatprep.mubr.f32.mxu0 %v8116_v30  ;;  %v284_v29 = vld [vmem:[%s13207_s1 + $0x40] sm:$0xff] }
 0x1a7   : > { %2931 = vmatprep.mubr.f32.mxu1 %v8116_v30  ;;  %v300_v30 = vld [vmem:[%s13207_s1 + $0xc0] sm:$0xff] }
 0x1a9   : > { %2418 = vmatmul.mubr.f32.gmra.mrb[104].mxu0 %v8117_v31 }
 0x1aa   : > { %2932 = vmatmul.mubr.f32.gmra.mrb[104].mxu1 %v8117_v31  ;;  %2423 = vmatprep.mubr.f32.mxu0 %v8118_v32 }
 0x1ab   : > { %2937 = vmatprep.mubr.f32.mxu1 %v8118_v32  ;;  %v286_v32 = vld [vmem:[%s13207_s1 + $0x50] sm:$0xff] }
 0x1ac   : > { %v10100_v33 = vpop.f32.mrb[0].mxu0 }
 0x1ad   : > { %v10102_v34 = vpop.f32.mrb[0].mxu1  ;;  %v10104_v35 = vpop.f32.mrb[1].mxu0  ;;  %2424 = vmatmul.mubr.f32.gmra.mrb[106].mxu0 %v8119_v36 }
 0x1ae   : > { %v10107_v37 = vpop.f32.mrb[1].mxu1  ;;  %2938 = vmatmul.mubr.f32.gmra.mrb[106].mxu1 %v8119_v36  ;;  %2429 = vmatprep.mubr.f32.mxu0 %v8120_v38  ;;  %v302_v36 = vld [vmem:[%s13207_s1 + $0xd0] sm:$0xff] }
 0x1af   : > { %2943 = vmatprep.mubr.f32.mxu1 %v8120_v38 }
 0x1b0   : > { %v10110_v39 = vpop.f32.mrb[2].mxu0 }
 0x1b1   : > { %v10112_v40 = vpop.f32.mrb[2].mxu1  ;;  %v10114_v41 = vpop.f32.mrb[3].mxu0  ;;  %2430 = vmatmul.mubr.f32.gmra.mrb[108].mxu0 %v8121_v42 }
 0x1b2   : > { %v10117_v43 = vpop.f32.mrb[3].mxu1  ;;  %2944 = vmatmul.mubr.f32.gmra.mrb[108].mxu1 %v8121_v42  ;;  %2435 = vmatprep.mubr.f32.mxu0 %v8122_v44 }
 0x1b3   : > { %2949 = vmatprep.mubr.f32.mxu1 %v8122_v44  ;;  %v8139_v44 = vld [vmem:[%s8879_s23 + $0x3e0] sm:$0xff] }
 0x1b4   : > { %v10120_v45 = vpop.f32.mrb[4].mxu0 }
 0x1b5   : > { %v10122_v46 = vpop.f32.mrb[4].mxu1  ;;  %v10124_v47 = vpop.f32.mrb[5].mxu0  ;;  %2436 = vmatmul.mubr.f32.gmra.mrb[110].mxu0 %v8123_v48 }
 0x1b6   : > { %v10127_v49 = vpop.f32.mrb[5].mxu1  ;;  %2950 = vmatmul.mubr.f32.gmra.mrb[110].mxu1 %v8123_v48  ;;  %2441 = vmatprep.mubr.f32.mxu0 %v8124_v50  ;;  %v317_v48 = vld [vmem:[%s13207_s1 + $0x148] sm:$0xff] }
 0x1b7   : > { %2955 = vmatprep.mubr.f32.mxu1 %v8124_v50  ;;  %v333_v50 = vld [vmem:[%s13207_s1 + $0x1c8] sm:$0xff] }
 0x1b8   : > { %v10130_v51 = vpop.f32.mrb[6].mxu0 }
 0x1b9   : > { %v10132_v52 = vpop.f32.mrb[6].mxu1  ;;  %v10134_v53 = vpop.f32.mrb[7].mxu0  ;;  %2442 = vmatmul.mubr.f32.gmra.mrb[112].mxu0 %v8125_v54 }
 0x1ba   : > { %v10137_v55 = vpop.f32.mrb[7].mxu1  ;;  %2956 = vmatmul.mubr.f32.gmra.mrb[112].mxu1 %v8125_v54  ;;  %2447 = vmatprep.mubr.f32.mxu0 %v8126_v56 }
 0x1bb   : > { %2961 = vmatprep.mubr.f32.mxu1 %v8126_v56  ;;  %v8140_v56 = vld [vmem:[%s8879_s23 + $0x18] sm:$0xff] }
 0x1bc   : > { %v10140_v57 = vpop.f32.mrb[8].mxu0 }
 0x1bd   : > { %v10142_v58 = vpop.f32.mrb[8].mxu1  ;;  %v10144_v59 = vpop.f32.mrb[9].mxu0  ;;  %2448 = vmatmul.mubr.f32.gmra.mrb[114].mxu0 %v8127_v60 }
 0x1be   : > { %v10147_v61 = vpop.f32.mrb[9].mxu1  ;;  %2962 = vmatmul.mubr.f32.gmra.mrb[114].mxu1 %v8127_v60  ;;  %2453 = vmatprep.mubr.f32.mxu0 %v8128_v62  ;;  %v7109_v60 = vpack.c.bf16 %v300_v30, %v284_v29  ;;  %v334_v30 = vld [vmem:[%s13207_s1 + $0x1d0] sm:$0xff] }
 0x1bf   : > { %2967 = vmatprep.mubr.f32.mxu1 %v8128_v62  ;;  %v319_v62 = vld [vmem:[%s13207_s1 + $0x158] sm:$0xff] }
 0x1c0   : > { %v10150_v63 = vpop.f32.mrb[10].mxu0 }
 0x1c1   : > { %v10152_v0 = vpop.f32.mrb[10].mxu1  ;;  %v10154_v1 = vpop.f32.mrb[11].mxu0  ;;  %2454 = vmatmul.mubr.f32.gmra.mrb[116].mxu0 %v8129_v2 }
 0x1c2   : > { %v10157_v3 = vpop.f32.mrb[11].mxu1  ;;  %2968 = vmatmul.mubr.f32.gmra.mrb[116].mxu1 %v8129_v2  ;;  %2459 = vmatprep.mubr.f32.mxu0 %v8130_v4  ;;  %v335_v2 = vld [vmem:[%s13207_s1 + $0x1d8] sm:$0xff] }
 0x1c3   : > { %2973 = vmatprep.mubr.f32.mxu1 %v8130_v4  ;;  %v7213_v4 = vpack.c.bf16 %v302_v36, %v286_v32  ;;  %v7215_v29 = vpack.c.bf16 %v335_v2, %v319_v62  ;;  %v349_v32 = vld [vmem:[%s13207_s1 + $0x248] sm:$0xff] }
 0x1c4   : > { %v10160_v5 = vpop.f32.mrb[12].mxu0  ;;  %v365_v36 = vld [vmem:[%s13207_s1 + $0x2c8] sm:$0xff] }
 0x1c5   : > { %v10162_v6 = vpop.f32.mrb[12].mxu1  ;;  %v10164_v7 = vpop.f32.mrb[13].mxu0  ;;  %2460 = vmatmul.mubr.f32.gmra.mrb[118].mxu0 %v8131_v8 }
 0x1c6   : > { %v10167_v9 = vpop.f32.mrb[13].mxu1  ;;  %2974 = vmatmul.mubr.f32.gmra.mrb[118].mxu1 %v8131_v8  ;;  %2465 = vmatprep.mubr.f32.mxu0 %v8132_v10 }
 0x1c7   : > { %2979 = vmatprep.mubr.f32.mxu1 %v8132_v10  ;;  %v7111_v10 = vpack.c.bf16 %v333_v50, %v317_v48  ;;  %v351_v48 = vld [vmem:[%s13207_s1 + $0x258] sm:$0xff] }
 0x1c8   : > { %v10170_v11 = vpop.f32.mrb[14].mxu0  ;;  %v367_v50 = vld [vmem:[%s13207_s1 + $0x2d8] sm:$0xff] }
 0x1c9   : > { %v10172_v12 = vpop.f32.mrb[14].mxu1  ;;  %v10174_v13 = vpop.f32.mrb[15].mxu0  ;;  %2466 = vmatmul.mubr.f32.gmra.mrb[120].mxu0 %v8133_v14 }
 0x1ca   : > { %v10177_v15 = vpop.f32.mrb[15].mxu1  ;;  %2980 = vmatmul.mubr.f32.gmra.mrb[120].mxu1 %v8133_v14  ;;  %2471 = vmatprep.mubr.f32.mxu0 %v8134_v16  ;;  %v316_v14 = vld [vmem:[%s13207_s1 + $0x140] sm:$0xff] }
 0x1cb   : > { %2985 = vmatprep.mubr.f32.mxu1 %v8134_v16  ;;  %v332_v16 = vld [vmem:[%s13207_s1 + $0x1c0] sm:$0xff] }
 0x1cc   : > { %v10180_v17 = vpop.f32.mrb[16].mxu0  ;;  %v7113_v62 = vpack.c.bf16 %v332_v16, %v316_v14  ;;  %v350_v14 = vld [vmem:[%s13207_s1 + $0x250] sm:$0xff] }
 0x1cd   : > { %v10182_v18 = vpop.f32.mrb[16].mxu1  ;;  %v10184_v19 = vpop.f32.mrb[17].mxu0  ;;  %2472 = vmatmul.mubr.f32.gmra.mrb[122].mxu0 %v8135_v20 }
 0x1ce   : > { %v10187_v21 = vpop.f32.mrb[17].mxu1  ;;  %2986 = vmatmul.mubr.f32.gmra.mrb[122].mxu1 %v8135_v20  ;;  %2477 = vmatprep.mubr.f32.mxu0 %v8136_v22  ;;  %v318_v20 = vld [vmem:[%s13207_s1 + $0x150] sm:$0xff] }
 0x1cf   : > { %2991 = vmatprep.mubr.f32.mxu1 %v8136_v22 }
 0x1d0   : > { %v10190_v23 = vpop.f32.mrb[18].mxu0 }
 0x1d1   : > { %v10192_v24 = vpop.f32.mrb[18].mxu1  ;;  %v10194_v25 = vpop.f32.mrb[19].mxu0  ;;  %2478 = vmatmul.mubr.f32.gmra.mrb[124].mxu0 %v8137_v26 }
 0x1d2   : > { %v10197_v27 = vpop.f32.mrb[19].mxu1  ;;  %2992 = vmatmul.mubr.f32.gmra.mrb[124].mxu1 %v8137_v26  ;;  %2483 = vmatprep.mubr.f32.mxu0 %v8138_v28 }
 0x1d3   : > { %2997 = vmatprep.mubr.f32.mxu1 %v8138_v28  ;;  %v8141_v28 = vld [vmem:[%s8879_s23 + $0x10] sm:$0xff] }
 0x1d4   : > { %v10206_v31 = vpop.f32.mrb[20].mxu0 }
 0x1d5   : > { %v10214_v38 = vpop.f32.mrb[20].mxu1  ;;  %v10216_v42 = vpop.f32.mrb[21].mxu0  ;;  %2484 = vmatmul.mubr.f32.gmra.mrb[126].mxu0 %v8139_v44 }
 0x1d6   : > { %13212 = vst [vmem:[#allocation5_spill] sm:$0xff] %v10216_v42  ;;  %v10225_v54 = vpop.f32.mrb[21].mxu1  ;;  %2998 = vmatmul.mubr.f32.gmra.mrb[126].mxu1 %v8139_v44  ;;  %6490 = vmatprep.mubr.msk.f32.mxu0 %vm1108_vm0, %v8140_v56 }
 0x1d7   : > { %13213 = vst [vmem:[#allocation6_spill] sm:$0xff] %v10225_v54  ;;  %6522 = vmatprep.mubr.msk.f32.mxu1 %vm1108_vm0, %v8140_v56  ;;  %v8142_v56 = vld [vmem:[%s8879_s23 + $0x38] sm:$0xff] }
 0x1d8   : > { %v10236_v8 = vpop.f32.mrb[22].mxu0 }
 0x1d9   : > { %13214 = vst [vmem:[#allocation7_spill] sm:$0xff] %v10236_v8  ;;  %v10247_v22 = vpop.f32.mrb[22].mxu1  ;;  %v10249_v26 = vpop.f32.mrb[23].mxu0  ;;  %2555 = vmatmul.mubr.f32.vlgmr.msra.gmra.mrb[64].mxu0 %v8141_v28  ;;  %v8171_v8 = vld [vmem:[%s8879_s23 + $0x1f0] sm:$0xff] }
 0x1da   : > { %13215 = vst [vmem:[#allocation8_spill] sm:$0xff] %v10247_v22  ;;  %13216 = vst [vmem:[#allocation9_spill] sm:$0xff] %v10249_v26  ;;  %v10261_v44 = vpop.f32.mrb[23].mxu1  ;;  %3069 = vmatmul.mubr.f32.vlgmr.msra.gmra.mrb[64].mxu1 %v8141_v28  ;;  %7110 = vmatpush1.bf16.msra.mxu0 %v7109_v60  ;;  %v7217_v60 = vpack.c.bf16 %v334_v30, %v318_v20  ;;  %v7115_v28 = vpack.c.bf16 %v365_v36, %v349_v32  ;;  %v366_v30 = vld [vmem:[%s13207_s1 + $0x2d0] sm:$0xff]  ;;  %v381_v32 = vld [vmem:[%s13207_s1 + $0x348] sm:$0xff] }
 0x1db   : > { %13217 = vst [vmem:[#allocation10_spill] sm:$0xff] %v10261_v44  ;;  %7214 = vmatpush1.bf16.msra.mxu1 %v7213_v4  ;;  %6491 = vmatprep.mubr.msk.f32.mxu0 %vm1108_vm0, %v8142_v56  ;;  %v348_v44 = vld [vmem:[%s13207_s1 + $0x240] sm:$0xff]  ;;  %v7219_v20 = vpack.c.bf16 %v367_v50, %v351_v48  ;;  %v397_v36 = vld [vmem:[%s13207_s1 + $0x3c8] sm:$0xff]  ;;  %v399_v48 = vld [vmem:[%s13207_s1 + $0x3d8] sm:$0xff] }
 0x1dc   : > { %v10271_v2 = vpop.f32.mrb[24].mxu0  ;;  %6523 = vmatprep.mubr.msk.f32.mxu1 %vm1108_vm0, %v8142_v56  ;;  %7112 = vmatprep.subr.bf16.mxu0 %v7111_v10  ;;  %v364_v4 = vld [vmem:[%s13207_s1 + $0x2c0] sm:$0xff]  ;;  %v8143_v10 = vld [vmem:[%s8879_s23 + $0x30] sm:$0xff] }
 0x1dd   : > { %13218 = vst [vmem:[#allocation11_spill] sm:$0xff] %v10271_v2  ;;  %v10283_v16 = vpop.f32.mrb[24].mxu1  ;;  %v10285_v2 = vpop.f32.mrb[25].mxu0  ;;  %2561 = vmatmul.mubr.f32.gmra.mrb[66].mxu0 %v8143_v10  ;;  %7216 = vmatprep.subr.bf16.mxu1 %v7215_v29  ;;  %v383_v29 = vld [vmem:[%s13207_s1 + $0x358] sm:$0xff]  ;;  %v7117_v50 = vpack.c.bf16 %v364_v4, %v348_v44  ;;  %v380_v26 = vld [vmem:[%s13207_s1 + $0x340] sm:$0xff]  ;;  %v398_v4 = vld [vmem:[%s13207_s1 + $0x3d0] sm:$0xff] }
 0x1de   : > { %13219 = vst [vmem:[#allocation12_spill] sm:$0xff] %v10283_v16  ;;  %13220 = vst [vmem:[#allocation13_spill] sm:$0xff] %v10285_v2  ;;  %v10297_v56 = vpop.f32.mrb[25].mxu1  ;;  %3075 = vmatmul.mubr.f32.gmra.mrb[66].mxu1 %v8143_v10  ;;  %v8144_v2 = vld [vmem:[%s8879_s23 + $0x58] sm:$0xff]  ;;  %7114 = vmatpush1.bf16.msra.mxu0 %v7113_v62  ;;  %v7221_v10 = vpack.c.bf16 %v366_v30, %v350_v14  ;;  %v396_v22 = vld [vmem:[%s13207_s1 + $0x3c0] sm:$0xff] }
 0x1df   : > { %13221 = vst [vmem:[#allocation14_spill] sm:$0xff] %v10297_v56  ;;  %6492 = vmatprep.mubr.msk.f32.mxu0 %vm1108_vm0, %v8144_v2  ;;  %6524 = vmatprep.mubr.msk.f32.mxu1 %vm1108_vm0, %v8144_v2  ;;  %v7119_v56 = vpack.c.bf16 %v397_v36, %v381_v32  ;;  %v382_v62 = vld [vmem:[%s13207_s1 + $0x350] sm:$0xff]  ;;  %v413_v14 = vld [vmem:[%s13207_s1 + $0x448] sm:$0xff]  ;;  %v8146_v36 = vld [vmem:[%s8879_s23 + $0x78] sm:$0xff] }
 0x1e0   : > { %v10308_v16 = vpop.f32.mrb[26].mxu0  ;;  %7218 = vmatpush1.bf16.msra.mxu1 %v7217_v60  ;;  %7116 = vmatprep.subr.bf16.mxu0 %v7115_v28  ;;  %v8145_v60 = vld [vmem:[%s8879_s23 + $0x50] sm:$0xff]  ;;  %v7223_v28 = vpack.c.bf16 %v399_v48, %v383_v29  ;;  %v429_v30 = vld [vmem:[%s13207_s1 + $0x4c8] sm:$0xff]  ;;  %v431_v29 = vld [vmem:[%s13207_s1 + $0x4d8] sm:$0xff]  ;;  %v7121_v48 = vpack.c.bf16 %v396_v22, %v380_v26 }
 0x1e1   : > { %13222 = vst [vmem:[#allocation15_spill] sm:$0xff] %v10308_v16  ;;  %v10319_v44 = vpop.f32.mrb[26].mxu1  ;;  %v10321_v2 = vpop.f32.mrb[27].mxu0  ;;  %2567 = vmatmul.mubr.f32.gmra.mrb[68].mxu0 %v8145_v60  ;;  %7220 = vmatprep.subr.bf16.mxu1 %v7219_v20  ;;  %v415_v20 = vld [vmem:[%s13207_s1 + $0x458] sm:$0xff]  ;;  %v428_v16 = vld [vmem:[%s13207_s1 + $0x4c0] sm:$0xff] }
 0x1e2   : > { %13223 = vst [vmem:[#allocation16_spill] sm:$0xff] %v10319_v44  ;;  %13224 = vst [vmem:[#allocation17_spill] sm:$0xff] %v10321_v2  ;;  %v10333_v32 = vpop.f32.mrb[27].mxu1  ;;  %3081 = vmatmul.mubr.f32.gmra.mrb[68].mxu1 %v8145_v60  ;;  %6493 = vmatprep.mubr.msk.f32.mxu0 %vm1108_vm0, %v8146_v36  ;;  %v7225_v60 = vpack.c.bf16 %v398_v4, %v382_v62  ;;  %v412_v44 = vld [vmem:[%s13207_s1 + $0x440] sm:$0xff]  ;;  %v430_v62 = vld [vmem:[%s13207_s1 + $0x4d0] sm:$0xff] }
 0x1e3   : > { %13225 = vst [vmem:[#allocation18_spill] sm:$0xff] %v10333_v32  ;;  %6525 = vmatprep.mubr.msk.f32.mxu1 %vm1108_vm0, %v8146_v36  ;;  %7118 = vmatpush1.bf16.msra.mxu0 %v7117_v50  ;;  %v7123_v32 = vpack.c.bf16 %v429_v30, %v413_v14  ;;  %v414_v50 = vld [vmem:[%s13207_s1 + $0x450] sm:$0xff]  ;;  %v445_v4 = vld [vmem:[%s13207_s1 + $0x548] sm:$0xff]  ;;  %v8148_v36 = vld [vmem:[%s8879_s23 + $0x98] sm:$0xff] }
 0x1e4   : > { %v10344_v2 = vpop.f32.mrb[28].mxu0  ;;  %7222 = vmatpush1.bf16.msra.mxu1 %v7221_v10  ;;  %7120 = vmatprep.subr.bf16.mxu0 %v7119_v56  ;;  %v8147_v56 = vld [vmem:[%s8879_s23 + $0x70] sm:$0xff]  ;;  %v7227_v10 = vpack.c.bf16 %v431_v29, %v415_v20  ;;  %v461_v14 = vld [vmem:[%s13207_s1 + $0x5c8] sm:$0xff]  ;;  %v463_v20 = vld [vmem:[%s13207_s1 + $0x5d8] sm:$0xff]  ;;  %v7125_v29 = vpack.c.bf16 %v428_v16, %v412_v44 }
 0x1e5   : > { %13226 = vst [vmem:[#allocation19_spill] sm:$0xff] %v10344_v2  ;;  %v10355_v22 = vpop.f32.mrb[28].mxu1  ;;  %v10357_v26 = vpop.f32.mrb[29].mxu0  ;;  %2573 = vmatmul.mubr.f32.gmra.mrb[70].mxu0 %v8147_v56  ;;  %7224 = vmatprep.subr.bf16.mxu1 %v7223_v28  ;;  %v447_v28 = vld [vmem:[%s13207_s1 + $0x558] sm:$0xff]  ;;  %v460_v2 = vld [vmem:[%s13207_s1 + $0x5c0] sm:$0xff] }
 0x1e6   : > { %13227 = vst [vmem:[#allocation20_spill] sm:$0xff] %v10355_v22  ;;  %13228 = vst [vmem:[#allocation21_spill] sm:$0xff] %v10357_v26  ;;  %v10369_v30 = vpop.f32.mrb[29].mxu1  ;;  %3087 = vmatmul.mubr.f32.gmra.mrb[70].mxu1 %v8147_v56  ;;  %6494 = vmatprep.mubr.msk.f32.mxu0 %vm1108_vm0, %v8148_v36  ;;  %v7229_v56 = vpack.c.bf16 %v430_v62, %v414_v50  ;;  %v444_v22 = vld [vmem:[%s13207_s1 + $0x540] sm:$0xff]  ;;  %v462_v50 = vld [vmem:[%s13207_s1 + $0x5d0] sm:$0xff] }
 0x1e7   : > { %13229 = vst [vmem:[#allocation22_spill] sm:$0xff] %v10369_v30  ;;  %6526 = vmatprep.mubr.msk.f32.mxu1 %vm1108_vm0, %v8148_v36  ;;  %7122 = vmatpush1.bf16.msra.mxu0 %v7121_v48  ;;  %v7127_v30 = vpack.c.bf16 %v461_v14, %v445_v4  ;;  %v446_v48 = vld [vmem:[%s13207_s1 + $0x550] sm:$0xff]  ;;  %v477_v62 = vld [vmem:[%s13207_s1 + $0x648] sm:$0xff]  ;;  %v8150_v36 = vld [vmem:[%s8879_s23 + $0xb8] sm:$0xff] }
 0x1e8   : > { %v10380_v26 = vpop.f32.mrb[30].mxu0  ;;  %7226 = vmatpush1.bf16.msra.mxu1 %v7225_v60  ;;  %7124 = vmatprep.subr.bf16.mxu0 %v7123_v32  ;;  %v8149_v32 = vld [vmem:[%s8879_s23 + $0x90] sm:$0xff]  ;;  %v7231_v60 = vpack.c.bf16 %v463_v20, %v447_v28  ;;  %v493_v4 = vld [vmem:[%s13207_s1 + $0x6c8] sm:$0xff]  ;;  %v495_v28 = vld [vmem:[%s13207_s1 + $0x6d8] sm:$0xff]  ;;  %v7129_v20 = vpack.c.bf16 %v460_v2, %v444_v22 }
 0x1e9   : > { %13230 = vst [vmem:[#allocation23_spill] sm:$0xff] %v10380_v26  ;;  %v10391_v16 = vpop.f32.mrb[30].mxu1  ;;  %v10393_v44 = vpop.f32.mrb[31].mxu0  ;;  %2579 = vmatmul.mubr.f32.gmra.mrb[72].mxu0 %v8149_v32  ;;  %7228 = vmatprep.subr.bf16.mxu1 %v7227_v10  ;;  %v479_v10 = vld [vmem:[%s13207_s1 + $0x658] sm:$0xff]  ;;  %v492_v26 = vld [vmem:[%s13207_s1 + $0x6c0] sm:$0xff] }
 0x1ea   : > { %13231 = vst [vmem:[#allocation24_spill] sm:$0xff] %v10391_v16  ;;  %13232 = vst [vmem:[#allocation25_spill] sm:$0xff] %v10393_v44  ;;  %v10405_v14 = vpop.f32.mrb[31].mxu1  ;;  %3093 = vmatmul.mubr.f32.gmra.mrb[72].mxu1 %v8149_v32  ;;  %6495 = vmatprep.mubr.msk.f32.mxu0 %vm1108_vm0, %v8150_v36  ;;  %v7233_v32 = vpack.c.bf16 %v462_v50, %v446_v48  ;;  %v476_v16 = vld [vmem:[%s13207_s1 + $0x640] sm:$0xff]  ;;  %v494_v48 = vld [vmem:[%s13207_s1 + $0x6d0] sm:$0xff] }
 0x1eb   : > { %13233 = vst [vmem:[#allocation26_spill] sm:$0xff] %v10405_v14  ;;  %6527 = vmatprep.mubr.msk.f32.mxu1 %vm1108_vm0, %v8150_v36  ;;  %7126 = vmatpush1.bf16.msra.mxu0 %v7125_v29  ;;  %v7131_v14 = vpack.c.bf16 %v493_v4, %v477_v62  ;;  %v478_v29 = vld [vmem:[%s13207_s1 + $0x650] sm:$0xff]  ;;  %v509_v50 = vld [vmem:[%s13207_s1 + $0x748] sm:$0xff]  ;;  %v8152_v36 = vld [vmem:[%s8879_s23 + $0xd8] sm:$0xff] }
 0x1ec   : > { %v10416_v44 = vpop.f32.mrb[32].mxu0  ;;  %7230 = vmatpush1.bf16.msra.mxu1 %v7229_v56  ;;  %7128 = vmatprep.subr.bf16.mxu0 %v7127_v30  ;;  %v8151_v30 = vld [vmem:[%s8879_s23 + $0xb0] sm:$0xff]  ;;  %v7235_v56 = vpack.c.bf16 %v495_v28, %v479_v10  ;;  %v525_v62 = vld [vmem:[%s13207_s1 + $0x7c8] sm:$0xff]  ;;  %v527_v10 = vld [vmem:[%s13207_s1 + $0x7d8] sm:$0xff]  ;;  %v7133_v28 = vpack.c.bf16 %v492_v26, %v476_v16 }
 0x1ed   : > { %13234 = vst [vmem:[#allocation27_spill] sm:$0xff] %v10416_v44  ;;  %v10427_v2 = vpop.f32.mrb[32].mxu1  ;;  %v10429_v22 = vpop.f32.mrb[33].mxu0  ;;  %2585 = vmatmul.mubr.f32.gmra.mrb[74].mxu0 %v8151_v30  ;;  %7232 = vmatprep.subr.bf16.mxu1 %v7231_v60  ;;  %v511_v60 = vld [vmem:[%s13207_s1 + $0x758] sm:$0xff]  ;;  %v524_v44 = vld [vmem:[%s13207_s1 + $0x7c0] sm:$0xff] }
 0x1ee   : > { %13235 = vst [vmem:[#allocation28_spill] sm:$0xff] %v10427_v2  ;;  %13236 = vst [vmem:[#allocation29_spill] sm:$0xff] %v10429_v22  ;;  %v10441_v4 = vpop.f32.mrb[33].mxu1  ;;  %3099 = vmatmul.mubr.f32.gmra.mrb[74].mxu1 %v8151_v30  ;;  %6496 = vmatprep.mubr.msk.f32.mxu0 %vm1108_vm0, %v8152_v36  ;;  %v7237_v30 = vpack.c.bf16 %v494_v48, %v478_v29  ;;  %v508_v2 = vld [vmem:[%s13207_s1 + $0x740] sm:$0xff]  ;;  %v526_v29 = vld [vmem:[%s13207_s1 + $0x7d0] sm:$0xff] }
 0x1ef   : > { %13237 = vst [vmem:[#allocation30_spill] sm:$0xff] %v10441_v4  ;;  %6528 = vmatprep.mubr.msk.f32.mxu1 %vm1108_vm0, %v8152_v36  ;;  %7130 = vmatpush1.bf16.msra.mxu0 %v7129_v20  ;;  %v7135_v4 = vpack.c.bf16 %v525_v62, %v509_v50  ;;  %v510_v20 = vld [vmem:[%s13207_s1 + $0x750] sm:$0xff]  ;;  %v541_v48 = vld [vmem:[%s13207_s1 + $0x848] sm:$0xff]  ;;  %v8154_v36 = vld [vmem:[%s8879_s23 + $0xf8] sm:$0xff] }
 0x1f0   : > { %v10452_v22 = vpop.f32.mrb[34].mxu0  ;;  %7234 = vmatpush1.bf16.msra.mxu1 %v7233_v32  ;;  %7132 = vmatprep.subr.bf16.mxu0 %v7131_v14  ;;  %v8153_v14 = vld [vmem:[%s8879_s23 + $0xd0] sm:$0xff]  ;;  %v7239_v32 = vpack.c.bf16 %v527_v10, %v511_v60  ;;  %v557_v50 = vld [vmem:[%s13207_s1 + $0x8c8] sm:$0xff]  ;;  %v559_v60 = vld [vmem:[%s13207_s1 + $0x8d8] sm:$0xff]  ;;  %v7137_v10 = vpack.c.bf16 %v524_v44, %v508_v2 }
 0x1f1   : > { %13238 = vst [vmem:[#allocation31_spill] sm:$0xff] %v10452_v22  ;;  %v10463_v26 = vpop.f32.mrb[34].mxu1  ;;  %v10465_v16 = vpop.f32.mrb[35].mxu0  ;;  %2591 = vmatmul.mubr.f32.gmra.mrb[76].mxu0 %v8153_v14  ;;  %7236 = vmatprep.subr.bf16.mxu1 %v7235_v56  ;;  %v543_v56 = vld [vmem:[%s13207_s1 + $0x858] sm:$0xff]  ;;  %v556_v22 = vld [vmem:[%s13207_s1 + $0x8c0] sm:$0xff] }
 0x1f2   : > { %13239 = vst [vmem:[#allocation32_spill] sm:$0xff] %v10463_v26  ;;  %13240 = vst [vmem:[#allocation33_spill] sm:$0xff] %v10465_v16  ;;  %v10477_v62 = vpop.f32.mrb[35].mxu1  ;;  %3105 = vmatmul.mubr.f32.gmra.mrb[76].mxu1 %v8153_v14  ;;  %6497 = vmatprep.mubr.msk.f32.mxu0 %vm1108_vm0, %v8154_v36  ;;  %v7241_v14 = vpack.c.bf16 %v526_v29, %v510_v20  ;;  %v540_v26 = vld [vmem:[%s13207_s1 + $0x840] sm:$0xff]  ;;  %v558_v20 = vld [vmem:[%s13207_s1 + $0x8d0] sm:$0xff] }
 0x1f3   : > { %13241 = vst [vmem:[#allocation34_spill] sm:$0xff] %v10477_v62  ;;  %6529 = vmatprep.mubr.msk.f32.mxu1 %vm1108_vm0, %v8154_v36  ;;  %7134 = vmatpush1.bf16.msra.mxu0 %v7133_v28  ;;  %v7139_v62 = vpack.c.bf16 %v557_v50, %v541_v48  ;;  %v542_v28 = vld [vmem:[%s13207_s1 + $0x850] sm:$0xff]  ;;  %v573_v29 = vld [vmem:[%s13207_s1 + $0x948] sm:$0xff]  ;;  %v8156_v36 = vld [vmem:[%s8879_s23 + $0x118] sm:$0xff] }
 0x1f4   : > { %v10488_v16 = vpop.f32.mrb[36].mxu0  ;;  %7238 = vmatpush1.bf16.msra.mxu1 %v7237_v30  ;;  %7136 = vmatprep.subr.bf16.mxu0 %v7135_v4  ;;  %v8155_v4 = vld [vmem:[%s8879_s23 + $0xf0] sm:$0xff]  ;;  %v7243_v30 = vpack.c.bf16 %v559_v60, %v543_v56  ;;  %v589_v48 = vld [vmem:[%s13207_s1 + $0x9c8] sm:$0xff]  ;;  %v591_v56 = vld [vmem:[%s13207_s1 + $0x9d8] sm:$0xff]  ;;  %v7141_v60 = vpack.c.bf16 %v556_v22, %v540_v26 }
 0x1f5   : > { %13242 = vst [vmem:[#allocation35_spill] sm:$0xff] %v10488_v16  ;;  %v10499_v44 = vpop.f32.mrb[36].mxu1  ;;  %v10501_v2 = vpop.f32.mrb[37].mxu0  ;;  %2597 = vmatmul.mubr.f32.gmra.mrb[78].mxu0 %v8155_v4  ;;  %7240 = vmatprep.subr.bf16.mxu1 %v7239_v32  ;;  %v575_v32 = vld [vmem:[%s13207_s1 + $0x958] sm:$0xff]  ;;  %v588_v16 = vld [vmem:[%s13207_s1 + $0x9c0] sm:$0xff] }
 0x1f6   : > { %13243 = vst [vmem:[#allocation36_spill] sm:$0xff] %v10499_v44  ;;  %13244 = vst [vmem:[#allocation37_spill] sm:$0xff] %v10501_v2  ;;  %v10513_v50 = vpop.f32.mrb[37].mxu1  ;;  %3111 = vmatmul.mubr.f32.gmra.mrb[78].mxu1 %v8155_v4  ;;  %6498 = vmatprep.mubr.msk.f32.mxu0 %vm1108_vm0, %v8156_v36  ;;  %v7245_v4 = vpack.c.bf16 %v558_v20, %v542_v28  ;;  %v572_v44 = vld [vmem:[%s13207_s1 + $0x940] sm:$0xff]  ;;  %v590_v28 = vld [vmem:[%s13207_s1 + $0x9d0] sm:$0xff] }
 0x1f7   : > { %13245 = vst [vmem:[#allocation38_spill] sm:$0xff] %v10513_v50  ;;  %6530 = vmatprep.mubr.msk.f32.mxu1 %vm1108_vm0, %v8156_v36  ;;  %7138 = vmatpush1.bf16.msra.mxu0 %v7137_v10  ;;  %v7143_v50 = vpack.c.bf16 %v589_v48, %v573_v29  ;;  %v574_v10 = vld [vmem:[%s13207_s1 + $0x950] sm:$0xff]  ;;  %v605_v20 = vld [vmem:[%s13207_s1 + $0xa48] sm:$0xff]  ;;  %v8158_v36 = vld [vmem:[%s8879_s23 + $0x138] sm:$0xff] }
 0x1f8   : > { %v10524_v2 = vpop.f32.mrb[38].mxu0  ;;  %7242 = vmatpush1.bf16.msra.mxu1 %v7241_v14  ;;  %7140 = vmatprep.subr.bf16.mxu0 %v7139_v62  ;;  %v8157_v62 = vld [vmem:[%s8879_s23 + $0x110] sm:$0xff]  ;;  %v7247_v14 = vpack.c.bf16 %v591_v56, %v575_v32  ;;  %v621_v29 = vld [vmem:[%s13207_s1 + $0xac8] sm:$0xff]  ;;  %v623_v32 = vld [vmem:[%s13207_s1 + $0xad8] sm:$0xff]  ;;  %v7145_v56 = vpack.c.bf16 %v588_v16, %v572_v44 }
 0x1f9   : > { %13246 = vst [vmem:[#allocation39_spill] sm:$0xff] %v10524_v2  ;;  %v10535_v22 = vpop.f32.mrb[38].mxu1  ;;  %v10537_v26 = vpop.f32.mrb[39].mxu0  ;;  %2603 = vmatmul.mubr.f32.gmra.mrb[80].mxu0 %v8157_v62  ;;  %7244 = vmatprep.subr.bf16.mxu1 %v7243_v30  ;;  %v607_v30 = vld [vmem:[%s13207_s1 + $0xa58] sm:$0xff]  ;;  %v620_v2 = vld [vmem:[%s13207_s1 + $0xac0] sm:$0xff] }
 0x1fa   : > { %13247 = vst [vmem:[#allocation40_spill] sm:$0xff] %v10535_v22  ;;  %13248 = vst [vmem:[#allocation41_spill] sm:$0xff] %v10537_v26  ;;  %v10549_v48 = vpop.f32.mrb[39].mxu1  ;;  %3117 = vmatmul.mubr.f32.gmra.mrb[80].mxu1 %v8157_v62  ;;  %6499 = vmatprep.mubr.msk.f32.mxu0 %vm1108_vm0, %v8158_v36  ;;  %v7249_v62 = vpack.c.bf16 %v590_v28, %v574_v10  ;;  %v604_v22 = vld [vmem:[%s13207_s1 + $0xa40] sm:$0xff]  ;;  %v622_v10 = vld [vmem:[%s13207_s1 + $0xad0] sm:$0xff] }
 0x1fb   : > { %13249 = vst [vmem:[#allocation42_spill] sm:$0xff] %v10549_v48  ;;  %6531 = vmatprep.mubr.msk.f32.mxu1 %vm1108_vm0, %v8158_v36  ;;  %7142 = vmatpush1.bf16.msra.mxu0 %v7141_v60  ;;  %v7147_v48 = vpack.c.bf16 %v621_v29, %v605_v20  ;;  %v606_v60 = vld [vmem:[%s13207_s1 + $0xa50] sm:$0xff]  ;;  %v637_v28 = vld [vmem:[%s13207_s1 + $0xb48] sm:$0xff]  ;;  %v8160_v36 = vld [vmem:[%s8879_s23 + $0x158] sm:$0xff] }
 0x1fc   : > { %v10560_v26 = vpop.f32.mrb[40].mxu0  ;;  %7246 = vmatpush1.bf16.msra.mxu1 %v7245_v4  ;;  %7144 = vmatprep.subr.bf16.mxu0 %v7143_v50  ;;  %v8159_v50 = vld [vmem:[%s8879_s23 + $0x130] sm:$0xff]  ;;  %v7251_v4 = vpack.c.bf16 %v623_v32, %v607_v30  ;;  %v653_v20 = vld [vmem:[%s13207_s1 + $0xbc8] sm:$0xff]  ;;  %v655_v30 = vld [vmem:[%s13207_s1 + $0xbd8] sm:$0xff]  ;;  %v7149_v32 = vpack.c.bf16 %v620_v2, %v604_v22 }
 0x1fd   : > { %13250 = vst [vmem:[#allocation43_spill] sm:$0xff] %v10560_v26  ;;  %v10571_v16 = vpop.f32.mrb[40].mxu1  ;;  %v10573_v44 = vpop.f32.mrb[41].mxu0  ;;  %2609 = vmatmul.mubr.f32.gmra.mrb[82].mxu0 %v8159_v50  ;;  %7248 = vmatprep.subr.bf16.mxu1 %v7247_v14  ;;  %v639_v14 = vld [vmem:[%s13207_s1 + $0xb58] sm:$0xff]  ;;  %v652_v26 = vld [vmem:[%s13207_s1 + $0xbc0] sm:$0xff] }
 0x1fe   : > { %13251 = vst [vmem:[#allocation44_spill] sm:$0xff] %v10571_v16  ;;  %13252 = vst [vmem:[#allocation45_spill] sm:$0xff] %v10573_v44  ;;  %v10585_v29 = vpop.f32.mrb[41].mxu1  ;;  %3123 = vmatmul.mubr.f32.gmra.mrb[82].mxu1 %v8159_v50  ;;  %6500 = vmatprep.mubr.msk.f32.mxu0 %vm1108_vm0, %v8160_v36  ;;  %v7253_v50 = vpack.c.bf16 %v622_v10, %v606_v60  ;;  %v636_v16 = vld [vmem:[%s13207_s1 + $0xb40] sm:$0xff]  ;;  %v654_v60 = vld [vmem:[%s13207_s1 + $0xbd0] sm:$0xff] }
 0x1ff   : > { %13253 = vst [vmem:[#allocation46_spill] sm:$0xff] %v10585_v29  ;;  %6532 = vmatprep.mubr.msk.f32.mxu1 %vm1108_vm0, %v8160_v36  ;;  %7146 = vmatpush1.bf16.msra.mxu0 %v7145_v56  ;;  %v7151_v29 = vpack.c.bf16 %v653_v20, %v637_v28  ;;  %v638_v56 = vld [vmem:[%s13207_s1 + $0xb50] sm:$0xff]  ;;  %v669_v10 = vld [vmem:[%s13207_s1 + $0xc48] sm:$0xff]  ;;  %v8162_v36 = vld [vmem:[%s8879_s23 + $0x178] sm:$0xff] }
 0x200   : > { %v10596_v44 = vpop.f32.mrb[42].mxu0  ;;  %7250 = vmatpush1.bf16.msra.mxu1 %v7249_v62  ;;  %7148 = vmatprep.subr.bf16.mxu0 %v7147_v48  ;;  %v8161_v48 = vld [vmem:[%s8879_s23 + $0x150] sm:$0xff]  ;;  %v7255_v62 = vpack.c.bf16 %v655_v30, %v639_v14  ;;  %v685_v28 = vld [vmem:[%s13207_s1 + $0xcc8] sm:$0xff]  ;;  %v687_v14 = vld [vmem:[%s13207_s1 + $0xcd8] sm:$0xff]  ;;  %v7153_v30 = vpack.c.bf16 %v652_v26, %v636_v16 }
 0x201   : > { %13254 = vst [vmem:[#allocation47_spill] sm:$0xff] %v10596_v44  ;;  %v10607_v2 = vpop.f32.mrb[42].mxu1  ;;  %v10609_v22 = vpop.f32.mrb[43].mxu0  ;;  %2615 = vmatmul.mubr.f32.gmra.mrb[84].mxu0 %v8161_v48  ;;  %7252 = vmatprep.subr.bf16.mxu1 %v7251_v4  ;;  %v671_v4 = vld [vmem:[%s13207_s1 + $0xc58] sm:$0xff]  ;;  %v684_v44 = vld [vmem:[%s13207_s1 + $0xcc0] sm:$0xff] }
 0x202   : > { %13255 = vst [vmem:[#allocation48_spill] sm:$0xff] %v10607_v2  ;;  %13256 = vst [vmem:[#allocation49_spill] sm:$0xff] %v10609_v22  ;;  %v10621_v20 = vpop.f32.mrb[43].mxu1  ;;  %3129 = vmatmul.mubr.f32.gmra.mrb[84].mxu1 %v8161_v48  ;;  %6501 = vmatprep.mubr.msk.f32.mxu0 %vm1108_vm0, %v8162_v36  ;;  %v7257_v48 = vpack.c.bf16 %v654_v60, %v638_v56  ;;  %v668_v2 = vld [vmem:[%s13207_s1 + $0xc40] sm:$0xff]  ;;  %v686_v56 = vld [vmem:[%s13207_s1 + $0xcd0] sm:$0xff] }
 0x203   : > { %13257 = vst [vmem:[#allocation50_spill] sm:$0xff] %v10621_v20  ;;  %6533 = vmatprep.mubr.msk.f32.mxu1 %vm1108_vm0, %v8162_v36  ;;  %7150 = vmatpush1.bf16.msra.mxu0 %v7149_v32  ;;  %v7155_v20 = vpack.c.bf16 %v685_v28, %v669_v10  ;;  %v670_v32 = vld [vmem:[%s13207_s1 + $0xc50] sm:$0xff]  ;;  %v701_v60 = vld [vmem:[%s13207_s1 + $0xd48] sm:$0xff]  ;;  %v8164_v36 = vld [vmem:[%s8879_s23 + $0x198] sm:$0xff] }
 0x204   : > { %v10632_v22 = vpop.f32.mrb[44].mxu0  ;;  %7254 = vmatpush1.bf16.msra.mxu1 %v7253_v50  ;;  %7152 = vmatprep.subr.bf16.mxu0 %v7151_v29  ;;  %v8163_v29 = vld [vmem:[%s8879_s23 + $0x170] sm:$0xff]  ;;  %v7259_v50 = vpack.c.bf16 %v687_v14, %v671_v4  ;;  %v717_v10 = vld [vmem:[%s13207_s1 + $0xdc8] sm:$0xff]  ;;  %v719_v4 = vld [vmem:[%s13207_s1 + $0xdd8] sm:$0xff]  ;;  %v7157_v14 = vpack.c.bf16 %v684_v44, %v668_v2 }
 0x205   : > { %13258 = vst [vmem:[#allocation51_spill] sm:$0xff] %v10632_v22  ;;  %v10643_v26 = vpop.f32.mrb[44].mxu1  ;;  %v10645_v16 = vpop.f32.mrb[45].mxu0  ;;  %2621 = vmatmul.mubr.f32.gmra.mrb[86].mxu0 %v8163_v29  ;;  %7256 = vmatprep.subr.bf16.mxu1 %v7255_v62  ;;  %v703_v62 = vld [vmem:[%s13207_s1 + $0xd58] sm:$0xff]  ;;  %v716_v22 = vld [vmem:[%s13207_s1 + $0xdc0] sm:$0xff] }
 0x206   : > { %13259 = vst [vmem:[#allocation52_spill] sm:$0xff] %v10643_v26  ;;  %13260 = vst [vmem:[#allocation53_spill] sm:$0xff] %v10645_v16  ;;  %v10657_v28 = vpop.f32.mrb[45].mxu1  ;;  %3135 = vmatmul.mubr.f32.gmra.mrb[86].mxu1 %v8163_v29  ;;  %6502 = vmatprep.mubr.msk.f32.mxu0 %vm1108_vm0, %v8164_v36  ;;  %v7261_v29 = vpack.c.bf16 %v686_v56, %v670_v32  ;;  %v700_v26 = vld [vmem:[%s13207_s1 + $0xd40] sm:$0xff]  ;;  %v718_v32 = vld [vmem:[%s13207_s1 + $0xdd0] sm:$0xff] }
 0x207   : > { %13261 = vst [vmem:[#allocation54_spill] sm:$0xff] %v10657_v28  ;;  %6534 = vmatprep.mubr.msk.f32.mxu1 %vm1108_vm0, %v8164_v36  ;;  %7154 = vmatpush1.bf16.msra.mxu0 %v7153_v30  ;;  %v7159_v28 = vpack.c.bf16 %v717_v10, %v701_v60  ;;  %v702_v30 = vld [vmem:[%s13207_s1 + $0xd50] sm:$0xff]  ;;  %v733_v56 = vld [vmem:[%s13207_s1 + $0xe48] sm:$0xff]  ;;  %v8166_v36 = vld [vmem:[%s8879_s23 + $0x1b8] sm:$0xff] }
 0x208   : > { %v10668_v16 = vpop.f32.mrb[46].mxu0  ;;  %7258 = vmatpush1.bf16.msra.mxu1 %v7257_v48  ;;  %7156 = vmatprep.subr.bf16.mxu0 %v7155_v20  ;;  %v8165_v20 = vld [vmem:[%s8879_s23 + $0x190] sm:$0xff]  ;;  %v7263_v48 = vpack.c.bf16 %v719_v4, %v703_v62  ;;  %v749_v60 = vld [vmem:[%s13207_s1 + $0xec8] sm:$0xff]  ;;  %v751_v62 = vld [vmem:[%s13207_s1 + $0xed8] sm:$0xff]  ;;  %v7161_v4 = vpack.c.bf16 %v716_v22, %v700_v26 }
 0x209   : > { %13262 = vst [vmem:[#allocation55_spill] sm:$0xff] %v10668_v16  ;;  %v10679_v44 = vpop.f32.mrb[46].mxu1  ;;  %v10681_v2 = vpop.f32.mrb[47].mxu0  ;;  %2627 = vmatmul.mubr.f32.gmra.mrb[88].mxu0 %v8165_v20  ;;  %7260 = vmatprep.subr.bf16.mxu1 %v7259_v50  ;;  %v735_v50 = vld [vmem:[%s13207_s1 + $0xe58] sm:$0xff]  ;;  %v748_v16 = vld [vmem:[%s13207_s1 + $0xec0] sm:$0xff] }
 0x20a   : > { %13263 = vst [vmem:[#allocation56_spill] sm:$0xff] %v10679_v44  ;;  %13264 = vst [vmem:[#allocation57_spill] sm:$0xff] %v10681_v2  ;;  %v10693_v10 = vpop.f32.mrb[47].mxu1  ;;  %3141 = vmatmul.mubr.f32.gmra.mrb[88].mxu1 %v8165_v20  ;;  %6503 = vmatprep.mubr.msk.f32.mxu0 %vm1108_vm0, %v8166_v36  ;;  %v7265_v20 = vpack.c.bf16 %v718_v32, %v702_v30  ;;  %v732_v44 = vld [vmem:[%s13207_s1 + $0xe40] sm:$0xff]  ;;  %v750_v30 = vld [vmem:[%s13207_s1 + $0xed0] sm:$0xff] }
 0x20b   : > { %13265 = vst [vmem:[#allocation58_spill] sm:$0xff] %v10693_v10  ;;  %6535 = vmatprep.mubr.msk.f32.mxu1 %vm1108_vm0, %v8166_v36  ;;  %7158 = vmatpush1.bf16.msra.mxu0 %v7157_v14  ;;  %v7163_v10 = vpack.c.bf16 %v749_v60, %v733_v56  ;;  %v734_v14 = vld [vmem:[%s13207_s1 + $0xe50] sm:$0xff]  ;;  %v765_v32 = vld [vmem:[%s13207_s1 + $0xf48] sm:$0xff]  ;;  %v8168_v36 = vld [vmem:[%s8879_s23 + $0x1d8] sm:$0xff] }
 0x20c   : > { %v10704_v2 = vpop.f32.mrb[48].mxu0  ;;  %7262 = vmatpush1.bf16.msra.mxu1 %v7261_v29  ;;  %7160 = vmatprep.subr.bf16.mxu0 %v7159_v28  ;;  %v8167_v28 = vld [vmem:[%s8879_s23 + $0x1b0] sm:$0xff]  ;;  %v7267_v29 = vpack.c.bf16 %v751_v62, %v735_v50  ;;  %v781_v56 = vld [vmem:[%s13207_s1 + $0xfc8] sm:$0xff]  ;;  %v783_v50 = vld [vmem:[%s13207_s1 + $0xfd8] sm:$0xff]  ;;  %v7165_v62 = vpack.c.bf16 %v748_v16, %v732_v44 }
 0x20d   : > { %13266 = vst [vmem:[#allocation59_spill] sm:$0xff] %v10704_v2  ;;  %v10715_v22 = vpop.f32.mrb[48].mxu1  ;;  %v10717_v26 = vpop.f32.mrb[49].mxu0  ;;  %2633 = vmatmul.mubr.f32.gmra.mrb[90].mxu0 %v8167_v28  ;;  %7264 = vmatprep.subr.bf16.mxu1 %v7263_v48  ;;  %v767_v48 = vld [vmem:[%s13207_s1 + $0xf58] sm:$0xff]  ;;  %v780_v2 = vld [vmem:[%s13207_s1 + $0xfc0] sm:$0xff] }
 0x20e   : > { %13267 = vst [vmem:[#allocation60_spill] sm:$0xff] %v10715_v22  ;;  %13268 = vst [vmem:[#allocation61_spill] sm:$0xff] %v10717_v26  ;;  %v10729_v60 = vpop.f32.mrb[49].mxu1  ;;  %3147 = vmatmul.mubr.f32.gmra.mrb[90].mxu1 %v8167_v28  ;;  %6504 = vmatprep.mubr.msk.f32.mxu0 %vm1108_vm0, %v8168_v36  ;;  %v7269_v28 = vpack.c.bf16 %v750_v30, %v734_v14  ;;  %v764_v22 = vld [vmem:[%s13207_s1 + $0xf40] sm:$0xff]  ;;  %v782_v14 = vld [vmem:[%s13207_s1 + $0xfd0] sm:$0xff] }
 0x20f   : > { %13269 = vst [vmem:[#allocation62_spill] sm:$0xff] %v10729_v60  ;;  %6536 = vmatprep.mubr.msk.f32.mxu1 %vm1108_vm0, %v8168_v36  ;;  %7162 = vmatpush1.bf16.msra.mxu0 %v7161_v4  ;;  %v7167_v60 = vpack.c.bf16 %v781_v56, %v765_v32  ;;  %v766_v4 = vld [vmem:[%s13207_s1 + $0xf50] sm:$0xff]  ;;  %v797_v30 = vld [vmem:[%s13207_s1 + $0x1048] sm:$0xff]  ;;  %v8170_v36 = vld [vmem:[%s8879_s23 + $0x1f8] sm:$0xff] }
 0x210   : > { %v10740_v26 = vpop.f32.mrb[50].mxu0  ;;  %7266 = vmatpush1.bf16.msra.mxu1 %v7265_v20  ;;  %7164 = vmatprep.subr.bf16.mxu0 %v7163_v10  ;;  %v8169_v10 = vld [vmem:[%s8879_s23 + $0x1d0] sm:$0xff]  ;;  %v7271_v20 = vpack.c.bf16 %v783_v50, %v767_v48  ;;  %v813_v32 = vld [vmem:[%s13207_s1 + $0x10c8] sm:$0xff]  ;;  %v815_v48 = vld [vmem:[%s13207_s1 + $0x10d8] sm:$0xff]  ;;  %v7169_v50 = vpack.c.bf16 %v780_v2, %v764_v22 }
 0x211   : > { %13270 = vst [vmem:[#allocation63_spill] sm:$0xff] %v10740_v26  ;;  %v10751_v16 = vpop.f32.mrb[50].mxu1  ;;  %v10753_v44 = vpop.f32.mrb[51].mxu0  ;;  %2639 = vmatmul.mubr.f32.gmra.mrb[92].mxu0 %v8169_v10  ;;  %7268 = vmatprep.subr.bf16.mxu1 %v7267_v29  ;;  %v799_v29 = vld [vmem:[%s13207_s1 + $0x1058] sm:$0xff] }
 0x212   : > { %13271 = vst [vmem:[#allocation64_spill] sm:$0xff] %v10751_v16  ;;  %13272 = vst [vmem:[#allocation65_spill] sm:$0xff] %v10753_v44  ;;  %v10765_v56 = vpop.f32.mrb[51].mxu1  ;;  %3153 = vmatmul.mubr.f32.gmra.mrb[92].mxu1 %v8169_v10  ;;  %6505 = vmatprep.mubr.msk.f32.mxu0 %vm1108_vm0, %v8170_v36  ;;  %v7273_v10 = vpack.c.bf16 %v782_v14, %v766_v4  ;;  %v7275_v54 = vpack.c.bf16 %v815_v48, %v799_v29  ;;  %v8172_v2 = vld [vmem:[%s8879_s23 + $0x218] sm:$0xff] }
 0x213   : > { %13273 = vst [vmem:[#allocation66_spill] sm:$0xff] %v10765_v56  ;;  %6537 = vmatprep.mubr.msk.f32.mxu1 %vm1108_vm0, %v8170_v36  ;;  %7166 = vmatpush1.bf16.msra.mxu0 %v7165_v62  ;;  %v7171_v56 = vpack.c.bf16 %v813_v32, %v797_v30  ;;  %v8174_v4 = vld [vmem:[%s8879_s23 + $0x238] sm:$0xff]  ;;  %v8175_v32 = vld [vmem:[%s8879_s23 + $0x230] sm:$0xff] }
 0x214   : > { %v10776_v44 = vpop.f32.mrb[52].mxu0  ;;  %7270 = vmatpush1.bf16.msra.mxu1 %v7269_v28  ;;  %7168 = vmatprep.subr.bf16.mxu0 %v7167_v60  ;;  %v8173_v28 = vld [vmem:[%s8879_s23 + $0x210] sm:$0xff] }
 0x215   : > { %13274 = vst [vmem:[#allocation67_spill] sm:$0xff] %v10776_v44  ;;  %v10778_v16 = vpop.f32.mrb[52].mxu1  ;;  %v10780_v26 = vpop.f32.mrb[53].mxu0  ;;  %2645 = vmatmul.mubr.f32.gmra.mrb[94].mxu0 %v8171_v8  ;;  %7272 = vmatprep.subr.bf16.mxu1 %v7271_v20 }
 0x216   : > { %13275 = vst [vmem:[#allocation68_spill] sm:$0xff] %v10778_v16  ;;  %13276 = vst [vmem:[#allocation69_spill] sm:$0xff] %v10780_v26  ;;  %v10783_v42 = vpop.f32.mrb[53].mxu1  ;;  %3159 = vmatmul.mubr.f32.gmra.mrb[94].mxu1 %v8171_v8  ;;  %6506 = vmatprep.mubr.msk.f32.mxu0 %vm1108_vm0, %v8172_v2  ;;  %v8299_v26 = vld [vmem:[%s8879_s23 + $0x1f0] sm:$0xff] }
 0x217   : > { %13277 = vst [vmem:[#allocation70_spill] sm:$0xff] %v10783_v42  ;;  %6538 = vmatprep.mubr.msk.f32.mxu1 %vm1108_vm0, %v8172_v2  ;;  %7170 = vmatpush1.bf16.msra.mxu0 %v7169_v50  ;;  %v8177_v50 = vld [vmem:[%s8879_s23 + $0x250] sm:$0xff]  ;;  %v8178_v2 = vld [vmem:[%s8879_s23 + $0x278] sm:$0xff] }
 0x218   : > { %v10788_v22 = vpop.f32.mrb[54].mxu0  ;;  %7274 = vmatpush1.bf16.msra.mxu1 %v7273_v10  ;;  %7172 = vmatprep.subr.bf16.mxu0 %v7171_v56  ;;  %v894_v42 = vld [vmem:[%s13207_s1 + $0x1350] sm:$0xff] }
 0x219   : > { %13278 = vst [vmem:[#allocation71_spill] sm:$0xff] %v10788_v22  ;;  %v10790_v60 = vpop.f32.mrb[54].mxu1  ;;  %v10792_v62 = vpop.f32.mrb[55].mxu0  ;;  %2651 = vmatmul.mubr.f32.gmra.mrb[96].mxu0 %v8173_v28  ;;  %7276 = vmatprep.subr.bf16.mxu1 %v7275_v54  ;;  %v8176_v54 = vld [vmem:[%s8879_s23 + $0x258] sm:$0xff]  ;;  %v8207_v22 = vld [vmem:[%s8879_s23 + $0x20] sm:$0xff] }
 0x21a   : > { %13279 = vst [vmem:[#allocation72_spill] sm:$0xff] %v10790_v60  ;;  %13280 = vst [vmem:[#allocation73_spill] sm:$0xff] %v10792_v62  ;;  %v10795_v8 = vpop.f32.mrb[55].mxu1  ;;  %3165 = vmatmul.mubr.f32.gmra.mrb[96].mxu1 %v8173_v28  ;;  %6507 = vmatprep.mubr.msk.f32.mxu0 %vm1108_vm0, %v8174_v4 }
 0x21b   : > { %13281 = vst [vmem:[#allocation74_spill] sm:$0xff] %v10795_v8  ;;  %6539 = vmatprep.mubr.msk.f32.mxu1 %vm1108_vm0, %v8174_v4 }
 0x21c   : > { %v10800_v20 = vpop.f32.mrb[56].mxu0 }
 0x21d   : > { %13282 = vst [vmem:[#allocation75_spill] sm:$0xff] %v10800_v20  ;;  %v10802_v14 = vpop.f32.mrb[56].mxu1  ;;  %v10804_v30 = vpop.f32.mrb[57].mxu0  ;;  %2657 = vmatmul.mubr.f32.gmra.mrb[98].mxu0 %v8175_v32  ;;  %v828_v20 = vld [vmem:[%s13207_s1 + $0x1140] sm:$0xff] }
 0x21e   : > { %13283 = vst [vmem:[#allocation76_spill] sm:$0xff] %v10802_v14  ;;  %13284 = vst [vmem:[#allocation77_spill] sm:$0xff] %v10804_v30  ;;  %v10807_v56 = vpop.f32.mrb[57].mxu1  ;;  %3171 = vmatmul.mubr.f32.gmra.mrb[98].mxu1 %v8175_v32  ;;  %6508 = vmatprep.mubr.msk.f32.mxu0 %vm1108_vm0, %v8176_v54 }
 0x21f   : > { %13285 = vst [vmem:[#allocation78_spill] sm:$0xff] %v10807_v56  ;;  %6540 = vmatprep.mubr.msk.f32.mxu1 %vm1108_vm0, %v8176_v54  ;;  %v8179_v54 = vld [vmem:[%s8879_s23 + $0x270] sm:$0xff]  ;;  %v847_v56 = vld [vmem:[%s13207_s1 + $0x11d8] sm:$0xff] }
 0x220   : > { %v10812_v36 = vpop.f32.mrb[58].mxu0 }
 0x221   : > { %13286 = vst [vmem:[#allocation79_spill] sm:$0xff] %v10812_v36  ;;  %v10814_v29 = vpop.f32.mrb[58].mxu1  ;;  %v10816_v48 = vpop.f32.mrb[59].mxu0  ;;  %2663 = vmatmul.mubr.f32.gmra.mrb[100].mxu0 %v8177_v50  ;;  %v831_v36 = vld [vmem:[%s13207_s1 + $0x1158] sm:$0xff] }
 0x222   : > { %13287 = vst [vmem:[#allocation80_spill] sm:$0xff] %v10814_v29  ;;  %13288 = vst [vmem:[#allocation81_spill] sm:$0xff] %v10816_v48  ;;  %v10819_v10 = vpop.f32.mrb[59].mxu1  ;;  %3177 = vmatmul.mubr.f32.gmra.mrb[100].mxu1 %v8177_v50  ;;  %6509 = vmatprep.mubr.msk.f32.mxu0 %vm1108_vm0, %v8178_v2  ;;  %v8180_v50 = vld [vmem:[%s8879_s23 + $0x298] sm:$0xff]  ;;  %v7279_v8 = vpack.c.bf16 %v847_v56, %v831_v36  ;;  %v8206_v36 = vld [vmem:[%s8879_s23 + $0x28] sm:$0xff] }
 0x223   : > { %13289 = vst [vmem:[#allocation82_spill] sm:$0xff] %v10819_v10  ;;  %6541 = vmatprep.mubr.msk.f32.mxu1 %vm1108_vm0, %v8178_v2  ;;  %v879_v56 = vld [vmem:[%s13207_s1 + $0x12d8] sm:$0xff] }
 0x224   : > { %v10824_v28 = vpop.f32.mrb[60].mxu0 }
 0x225   : > { %13290 = vst [vmem:[#allocation83_spill] sm:$0xff] %v10824_v28  ;;  %v10826_v4 = vpop.f32.mrb[60].mxu1  ;;  %v10828_v32 = vpop.f32.mrb[61].mxu0  ;;  %2669 = vmatmul.mubr.f32.gmra.mrb[102].mxu0 %v8179_v54 }
 0x226   : > { %13291 = vst [vmem:[#allocation84_spill] sm:$0xff] %v10826_v4  ;;  %13292 = vst [vmem:[#allocation85_spill] sm:$0xff] %v10828_v32  ;;  %v10831_v48 = vpop.f32.mrb[61].mxu1  ;;  %3183 = vmatmul.mubr.f32.gmra.mrb[102].mxu1 %v8179_v54  ;;  %6510 = vmatprep.mubr.msk.f32.mxu0 %vm1108_vm0, %v8180_v50  ;;  %v8181_v32 = vld [vmem:[%s8879_s23 + $0x290] sm:$0xff]  ;;  %v8182_v54 = vld [vmem:[%s8879_s23 + $0x2b8] sm:$0xff] }
 0x227   : > { %13293 = vst [vmem:[#allocation86_spill] sm:$0xff] %v10831_v48  ;;  %6542 = vmatprep.mubr.msk.f32.mxu1 %vm1108_vm0, %v8180_v50  ;;  %v8183_v50 = vld [vmem:[%s8879_s23 + $0x2b0] sm:$0xff]  ;;  %v8204_v48 = vld [vmem:[%s8879_s23 + $0x8] sm:$0xff] }
 0x228   : > { %v10836_v2 = vpop.f32.mrb[62].mxu0 }
 0x229   : > { %13294 = vst [vmem:[#allocation87_spill] sm:$0xff] %v10836_v2  ;;  %v10838_v28 = vpop.f32.mrb[62].mxu1  ;;  %v10840_v4 = vpop.f32.mrb[63].mxu0  ;;  %2675 = vmatmul.mubr.f32.gmra.mrb[104].mxu0 %v8181_v32  ;;  %v845_v2 = vld [vmem:[%s13207_s1 + $0x11c8] sm:$0xff] }
 0x22a   : > { %13295 = vst [vmem:[#allocation88_spill] sm:$0xff] %v10838_v28  ;;  %13296 = vst [vmem:[#allocation89_spill] sm:$0xff] %v10840_v4  ;;  %v10843_v10 = vpop.f32.mrb[63].mxu1  ;;  %3189 = vmatmul.mubr.f32.gmra.mrb[104].mxu1 %v8181_v32  ;;  %6511 = vmatprep.mubr.msk.f32.mxu0 %vm1108_vm0, %v8182_v54  ;;  %v8184_v28 = vld [vmem:[%s8879_s23 + $0x2d8] sm:$0xff]  ;;  %v8185_v4 = vld [vmem:[%s8879_s23 + $0x2d0] sm:$0xff] }
 0x22b   : > { %13297 = vst [vmem:[#allocation90_spill] sm:$0xff] %v10843_v10  ;;  %6543 = vmatprep.mubr.msk.f32.mxu1 %vm1108_vm0, %v8182_v54  ;;  %v8186_v32 = vld [vmem:[%s8879_s23 + $0x2f8] sm:$0xff]  ;;  %v8187_v54 = vld [vmem:[%s8879_s23 + $0x2f0] sm:$0xff] }
 0x22c   : > { %v8202_v10 = vld [vmem:[%s8879_s23 + $0x3f8] sm:$0xff] }
 0x22d   : > { %2681 = vmatmul.mubr.f32.gmra.mrb[106].mxu0 %v8183_v50 }
 0x22e   : > { %3195 = vmatmul.mubr.f32.gmra.mrb[106].mxu1 %v8183_v50  ;;  %6512 = vmatprep.mubr.msk.f32.mxu0 %vm1108_vm0, %v8184_v28  ;;  %v8188_v50 = vld [vmem:[%s8879_s23 + $0x318] sm:$0xff] }
 0x22f   : > { %6544 = vmatprep.mubr.msk.f32.mxu1 %vm1108_vm0, %v8184_v28  ;;  %v8189_v28 = vld [vmem:[%s8879_s23 + $0x310] sm:$0xff] }
 0x231   : > { %2687 = vmatmul.mubr.f32.gmra.mrb[108].mxu0 %v8185_v4 }
 0x232   : > { %3201 = vmatmul.mubr.f32.gmra.mrb[108].mxu1 %v8185_v4  ;;  %6513 = vmatprep.mubr.msk.f32.mxu0 %vm1108_vm0, %v8186_v32  ;;  %v8190_v4 = vld [vmem:[%s8879_s23 + $0x338] sm:$0xff] }
 0x233   : > { %6545 = vmatprep.mubr.msk.f32.mxu1 %vm1108_vm0, %v8186_v32  ;;  %v8191_v32 = vld [vmem:[%s8879_s23 + $0x330] sm:$0xff] }
 0x235   : > { %2693 = vmatmul.mubr.f32.gmra.mrb[110].mxu0 %v8187_v54 }
 0x236   : > { %3207 = vmatmul.mubr.f32.gmra.mrb[110].mxu1 %v8187_v54  ;;  %6514 = vmatprep.mubr.msk.f32.mxu0 %vm1108_vm0, %v8188_v50  ;;  %v8192_v54 = vld [vmem:[%s8879_s23 + $0x358] sm:$0xff] }
 0x237   : > { %6546 = vmatprep.mubr.msk.f32.mxu1 %vm1108_vm0, %v8188_v50  ;;  %v8193_v50 = vld [vmem:[%s8879_s23 + $0x350] sm:$0xff] }
 0x239   : > { %2699 = vmatmul.mubr.f32.gmra.mrb[112].mxu0 %v8189_v28 }
 0x23a   : > { %3213 = vmatmul.mubr.f32.gmra.mrb[112].mxu1 %v8189_v28  ;;  %6515 = vmatprep.mubr.msk.f32.mxu0 %vm1108_vm0, %v8190_v4  ;;  %v8194_v28 = vld [vmem:[%s8879_s23 + $0x378] sm:$0xff] }
 0x23b   : > { %6547 = vmatprep.mubr.msk.f32.mxu1 %vm1108_vm0, %v8190_v4  ;;  %v8195_v4 = vld [vmem:[%s8879_s23 + $0x370] sm:$0xff] }
 0x23d   : > { %2705 = vmatmul.mubr.f32.gmra.mrb[114].mxu0 %v8191_v32 }
 0x23e   : > { %3219 = vmatmul.mubr.f32.gmra.mrb[114].mxu1 %v8191_v32  ;;  %6516 = vmatprep.mubr.msk.f32.mxu0 %vm1108_vm0, %v8192_v54  ;;  %v8196_v32 = vld [vmem:[%s8879_s23 + $0x398] sm:$0xff] }
 0x23f   : > { %6548 = vmatprep.mubr.msk.f32.mxu1 %vm1108_vm0, %v8192_v54  ;;  %v8197_v54 = vld [vmem:[%s8879_s23 + $0x390] sm:$0xff] }
 0x241   : > { %2711 = vmatmul.mubr.f32.gmra.mrb[116].mxu0 %v8193_v50 }
 0x242   : > { %3225 = vmatmul.mubr.f32.gmra.mrb[116].mxu1 %v8193_v50  ;;  %6517 = vmatprep.mubr.msk.f32.mxu0 %vm1108_vm0, %v8194_v28  ;;  %v8198_v50 = vld [vmem:[%s8879_s23 + $0x3b8] sm:$0xff] }
 0x243   : > { %6549 = vmatprep.mubr.msk.f32.mxu1 %vm1108_vm0, %v8194_v28  ;;  %v8199_v28 = vld [vmem:[%s8879_s23 + $0x3b0] sm:$0xff] }
 0x245   : > { %2717 = vmatmul.mubr.f32.gmra.mrb[118].mxu0 %v8195_v4 }
 0x246   : > { %3231 = vmatmul.mubr.f32.gmra.mrb[118].mxu1 %v8195_v4  ;;  %6518 = vmatprep.mubr.msk.f32.mxu0 %vm1108_vm0, %v8196_v32  ;;  %v8200_v4 = vld [vmem:[%s8879_s23 + $0x3d8] sm:$0xff] }
 0x247   : > { %6550 = vmatprep.mubr.msk.f32.mxu1 %vm1108_vm0, %v8196_v32  ;;  %v8201_v32 = vld [vmem:[%s8879_s23 + $0x3d0] sm:$0xff] }
 0x249   : > { %2723 = vmatmul.mubr.f32.gmra.mrb[120].mxu0 %v8197_v54 }
 0x24a   : > { %3237 = vmatmul.mubr.f32.gmra.mrb[120].mxu1 %v8197_v54  ;;  %6519 = vmatprep.mubr.msk.f32.mxu0 %vm1108_vm0, %v8198_v50  ;;  %v796_v54 = vld [vmem:[%s13207_s1 + $0x1040] sm:$0xff] }
 0x24b   : > { %6551 = vmatprep.mubr.msk.f32.mxu1 %vm1108_vm0, %v8198_v50  ;;  %v812_v50 = vld [vmem:[%s13207_s1 + $0x10c0] sm:$0xff] }
 0x24c   : > { %v7173_v29 = vpack.c.bf16 %v812_v50, %v796_v54  ;;  %v844_v54 = vld [vmem:[%s13207_s1 + $0x11c0] sm:$0xff]  ;;  %v830_v50 = vld [vmem:[%s13207_s1 + $0x1150] sm:$0xff] }
 0x24d   : > { %2729 = vmatmul.mubr.f32.gmra.mrb[122].mxu0 %v8199_v28 }
 0x24e   : > { %3243 = vmatmul.mubr.f32.gmra.mrb[122].mxu1 %v8199_v28  ;;  %6520 = vmatprep.mubr.msk.f32.mxu0 %vm1108_vm0, %v8200_v4  ;;  %v798_v28 = vld [vmem:[%s13207_s1 + $0x1050] sm:$0xff] }
 0x24f   : > { %6552 = vmatprep.mubr.msk.f32.mxu1 %vm1108_vm0, %v8200_v4  ;;  %v814_v4 = vld [vmem:[%s13207_s1 + $0x10d0] sm:$0xff] }
 0x250   : > { %v7277_v30 = vpack.c.bf16 %v814_v4, %v798_v28  ;;  %v877_v28 = vld [vmem:[%s13207_s1 + $0x12c8] sm:$0xff]  ;;  %v863_v4 = vld [vmem:[%s13207_s1 + $0x1258] sm:$0xff] }
 0x251   : > { %2735 = vmatmul.mubr.f32.gmra.mrb[124].mxu0 %v8201_v32 }
 0x252   : > { %3249 = vmatmul.mubr.f32.gmra.mrb[124].mxu1 %v8201_v32  ;;  %6521 = vmatprep.mubr.msk.f32.mxu0 %vm1108_vm0, %v8202_v10  ;;  %v8203_v32 = vld [vmem:[%s8879_s23 + $0x3f0] sm:$0xff] }
 0x253   : > { %6553 = vmatprep.mubr.msk.f32.mxu1 %vm1108_vm0, %v8202_v10  ;;  %v829_v10 = vld [vmem:[%s13207_s1 + $0x1148] sm:$0xff] }
 0x254   : > { %v7175_v14 = vpack.c.bf16 %v845_v2, %v829_v10  ;;  %v861_v2 = vld [vmem:[%s13207_s1 + $0x1248] sm:$0xff]  ;;  %v7177_v10 = vpack.c.bf16 %v844_v54, %v828_v20  ;;  %v7283_v20 = vpack.c.bf16 %v879_v56, %v863_v4 }
 0x255   : > { %2741 = vmatmul.mubr.f32.gmra.mrb[126].mxu0 %v8203_v32  ;;  %v7179_v60 = vpack.c.bf16 %v877_v28, %v861_v2  ;;  %v893_v54 = vld [vmem:[%s13207_s1 + $0x1348] sm:$0xff]  ;;  %v911_v2 = vld [vmem:[%s13207_s1 + $0x13d8] sm:$0xff] }
 0x256   : > { %3255 = vmatmul.mubr.f32.gmra.mrb[126].mxu1 %v8203_v32  ;;  %3325 = vmatprep.mubr.f32.mxu0 %v8204_v48  ;;  %v8205_v32 = vld [vmem:[%s8879_s23] sm:$0xff] }
 0x257   : > { %3839 = vmatprep.mubr.f32.mxu1 %v8204_v48  ;;  %v846_v48 = vld [vmem:[%s13207_s1 + $0x11d0] sm:$0xff] }
 0x258   : > { %v7281_v62 = vpack.c.bf16 %v846_v48, %v830_v50  ;;  %v909_v50 = vld [vmem:[%s13207_s1 + $0x13c8] sm:$0xff] }
 0x259   : > { %3326 = vmatmul.mubr.f32.vlgmr.msra.gmra.mrb[128].mxu0 %v8205_v32  ;;  %v8208_v48 = vld [vmem:[%s8879_s23 + $0x48] sm:$0xff]  ;;  %v7183_v56 = vpack.c.bf16 %v909_v50, %v893_v54 }
 0x25a   : > { %3840 = vmatmul.mubr.f32.vlgmr.msra.gmra.mrb[128].mxu1 %v8205_v32  ;;  %7174 = vmatpush1.bf16.msra.mxu0 %v7173_v29  ;;  %v860_v29 = vld [vmem:[%s13207_s1 + $0x1240] sm:$0xff] }
 0x25b   : > { %7278 = vmatpush1.bf16.msra.mxu1 %v7277_v30  ;;  %3331 = vmatprep.mubr.f32.mxu0 %v8206_v36  ;;  %v876_v32 = vld [vmem:[%s13207_s1 + $0x12c0] sm:$0xff]  ;;  %v862_v30 = vld [vmem:[%s13207_s1 + $0x1250] sm:$0xff] }
 0x25c   : > { %3845 = vmatprep.mubr.f32.mxu1 %v8206_v36  ;;  %7176 = vmatprep.subr.bf16.mxu0 %v7175_v14  ;;  %v878_v14 = vld [vmem:[%s13207_s1 + $0x12d0] sm:$0xff]  ;;  %v7181_v28 = vpack.c.bf16 %v876_v32, %v860_v29  ;;  %v908_v36 = vld [vmem:[%s13207_s1 + $0x13c0] sm:$0xff]  ;;  %v941_v29 = vld [vmem:[%s13207_s1 + $0x14c8] sm:$0xff] }
 0x25d   : > { %3332 = vmatmul.mubr.f32.gmra.mrb[130].mxu0 %v8207_v22  ;;  %7280 = vmatprep.subr.bf16.mxu1 %v7279_v8  ;;  %v895_v8 = vld [vmem:[%s13207_s1 + $0x1358] sm:$0xff]  ;;  %v7285_v4 = vpack.c.bf16 %v878_v14, %v862_v30  ;;  %v8210_v32 = vld [vmem:[%s8879_s23 + $0x68] sm:$0xff] }
 0x25e   : > { %3846 = vmatmul.mubr.f32.gmra.mrb[130].mxu1 %v8207_v22  ;;  %3337 = vmatprep.mubr.f32.mxu0 %v8208_v48  ;;  %v892_v22 = vld [vmem:[%s13207_s1 + $0x1340] sm:$0xff]  ;;  %v927_v30 = vld [vmem:[%s13207_s1 + $0x1458] sm:$0xff] }
 0x25f   : > { %3851 = vmatprep.mubr.f32.mxu1 %v8208_v48  ;;  %7178 = vmatpush1.bf16.msra.mxu0 %v7177_v10  ;;  %v8209_v48 = vld [vmem:[%s8879_s23 + $0x40] sm:$0xff]  ;;  %v7287_v10 = vpack.c.bf16 %v911_v2, %v895_v8  ;;  %v7185_v14 = vpack.c.bf16 %v908_v36, %v892_v22  ;;  %v8212_v22 = vld [vmem:[%s8879_s23 + $0x88] sm:$0xff]  ;;  %v959_v36 = vld [vmem:[%s13207_s1 + $0x1558] sm:$0xff] }
 0x260   : > { %7282 = vmatpush1.bf16.msra.mxu1 %v7281_v62  ;;  %7180 = vmatprep.subr.bf16.mxu0 %v7179_v60  ;;  %v910_v60 = vld [vmem:[%s13207_s1 + $0x13d0] sm:$0xff]  ;;  %v925_v62 = vld [vmem:[%s13207_s1 + $0x1448] sm:$0xff]  ;;  %v924_v8 = vld [vmem:[%s13207_s1 + $0x1440] sm:$0xff] }
 0x261   : > { %3338 = vmatmul.mubr.f32.gmra.mrb[132].mxu0 %v8209_v48  ;;  %7284 = vmatprep.subr.bf16.mxu1 %v7283_v20  ;;  %v943_v20 = vld [vmem:[%s13207_s1 + $0x14d8] sm:$0xff]  ;;  %v7289_v54 = vpack.c.bf16 %v910_v60, %v894_v42  ;;  %v7187_v50 = vpack.c.bf16 %v941_v29, %v925_v62  ;;  %v940_v2 = vld [vmem:[%s13207_s1 + $0x14c0] sm:$0xff]  ;;  %v942_v42 = vld [vmem:[%s13207_s1 + $0x14d0] sm:$0xff] }
 0x262   : > { %3852 = vmatmul.mubr.f32.gmra.mrb[132].mxu1 %v8209_v48  ;;  %3343 = vmatprep.mubr.f32.mxu0 %v8210_v32  ;;  %v926_v48 = vld [vmem:[%s13207_s1 + $0x1450] sm:$0xff]  ;;  %v7189_v60 = vpack.c.bf16 %v940_v2, %v924_v8  ;;  %v1005_v8 = vld [vmem:[%s13207_s1 + $0x16c8] sm:$0xff] }
 0x263   : > { %3857 = vmatprep.mubr.f32.mxu1 %v8210_v32  ;;  %7182 = vmatpush1.bf16.msra.mxu0 %v7181_v28  ;;  %v8211_v32 = vld [vmem:[%s8879_s23 + $0x60] sm:$0xff]  ;;  %v7291_v28 = vpack.c.bf16 %v943_v20, %v927_v30  ;;  %v7293_v62 = vpack.c.bf16 %v942_v42, %v926_v48  ;;  %v8214_v2 = vld [vmem:[%s8879_s23 + $0xa8] sm:$0xff]  ;;  %v991_v48 = vld [vmem:[%s13207_s1 + $0x1658] sm:$0xff] }
 0x264   : > { %7286 = vmatpush1.bf16.msra.mxu1 %v7285_v4  ;;  %7184 = vmatprep.subr.bf16.mxu0 %v7183_v56  ;;  %v957_v4 = vld [vmem:[%s13207_s1 + $0x1548] sm:$0xff]  ;;  %v956_v30 = vld [vmem:[%s13207_s1 + $0x1540] sm:$0xff] }
 0x265   : > { %3344 = vmatmul.mubr.f32.gmra.mrb[134].mxu0 %v8211_v32  ;;  %7288 = vmatprep.subr.bf16.mxu1 %v7287_v10  ;;  %v973_v56 = vld [vmem:[%s13207_s1 + $0x15c8] sm:$0xff]  ;;  %v975_v10 = vld [vmem:[%s13207_s1 + $0x15d8] sm:$0xff]  ;;  %v972_v20 = vld [vmem:[%s13207_s1 + $0x15c0] sm:$0xff] }
 0x266   : > { %3858 = vmatmul.mubr.f32.gmra.mrb[134].mxu1 %v8211_v32  ;;  %3349 = vmatprep.mubr.f32.mxu0 %v8212_v22  ;;  %v7191_v29 = vpack.c.bf16 %v973_v56, %v957_v4  ;;  %v958_v32 = vld [vmem:[%s13207_s1 + $0x1550] sm:$0xff]  ;;  %v7193_v42 = vpack.c.bf16 %v972_v20, %v956_v30  ;;  %v1037_v30 = vld [vmem:[%s13207_s1 + $0x17c8] sm:$0xff] }
 0x267   : > { %3863 = vmatprep.mubr.f32.mxu1 %v8212_v22  ;;  %7186 = vmatpush1.bf16.msra.mxu0 %v7185_v14  ;;  %v8213_v22 = vld [vmem:[%s8879_s23 + $0x80] sm:$0xff]  ;;  %v7295_v14 = vpack.c.bf16 %v975_v10, %v959_v36  ;;  %v8216_v20 = vld [vmem:[%s8879_s23 + $0xc8] sm:$0xff] }
 0x268   : > { %7290 = vmatpush1.bf16.msra.mxu1 %v7289_v54  ;;  %7188 = vmatprep.subr.bf16.mxu0 %v7187_v50  ;;  %v974_v54 = vld [vmem:[%s13207_s1 + $0x15d0] sm:$0xff]  ;;  %v989_v50 = vld [vmem:[%s13207_s1 + $0x1648] sm:$0xff]  ;;  %v988_v36 = vld [vmem:[%s13207_s1 + $0x1640] sm:$0xff] }
 0x269   : > { %3350 = vmatmul.mubr.f32.gmra.mrb[136].mxu0 %v8213_v22  ;;  %7292 = vmatprep.subr.bf16.mxu1 %v7291_v28  ;;  %v1007_v28 = vld [vmem:[%s13207_s1 + $0x16d8] sm:$0xff]  ;;  %v7297_v4 = vpack.c.bf16 %v974_v54, %v958_v32  ;;  %v7195_v56 = vpack.c.bf16 %v1005_v8, %v989_v50  ;;  %v1004_v10 = vld [vmem:[%s13207_s1 + $0x16c0] sm:$0xff] }
 0x26a   : > { %3864 = vmatmul.mubr.f32.gmra.mrb[136].mxu1 %v8213_v22  ;;  %3355 = vmatprep.mubr.f32.mxu0 %v8214_v2  ;;  %v990_v22 = vld [vmem:[%s13207_s1 + $0x1650] sm:$0xff]  ;;  %v1023_v32 = vld [vmem:[%s13207_s1 + $0x1758] sm:$0xff]  ;;  %v7197_v54 = vpack.c.bf16 %v1004_v10, %v988_v36  ;;  %v1069_v36 = vld [vmem:[%s13207_s1 + $0x18c8] sm:$0xff] }
 0x26b   : > { %3869 = vmatprep.mubr.f32.mxu1 %v8214_v2  ;;  %7190 = vmatpush1.bf16.msra.mxu0 %v7189_v60  ;;  %v8215_v2 = vld [vmem:[%s8879_s23 + $0xa0] sm:$0xff]  ;;  %v7299_v60 = vpack.c.bf16 %v1007_v28, %v991_v48  ;;  %v8218_v10 = vld [vmem:[%s8879_s23 + $0xe8] sm:$0xff] }
 0x26c   : > { %7294 = vmatpush1.bf16.msra.mxu1 %v7293_v62  ;;  %7192 = vmatprep.subr.bf16.mxu0 %v7191_v29  ;;  %v1006_v62 = vld [vmem:[%s13207_s1 + $0x16d0] sm:$0xff]  ;;  %v1021_v29 = vld [vmem:[%s13207_s1 + $0x1748] sm:$0xff]  ;;  %v1020_v48 = vld [vmem:[%s13207_s1 + $0x1740] sm:$0xff] }
 0x26d   : > { %3356 = vmatmul.mubr.f32.gmra.mrb[138].mxu0 %v8215_v2  ;;  %7296 = vmatprep.subr.bf16.mxu1 %v7295_v14  ;;  %v1039_v14 = vld [vmem:[%s13207_s1 + $0x17d8] sm:$0xff]  ;;  %v7301_v50 = vpack.c.bf16 %v1006_v62, %v990_v22  ;;  %v7199_v8 = vpack.c.bf16 %v1037_v30, %v1021_v29  ;;  %v1036_v28 = vld [vmem:[%s13207_s1 + $0x17c0] sm:$0xff] }
 0x26e   : > { %3870 = vmatmul.mubr.f32.gmra.mrb[138].mxu1 %v8215_v2  ;;  %3361 = vmatprep.mubr.f32.mxu0 %v8216_v20  ;;  %v1022_v2 = vld [vmem:[%s13207_s1 + $0x1750] sm:$0xff]  ;;  %v1055_v22 = vld [vmem:[%s13207_s1 + $0x1858] sm:$0xff]  ;;  %v7201_v62 = vpack.c.bf16 %v1036_v28, %v1020_v48  ;;  %v1101_v48 = vld [vmem:[%s13207_s1 + $0x19c8] sm:$0xff] }
 0x26f   : > { %3875 = vmatprep.mubr.f32.mxu1 %v8216_v20  ;;  %7194 = vmatpush1.bf16.msra.mxu0 %v7193_v42  ;;  %v8217_v20 = vld [vmem:[%s8879_s23 + $0xc0] sm:$0xff]  ;;  %v7303_v42 = vpack.c.bf16 %v1039_v14, %v1023_v32  ;;  %v8220_v28 = vld [vmem:[%s8879_s23 + $0x108] sm:$0xff] }
 0x270   : > { %7298 = vmatpush1.bf16.msra.mxu1 %v7297_v4  ;;  %7196 = vmatprep.subr.bf16.mxu0 %v7195_v56  ;;  %v1038_v4 = vld [vmem:[%s13207_s1 + $0x17d0] sm:$0xff]  ;;  %v1053_v56 = vld [vmem:[%s13207_s1 + $0x1848] sm:$0xff]  ;;  %v1052_v32 = vld [vmem:[%s13207_s1 + $0x1840] sm:$0xff] }
 0x271   : > { %3362 = vmatmul.mubr.f32.gmra.mrb[140].mxu0 %v8217_v20  ;;  %7300 = vmatprep.subr.bf16.mxu1 %v7299_v60  ;;  %v1071_v60 = vld [vmem:[%s13207_s1 + $0x18d8] sm:$0xff]  ;;  %v7305_v29 = vpack.c.bf16 %v1038_v4, %v1022_v2  ;;  %v7203_v30 = vpack.c.bf16 %v1069_v36, %v1053_v56  ;;  %v1068_v14 = vld [vmem:[%s13207_s1 + $0x18c0] sm:$0xff] }
 0x272   : > { %3876 = vmatmul.mubr.f32.gmra.mrb[140].mxu1 %v8217_v20  ;;  %3367 = vmatprep.mubr.f32.mxu0 %v8218_v10  ;;  %v1054_v20 = vld [vmem:[%s13207_s1 + $0x1850] sm:$0xff]  ;;  %v1087_v2 = vld [vmem:[%s13207_s1 + $0x1958] sm:$0xff]  ;;  %v7205_v4 = vpack.c.bf16 %v1068_v14, %v1052_v32  ;;  %v305_v32 = vld [vmem:[%s13207_s1 + $0xe8] sm:$0xff] }
 0x273   : > { %3881 = vmatprep.mubr.f32.mxu1 %v8218_v10  ;;  %7198 = vmatpush1.bf16.msra.mxu0 %v7197_v54  ;;  %v8219_v10 = vld [vmem:[%s8879_s23 + $0xe0] sm:$0xff]  ;;  %v7307_v54 = vpack.c.bf16 %v1071_v60, %v1055_v22  ;;  %v8222_v14 = vld [vmem:[%s8879_s23 + $0x128] sm:$0xff] }
 0x274   : > { %7302 = vmatpush1.bf16.msra.mxu1 %v7301_v50  ;;  %7200 = vmatprep.subr.bf16.mxu0 %v7199_v8  ;;  %v1070_v50 = vld [vmem:[%s13207_s1 + $0x18d0] sm:$0xff]  ;;  %v1085_v8 = vld [vmem:[%s13207_s1 + $0x1948] sm:$0xff]  ;;  %v1084_v22 = vld [vmem:[%s13207_s1 + $0x1940] sm:$0xff] }
 0x275   : > { %3368 = vmatmul.mubr.f32.gmra.mrb[142].mxu0 %v8219_v10  ;;  %7304 = vmatprep.subr.bf16.mxu1 %v7303_v42  ;;  %v1103_v42 = vld [vmem:[%s13207_s1 + $0x19d8] sm:$0xff]  ;;  %v7309_v56 = vpack.c.bf16 %v1070_v50, %v1054_v20  ;;  %v7207_v36 = vpack.c.bf16 %v1101_v48, %v1085_v8  ;;  %v1100_v60 = vld [vmem:[%s13207_s1 + $0x19c0] sm:$0xff] }
 0x276   : > { %3882 = vmatmul.mubr.f32.gmra.mrb[142].mxu1 %v8219_v10  ;;  %3373 = vmatprep.mubr.f32.mxu0 %v8220_v28  ;;  %v1086_v10 = vld [vmem:[%s13207_s1 + $0x1950] sm:$0xff]  ;;  %v291_v20 = vld [vmem:[%s13207_s1 + $0x78] sm:$0xff]  ;;  %v7209_v50 = vpack.c.bf16 %v1100_v60, %v1084_v22  ;;  %v8228_v22 = vld [vmem:[%s8879_s23 + $0x188] sm:$0xff] }
 0x277   : > { %3887 = vmatprep.mubr.f32.mxu1 %v8220_v28  ;;  %7202 = vmatpush1.bf16.msra.mxu0 %v7201_v62  ;;  %v8221_v28 = vld [vmem:[%s8879_s23 + $0x100] sm:$0xff]  ;;  %v7311_v62 = vpack.c.bf16 %v1103_v42, %v1087_v2 }
 0x278   : > { %7306 = vmatpush1.bf16.msra.mxu1 %v7305_v29  ;;  %7204 = vmatprep.subr.bf16.mxu0 %v7203_v30  ;;  %v1102_v29 = vld [vmem:[%s13207_s1 + $0x19d0] sm:$0xff]  ;;  %v289_v30 = vld [vmem:[%s13207_s1 + $0x68] sm:$0xff]  ;;  %v8223_v2 = vld [vmem:[%s8879_s23 + $0x120] sm:$0xff] }
 0x279   : > { %3374 = vmatmul.mubr.f32.gmra.mrb[144].mxu0 %v8221_v28  ;;  %7308 = vmatprep.subr.bf16.mxu1 %v7307_v54  ;;  %v307_v54 = vld [vmem:[%s13207_s1 + $0xf8] sm:$0xff]  ;;  %v7313_v8 = vpack.c.bf16 %v1102_v29, %v1086_v10  ;;  %v7315_v48 = vpack.c.bf16 %v305_v32, %v289_v30  ;;  %v8229_v60 = vld [vmem:[%s8879_s23 + $0x180] sm:$0xff]  ;;  %v8230_v10 = vld [vmem:[%s8879_s23 + $0x1a8] sm:$0xff] }
 0x27a   : > { %3888 = vmatmul.mubr.f32.gmra.mrb[144].mxu1 %v8221_v28  ;;  %3379 = vmatprep.mubr.f32.mxu0 %v8222_v14  ;;  %v7419_v42 = vpack.c.bf16 %v307_v54, %v291_v20  ;;  %v8224_v28 = vld [vmem:[%s8879_s23 + $0x148] sm:$0xff]  ;;  %v8233_v30 = vld [vmem:[%s8879_s23 + $0x1c0] sm:$0xff] }
 0x27b   : > { %3893 = vmatprep.mubr.f32.mxu1 %v8222_v14  ;;  %7206 = vmatpush1.bf16.msra.mxu0 %v7205_v4  ;;  %v8225_v4 = vld [vmem:[%s8879_s23 + $0x140] sm:$0xff]  ;;  %v8232_v29 = vld [vmem:[%s8879_s23 + $0x1c8] sm:$0xff] }
 0x27c   : > { %7310 = vmatpush1.bf16.msra.mxu1 %v7309_v56  ;;  %7208 = vmatprep.subr.bf16.mxu0 %v7207_v36  ;;  %v8226_v56 = vld [vmem:[%s8879_s23 + $0x168] sm:$0xff]  ;;  %v8227_v36 = vld [vmem:[%s8879_s23 + $0x160] sm:$0xff] }
 0x27d   : > { %3380 = vmatmul.mubr.f32.gmra.mrb[146].mxu0 %v8223_v2  ;;  %7312 = vmatprep.subr.bf16.mxu1 %v7311_v62  ;;  %v8231_v62 = vld [vmem:[%s8879_s23 + $0x1a0] sm:$0xff]  ;;  %v8234_v32 = vld [vmem:[%s8879_s23 + $0x1e8] sm:$0xff] }
 0x27e   : > { %3894 = vmatmul.mubr.f32.gmra.mrb[146].mxu1 %v8223_v2  ;;  %3385 = vmatprep.mubr.f32.mxu0 %v8224_v28  ;;  %v8235_v14 = vld [vmem:[%s8879_s23 + $0x1e0] sm:$0xff]  ;;  %v8236_v20 = vld [vmem:[%s8879_s23 + $0x208] sm:$0xff] }
 0x27f   : > { %3899 = vmatprep.mubr.f32.mxu1 %v8224_v28  ;;  %7210 = vmatpush1.bf16.msra.mxu0 %v7209_v50  ;;  %v8237_v54 = vld [vmem:[%s8879_s23 + $0x200] sm:$0xff]  ;;  %v8238_v50 = vld [vmem:[%s8879_s23 + $0x228] sm:$0xff] }
 0x280   : > { %7314 = vmatpush1.bf16.msra.mxu1 %v7313_v8  ;;  %7316 = vmatprep.subr.bf16.mxu0 %v7315_v48  ;;  %v8239_v8 = vld [vmem:[%s8879_s23 + $0x220] sm:$0xff]  ;;  %v8240_v48 = vld [vmem:[%s8879_s23 + $0x248] sm:$0xff] }
 0x281   : > { %3386 = vmatmul.mubr.f32.gmra.mrb[148].mxu0 %v8225_v4  ;;  %7420 = vmatprep.subr.bf16.mxu1 %v7419_v42  ;;  %v8241_v2 = vld [vmem:[%s8879_s23 + $0x240] sm:$0xff]  ;;  %v8242_v42 = vld [vmem:[%s8879_s23 + $0x268] sm:$0xff] }
 0x282   : > { %3900 = vmatmul.mubr.f32.gmra.mrb[148].mxu1 %v8225_v4  ;;  %3391 = vmatprep.mubr.f32.mxu0 %v8226_v56  ;;  %v8243_v28 = vld [vmem:[%s8879_s23 + $0x260] sm:$0xff]  ;;  %v8244_v4 = vld [vmem:[%s8879_s23 + $0x288] sm:$0xff] }
 0x283   : > { %3905 = vmatprep.mubr.f32.mxu1 %v8226_v56  ;;  %v8245_v56 = vld [vmem:[%s8879_s23 + $0x280] sm:$0xff] }
 0x285   : > { %3392 = vmatmul.mubr.f32.gmra.mrb[150].mxu0 %v8227_v36 }
 0x286   : > { %3906 = vmatmul.mubr.f32.gmra.mrb[150].mxu1 %v8227_v36  ;;  %3397 = vmatprep.mubr.f32.mxu0 %v8228_v22  ;;  %v8246_v36 = vld [vmem:[%s8879_s23 + $0x2a8] sm:$0xff] }
 0x287   : > { %3911 = vmatprep.mubr.f32.mxu1 %v8228_v22 }
 0x289   : > { %3398 = vmatmul.mubr.f32.gmra.mrb[152].mxu0 %v8229_v60 }
 0x28a   : > { %3912 = vmatmul.mubr.f32.gmra.mrb[152].mxu1 %v8229_v60  ;;  %3403 = vmatprep.mubr.f32.mxu0 %v8230_v10 }
 0x28b   : > { %3917 = vmatprep.mubr.f32.mxu1 %v8230_v10 }
 0x28d   : > { %3404 = vmatmul.mubr.f32.gmra.mrb[154].mxu0 %v8231_v62 }
 0x28e   : > { %3918 = vmatmul.mubr.f32.gmra.mrb[154].mxu1 %v8231_v62  ;;  %3409 = vmatprep.mubr.f32.mxu0 %v8232_v29  ;;  %v8247_v62 = vld [vmem:[%s8879_s23 + $0x2a0] sm:$0xff] }
 0x28f   : > { %3923 = vmatprep.mubr.f32.mxu1 %v8232_v29 }
 0x291   : > { %3410 = vmatmul.mubr.f32.gmra.mrb[156].mxu0 %v8233_v30 }
 0x292   : > { %3924 = vmatmul.mubr.f32.gmra.mrb[156].mxu1 %v8233_v30  ;;  %3415 = vmatprep.mubr.f32.mxu0 %v8234_v32  ;;  %v8248_v30 = vld [vmem:[%s8879_s23 + $0x2c8] sm:$0xff] }
 0x293   : > { %3929 = vmatprep.mubr.f32.mxu1 %v8234_v32 }
 0x295   : > { %3416 = vmatmul.mubr.f32.gmra.mrb[158].mxu0 %v8235_v14 }
 0x296   : > { %3930 = vmatmul.mubr.f32.gmra.mrb[158].mxu1 %v8235_v14  ;;  %3421 = vmatprep.mubr.f32.mxu0 %v8236_v20 }
 0x297   : > { %3935 = vmatprep.mubr.f32.mxu1 %v8236_v20 }
 0x299   : > { %3422 = vmatmul.mubr.f32.gmra.mrb[160].mxu0 %v8237_v54 }
 0x29a   : > { %3936 = vmatmul.mubr.f32.gmra.mrb[160].mxu1 %v8237_v54  ;;  %3427 = vmatprep.mubr.f32.mxu0 %v8238_v50  ;;  %v8249_v54 = vld [vmem:[%s8879_s23 + $0x2c0] sm:$0xff] }
 0x29b   : > { %3941 = vmatprep.mubr.f32.mxu1 %v8238_v50 }
 0x29d   : > { %3428 = vmatmul.mubr.f32.gmra.mrb[162].mxu0 %v8239_v8 }
 0x29e   : > { %3942 = vmatmul.mubr.f32.gmra.mrb[162].mxu1 %v8239_v8  ;;  %3433 = vmatprep.mubr.f32.mxu0 %v8240_v48  ;;  %v8250_v8 = vld [vmem:[%s8879_s23 + $0x2e8] sm:$0xff] }
 0x29f   : > { %3947 = vmatprep.mubr.f32.mxu1 %v8240_v48 }
 0x2a1   : > { %3434 = vmatmul.mubr.f32.gmra.mrb[164].mxu0 %v8241_v2 }
 0x2a2   : > { %3948 = vmatmul.mubr.f32.gmra.mrb[164].mxu1 %v8241_v2  ;;  %3439 = vmatprep.mubr.f32.mxu0 %v8242_v42 }
 0x2a3   : > { %3953 = vmatprep.mubr.f32.mxu1 %v8242_v42 }
 0x2a5   : > { %3440 = vmatmul.mubr.f32.gmra.mrb[166].mxu0 %v8243_v28 }
 0x2a6   : > { %3954 = vmatmul.mubr.f32.gmra.mrb[166].mxu1 %v8243_v28  ;;  %3445 = vmatprep.mubr.f32.mxu0 %v8244_v4  ;;  %v8251_v28 = vld [vmem:[%s8879_s23 + $0x2e0] sm:$0xff] }
 0x2a7   : > { %3959 = vmatprep.mubr.f32.mxu1 %v8244_v4 }
 0x2a9   : > { %3446 = vmatmul.mubr.f32.gmra.mrb[168].mxu0 %v8245_v56 }
 0x2aa   : > { %3960 = vmatmul.mubr.f32.gmra.mrb[168].mxu1 %v8245_v56  ;;  %3451 = vmatprep.mubr.f32.mxu0 %v8246_v36  ;;  %v8252_v56 = vld [vmem:[%s8879_s23 + $0x308] sm:$0xff] }
 0x2ab   : > { %3965 = vmatprep.mubr.f32.mxu1 %v8246_v36 }
 0x2ac   : > { %v11172_v22 = vpop.f32.mrb[64].mxu0 }
 0x2ad   : > { %13298 = vst [vmem:[#allocation91_spill] sm:$0xff] %v11172_v22  ;;  %v11174_v60 = vpop.f32.mrb[64].mxu1  ;;  %v11176_v10 = vpop.f32.mrb[65].mxu0  ;;  %3452 = vmatmul.mubr.f32.gmra.mrb[170].mxu0 %v8247_v62  ;;  %v400_v22 = vld [vmem:[%s13207_s1 + $0x3e0] sm:$0xff] }
 0x2ae   : > { %13299 = vst [vmem:[#allocation92_spill] sm:$0xff] %v11174_v60  ;;  %13300 = vst [vmem:[#allocation93_spill] sm:$0xff] %v11176_v10  ;;  %v11179_v29 = vpop.f32.mrb[65].mxu1  ;;  %3966 = vmatmul.mubr.f32.gmra.mrb[170].mxu1 %v8247_v62  ;;  %3457 = vmatprep.mubr.f32.mxu0 %v8248_v30  ;;  %v384_v60 = vld [vmem:[%s13207_s1 + $0x360] sm:$0xff] }
 0x2af   : > { %13301 = vst [vmem:[#allocation94_spill] sm:$0xff] %v11179_v29  ;;  %3971 = vmatprep.mubr.f32.mxu1 %v8248_v30 }
 0x2b0   : > { %v11182_v32 = vpop.f32.mrb[66].mxu0 }
 0x2b1   : > { %13302 = vst [vmem:[#allocation95_spill] sm:$0xff] %v11182_v32  ;;  %v11184_v14 = vpop.f32.mrb[66].mxu1  ;;  %v11186_v20 = vpop.f32.mrb[67].mxu0  ;;  %3458 = vmatmul.mubr.f32.gmra.mrb[172].mxu0 %v8249_v54 }
 0x2b2   : > { %13303 = vst [vmem:[#allocation96_spill] sm:$0xff] %v11184_v14  ;;  %13304 = vst [vmem:[#allocation97_spill] sm:$0xff] %v11186_v20  ;;  %v11189_v50 = vpop.f32.mrb[67].mxu1  ;;  %3972 = vmatmul.mubr.f32.gmra.mrb[172].mxu1 %v8249_v54  ;;  %3463 = vmatprep.mubr.f32.mxu0 %v8250_v8  ;;  %v8253_v54 = vld [vmem:[%s8879_s23 + $0x300] sm:$0xff] }
 0x2b3   : > { %13305 = vst [vmem:[#allocation98_spill] sm:$0xff] %v11189_v50  ;;  %3977 = vmatprep.mubr.f32.mxu1 %v8250_v8  ;;  %v339_v50 = vld [vmem:[%s13207_s1 + $0x1f8] sm:$0xff] }
 0x2b4   : > { %v11192_v48 = vpop.f32.mrb[68].mxu0 }
 0x2b5   : > { %13306 = vst [vmem:[#allocation99_spill] sm:$0xff] %v11192_v48  ;;  %v11194_v2 = vpop.f32.mrb[68].mxu1  ;;  %v11196_v42 = vpop.f32.mrb[69].mxu0  ;;  %3464 = vmatmul.mubr.f32.gmra.mrb[174].mxu0 %v8251_v28  ;;  %v8268_v48 = vld [vmem:[%s8879_s23 + $0x18] sm:$0xff] }
 0x2b6   : > { %13307 = vst [vmem:[#allocation100_spill] sm:$0xff] %v11194_v2  ;;  %13308 = vst [vmem:[#allocation101_spill] sm:$0xff] %v11196_v42  ;;  %v11199_v4 = vpop.f32.mrb[69].mxu1  ;;  %3978 = vmatmul.mubr.f32.gmra.mrb[174].mxu1 %v8251_v28  ;;  %3469 = vmatprep.mubr.f32.mxu0 %v8252_v56  ;;  %v8254_v42 = vld [vmem:[%s8879_s23 + $0x328] sm:$0xff] }
 0x2b7   : > { %13309 = vst [vmem:[#allocation102_spill] sm:$0xff] %v11199_v4  ;;  %3983 = vmatprep.mubr.f32.mxu1 %v8252_v56 }
 0x2b8   : > { %v11202_v36 = vpop.f32.mrb[70].mxu0 }
 0x2b9   : > { %13310 = vst [vmem:[#allocation103_spill] sm:$0xff] %v11202_v36  ;;  %v11204_v62 = vpop.f32.mrb[70].mxu1  ;;  %v11206_v30 = vpop.f32.mrb[71].mxu0  ;;  %3470 = vmatmul.mubr.f32.gmra.mrb[176].mxu0 %v8253_v54 }
 0x2ba   : > { %13311 = vst [vmem:[#allocation104_spill] sm:$0xff] %v11204_v62  ;;  %13312 = vst [vmem:[#allocation105_spill] sm:$0xff] %v11206_v30  ;;  %v11209_v8 = vpop.f32.mrb[71].mxu1  ;;  %3984 = vmatmul.mubr.f32.gmra.mrb[176].mxu1 %v8253_v54  ;;  %3475 = vmatprep.mubr.f32.mxu0 %v8254_v42  ;;  %v8255_v62 = vld [vmem:[%s8879_s23 + $0x320] sm:$0xff]  ;;  %v8256_v30 = vld [vmem:[%s8879_s23 + $0x348] sm:$0xff] }
 0x2bb   : > { %13313 = vst [vmem:[#allocation106_spill] sm:$0xff] %v11209_v8  ;;  %3989 = vmatprep.mubr.f32.mxu1 %v8254_v42 }
 0x2bc   : > { %v11212_v28 = vpop.f32.mrb[72].mxu0 }
 0x2bd   : > { %13314 = vst [vmem:[#allocation107_spill] sm:$0xff] %v11212_v28  ;;  %v11214_v4 = vpop.f32.mrb[72].mxu1  ;;  %v11216_v56 = vpop.f32.mrb[73].mxu0  ;;  %3476 = vmatmul.mubr.f32.gmra.mrb[178].mxu0 %v8255_v62 }
 0x2be   : > { %13315 = vst [vmem:[#allocation108_spill] sm:$0xff] %v11214_v4  ;;  %13316 = vst [vmem:[#allocation109_spill] sm:$0xff] %v11216_v56  ;;  %v11219_v36 = vpop.f32.mrb[73].mxu1  ;;  %3990 = vmatmul.mubr.f32.gmra.mrb[178].mxu1 %v8255_v62  ;;  %3481 = vmatprep.mubr.f32.mxu0 %v8256_v30  ;;  %v8257_v4 = vld [vmem:[%s8879_s23 + $0x340] sm:$0xff]  ;;  %v8258_v56 = vld [vmem:[%s8879_s23 + $0x368] sm:$0xff] }
 0x2bf   : > { %13317 = vst [vmem:[#allocation110_spill] sm:$0xff] %v11219_v36  ;;  %3995 = vmatprep.mubr.f32.mxu1 %v8256_v30 }
 0x2c0   : > { %v11222_v54 = vpop.f32.mrb[74].mxu0 }
 0x2c1   : > { %13318 = vst [vmem:[#allocation111_spill] sm:$0xff] %v11222_v54  ;;  %v11224_v8 = vpop.f32.mrb[74].mxu1  ;;  %v11226_v42 = vpop.f32.mrb[75].mxu0  ;;  %3482 = vmatmul.mubr.f32.gmra.mrb[180].mxu0 %v8257_v4 }
 0x2c2   : > { %13319 = vst [vmem:[#allocation112_spill] sm:$0xff] %v11224_v8  ;;  %13320 = vst [vmem:[#allocation113_spill] sm:$0xff] %v11226_v42  ;;  %v11229_v28 = vpop.f32.mrb[75].mxu1  ;;  %3996 = vmatmul.mubr.f32.gmra.mrb[180].mxu1 %v8257_v4  ;;  %3487 = vmatprep.mubr.f32.mxu0 %v8258_v56  ;;  %v8259_v8 = vld [vmem:[%s8879_s23 + $0x360] sm:$0xff]  ;;  %v8260_v42 = vld [vmem:[%s8879_s23 + $0x388] sm:$0xff] }
 0x2c3   : > { %13321 = vst [vmem:[#allocation114_spill] sm:$0xff] %v11229_v28  ;;  %4001 = vmatprep.mubr.f32.mxu1 %v8258_v56 }
 0x2c4   : > { %v11232_v62 = vpop.f32.mrb[76].mxu0 }
 0x2c5   : > { %13322 = vst [vmem:[#allocation115_spill] sm:$0xff] %v11232_v62  ;;  %v11234_v36 = vpop.f32.mrb[76].mxu1  ;;  %v11236_v30 = vpop.f32.mrb[77].mxu0  ;;  %3488 = vmatmul.mubr.f32.gmra.mrb[182].mxu0 %v8259_v8 }
 0x2c6   : > { %13323 = vst [vmem:[#allocation116_spill] sm:$0xff] %v11234_v36  ;;  %13324 = vst [vmem:[#allocation117_spill] sm:$0xff] %v11236_v30  ;;  %v11239_v54 = vpop.f32.mrb[77].mxu1  ;;  %4002 = vmatmul.mubr.f32.gmra.mrb[182].mxu1 %v8259_v8  ;;  %3493 = vmatprep.mubr.f32.mxu0 %v8260_v42  ;;  %v8261_v36 = vld [vmem:[%s8879_s23 + $0x380] sm:$0xff]  ;;  %v8262_v30 = vld [vmem:[%s8879_s23 + $0x3a8] sm:$0xff] }
 0x2c7   : > { %13325 = vst [vmem:[#allocation118_spill] sm:$0xff] %v11239_v54  ;;  %4007 = vmatprep.mubr.f32.mxu1 %v8260_v42 }
 0x2c8   : > { %v11242_v4 = vpop.f32.mrb[78].mxu0 }
 0x2c9   : > { %13326 = vst [vmem:[#allocation119_spill] sm:$0xff] %v11242_v4  ;;  %v11244_v28 = vpop.f32.mrb[78].mxu1  ;;  %v11246_v56 = vpop.f32.mrb[79].mxu0  ;;  %3494 = vmatmul.mubr.f32.gmra.mrb[184].mxu0 %v8261_v36 }
 0x2ca   : > { %13327 = vst [vmem:[#allocation120_spill] sm:$0xff] %v11244_v28  ;;  %13328 = vst [vmem:[#allocation121_spill] sm:$0xff] %v11246_v56  ;;  %v11249_v62 = vpop.f32.mrb[79].mxu1  ;;  %4008 = vmatmul.mubr.f32.gmra.mrb[184].mxu1 %v8261_v36  ;;  %3499 = vmatprep.mubr.f32.mxu0 %v8262_v30  ;;  %v8263_v28 = vld [vmem:[%s8879_s23 + $0x3a0] sm:$0xff]  ;;  %v8264_v56 = vld [vmem:[%s8879_s23 + $0x3c8] sm:$0xff] }
 0x2cb   : > { %13329 = vst [vmem:[#allocation122_spill] sm:$0xff] %v11249_v62  ;;  %4013 = vmatprep.mubr.f32.mxu1 %v8262_v30 }
 0x2cc   : > { %v11252_v8 = vpop.f32.mrb[80].mxu0 }
 0x2cd   : > { %13330 = vst [vmem:[#allocation123_spill] sm:$0xff] %v11252_v8  ;;  %v11254_v54 = vpop.f32.mrb[80].mxu1  ;;  %v11256_v42 = vpop.f32.mrb[81].mxu0  ;;  %3500 = vmatmul.mubr.f32.gmra.mrb[186].mxu0 %v8263_v28  ;;  %v8265_v8 = vld [vmem:[%s8879_s23 + $0x3c0] sm:$0xff] }
 0x2ce   : > { %13331 = vst [vmem:[#allocation124_spill] sm:$0xff] %v11254_v54  ;;  %13332 = vst [vmem:[#allocation125_spill] sm:$0xff] %v11256_v42  ;;  %v11259_v4 = vpop.f32.mrb[81].mxu1  ;;  %4014 = vmatmul.mubr.f32.gmra.mrb[186].mxu1 %v8263_v28  ;;  %3505 = vmatprep.mubr.f32.mxu0 %v8264_v56  ;;  %v8266_v42 = vld [vmem:[%s8879_s23 + $0x3e8] sm:$0xff]  ;;  %v288_v28 = vld [vmem:[%s13207_s1 + $0x60] sm:$0xff] }
 0x2cf   : > { %13333 = vst [vmem:[#allocation126_spill] sm:$0xff] %v11259_v4  ;;  %4019 = vmatprep.mubr.f32.mxu1 %v8264_v56  ;;  %v304_v56 = vld [vmem:[%s13207_s1 + $0xe0] sm:$0xff]  ;;  %v321_v4 = vld [vmem:[%s13207_s1 + $0x168] sm:$0xff] }
 0x2d0   : > { %v11262_v36 = vpop.f32.mrb[82].mxu0 }
 0x2d1   : > { %13334 = vst [vmem:[#allocation127_spill] sm:$0xff] %v11262_v36  ;;  %v11264_v62 = vpop.f32.mrb[82].mxu1  ;;  %v11266_v30 = vpop.f32.mrb[83].mxu0  ;;  %3506 = vmatmul.mubr.f32.gmra.mrb[188].mxu0 %v8265_v8  ;;  %v8267_v36 = vld [vmem:[%s8879_s23 + $0x3e0] sm:$0xff] }
 0x2d2   : > { %13335 = vst [vmem:[#allocation128_spill] sm:$0xff] %v11264_v62  ;;  %13336 = vst [vmem:[#allocation129_spill] sm:$0xff] %v11266_v30  ;;  %v11269_v54 = vpop.f32.mrb[83].mxu1  ;;  %4020 = vmatmul.mubr.f32.gmra.mrb[188].mxu1 %v8265_v8  ;;  %3511 = vmatprep.mubr.f32.mxu0 %v8266_v42  ;;  %v290_v30 = vld [vmem:[%s13207_s1 + $0x70] sm:$0xff] }
 0x2d3   : > { %13337 = vst [vmem:[#allocation130_spill] sm:$0xff] %v11269_v54  ;;  %4025 = vmatprep.mubr.f32.mxu1 %v8266_v42  ;;  %v306_v8 = vld [vmem:[%s13207_s1 + $0xf0] sm:$0xff] }
 0x2d4   : > { %v11278_v62 = vpop.f32.mrb[84].mxu0  ;;  %v7421_v20 = vpack.c.bf16 %v306_v8, %v290_v30  ;;  %v8269_v30 = vld [vmem:[%s8879_s23 + $0x10] sm:$0xff]  ;;  %v353_v8 = vld [vmem:[%s13207_s1 + $0x268] sm:$0xff] }
 0x2d5   : > { %13338 = vst [vmem:[#allocation131_spill] sm:$0xff] %v11278_v62  ;;  %v11286_v54 = vpop.f32.mrb[84].mxu1  ;;  %v11288_v42 = vpop.f32.mrb[85].mxu0  ;;  %3512 = vmatmul.mubr.f32.gmra.mrb[190].mxu0 %v8267_v36  ;;  %v337_v62 = vld [vmem:[%s13207_s1 + $0x1e8] sm:$0xff] }
 0x2d6   : > { %13339 = vst [vmem:[#allocation132_spill] sm:$0xff] %v11286_v54  ;;  %13340 = vst [vmem:[#allocation133_spill] sm:$0xff] %v11288_v42  ;;  %v11297_v2 = vpop.f32.mrb[85].mxu1  ;;  %4026 = vmatmul.mubr.f32.gmra.mrb[190].mxu1 %v8267_v36  ;;  %6554 = vmatprep.mubr.msk.f32.mxu0 %vm1108_vm0, %v8268_v48  ;;  %v7317_v54 = vpack.c.bf16 %v304_v56, %v288_v28  ;;  %v323_v42 = vld [vmem:[%s13207_s1 + $0x178] sm:$0xff]  ;;  %v320_v36 = vld [vmem:[%s13207_s1 + $0x160] sm:$0xff] }
 0x2d7   : > { %13341 = vst [vmem:[#allocation134_spill] sm:$0xff] %v11297_v2  ;;  %6586 = vmatprep.mubr.msk.f32.mxu1 %vm1108_vm0, %v8268_v48  ;;  %v7319_v2 = vpack.c.bf16 %v337_v62, %v321_v4  ;;  %v336_v28 = vld [vmem:[%s13207_s1 + $0x1e0] sm:$0xff]  ;;  %v322_v56 = vld [vmem:[%s13207_s1 + $0x170] sm:$0xff]  ;;  %v7423_v62 = vpack.c.bf16 %v339_v50, %v323_v42  ;;  %v355_v50 = vld [vmem:[%s13207_s1 + $0x278] sm:$0xff] }
 0x2d8   : > { %v11308_v14 = vpop.f32.mrb[86].mxu0  ;;  %v338_v4 = vld [vmem:[%s13207_s1 + $0x1f0] sm:$0xff]  ;;  %v371_v42 = vld [vmem:[%s13207_s1 + $0x2f8] sm:$0xff] }
 0x2d9   : > { %13342 = vst [vmem:[#allocation135_spill] sm:$0xff] %v11308_v14  ;;  %v11319_v32 = vpop.f32.mrb[86].mxu1  ;;  %v11321_v48 = vpop.f32.mrb[87].mxu0  ;;  %3583 = vmatmul.mubr.f32.vlgmr.msra.gmra.mrb[128].mxu0 %v8269_v30  ;;  %v369_v14 = vld [vmem:[%s13207_s1 + $0x2e8] sm:$0xff] }
 0x2da   : > { %13343 = vst [vmem:[#allocation136_spill] sm:$0xff] %v11319_v32  ;;  %13344 = vst [vmem:[#allocation137_spill] sm:$0xff] %v11321_v48  ;;  %v11333_v29 = vpop.f32.mrb[87].mxu1  ;;  %4097 = vmatmul.mubr.f32.vlgmr.msra.gmra.mrb[128].mxu1 %v8269_v30  ;;  %7318 = vmatpush1.bf16.msra.mxu0 %v7317_v54  ;;  %v8270_v48 = vld [vmem:[%s8879_s23 + $0x38] sm:$0xff]  ;;  %v7321_v32 = vpack.c.bf16 %v336_v28, %v320_v36  ;;  %v7425_v54 = vpack.c.bf16 %v338_v4, %v322_v56  ;;  %v354_v36 = vld [vmem:[%s13207_s1 + $0x270] sm:$0xff] }
 0x2db   : > { %13345 = vst [vmem:[#allocation138_spill] sm:$0xff] %v11333_v29  ;;  %7422 = vmatpush1.bf16.msra.mxu1 %v7421_v20  ;;  %6555 = vmatprep.mubr.msk.f32.mxu0 %vm1108_vm0, %v8270_v48  ;;  %v7323_v30 = vpack.c.bf16 %v369_v14, %v353_v8  ;;  %v352_v29 = vld [vmem:[%s13207_s1 + $0x260] sm:$0xff]  ;;  %v7427_v14 = vpack.c.bf16 %v371_v42, %v355_v50  ;;  %v370_v56 = vld [vmem:[%s13207_s1 + $0x2f0] sm:$0xff]  ;;  %v401_v4 = vld [vmem:[%s13207_s1 + $0x3e8] sm:$0xff] }
 0x2dc   : > { %v11343_v10 = vpop.f32.mrb[88].mxu0  ;;  %6587 = vmatprep.mubr.msk.f32.mxu1 %vm1108_vm0, %v8270_v48  ;;  %7320 = vmatprep.subr.bf16.mxu0 %v7319_v2  ;;  %v368_v20 = vld [vmem:[%s13207_s1 + $0x2e0] sm:$0xff]  ;;  %v8271_v2 = vld [vmem:[%s8879_s23 + $0x30] sm:$0xff]  ;;  %v385_v48 = vld [vmem:[%s13207_s1 + $0x368] sm:$0xff] }
 0x2dd   : > { %13346 = vst [vmem:[#allocation139_spill] sm:$0xff] %v11343_v10  ;;  %v11355_v28 = vpop.f32.mrb[88].mxu1  ;;  %v11357_v10 = vpop.f32.mrb[89].mxu0  ;;  %3589 = vmatmul.mubr.f32.gmra.mrb[130].mxu0 %v8271_v2  ;;  %7424 = vmatprep.subr.bf16.mxu1 %v7423_v62  ;;  %v387_v62 = vld [vmem:[%s13207_s1 + $0x378] sm:$0xff]  ;;  %v7325_v42 = vpack.c.bf16 %v368_v20, %v352_v29  ;;  %v402_v20 = vld [vmem:[%s13207_s1 + $0x3f0] sm:$0xff] }
 0x2de   : > { %13347 = vst [vmem:[#allocation140_spill] sm:$0xff] %v11355_v28  ;;  %13348 = vst [vmem:[#allocation141_spill] sm:$0xff] %v11357_v10  ;;  %v11369_v8 = vpop.f32.mrb[89].mxu1  ;;  %4103 = vmatmul.mubr.f32.gmra.mrb[130].mxu1 %v8271_v2  ;;  %v8272_v10 = vld [vmem:[%s8879_s23 + $0x58] sm:$0xff]  ;;  %7322 = vmatpush1.bf16.msra.mxu0 %v7321_v32  ;;  %v7429_v2 = vpack.c.bf16 %v370_v56, %v354_v36  ;;  %v417_v36 = vld [vmem:[%s13207_s1 + $0x468] sm:$0xff] }
 0x2df   : > { %13349 = vst [vmem:[#allocation142_spill] sm:$0xff] %v11369_v8  ;;  %6556 = vmatprep.mubr.msk.f32.mxu0 %vm1108_vm0, %v8272_v10  ;;  %v403_v50 = vld [vmem:[%s13207_s1 + $0x3f8] sm:$0xff]  ;;  %6588 = vmatprep.mubr.msk.f32.mxu1 %vm1108_vm0, %v8272_v10  ;;  %v7327_v8 = vpack.c.bf16 %v401_v4, %v385_v48  ;;  %v386_v10 = vld [vmem:[%s13207_s1 + $0x370] sm:$0xff]  ;;  %v433_v56 = vld [vmem:[%s13207_s1 + $0x4e8] sm:$0xff] }
 0x2e0   : > { %v11380_v28 = vpop.f32.mrb[90].mxu0  ;;  %7426 = vmatpush1.bf16.msra.mxu1 %v7425_v54  ;;  %7324 = vmatprep.subr.bf16.mxu0 %v7323_v30  ;;  %v8273_v54 = vld [vmem:[%s8879_s23 + $0x50] sm:$0xff]  ;;  %v7431_v30 = vpack.c.bf16 %v403_v50, %v387_v62  ;;  %v8274_v4 = vld [vmem:[%s8879_s23 + $0x78] sm:$0xff]  ;;  %v7329_v50 = vpack.c.bf16 %v400_v22, %v384_v60 }
 0x2e1   : > { %13350 = vst [vmem:[#allocation143_spill] sm:$0xff] %v11380_v28  ;;  %v11391_v29 = vpop.f32.mrb[90].mxu1  ;;  %v11393_v32 = vpop.f32.mrb[91].mxu0  ;;  %3595 = vmatmul.mubr.f32.gmra.mrb[132].mxu0 %v8273_v54  ;;  %7428 = vmatprep.subr.bf16.mxu1 %v7427_v14  ;;  %v419_v14 = vld [vmem:[%s13207_s1 + $0x478] sm:$0xff]  ;;  %v432_v28 = vld [vmem:[%s13207_s1 + $0x4e0] sm:$0xff] }
 0x2e2   : > { %13351 = vst [vmem:[#allocation144_spill] sm:$0xff] %v11391_v29  ;;  %13352 = vst [vmem:[#allocation145_spill] sm:$0xff] %v11393_v32  ;;  %v11405_v48 = vpop.f32.mrb[91].mxu1  ;;  %4109 = vmatmul.mubr.f32.gmra.mrb[132].mxu1 %v8273_v54  ;;  %6557 = vmatprep.mubr.msk.f32.mxu0 %vm1108_vm0, %v8274_v4  ;;  %v435_v62 = vld [vmem:[%s13207_s1 + $0x4f8] sm:$0xff]  ;;  %v7433_v54 = vpack.c.bf16 %v402_v20, %v386_v10  ;;  %v416_v29 = vld [vmem:[%s13207_s1 + $0x460] sm:$0xff] }
 0x2e3   : > { %13353 = vst [vmem:[#allocation146_spill] sm:$0xff] %v11405_v48  ;;  %6589 = vmatprep.mubr.msk.f32.mxu1 %vm1108_vm0, %v8274_v4  ;;  %7326 = vmatpush1.bf16.msra.mxu0 %v7325_v42  ;;  %v7331_v48 = vpack.c.bf16 %v433_v56, %v417_v36  ;;  %v418_v42 = vld [vmem:[%s13207_s1 + $0x470] sm:$0xff]  ;;  %v449_v20 = vld [vmem:[%s13207_s1 + $0x568] sm:$0xff]  ;;  %v8276_v4 = vld [vmem:[%s8879_s23 + $0x98] sm:$0xff] }
 0x2e4   : > { %v11416_v32 = vpop.f32.mrb[92].mxu0  ;;  %7430 = vmatpush1.bf16.msra.mxu1 %v7429_v2  ;;  %7328 = vmatprep.subr.bf16.mxu0 %v7327_v8  ;;  %v8275_v8 = vld [vmem:[%s8879_s23 + $0x70] sm:$0xff]  ;;  %v7435_v2 = vpack.c.bf16 %v435_v62, %v419_v14  ;;  %v465_v36 = vld [vmem:[%s13207_s1 + $0x5e8] sm:$0xff]  ;;  %v467_v14 = vld [vmem:[%s13207_s1 + $0x5f8] sm:$0xff]  ;;  %v7333_v62 = vpack.c.bf16 %v432_v28, %v416_v29 }
 0x2e5   : > { %13354 = vst [vmem:[#allocation147_spill] sm:$0xff] %v11416_v32  ;;  %v11427_v22 = vpop.f32.mrb[92].mxu1  ;;  %v11429_v60 = vpop.f32.mrb[93].mxu0  ;;  %3601 = vmatmul.mubr.f32.gmra.mrb[134].mxu0 %v8275_v8  ;;  %7432 = vmatprep.subr.bf16.mxu1 %v7431_v30  ;;  %v434_v10 = vld [vmem:[%s13207_s1 + $0x4f0] sm:$0xff]  ;;  %v451_v30 = vld [vmem:[%s13207_s1 + $0x578] sm:$0xff]  ;;  %v464_v32 = vld [vmem:[%s13207_s1 + $0x5e0] sm:$0xff] }
 0x2e6   : > { %13355 = vst [vmem:[#allocation148_spill] sm:$0xff] %v11427_v22  ;;  %13356 = vst [vmem:[#allocation149_spill] sm:$0xff] %v11429_v60  ;;  %v11441_v56 = vpop.f32.mrb[93].mxu1  ;;  %4115 = vmatmul.mubr.f32.gmra.mrb[134].mxu1 %v8275_v8  ;;  %6558 = vmatprep.mubr.msk.f32.mxu0 %vm1108_vm0, %v8276_v4  ;;  %v7437_v8 = vpack.c.bf16 %v434_v10, %v418_v42  ;;  %v448_v22 = vld [vmem:[%s13207_s1 + $0x560] sm:$0xff]  ;;  %v466_v42 = vld [vmem:[%s13207_s1 + $0x5f0] sm:$0xff] }
 0x2e7   : > { %13357 = vst [vmem:[#allocation150_spill] sm:$0xff] %v11441_v56  ;;  %6590 = vmatprep.mubr.msk.f32.mxu1 %vm1108_vm0, %v8276_v4  ;;  %7330 = vmatpush1.bf16.msra.mxu0 %v7329_v50  ;;  %v7335_v56 = vpack.c.bf16 %v465_v36, %v449_v20  ;;  %v450_v50 = vld [vmem:[%s13207_s1 + $0x570] sm:$0xff]  ;;  %v481_v10 = vld [vmem:[%s13207_s1 + $0x668] sm:$0xff]  ;;  %v8278_v4 = vld [vmem:[%s8879_s23 + $0xb8] sm:$0xff] }
 0x2e8   : > { %v11452_v60 = vpop.f32.mrb[94].mxu0  ;;  %7434 = vmatpush1.bf16.msra.mxu1 %v7433_v54  ;;  %7332 = vmatprep.subr.bf16.mxu0 %v7331_v48  ;;  %v8277_v48 = vld [vmem:[%s8879_s23 + $0x90] sm:$0xff]  ;;  %v7439_v54 = vpack.c.bf16 %v467_v14, %v451_v30  ;;  %v497_v20 = vld [vmem:[%s13207_s1 + $0x6e8] sm:$0xff]  ;;  %v499_v30 = vld [vmem:[%s13207_s1 + $0x6f8] sm:$0xff]  ;;  %v7337_v14 = vpack.c.bf16 %v464_v32, %v448_v22 }
 0x2e9   : > { %13358 = vst [vmem:[#allocation151_spill] sm:$0xff] %v11452_v60  ;;  %v11463_v28 = vpop.f32.mrb[94].mxu1  ;;  %v11465_v29 = vpop.f32.mrb[95].mxu0  ;;  %3607 = vmatmul.mubr.f32.gmra.mrb[136].mxu0 %v8277_v48  ;;  %7436 = vmatprep.subr.bf16.mxu1 %v7435_v2  ;;  %v483_v2 = vld [vmem:[%s13207_s1 + $0x678] sm:$0xff]  ;;  %v496_v60 = vld [vmem:[%s13207_s1 + $0x6e0] sm:$0xff] }
 0x2ea   : > { %13359 = vst [vmem:[#allocation152_spill] sm:$0xff] %v11463_v28  ;;  %13360 = vst [vmem:[#allocation153_spill] sm:$0xff] %v11465_v29  ;;  %v11477_v36 = vpop.f32.mrb[95].mxu1  ;;  %4121 = vmatmul.mubr.f32.gmra.mrb[136].mxu1 %v8277_v48  ;;  %6559 = vmatprep.mubr.msk.f32.mxu0 %vm1108_vm0, %v8278_v4  ;;  %v7441_v48 = vpack.c.bf16 %v466_v42, %v450_v50  ;;  %v480_v28 = vld [vmem:[%s13207_s1 + $0x660] sm:$0xff]  ;;  %v498_v50 = vld [vmem:[%s13207_s1 + $0x6f0] sm:$0xff] }
 0x2eb   : > { %13361 = vst [vmem:[#allocation154_spill] sm:$0xff] %v11477_v36  ;;  %6591 = vmatprep.mubr.msk.f32.mxu1 %vm1108_vm0, %v8278_v4  ;;  %7334 = vmatpush1.bf16.msra.mxu0 %v7333_v62  ;;  %v7339_v36 = vpack.c.bf16 %v497_v20, %v481_v10  ;;  %v482_v62 = vld [vmem:[%s13207_s1 + $0x670] sm:$0xff]  ;;  %v513_v42 = vld [vmem:[%s13207_s1 + $0x768] sm:$0xff]  ;;  %v8280_v4 = vld [vmem:[%s8879_s23 + $0xd8] sm:$0xff] }
 0x2ec   : > { %v11488_v29 = vpop.f32.mrb[96].mxu0  ;;  %7438 = vmatpush1.bf16.msra.mxu1 %v7437_v8  ;;  %7336 = vmatprep.subr.bf16.mxu0 %v7335_v56  ;;  %v8279_v56 = vld [vmem:[%s8879_s23 + $0xb0] sm:$0xff]  ;;  %v7443_v8 = vpack.c.bf16 %v499_v30, %v483_v2  ;;  %v529_v10 = vld [vmem:[%s13207_s1 + $0x7e8] sm:$0xff]  ;;  %v531_v2 = vld [vmem:[%s13207_s1 + $0x7f8] sm:$0xff]  ;;  %v7341_v30 = vpack.c.bf16 %v496_v60, %v480_v28 }
 0x2ed   : > { %13362 = vst [vmem:[#allocation155_spill] sm:$0xff] %v11488_v29  ;;  %v11499_v32 = vpop.f32.mrb[96].mxu1  ;;  %v11501_v22 = vpop.f32.mrb[97].mxu0  ;;  %3613 = vmatmul.mubr.f32.gmra.mrb[138].mxu0 %v8279_v56  ;;  %7440 = vmatprep.subr.bf16.mxu1 %v7439_v54  ;;  %v515_v54 = vld [vmem:[%s13207_s1 + $0x778] sm:$0xff]  ;;  %v528_v29 = vld [vmem:[%s13207_s1 + $0x7e0] sm:$0xff] }
 0x2ee   : > { %13363 = vst [vmem:[#allocation156_spill] sm:$0xff] %v11499_v32  ;;  %13364 = vst [vmem:[#allocation157_spill] sm:$0xff] %v11501_v22  ;;  %v11513_v20 = vpop.f32.mrb[97].mxu1  ;;  %4127 = vmatmul.mubr.f32.gmra.mrb[138].mxu1 %v8279_v56  ;;  %6560 = vmatprep.mubr.msk.f32.mxu0 %vm1108_vm0, %v8280_v4  ;;  %v7445_v56 = vpack.c.bf16 %v498_v50, %v482_v62  ;;  %v512_v32 = vld [vmem:[%s13207_s1 + $0x760] sm:$0xff]  ;;  %v530_v62 = vld [vmem:[%s13207_s1 + $0x7f0] sm:$0xff] }
 0x2ef   : > { %13365 = vst [vmem:[#allocation158_spill] sm:$0xff] %v11513_v20  ;;  %6592 = vmatprep.mubr.msk.f32.mxu1 %vm1108_vm0, %v8280_v4  ;;  %7338 = vmatpush1.bf16.msra.mxu0 %v7337_v14  ;;  %v7343_v20 = vpack.c.bf16 %v529_v10, %v513_v42  ;;  %v514_v14 = vld [vmem:[%s13207_s1 + $0x770] sm:$0xff]  ;;  %v545_v50 = vld [vmem:[%s13207_s1 + $0x868] sm:$0xff]  ;;  %v8282_v4 = vld [vmem:[%s8879_s23 + $0xf8] sm:$0xff] }
 0x2f0   : > { %v11524_v22 = vpop.f32.mrb[98].mxu0  ;;  %7442 = vmatpush1.bf16.msra.mxu1 %v7441_v48  ;;  %7340 = vmatprep.subr.bf16.mxu0 %v7339_v36  ;;  %v8281_v36 = vld [vmem:[%s8879_s23 + $0xd0] sm:$0xff]  ;;  %v7447_v48 = vpack.c.bf16 %v531_v2, %v515_v54  ;;  %v561_v42 = vld [vmem:[%s13207_s1 + $0x8e8] sm:$0xff]  ;;  %v563_v54 = vld [vmem:[%s13207_s1 + $0x8f8] sm:$0xff]  ;;  %v7345_v2 = vpack.c.bf16 %v528_v29, %v512_v32 }
 0x2f1   : > { %13366 = vst [vmem:[#allocation159_spill] sm:$0xff] %v11524_v22  ;;  %v11535_v60 = vpop.f32.mrb[98].mxu1  ;;  %v11537_v28 = vpop.f32.mrb[99].mxu0  ;;  %3619 = vmatmul.mubr.f32.gmra.mrb[140].mxu0 %v8281_v36  ;;  %7444 = vmatprep.subr.bf16.mxu1 %v7443_v8  ;;  %v547_v8 = vld [vmem:[%s13207_s1 + $0x878] sm:$0xff]  ;;  %v560_v22 = vld [vmem:[%s13207_s1 + $0x8e0] sm:$0xff] }
 0x2f2   : > { %13367 = vst [vmem:[#allocation160_spill] sm:$0xff] %v11535_v60  ;;  %13368 = vst [vmem:[#allocation161_spill] sm:$0xff] %v11537_v28  ;;  %v11549_v10 = vpop.f32.mrb[99].mxu1  ;;  %4133 = vmatmul.mubr.f32.gmra.mrb[140].mxu1 %v8281_v36  ;;  %6561 = vmatprep.mubr.msk.f32.mxu0 %vm1108_vm0, %v8282_v4  ;;  %v7449_v36 = vpack.c.bf16 %v530_v62, %v514_v14  ;;  %v544_v60 = vld [vmem:[%s13207_s1 + $0x860] sm:$0xff]  ;;  %v562_v14 = vld [vmem:[%s13207_s1 + $0x8f0] sm:$0xff] }
 0x2f3   : > { %13369 = vst [vmem:[#allocation162_spill] sm:$0xff] %v11549_v10  ;;  %6593 = vmatprep.mubr.msk.f32.mxu1 %vm1108_vm0, %v8282_v4  ;;  %7342 = vmatpush1.bf16.msra.mxu0 %v7341_v30  ;;  %v7347_v10 = vpack.c.bf16 %v561_v42, %v545_v50  ;;  %v546_v30 = vld [vmem:[%s13207_s1 + $0x870] sm:$0xff]  ;;  %v577_v62 = vld [vmem:[%s13207_s1 + $0x968] sm:$0xff]  ;;  %v8284_v4 = vld [vmem:[%s8879_s23 + $0x118] sm:$0xff] }
 0x2f4   : > { %v11560_v28 = vpop.f32.mrb[100].mxu0  ;;  %7446 = vmatpush1.bf16.msra.mxu1 %v7445_v56  ;;  %7344 = vmatprep.subr.bf16.mxu0 %v7343_v20  ;;  %v8283_v20 = vld [vmem:[%s8879_s23 + $0xf0] sm:$0xff]  ;;  %v7451_v56 = vpack.c.bf16 %v563_v54, %v547_v8  ;;  %v593_v50 = vld [vmem:[%s13207_s1 + $0x9e8] sm:$0xff]  ;;  %v595_v8 = vld [vmem:[%s13207_s1 + $0x9f8] sm:$0xff]  ;;  %v7349_v54 = vpack.c.bf16 %v560_v22, %v544_v60 }
 0x2f5   : > { %13370 = vst [vmem:[#allocation163_spill] sm:$0xff] %v11560_v28  ;;  %v11571_v29 = vpop.f32.mrb[100].mxu1  ;;  %v11573_v32 = vpop.f32.mrb[101].mxu0  ;;  %3625 = vmatmul.mubr.f32.gmra.mrb[142].mxu0 %v8283_v20  ;;  %7448 = vmatprep.subr.bf16.mxu1 %v7447_v48  ;;  %v579_v48 = vld [vmem:[%s13207_s1 + $0x978] sm:$0xff]  ;;  %v592_v28 = vld [vmem:[%s13207_s1 + $0x9e0] sm:$0xff] }
 0x2f6   : > { %13371 = vst [vmem:[#allocation164_spill] sm:$0xff] %v11571_v29  ;;  %13372 = vst [vmem:[#allocation165_spill] sm:$0xff] %v11573_v32  ;;  %v11585_v42 = vpop.f32.mrb[101].mxu1  ;;  %4139 = vmatmul.mubr.f32.gmra.mrb[142].mxu1 %v8283_v20  ;;  %6562 = vmatprep.mubr.msk.f32.mxu0 %vm1108_vm0, %v8284_v4  ;;  %v7453_v20 = vpack.c.bf16 %v562_v14, %v546_v30  ;;  %v576_v29 = vld [vmem:[%s13207_s1 + $0x960] sm:$0xff]  ;;  %v594_v30 = vld [vmem:[%s13207_s1 + $0x9f0] sm:$0xff] }
 0x2f7   : > { %13373 = vst [vmem:[#allocation166_spill] sm:$0xff] %v11585_v42  ;;  %6594 = vmatprep.mubr.msk.f32.mxu1 %vm1108_vm0, %v8284_v4  ;;  %7346 = vmatpush1.bf16.msra.mxu0 %v7345_v2  ;;  %v7351_v42 = vpack.c.bf16 %v593_v50, %v577_v62  ;;  %v578_v2 = vld [vmem:[%s13207_s1 + $0x970] sm:$0xff]  ;;  %v609_v14 = vld [vmem:[%s13207_s1 + $0xa68] sm:$0xff]  ;;  %v8286_v4 = vld [vmem:[%s8879_s23 + $0x138] sm:$0xff] }
 0x2f8   : > { %v11596_v32 = vpop.f32.mrb[102].mxu0  ;;  %7450 = vmatpush1.bf16.msra.mxu1 %v7449_v36  ;;  %7348 = vmatprep.subr.bf16.mxu0 %v7347_v10  ;;  %v8285_v10 = vld [vmem:[%s8879_s23 + $0x110] sm:$0xff]  ;;  %v7455_v36 = vpack.c.bf16 %v595_v8, %v579_v48  ;;  %v625_v62 = vld [vmem:[%s13207_s1 + $0xae8] sm:$0xff]  ;;  %v627_v48 = vld [vmem:[%s13207_s1 + $0xaf8] sm:$0xff]  ;;  %v7353_v8 = vpack.c.bf16 %v592_v28, %v576_v29 }
 0x2f9   : > { %13374 = vst [vmem:[#allocation167_spill] sm:$0xff] %v11596_v32  ;;  %v11607_v22 = vpop.f32.mrb[102].mxu1  ;;  %v11609_v60 = vpop.f32.mrb[103].mxu0  ;;  %3631 = vmatmul.mubr.f32.gmra.mrb[144].mxu0 %v8285_v10  ;;  %7452 = vmatprep.subr.bf16.mxu1 %v7451_v56  ;;  %v611_v56 = vld [vmem:[%s13207_s1 + $0xa78] sm:$0xff]  ;;  %v624_v32 = vld [vmem:[%s13207_s1 + $0xae0] sm:$0xff] }
 0x2fa   : > { %13375 = vst [vmem:[#allocation168_spill] sm:$0xff] %v11607_v22  ;;  %13376 = vst [vmem:[#allocation169_spill] sm:$0xff] %v11609_v60  ;;  %v11621_v50 = vpop.f32.mrb[103].mxu1  ;;  %4145 = vmatmul.mubr.f32.gmra.mrb[144].mxu1 %v8285_v10  ;;  %6563 = vmatprep.mubr.msk.f32.mxu0 %vm1108_vm0, %v8286_v4  ;;  %v7457_v10 = vpack.c.bf16 %v594_v30, %v578_v2  ;;  %v608_v22 = vld [vmem:[%s13207_s1 + $0xa60] sm:$0xff]  ;;  %v626_v2 = vld [vmem:[%s13207_s1 + $0xaf0] sm:$0xff] }
 0x2fb   : > { %13377 = vst [vmem:[#allocation170_spill] sm:$0xff] %v11621_v50  ;;  %6595 = vmatprep.mubr.msk.f32.mxu1 %vm1108_vm0, %v8286_v4  ;;  %7350 = vmatpush1.bf16.msra.mxu0 %v7349_v54  ;;  %v7355_v50 = vpack.c.bf16 %v625_v62, %v609_v14  ;;  %v610_v54 = vld [vmem:[%s13207_s1 + $0xa70] sm:$0xff]  ;;  %v641_v30 = vld [vmem:[%s13207_s1 + $0xb68] sm:$0xff]  ;;  %v8288_v4 = vld [vmem:[%s8879_s23 + $0x158] sm:$0xff] }
 0x2fc   : > { %v11632_v60 = vpop.f32.mrb[104].mxu0  ;;  %7454 = vmatpush1.bf16.msra.mxu1 %v7453_v20  ;;  %7352 = vmatprep.subr.bf16.mxu0 %v7351_v42  ;;  %v8287_v42 = vld [vmem:[%s8879_s23 + $0x130] sm:$0xff]  ;;  %v7459_v20 = vpack.c.bf16 %v627_v48, %v611_v56  ;;  %v657_v14 = vld [vmem:[%s13207_s1 + $0xbe8] sm:$0xff]  ;;  %v659_v56 = vld [vmem:[%s13207_s1 + $0xbf8] sm:$0xff]  ;;  %v7357_v48 = vpack.c.bf16 %v624_v32, %v608_v22 }
 0x2fd   : > { %13378 = vst [vmem:[#allocation171_spill] sm:$0xff] %v11632_v60  ;;  %v11643_v28 = vpop.f32.mrb[104].mxu1  ;;  %v11645_v29 = vpop.f32.mrb[105].mxu0  ;;  %3637 = vmatmul.mubr.f32.gmra.mrb[146].mxu0 %v8287_v42  ;;  %7456 = vmatprep.subr.bf16.mxu1 %v7455_v36  ;;  %v643_v36 = vld [vmem:[%s13207_s1 + $0xb78] sm:$0xff]  ;;  %v656_v60 = vld [vmem:[%s13207_s1 + $0xbe0] sm:$0xff] }
 0x2fe   : > { %13379 = vst [vmem:[#allocation172_spill] sm:$0xff] %v11643_v28  ;;  %13380 = vst [vmem:[#allocation173_spill] sm:$0xff] %v11645_v29  ;;  %v11657_v62 = vpop.f32.mrb[105].mxu1  ;;  %4151 = vmatmul.mubr.f32.gmra.mrb[146].mxu1 %v8287_v42  ;;  %6564 = vmatprep.mubr.msk.f32.mxu0 %vm1108_vm0, %v8288_v4  ;;  %v7461_v42 = vpack.c.bf16 %v626_v2, %v610_v54  ;;  %v640_v28 = vld [vmem:[%s13207_s1 + $0xb60] sm:$0xff]  ;;  %v658_v54 = vld [vmem:[%s13207_s1 + $0xbf0] sm:$0xff] }
 0x2ff   : > { %13381 = vst [vmem:[#allocation174_spill] sm:$0xff] %v11657_v62  ;;  %6596 = vmatprep.mubr.msk.f32.mxu1 %vm1108_vm0, %v8288_v4  ;;  %7354 = vmatpush1.bf16.msra.mxu0 %v7353_v8  ;;  %v7359_v62 = vpack.c.bf16 %v657_v14, %v641_v30  ;;  %v642_v8 = vld [vmem:[%s13207_s1 + $0xb70] sm:$0xff]  ;;  %v673_v2 = vld [vmem:[%s13207_s1 + $0xc68] sm:$0xff]  ;;  %v8290_v4 = vld [vmem:[%s8879_s23 + $0x178] sm:$0xff] }
 0x300   : > { %v11668_v29 = vpop.f32.mrb[106].mxu0  ;;  %7458 = vmatpush1.bf16.msra.mxu1 %v7457_v10  ;;  %7356 = vmatprep.subr.bf16.mxu0 %v7355_v50  ;;  %v8289_v50 = vld [vmem:[%s8879_s23 + $0x150] sm:$0xff]  ;;  %v7463_v10 = vpack.c.bf16 %v659_v56, %v643_v36  ;;  %v689_v30 = vld [vmem:[%s13207_s1 + $0xce8] sm:$0xff]  ;;  %v691_v36 = vld [vmem:[%s13207_s1 + $0xcf8] sm:$0xff]  ;;  %v7361_v56 = vpack.c.bf16 %v656_v60, %v640_v28 }
 0x301   : > { %13382 = vst [vmem:[#allocation175_spill] sm:$0xff] %v11668_v29  ;;  %v11679_v32 = vpop.f32.mrb[106].mxu1  ;;  %v11681_v22 = vpop.f32.mrb[107].mxu0  ;;  %3643 = vmatmul.mubr.f32.gmra.mrb[148].mxu0 %v8289_v50  ;;  %7460 = vmatprep.subr.bf16.mxu1 %v7459_v20  ;;  %v675_v20 = vld [vmem:[%s13207_s1 + $0xc78] sm:$0xff]  ;;  %v688_v29 = vld [vmem:[%s13207_s1 + $0xce0] sm:$0xff] }
 0x302   : > { %13383 = vst [vmem:[#allocation176_spill] sm:$0xff] %v11679_v32  ;;  %13384 = vst [vmem:[#allocation177_spill] sm:$0xff] %v11681_v22  ;;  %v11693_v14 = vpop.f32.mrb[107].mxu1  ;;  %4157 = vmatmul.mubr.f32.gmra.mrb[148].mxu1 %v8289_v50  ;;  %6565 = vmatprep.mubr.msk.f32.mxu0 %vm1108_vm0, %v8290_v4  ;;  %v7465_v50 = vpack.c.bf16 %v658_v54, %v642_v8  ;;  %v672_v32 = vld [vmem:[%s13207_s1 + $0xc60] sm:$0xff]  ;;  %v690_v8 = vld [vmem:[%s13207_s1 + $0xcf0] sm:$0xff] }
 0x303   : > { %13385 = vst [vmem:[#allocation178_spill] sm:$0xff] %v11693_v14  ;;  %6597 = vmatprep.mubr.msk.f32.mxu1 %vm1108_vm0, %v8290_v4  ;;  %7358 = vmatpush1.bf16.msra.mxu0 %v7357_v48  ;;  %v7363_v14 = vpack.c.bf16 %v689_v30, %v673_v2  ;;  %v674_v48 = vld [vmem:[%s13207_s1 + $0xc70] sm:$0xff]  ;;  %v705_v54 = vld [vmem:[%s13207_s1 + $0xd68] sm:$0xff]  ;;  %v8292_v4 = vld [vmem:[%s8879_s23 + $0x198] sm:$0xff] }
 0x304   : > { %v11704_v22 = vpop.f32.mrb[108].mxu0  ;;  %7462 = vmatpush1.bf16.msra.mxu1 %v7461_v42  ;;  %7360 = vmatprep.subr.bf16.mxu0 %v7359_v62  ;;  %v8291_v62 = vld [vmem:[%s8879_s23 + $0x170] sm:$0xff]  ;;  %v7467_v42 = vpack.c.bf16 %v691_v36, %v675_v20  ;;  %v721_v2 = vld [vmem:[%s13207_s1 + $0xde8] sm:$0xff]  ;;  %v723_v20 = vld [vmem:[%s13207_s1 + $0xdf8] sm:$0xff]  ;;  %v7365_v36 = vpack.c.bf16 %v688_v29, %v672_v32 }
 0x305   : > { %13386 = vst [vmem:[#allocation179_spill] sm:$0xff] %v11704_v22  ;;  %v11715_v60 = vpop.f32.mrb[108].mxu1  ;;  %v11717_v28 = vpop.f32.mrb[109].mxu0  ;;  %3649 = vmatmul.mubr.f32.gmra.mrb[150].mxu0 %v8291_v62  ;;  %7464 = vmatprep.subr.bf16.mxu1 %v7463_v10  ;;  %v707_v10 = vld [vmem:[%s13207_s1 + $0xd78] sm:$0xff]  ;;  %v720_v22 = vld [vmem:[%s13207_s1 + $0xde0] sm:$0xff] }
 0x306   : > { %13387 = vst [vmem:[#allocation180_spill] sm:$0xff] %v11715_v60  ;;  %13388 = vst [vmem:[#allocation181_spill] sm:$0xff] %v11717_v28  ;;  %v11729_v30 = vpop.f32.mrb[109].mxu1  ;;  %4163 = vmatmul.mubr.f32.gmra.mrb[150].mxu1 %v8291_v62  ;;  %6566 = vmatprep.mubr.msk.f32.mxu0 %vm1108_vm0, %v8292_v4  ;;  %v7469_v62 = vpack.c.bf16 %v690_v8, %v674_v48  ;;  %v704_v60 = vld [vmem:[%s13207_s1 + $0xd60] sm:$0xff]  ;;  %v722_v48 = vld [vmem:[%s13207_s1 + $0xdf0] sm:$0xff] }
 0x307   : > { %13389 = vst [vmem:[#allocation182_spill] sm:$0xff] %v11729_v30  ;;  %6598 = vmatprep.mubr.msk.f32.mxu1 %vm1108_vm0, %v8292_v4  ;;  %7362 = vmatpush1.bf16.msra.mxu0 %v7361_v56  ;;  %v7367_v30 = vpack.c.bf16 %v721_v2, %v705_v54  ;;  %v706_v56 = vld [vmem:[%s13207_s1 + $0xd70] sm:$0xff]  ;;  %v737_v8 = vld [vmem:[%s13207_s1 + $0xe68] sm:$0xff]  ;;  %v8294_v4 = vld [vmem:[%s8879_s23 + $0x1b8] sm:$0xff] }
 0x308   : > { %v11740_v28 = vpop.f32.mrb[110].mxu0  ;;  %7466 = vmatpush1.bf16.msra.mxu1 %v7465_v50  ;;  %7364 = vmatprep.subr.bf16.mxu0 %v7363_v14  ;;  %v8293_v14 = vld [vmem:[%s8879_s23 + $0x190] sm:$0xff]  ;;  %v7471_v50 = vpack.c.bf16 %v723_v20, %v707_v10  ;;  %v753_v54 = vld [vmem:[%s13207_s1 + $0xee8] sm:$0xff]  ;;  %v755_v10 = vld [vmem:[%s13207_s1 + $0xef8] sm:$0xff]  ;;  %v7369_v20 = vpack.c.bf16 %v720_v22, %v704_v60 }
 0x309   : > { %13390 = vst [vmem:[#allocation183_spill] sm:$0xff] %v11740_v28  ;;  %v11751_v29 = vpop.f32.mrb[110].mxu1  ;;  %v11753_v32 = vpop.f32.mrb[111].mxu0  ;;  %3655 = vmatmul.mubr.f32.gmra.mrb[152].mxu0 %v8293_v14  ;;  %7468 = vmatprep.subr.bf16.mxu1 %v7467_v42  ;;  %v739_v42 = vld [vmem:[%s13207_s1 + $0xe78] sm:$0xff]  ;;  %v752_v28 = vld [vmem:[%s13207_s1 + $0xee0] sm:$0xff] }
 0x30a   : > { %13391 = vst [vmem:[#allocation184_spill] sm:$0xff] %v11751_v29  ;;  %13392 = vst [vmem:[#allocation185_spill] sm:$0xff] %v11753_v32  ;;  %v11765_v2 = vpop.f32.mrb[111].mxu1  ;;  %4169 = vmatmul.mubr.f32.gmra.mrb[152].mxu1 %v8293_v14  ;;  %6567 = vmatprep.mubr.msk.f32.mxu0 %vm1108_vm0, %v8294_v4  ;;  %v7473_v14 = vpack.c.bf16 %v722_v48, %v706_v56  ;;  %v736_v29 = vld [vmem:[%s13207_s1 + $0xe60] sm:$0xff]  ;;  %v754_v56 = vld [vmem:[%s13207_s1 + $0xef0] sm:$0xff] }
 0x30b   : > { %13393 = vst [vmem:[#allocation186_spill] sm:$0xff] %v11765_v2  ;;  %6599 = vmatprep.mubr.msk.f32.mxu1 %vm1108_vm0, %v8294_v4  ;;  %7366 = vmatpush1.bf16.msra.mxu0 %v7365_v36  ;;  %v7371_v2 = vpack.c.bf16 %v753_v54, %v737_v8  ;;  %v738_v36 = vld [vmem:[%s13207_s1 + $0xe70] sm:$0xff]  ;;  %v769_v48 = vld [vmem:[%s13207_s1 + $0xf68] sm:$0xff]  ;;  %v8296_v4 = vld [vmem:[%s8879_s23 + $0x1d8] sm:$0xff] }
 0x30c   : > { %v11776_v32 = vpop.f32.mrb[112].mxu0  ;;  %7470 = vmatpush1.bf16.msra.mxu1 %v7469_v62  ;;  %7368 = vmatprep.subr.bf16.mxu0 %v7367_v30  ;;  %v8295_v30 = vld [vmem:[%s8879_s23 + $0x1b0] sm:$0xff]  ;;  %v7475_v62 = vpack.c.bf16 %v755_v10, %v739_v42  ;;  %v785_v8 = vld [vmem:[%s13207_s1 + $0xfe8] sm:$0xff]  ;;  %v787_v42 = vld [vmem:[%s13207_s1 + $0xff8] sm:$0xff]  ;;  %v7373_v10 = vpack.c.bf16 %v752_v28, %v736_v29 }
 0x30d   : > { %13394 = vst [vmem:[#allocation187_spill] sm:$0xff] %v11776_v32  ;;  %v11787_v22 = vpop.f32.mrb[112].mxu1  ;;  %v11789_v60 = vpop.f32.mrb[113].mxu0  ;;  %3661 = vmatmul.mubr.f32.gmra.mrb[154].mxu0 %v8295_v30  ;;  %7472 = vmatprep.subr.bf16.mxu1 %v7471_v50  ;;  %v771_v50 = vld [vmem:[%s13207_s1 + $0xf78] sm:$0xff]  ;;  %v784_v32 = vld [vmem:[%s13207_s1 + $0xfe0] sm:$0xff] }
 0x30e   : > { %13395 = vst [vmem:[#allocation188_spill] sm:$0xff] %v11787_v22  ;;  %13396 = vst [vmem:[#allocation189_spill] sm:$0xff] %v11789_v60  ;;  %v11801_v54 = vpop.f32.mrb[113].mxu1  ;;  %4175 = vmatmul.mubr.f32.gmra.mrb[154].mxu1 %v8295_v30  ;;  %6568 = vmatprep.mubr.msk.f32.mxu0 %vm1108_vm0, %v8296_v4  ;;  %v7477_v30 = vpack.c.bf16 %v754_v56, %v738_v36  ;;  %v768_v22 = vld [vmem:[%s13207_s1 + $0xf60] sm:$0xff]  ;;  %v786_v36 = vld [vmem:[%s13207_s1 + $0xff0] sm:$0xff] }
 0x30f   : > { %13397 = vst [vmem:[#allocation190_spill] sm:$0xff] %v11801_v54  ;;  %6600 = vmatprep.mubr.msk.f32.mxu1 %vm1108_vm0, %v8296_v4  ;;  %7370 = vmatpush1.bf16.msra.mxu0 %v7369_v20  ;;  %v7375_v54 = vpack.c.bf16 %v785_v8, %v769_v48  ;;  %v770_v20 = vld [vmem:[%s13207_s1 + $0xf70] sm:$0xff]  ;;  %v801_v56 = vld [vmem:[%s13207_s1 + $0x1068] sm:$0xff]  ;;  %v8298_v4 = vld [vmem:[%s8879_s23 + $0x1f8] sm:$0xff] }
 0x310   : > { %v11812_v60 = vpop.f32.mrb[114].mxu0  ;;  %7474 = vmatpush1.bf16.msra.mxu1 %v7473_v14  ;;  %7372 = vmatprep.subr.bf16.mxu0 %v7371_v2  ;;  %v8297_v2 = vld [vmem:[%s8879_s23 + $0x1d0] sm:$0xff]  ;;  %v7479_v14 = vpack.c.bf16 %v787_v42, %v771_v50  ;;  %v817_v48 = vld [vmem:[%s13207_s1 + $0x10e8] sm:$0xff]  ;;  %v819_v50 = vld [vmem:[%s13207_s1 + $0x10f8] sm:$0xff]  ;;  %v7377_v42 = vpack.c.bf16 %v784_v32, %v768_v22 }
 0x311   : > { %13398 = vst [vmem:[#allocation191_spill] sm:$0xff] %v11812_v60  ;;  %v11823_v28 = vpop.f32.mrb[114].mxu1  ;;  %v11825_v29 = vpop.f32.mrb[115].mxu0  ;;  %3667 = vmatmul.mubr.f32.gmra.mrb[156].mxu0 %v8297_v2  ;;  %7476 = vmatprep.subr.bf16.mxu1 %v7475_v62  ;;  %v803_v62 = vld [vmem:[%s13207_s1 + $0x1078] sm:$0xff] }
 0x312   : > { %13399 = vst [vmem:[#allocation192_spill] sm:$0xff] %v11823_v28  ;;  %13400 = vst [vmem:[#allocation193_spill] sm:$0xff] %v11825_v29  ;;  %v11837_v8 = vpop.f32.mrb[115].mxu1  ;;  %4181 = vmatmul.mubr.f32.gmra.mrb[156].mxu1 %v8297_v2  ;;  %6569 = vmatprep.mubr.msk.f32.mxu0 %vm1108_vm0, %v8298_v4  ;;  %v7481_v2 = vpack.c.bf16 %v786_v36, %v770_v20  ;;  %v7483_v16 = vpack.c.bf16 %v819_v50, %v803_v62  ;;  %v8300_v32 = vld [vmem:[%s8879_s23 + $0x218] sm:$0xff] }
 0x313   : > { %13401 = vst [vmem:[#allocation194_spill] sm:$0xff] %v11837_v8  ;;  %6601 = vmatprep.mubr.msk.f32.mxu1 %vm1108_vm0, %v8298_v4  ;;  %7374 = vmatpush1.bf16.msra.mxu0 %v7373_v10  ;;  %v7379_v8 = vpack.c.bf16 %v817_v48, %v801_v56  ;;  %v8302_v20 = vld [vmem:[%s8879_s23 + $0x238] sm:$0xff]  ;;  %v8303_v48 = vld [vmem:[%s8879_s23 + $0x230] sm:$0xff] }
 0x314   : > { %v11848_v29 = vpop.f32.mrb[116].mxu0  ;;  %7478 = vmatpush1.bf16.msra.mxu1 %v7477_v30  ;;  %7376 = vmatprep.subr.bf16.mxu0 %v7375_v54  ;;  %v8301_v30 = vld [vmem:[%s8879_s23 + $0x210] sm:$0xff] }
 0x315   : > { %v11850_v28 = vpop.f32.mrb[116].mxu1  ;;  %v11852_v60 = vpop.f32.mrb[117].mxu0  ;;  %3673 = vmatmul.mubr.f32.gmra.mrb[158].mxu0 %v8299_v26  ;;  %7480 = vmatprep.subr.bf16.mxu1 %v7479_v14 }
 0x316   : > { %v11855_v44 = vpop.f32.mrb[117].mxu1  ;;  %4187 = vmatmul.mubr.f32.gmra.mrb[158].mxu1 %v8299_v26  ;;  %6570 = vmatprep.mubr.msk.f32.mxu0 %vm1108_vm0, %v8300_v32 }
 0x317   : > { %13402 = vst [vmem:[#allocation195_spill] sm:$0xff] %v11855_v44  ;;  %6602 = vmatprep.mubr.msk.f32.mxu1 %vm1108_vm0, %v8300_v32  ;;  %7378 = vmatpush1.bf16.msra.mxu0 %v7377_v42  ;;  %v8305_v42 = vld [vmem:[%s8879_s23 + $0x250] sm:$0xff]  ;;  %v8306_v32 = vld [vmem:[%s8879_s23 + $0x278] sm:$0xff] }
 0x318   : > { %v11860_v22 = vpop.f32.mrb[118].mxu0  ;;  %7482 = vmatpush1.bf16.msra.mxu1 %v7481_v2  ;;  %7380 = vmatprep.subr.bf16.mxu0 %v7379_v8  ;;  %v898_v44 = vld [vmem:[%s13207_s1 + $0x1370] sm:$0xff] }
 0x319   : > { %13403 = vst [vmem:[#allocation196_spill] sm:$0xff] %v11860_v22  ;;  %v11862_v54 = vpop.f32.mrb[118].mxu1  ;;  %v11864_v10 = vpop.f32.mrb[119].mxu0  ;;  %3679 = vmatmul.mubr.f32.gmra.mrb[160].mxu0 %v8301_v30  ;;  %7484 = vmatprep.subr.bf16.mxu1 %v7483_v16  ;;  %v8304_v16 = vld [vmem:[%s8879_s23 + $0x258] sm:$0xff]  ;;  %v8335_v22 = vld [vmem:[%s8879_s23 + $0x20] sm:$0xff] }
 0x31a   : > { %13404 = vst [vmem:[#allocation197_spill] sm:$0xff] %v11862_v54  ;;  %13405 = vst [vmem:[#allocation198_spill] sm:$0xff] %v11864_v10  ;;  %v11867_v26 = vpop.f32.mrb[119].mxu1  ;;  %4193 = vmatmul.mubr.f32.gmra.mrb[160].mxu1 %v8301_v30  ;;  %6571 = vmatprep.mubr.msk.f32.mxu0 %vm1108_vm0, %v8302_v20 }
 0x31b   : > { %13406 = vst [vmem:[#allocation199_spill] sm:$0xff] %v11867_v26  ;;  %6603 = vmatprep.mubr.msk.f32.mxu1 %vm1108_vm0, %v8302_v20 }
 0x31c   : > { %v11872_v14 = vpop.f32.mrb[120].mxu0 }
 0x31d   : > { %13407 = vst [vmem:[#allocation200_spill] sm:$0xff] %v11872_v14  ;;  %v11874_v36 = vpop.f32.mrb[120].mxu1  ;;  %v11876_v56 = vpop.f32.mrb[121].mxu0  ;;  %3685 = vmatmul.mubr.f32.gmra.mrb[162].mxu0 %v8303_v48  ;;  %v832_v14 = vld [vmem:[%s13207_s1 + $0x1160] sm:$0xff] }
 0x31e   : > { %13408 = vst [vmem:[#allocation201_spill] sm:$0xff] %v11874_v36  ;;  %13409 = vst [vmem:[#allocation202_spill] sm:$0xff] %v11876_v56  ;;  %v11879_v8 = vpop.f32.mrb[121].mxu1  ;;  %4199 = vmatmul.mubr.f32.gmra.mrb[162].mxu1 %v8303_v48  ;;  %6572 = vmatprep.mubr.msk.f32.mxu0 %vm1108_vm0, %v8304_v16 }
 0x31f   : > { %13410 = vst [vmem:[#allocation203_spill] sm:$0xff] %v11879_v8  ;;  %6604 = vmatprep.mubr.msk.f32.mxu1 %vm1108_vm0, %v8304_v16  ;;  %v8307_v16 = vld [vmem:[%s8879_s23 + $0x270] sm:$0xff]  ;;  %v851_v8 = vld [vmem:[%s13207_s1 + $0x11f8] sm:$0xff] }
 0x320   : > { %v11884_v4 = vpop.f32.mrb[122].mxu0 }
 0x321   : > { %13411 = vst [vmem:[#allocation204_spill] sm:$0xff] %v11884_v4  ;;  %v11886_v62 = vpop.f32.mrb[122].mxu1  ;;  %v11888_v50 = vpop.f32.mrb[123].mxu0  ;;  %3691 = vmatmul.mubr.f32.gmra.mrb[164].mxu0 %v8305_v42  ;;  %v835_v4 = vld [vmem:[%s13207_s1 + $0x1178] sm:$0xff] }
 0x322   : > { %13412 = vst [vmem:[#allocation205_spill] sm:$0xff] %v11886_v62  ;;  %13413 = vst [vmem:[#allocation206_spill] sm:$0xff] %v11888_v50  ;;  %v11891_v2 = vpop.f32.mrb[123].mxu1  ;;  %4205 = vmatmul.mubr.f32.gmra.mrb[164].mxu1 %v8305_v42  ;;  %6573 = vmatprep.mubr.msk.f32.mxu0 %vm1108_vm0, %v8306_v32  ;;  %v8308_v42 = vld [vmem:[%s8879_s23 + $0x298] sm:$0xff]  ;;  %v7487_v26 = vpack.c.bf16 %v851_v8, %v835_v4  ;;  %v8334_v4 = vld [vmem:[%s8879_s23 + $0x28] sm:$0xff] }
 0x323   : > { %13414 = vst [vmem:[#allocation207_spill] sm:$0xff] %v11891_v2  ;;  %6605 = vmatprep.mubr.msk.f32.mxu1 %vm1108_vm0, %v8306_v32  ;;  %v883_v8 = vld [vmem:[%s13207_s1 + $0x12f8] sm:$0xff] }
 0x324   : > { %v11896_v30 = vpop.f32.mrb[124].mxu0 }
 0x325   : > { %13415 = vst [vmem:[#allocation208_spill] sm:$0xff] %v11896_v30  ;;  %v11898_v20 = vpop.f32.mrb[124].mxu1  ;;  %v11900_v48 = vpop.f32.mrb[125].mxu0  ;;  %3697 = vmatmul.mubr.f32.gmra.mrb[166].mxu0 %v8307_v16 }
 0x326   : > { %13416 = vst [vmem:[#allocation209_spill] sm:$0xff] %v11898_v20  ;;  %13417 = vst [vmem:[#allocation210_spill] sm:$0xff] %v11900_v48  ;;  %v11903_v50 = vpop.f32.mrb[125].mxu1  ;;  %4211 = vmatmul.mubr.f32.gmra.mrb[166].mxu1 %v8307_v16  ;;  %6574 = vmatprep.mubr.msk.f32.mxu0 %vm1108_vm0, %v8308_v42  ;;  %v8309_v48 = vld [vmem:[%s8879_s23 + $0x290] sm:$0xff]  ;;  %v8310_v16 = vld [vmem:[%s8879_s23 + $0x2b8] sm:$0xff] }
 0x327   : > { %13418 = vst [vmem:[#allocation211_spill] sm:$0xff] %v11903_v50  ;;  %6606 = vmatprep.mubr.msk.f32.mxu1 %vm1108_vm0, %v8308_v42  ;;  %v8311_v42 = vld [vmem:[%s8879_s23 + $0x2b0] sm:$0xff]  ;;  %v8332_v50 = vld [vmem:[%s8879_s23 + $0x8] sm:$0xff] }
 0x328   : > { %v11908_v32 = vpop.f32.mrb[126].mxu0 }
 0x329   : > { %13419 = vst [vmem:[#allocation212_spill] sm:$0xff] %v11908_v32  ;;  %v11910_v30 = vpop.f32.mrb[126].mxu1  ;;  %v11912_v20 = vpop.f32.mrb[127].mxu0  ;;  %3703 = vmatmul.mubr.f32.gmra.mrb[168].mxu0 %v8309_v48  ;;  %v849_v32 = vld [vmem:[%s13207_s1 + $0x11e8] sm:$0xff] }
 0x32a   : > { %13420 = vst [vmem:[#allocation213_spill] sm:$0xff] %v11910_v30  ;;  %13421 = vst [vmem:[#allocation214_spill] sm:$0xff] %v11912_v20  ;;  %v11915_v2 = vpop.f32.mrb[127].mxu1  ;;  %4217 = vmatmul.mubr.f32.gmra.mrb[168].mxu1 %v8309_v48  ;;  %6575 = vmatprep.mubr.msk.f32.mxu0 %vm1108_vm0, %v8310_v16  ;;  %v8312_v30 = vld [vmem:[%s8879_s23 + $0x2d8] sm:$0xff]  ;;  %v8313_v20 = vld [vmem:[%s8879_s23 + $0x2d0] sm:$0xff] }
 0x32b   : > { %13422 = vst [vmem:[#allocation215_spill] sm:$0xff] %v11915_v2  ;;  %6607 = vmatprep.mubr.msk.f32.mxu1 %vm1108_vm0, %v8310_v16  ;;  %v8314_v48 = vld [vmem:[%s8879_s23 + $0x2f8] sm:$0xff]  ;;  %v8315_v16 = vld [vmem:[%s8879_s23 + $0x2f0] sm:$0xff] }
 0x32c   : > { %v8330_v2 = vld [vmem:[%s8879_s23 + $0x3f8] sm:$0xff] }
 0x32d   : > { %3709 = vmatmul.mubr.f32.gmra.mrb[170].mxu0 %v8311_v42 }
 0x32e   : > { %4223 = vmatmul.mubr.f32.gmra.mrb[170].mxu1 %v8311_v42  ;;  %6576 = vmatprep.mubr.msk.f32.mxu0 %vm1108_vm0, %v8312_v30  ;;  %v8316_v42 = vld [vmem:[%s8879_s23 + $0x318] sm:$0xff] }
 0x32f   : > { %6608 = vmatprep.mubr.msk.f32.mxu1 %vm1108_vm0, %v8312_v30  ;;  %v8317_v30 = vld [vmem:[%s8879_s23 + $0x310] sm:$0xff] }
 0x331   : > { %3715 = vmatmul.mubr.f32.gmra.mrb[172].mxu0 %v8313_v20 }
 0x332   : > { %4229 = vmatmul.mubr.f32.gmra.mrb[172].mxu1 %v8313_v20  ;;  %6577 = vmatprep.mubr.msk.f32.mxu0 %vm1108_vm0, %v8314_v48  ;;  %v8318_v20 = vld [vmem:[%s8879_s23 + $0x338] sm:$0xff] }
 0x333   : > { %6609 = vmatprep.mubr.msk.f32.mxu1 %vm1108_vm0, %v8314_v48  ;;  %v8319_v48 = vld [vmem:[%s8879_s23 + $0x330] sm:$0xff] }
 0x335   : > { %3721 = vmatmul.mubr.f32.gmra.mrb[174].mxu0 %v8315_v16 }
 0x336   : > { %4235 = vmatmul.mubr.f32.gmra.mrb[174].mxu1 %v8315_v16  ;;  %6578 = vmatprep.mubr.msk.f32.mxu0 %vm1108_vm0, %v8316_v42  ;;  %v8320_v16 = vld [vmem:[%s8879_s23 + $0x358] sm:$0xff] }
 0x337   : > { %6610 = vmatprep.mubr.msk.f32.mxu1 %vm1108_vm0, %v8316_v42  ;;  %v8321_v42 = vld [vmem:[%s8879_s23 + $0x350] sm:$0xff] }
 0x339   : > { %3727 = vmatmul.mubr.f32.gmra.mrb[176].mxu0 %v8317_v30 }
 0x33a   : > { %4241 = vmatmul.mubr.f32.gmra.mrb[176].mxu1 %v8317_v30  ;;  %6579 = vmatprep.mubr.msk.f32.mxu0 %vm1108_vm0, %v8318_v20  ;;  %v8322_v30 = vld [vmem:[%s8879_s23 + $0x378] sm:$0xff] }
 0x33b   : > { %6611 = vmatprep.mubr.msk.f32.mxu1 %vm1108_vm0, %v8318_v20  ;;  %v8323_v20 = vld [vmem:[%s8879_s23 + $0x370] sm:$0xff] }
 0x33d   : > { %3733 = vmatmul.mubr.f32.gmra.mrb[178].mxu0 %v8319_v48 }
 0x33e   : > { %4247 = vmatmul.mubr.f32.gmra.mrb[178].mxu1 %v8319_v48  ;;  %6580 = vmatprep.mubr.msk.f32.mxu0 %vm1108_vm0, %v8320_v16  ;;  %v8324_v48 = vld [vmem:[%s8879_s23 + $0x398] sm:$0xff] }
 0x33f   : > { %6612 = vmatprep.mubr.msk.f32.mxu1 %vm1108_vm0, %v8320_v16  ;;  %v8325_v16 = vld [vmem:[%s8879_s23 + $0x390] sm:$0xff] }
 0x341   : > { %3739 = vmatmul.mubr.f32.gmra.mrb[180].mxu0 %v8321_v42 }
 0x342   : > { %4253 = vmatmul.mubr.f32.gmra.mrb[180].mxu1 %v8321_v42  ;;  %6581 = vmatprep.mubr.msk.f32.mxu0 %vm1108_vm0, %v8322_v30  ;;  %v8326_v42 = vld [vmem:[%s8879_s23 + $0x3b8] sm:$0xff] }
 0x343   : > { %6613 = vmatprep.mubr.msk.f32.mxu1 %vm1108_vm0, %v8322_v30  ;;  %v8327_v30 = vld [vmem:[%s8879_s23 + $0x3b0] sm:$0xff] }
 0x345   : > { %3745 = vmatmul.mubr.f32.gmra.mrb[182].mxu0 %v8323_v20 }
 0x346   : > { %4259 = vmatmul.mubr.f32.gmra.mrb[182].mxu1 %v8323_v20  ;;  %6582 = vmatprep.mubr.msk.f32.mxu0 %vm1108_vm0, %v8324_v48  ;;  %v8328_v20 = vld [vmem:[%s8879_s23 + $0x3d8] sm:$0xff] }
 0x347   : > { %6614 = vmatprep.mubr.msk.f32.mxu1 %vm1108_vm0, %v8324_v48  ;;  %v8329_v48 = vld [vmem:[%s8879_s23 + $0x3d0] sm:$0xff] }
 0x349   : > { %3751 = vmatmul.mubr.f32.gmra.mrb[184].mxu0 %v8325_v16 }
 0x34a   : > { %4265 = vmatmul.mubr.f32.gmra.mrb[184].mxu1 %v8325_v16  ;;  %6583 = vmatprep.mubr.msk.f32.mxu0 %vm1108_vm0, %v8326_v42  ;;  %v800_v16 = vld [vmem:[%s13207_s1 + $0x1060] sm:$0xff] }
 0x34b   : > { %6615 = vmatprep.mubr.msk.f32.mxu1 %vm1108_vm0, %v8326_v42  ;;  %v816_v42 = vld [vmem:[%s13207_s1 + $0x10e0] sm:$0xff] }
 0x34c   : > { %v7381_v62 = vpack.c.bf16 %v816_v42, %v800_v16  ;;  %v848_v16 = vld [vmem:[%s13207_s1 + $0x11e0] sm:$0xff]  ;;  %v834_v42 = vld [vmem:[%s13207_s1 + $0x1170] sm:$0xff] }
 0x34d   : > { %3757 = vmatmul.mubr.f32.gmra.mrb[186].mxu0 %v8327_v30 }
 0x34e   : > { %4271 = vmatmul.mubr.f32.gmra.mrb[186].mxu1 %v8327_v30  ;;  %6584 = vmatprep.mubr.msk.f32.mxu0 %vm1108_vm0, %v8328_v20  ;;  %v802_v30 = vld [vmem:[%s13207_s1 + $0x1070] sm:$0xff] }
 0x34f   : > { %6616 = vmatprep.mubr.msk.f32.mxu1 %vm1108_vm0, %v8328_v20  ;;  %v818_v20 = vld [vmem:[%s13207_s1 + $0x10f0] sm:$0xff] }
 0x350   : > { %v7485_v56 = vpack.c.bf16 %v818_v20, %v802_v30  ;;  %v881_v30 = vld [vmem:[%s13207_s1 + $0x12e8] sm:$0xff]  ;;  %v867_v20 = vld [vmem:[%s13207_s1 + $0x1278] sm:$0xff] }
 0x351   : > { %3763 = vmatmul.mubr.f32.gmra.mrb[188].mxu0 %v8329_v48 }
 0x352   : > { %4277 = vmatmul.mubr.f32.gmra.mrb[188].mxu1 %v8329_v48  ;;  %6585 = vmatprep.mubr.msk.f32.mxu0 %vm1108_vm0, %v8330_v2  ;;  %v8331_v48 = vld [vmem:[%s8879_s23 + $0x3f0] sm:$0xff] }
 0x353   : > { %6617 = vmatprep.mubr.msk.f32.mxu1 %vm1108_vm0, %v8330_v2  ;;  %v833_v2 = vld [vmem:[%s13207_s1 + $0x1168] sm:$0xff] }
 0x354   : > { %v7383_v36 = vpack.c.bf16 %v849_v32, %v833_v2  ;;  %v865_v32 = vld [vmem:[%s13207_s1 + $0x1268] sm:$0xff]  ;;  %v7385_v2 = vpack.c.bf16 %v848_v16, %v832_v14  ;;  %v7491_v14 = vpack.c.bf16 %v883_v8, %v867_v20 }
 0x355   : > { %3769 = vmatmul.mubr.f32.gmra.mrb[190].mxu0 %v8331_v48  ;;  %v7387_v54 = vpack.c.bf16 %v881_v30, %v865_v32  ;;  %v897_v16 = vld [vmem:[%s13207_s1 + $0x1368] sm:$0xff]  ;;  %v915_v32 = vld [vmem:[%s13207_s1 + $0x13f8] sm:$0xff] }
 0x356   : > { %4283 = vmatmul.mubr.f32.gmra.mrb[190].mxu1 %v8331_v48  ;;  %4353 = vmatprep.mubr.f32.mxu0 %v8332_v50  ;;  %v8333_v48 = vld [vmem:[%s8879_s23] sm:$0xff] }
 0x357   : > { %4867 = vmatprep.mubr.f32.mxu1 %v8332_v50  ;;  %v850_v50 = vld [vmem:[%s13207_s1 + $0x11f0] sm:$0xff] }
 0x358   : > { %v7489_v10 = vpack.c.bf16 %v850_v50, %v834_v42  ;;  %v913_v42 = vld [vmem:[%s13207_s1 + $0x13e8] sm:$0xff] }
 0x359   : > { %4354 = vmatmul.mubr.f32.vlgmr.msra.gmra.mrb[192].mxu0 %v8333_v48  ;;  %v8336_v50 = vld [vmem:[%s8879_s23 + $0x48] sm:$0xff]  ;;  %v7391_v8 = vpack.c.bf16 %v913_v42, %v897_v16 }
 0x35a   : > { %4868 = vmatmul.mubr.f32.vlgmr.msra.gmra.mrb[192].mxu1 %v8333_v48  ;;  %7382 = vmatpush1.bf16.msra.mxu0 %v7381_v62  ;;  %v864_v62 = vld [vmem:[%s13207_s1 + $0x1260] sm:$0xff] }
 0x35b   : > { %7486 = vmatpush1.bf16.msra.mxu1 %v7485_v56  ;;  %4359 = vmatprep.mubr.f32.mxu0 %v8334_v4  ;;  %v880_v48 = vld [vmem:[%s13207_s1 + $0x12e0] sm:$0xff]  ;;  %v866_v56 = vld [vmem:[%s13207_s1 + $0x1270] sm:$0xff] }
 0x35c   : > { %4873 = vmatprep.mubr.f32.mxu1 %v8334_v4  ;;  %7384 = vmatprep.subr.bf16.mxu0 %v7383_v36  ;;  %v882_v36 = vld [vmem:[%s13207_s1 + $0x12f0] sm:$0xff]  ;;  %v7389_v30 = vpack.c.bf16 %v880_v48, %v864_v62  ;;  %v912_v4 = vld [vmem:[%s13207_s1 + $0x13e0] sm:$0xff]  ;;  %v945_v62 = vld [vmem:[%s13207_s1 + $0x14e8] sm:$0xff] }
 0x35d   : > { %4360 = vmatmul.mubr.f32.gmra.mrb[194].mxu0 %v8335_v22  ;;  %7488 = vmatprep.subr.bf16.mxu1 %v7487_v26  ;;  %v899_v26 = vld [vmem:[%s13207_s1 + $0x1378] sm:$0xff]  ;;  %v7493_v20 = vpack.c.bf16 %v882_v36, %v866_v56  ;;  %v8338_v48 = vld [vmem:[%s8879_s23 + $0x68] sm:$0xff] }
 0x35e   : > { %4874 = vmatmul.mubr.f32.gmra.mrb[194].mxu1 %v8335_v22  ;;  %4365 = vmatprep.mubr.f32.mxu0 %v8336_v50  ;;  %v896_v22 = vld [vmem:[%s13207_s1 + $0x1360] sm:$0xff]  ;;  %v931_v56 = vld [vmem:[%s13207_s1 + $0x1478] sm:$0xff] }
 0x35f   : > { %4879 = vmatprep.mubr.f32.mxu1 %v8336_v50  ;;  %7386 = vmatpush1.bf16.msra.mxu0 %v7385_v2  ;;  %v8337_v50 = vld [vmem:[%s8879_s23 + $0x40] sm:$0xff]  ;;  %v7495_v2 = vpack.c.bf16 %v915_v32, %v899_v26  ;;  %v7393_v36 = vpack.c.bf16 %v912_v4, %v896_v22  ;;  %v8340_v22 = vld [vmem:[%s8879_s23 + $0x88] sm:$0xff]  ;;  %v963_v4 = vld [vmem:[%s13207_s1 + $0x1578] sm:$0xff] }
 0x360   : > { %7490 = vmatpush1.bf16.msra.mxu1 %v7489_v10  ;;  %7388 = vmatprep.subr.bf16.mxu0 %v7387_v54  ;;  %v914_v54 = vld [vmem:[%s13207_s1 + $0x13f0] sm:$0xff]  ;;  %v929_v10 = vld [vmem:[%s13207_s1 + $0x1468] sm:$0xff]  ;;  %v928_v26 = vld [vmem:[%s13207_s1 + $0x1460] sm:$0xff] }
 0x361   : > { %4366 = vmatmul.mubr.f32.gmra.mrb[196].mxu0 %v8337_v50  ;;  %7492 = vmatprep.subr.bf16.mxu1 %v7491_v14  ;;  %v947_v14 = vld [vmem:[%s13207_s1 + $0x14f8] sm:$0xff]  ;;  %v7497_v16 = vpack.c.bf16 %v914_v54, %v898_v44  ;;  %v7395_v42 = vpack.c.bf16 %v945_v62, %v929_v10  ;;  %v944_v32 = vld [vmem:[%s13207_s1 + $0x14e0] sm:$0xff]  ;;  %v946_v44 = vld [vmem:[%s13207_s1 + $0x14f0] sm:$0xff] }
 0x362   : > { %4880 = vmatmul.mubr.f32.gmra.mrb[196].mxu1 %v8337_v50  ;;  %4371 = vmatprep.mubr.f32.mxu0 %v8338_v48  ;;  %v930_v50 = vld [vmem:[%s13207_s1 + $0x1470] sm:$0xff]  ;;  %v7397_v54 = vpack.c.bf16 %v944_v32, %v928_v26  ;;  %v1009_v26 = vld [vmem:[%s13207_s1 + $0x16e8] sm:$0xff] }
 0x363   : > { %4885 = vmatprep.mubr.f32.mxu1 %v8338_v48  ;;  %7390 = vmatpush1.bf16.msra.mxu0 %v7389_v30  ;;  %v8339_v48 = vld [vmem:[%s8879_s23 + $0x60] sm:$0xff]  ;;  %v7499_v30 = vpack.c.bf16 %v947_v14, %v931_v56  ;;  %v7501_v10 = vpack.c.bf16 %v946_v44, %v930_v50  ;;  %v8342_v32 = vld [vmem:[%s8879_s23 + $0xa8] sm:$0xff]  ;;  %v995_v50 = vld [vmem:[%s13207_s1 + $0x1678] sm:$0xff] }
 0x364   : > { %7494 = vmatpush1.bf16.msra.mxu1 %v7493_v20  ;;  %7392 = vmatprep.subr.bf16.mxu0 %v7391_v8  ;;  %v961_v20 = vld [vmem:[%s13207_s1 + $0x1568] sm:$0xff]  ;;  %v960_v56 = vld [vmem:[%s13207_s1 + $0x1560] sm:$0xff] }
 0x365   : > { %4372 = vmatmul.mubr.f32.gmra.mrb[198].mxu0 %v8339_v48  ;;  %7496 = vmatprep.subr.bf16.mxu1 %v7495_v2  ;;  %v977_v8 = vld [vmem:[%s13207_s1 + $0x15e8] sm:$0xff]  ;;  %v979_v2 = vld [vmem:[%s13207_s1 + $0x15f8] sm:$0xff]  ;;  %v976_v14 = vld [vmem:[%s13207_s1 + $0x15e0] sm:$0xff] }
 0x366   : > { %4886 = vmatmul.mubr.f32.gmra.mrb[198].mxu1 %v8339_v48  ;;  %4377 = vmatprep.mubr.f32.mxu0 %v8340_v22  ;;  %v7399_v62 = vpack.c.bf16 %v977_v8, %v961_v20  ;;  %v962_v48 = vld [vmem:[%s13207_s1 + $0x1570] sm:$0xff]  ;;  %v7401_v44 = vpack.c.bf16 %v976_v14, %v960_v56  ;;  %v1041_v56 = vld [vmem:[%s13207_s1 + $0x17e8] sm:$0xff] }
 0x367   : > { %4891 = vmatprep.mubr.f32.mxu1 %v8340_v22  ;;  %7394 = vmatpush1.bf16.msra.mxu0 %v7393_v36  ;;  %v8341_v22 = vld [vmem:[%s8879_s23 + $0x80] sm:$0xff]  ;;  %v7503_v36 = vpack.c.bf16 %v979_v2, %v963_v4  ;;  %v8344_v14 = vld [vmem:[%s8879_s23 + $0xc8] sm:$0xff] }
 0x368   : > { %7498 = vmatpush1.bf16.msra.mxu1 %v7497_v16  ;;  %7396 = vmatprep.subr.bf16.mxu0 %v7395_v42  ;;  %v978_v16 = vld [vmem:[%s13207_s1 + $0x15f0] sm:$0xff]  ;;  %v993_v42 = vld [vmem:[%s13207_s1 + $0x1668] sm:$0xff]  ;;  %v992_v4 = vld [vmem:[%s13207_s1 + $0x1660] sm:$0xff] }
 0x369   : > { %4378 = vmatmul.mubr.f32.gmra.mrb[200].mxu0 %v8341_v22  ;;  %7500 = vmatprep.subr.bf16.mxu1 %v7499_v30  ;;  %v1011_v30 = vld [vmem:[%s13207_s1 + $0x16f8] sm:$0xff]  ;;  %v7505_v20 = vpack.c.bf16 %v978_v16, %v962_v48  ;;  %v7403_v8 = vpack.c.bf16 %v1009_v26, %v993_v42  ;;  %v1008_v2 = vld [vmem:[%s13207_s1 + $0x16e0] sm:$0xff] }
 0x36a   : > { %4892 = vmatmul.mubr.f32.gmra.mrb[200].mxu1 %v8341_v22  ;;  %4383 = vmatprep.mubr.f32.mxu0 %v8342_v32  ;;  %v994_v22 = vld [vmem:[%s13207_s1 + $0x1670] sm:$0xff]  ;;  %v1027_v48 = vld [vmem:[%s13207_s1 + $0x1778] sm:$0xff]  ;;  %v7405_v16 = vpack.c.bf16 %v1008_v2, %v992_v4  ;;  %v1073_v4 = vld [vmem:[%s13207_s1 + $0x18e8] sm:$0xff] }
 0x36b   : > { %4897 = vmatprep.mubr.f32.mxu1 %v8342_v32  ;;  %7398 = vmatpush1.bf16.msra.mxu0 %v7397_v54  ;;  %v8343_v32 = vld [vmem:[%s8879_s23 + $0xa0] sm:$0xff]  ;;  %v7507_v54 = vpack.c.bf16 %v1011_v30, %v995_v50  ;;  %v8346_v2 = vld [vmem:[%s8879_s23 + $0xe8] sm:$0xff] }
 0x36c   : > { %7502 = vmatpush1.bf16.msra.mxu1 %v7501_v10  ;;  %7400 = vmatprep.subr.bf16.mxu0 %v7399_v62  ;;  %v1010_v10 = vld [vmem:[%s13207_s1 + $0x16f0] sm:$0xff]  ;;  %v1025_v62 = vld [vmem:[%s13207_s1 + $0x1768] sm:$0xff]  ;;  %v1024_v50 = vld [vmem:[%s13207_s1 + $0x1760] sm:$0xff] }
 0x36d   : > { %4384 = vmatmul.mubr.f32.gmra.mrb[202].mxu0 %v8343_v32  ;;  %7504 = vmatprep.subr.bf16.mxu1 %v7503_v36  ;;  %v1043_v36 = vld [vmem:[%s13207_s1 + $0x17f8] sm:$0xff]  ;;  %v7509_v42 = vpack.c.bf16 %v1010_v10, %v994_v22  ;;  %v7407_v26 = vpack.c.bf16 %v1041_v56, %v1025_v62  ;;  %v1040_v30 = vld [vmem:[%s13207_s1 + $0x17e0] sm:$0xff] }
 0x36e   : > { %4898 = vmatmul.mubr.f32.gmra.mrb[202].mxu1 %v8343_v32  ;;  %4389 = vmatprep.mubr.f32.mxu0 %v8344_v14  ;;  %v1026_v32 = vld [vmem:[%s13207_s1 + $0x1770] sm:$0xff]  ;;  %v1059_v22 = vld [vmem:[%s13207_s1 + $0x1878] sm:$0xff]  ;;  %v7409_v10 = vpack.c.bf16 %v1040_v30, %v1024_v50  ;;  %v1105_v50 = vld [vmem:[%s13207_s1 + $0x19e8] sm:$0xff] }
 0x36f   : > { %4903 = vmatprep.mubr.f32.mxu1 %v8344_v14  ;;  %7402 = vmatpush1.bf16.msra.mxu0 %v7401_v44  ;;  %v8345_v14 = vld [vmem:[%s8879_s23 + $0xc0] sm:$0xff]  ;;  %v7511_v44 = vpack.c.bf16 %v1043_v36, %v1027_v48  ;;  %v8348_v30 = vld [vmem:[%s8879_s23 + $0x108] sm:$0xff] }
 0x370   : > { %7506 = vmatpush1.bf16.msra.mxu1 %v7505_v20  ;;  %7404 = vmatprep.subr.bf16.mxu0 %v7403_v8  ;;  %v1042_v20 = vld [vmem:[%s13207_s1 + $0x17f0] sm:$0xff]  ;;  %v1057_v8 = vld [vmem:[%s13207_s1 + $0x1868] sm:$0xff]  ;;  %v1056_v48 = vld [vmem:[%s13207_s1 + $0x1860] sm:$0xff] }
 0x371   : > { %4390 = vmatmul.mubr.f32.gmra.mrb[204].mxu0 %v8345_v14  ;;  %7508 = vmatprep.subr.bf16.mxu1 %v7507_v54  ;;  %v1075_v54 = vld [vmem:[%s13207_s1 + $0x18f8] sm:$0xff]  ;;  %v7513_v62 = vpack.c.bf16 %v1042_v20, %v1026_v32  ;;  %v7411_v56 = vpack.c.bf16 %v1073_v4, %v1057_v8  ;;  %v1072_v36 = vld [vmem:[%s13207_s1 + $0x18e0] sm:$0xff] }
 0x372   : > { %4904 = vmatmul.mubr.f32.gmra.mrb[204].mxu1 %v8345_v14  ;;  %4395 = vmatprep.mubr.f32.mxu0 %v8346_v2  ;;  %v1058_v14 = vld [vmem:[%s13207_s1 + $0x1870] sm:$0xff]  ;;  %v1091_v32 = vld [vmem:[%s13207_s1 + $0x1978] sm:$0xff]  ;;  %v7413_v20 = vpack.c.bf16 %v1072_v36, %v1056_v48 }
 0x373   : > { %4909 = vmatprep.mubr.f32.mxu1 %v8346_v2  ;;  %7406 = vmatpush1.bf16.msra.mxu0 %v7405_v16  ;;  %v8347_v2 = vld [vmem:[%s8879_s23 + $0xe0] sm:$0xff]  ;;  %v7515_v16 = vpack.c.bf16 %v1075_v54, %v1059_v22 }
 0x374   : > { %7510 = vmatpush1.bf16.msra.mxu1 %v7509_v42  ;;  %7408 = vmatprep.subr.bf16.mxu0 %v7407_v26  ;;  %v1074_v42 = vld [vmem:[%s13207_s1 + $0x18f0] sm:$0xff]  ;;  %v1089_v26 = vld [vmem:[%s13207_s1 + $0x1968] sm:$0xff]  ;;  %v1088_v22 = vld [vmem:[%s13207_s1 + $0x1960] sm:$0xff] }
 0x375   : > { %4396 = vmatmul.mubr.f32.gmra.mrb[206].mxu0 %v8347_v2  ;;  %7512 = vmatprep.subr.bf16.mxu1 %v7511_v44  ;;  %v1107_v44 = vld [vmem:[%s13207_s1 + $0x19f8] sm:$0xff]  ;;  %v7517_v8 = vpack.c.bf16 %v1074_v42, %v1058_v14  ;;  %v7415_v4 = vpack.c.bf16 %v1105_v50, %v1089_v26  ;;  %v1104_v54 = vld [vmem:[%s13207_s1 + $0x19e0] sm:$0xff]  ;;  %v8354_v26 = vld [vmem:[%s8879_s23 + $0x168] sm:$0xff] }
 0x376   : > { %4910 = vmatmul.mubr.f32.gmra.mrb[206].mxu1 %v8347_v2  ;;  %4401 = vmatprep.mubr.f32.mxu0 %v8348_v30  ;;  %v8349_v2 = vld [vmem:[%s8879_s23 + $0x100] sm:$0xff]  ;;  %v7417_v48 = vpack.c.bf16 %v1104_v54, %v1088_v22  ;;  %v8362_v54 = vld [vmem:[%s8879_s23 + $0x1e8] sm:$0xff] }
 0x377   : > { %4915 = vmatprep.mubr.f32.mxu1 %v8348_v30  ;;  %7410 = vmatpush1.bf16.msra.mxu0 %v7409_v10  ;;  %v7519_v30 = vpack.c.bf16 %v1107_v44, %v1091_v32  ;;  %v1090_v10 = vld [vmem:[%s13207_s1 + $0x1970] sm:$0xff]  ;;  %v8351_v14 = vld [vmem:[%s8879_s23 + $0x120] sm:$0xff]  ;;  %v8356_v32 = vld [vmem:[%s8879_s23 + $0x188] sm:$0xff] }
 0x378   : > { %7514 = vmatpush1.bf16.msra.mxu1 %v7513_v62  ;;  %7412 = vmatprep.subr.bf16.mxu0 %v7411_v56  ;;  %v1106_v62 = vld [vmem:[%s13207_s1 + $0x19f0] sm:$0xff]  ;;  %v8350_v56 = vld [vmem:[%s8879_s23 + $0x128] sm:$0xff]  ;;  %v8353_v42 = vld [vmem:[%s8879_s23 + $0x140] sm:$0xff] }
 0x379   : > { %4402 = vmatmul.mubr.f32.gmra.mrb[208].mxu0 %v8349_v2  ;;  %7516 = vmatprep.subr.bf16.mxu1 %v7515_v16  ;;  %v7521_v36 = vpack.c.bf16 %v1106_v62, %v1090_v10  ;;  %v8352_v16 = vld [vmem:[%s8879_s23 + $0x148] sm:$0xff]  ;;  %v8355_v50 = vld [vmem:[%s8879_s23 + $0x160] sm:$0xff] }
 0x37a   : > { %4916 = vmatmul.mubr.f32.gmra.mrb[208].mxu1 %v8349_v2  ;;  %4407 = vmatprep.mubr.f32.mxu0 %v8350_v56  ;;  %v8357_v44 = vld [vmem:[%s8879_s23 + $0x180] sm:$0xff]  ;;  %v8366_v62 = vld [vmem:[%s8879_s23 + $0x228] sm:$0xff] }
 0x37b   : > { %4921 = vmatprep.mubr.f32.mxu1 %v8350_v56  ;;  %7414 = vmatpush1.bf16.msra.mxu0 %v7413_v20  ;;  %v8358_v20 = vld [vmem:[%s8879_s23 + $0x1a8] sm:$0xff]  ;;  %v8361_v22 = vld [vmem:[%s8879_s23 + $0x1c0] sm:$0xff] }
 0x37c   : > { %7518 = vmatpush1.bf16.msra.mxu1 %v7517_v8  ;;  %7416 = vmatprep.subr.bf16.mxu0 %v7415_v4  ;;  %v8359_v8 = vld [vmem:[%s8879_s23 + $0x1a0] sm:$0xff]  ;;  %v8360_v4 = vld [vmem:[%s8879_s23 + $0x1c8] sm:$0xff] }
 0x37d   : > { %4408 = vmatmul.mubr.f32.gmra.mrb[210].mxu0 %v8351_v14  ;;  %7520 = vmatprep.subr.bf16.mxu1 %v7519_v30  ;;  %v8363_v2 = vld [vmem:[%s8879_s23 + $0x1e0] sm:$0xff]  ;;  %v8364_v30 = vld [vmem:[%s8879_s23 + $0x208] sm:$0xff] }
 0x37e   : > { %4922 = vmatmul.mubr.f32.gmra.mrb[210].mxu1 %v8351_v14  ;;  %4413 = vmatprep.mubr.f32.mxu0 %v8352_v16  ;;  %v8365_v10 = vld [vmem:[%s8879_s23 + $0x200] sm:$0xff]  ;;  %v8370_v14 = vld [vmem:[%s8879_s23 + $0x268] sm:$0xff] }
 0x37f   : > { %4927 = vmatprep.mubr.f32.mxu1 %v8352_v16  ;;  %7418 = vmatpush1.bf16.msra.mxu0 %v7417_v48  ;;  %v8367_v56 = vld [vmem:[%s8879_s23 + $0x220] sm:$0xff]  ;;  %v8368_v48 = vld [vmem:[%s8879_s23 + $0x248] sm:$0xff] }
 0x380   : > { %7522 = vmatpush1.bf16.msra.mxu1 %v7521_v36  ;;  %v8369_v36 = vld [vmem:[%s8879_s23 + $0x240] sm:$0xff] }
 0x381   : > { %4414 = vmatmul.mubr.f32.gmra.mrb[212].mxu0 %v8353_v42  ;;  %v8371_v16 = vld [vmem:[%s8879_s23 + $0x260] sm:$0xff] }
 0x382   : > { %4928 = vmatmul.mubr.f32.gmra.mrb[212].mxu1 %v8353_v42  ;;  %4419 = vmatprep.mubr.f32.mxu0 %v8354_v26  ;;  %v8372_v42 = vld [vmem:[%s8879_s23 + $0x288] sm:$0xff] }
 0x383   : > { %4933 = vmatprep.mubr.f32.mxu1 %v8354_v26  ;;  %v8373_v26 = vld [vmem:[%s8879_s23 + $0x280] sm:$0xff] }
 0x385   : > { %4420 = vmatmul.mubr.f32.gmra.mrb[214].mxu0 %v8355_v50 }
 0x386   : > { %4934 = vmatmul.mubr.f32.gmra.mrb[214].mxu1 %v8355_v50  ;;  %4425 = vmatprep.mubr.f32.mxu0 %v8356_v32  ;;  %v8374_v50 = vld [vmem:[%s8879_s23 + $0x2a8] sm:$0xff] }
 0x387   : > { %4939 = vmatprep.mubr.f32.mxu1 %v8356_v32 }
 0x389   : > { %4426 = vmatmul.mubr.f32.gmra.mrb[216].mxu0 %v8357_v44 }
 0x38a   : > { %4940 = vmatmul.mubr.f32.gmra.mrb[216].mxu1 %v8357_v44  ;;  %4431 = vmatprep.mubr.f32.mxu0 %v8358_v20  ;;  %v5317_v44 = vmul.f32 %v10100_v33, %v10100_v33  ;;  %v5320_v33 = vmul.f32 %v10107_v37, %v10107_v37 }
 0x38b   : > { %4945 = vmatprep.mubr.f32.mxu1 %v8358_v20  ;;  %v5319_v20 = vmul.f32 %v10102_v34, %v10102_v34 }
 0x38d   : > { %4432 = vmatmul.mubr.f32.gmra.mrb[218].mxu0 %v8359_v8 }
 0x38e   : > { %4946 = vmatmul.mubr.f32.gmra.mrb[218].mxu1 %v8359_v8  ;;  %4437 = vmatprep.mubr.f32.mxu0 %v8360_v4 }
 0x38f   : > { %4951 = vmatprep.mubr.f32.mxu1 %v8360_v4 }
 0x391   : > { %4438 = vmatmul.mubr.f32.gmra.mrb[220].mxu0 %v8361_v22 }
 0x392   : > { %4952 = vmatmul.mubr.f32.gmra.mrb[220].mxu1 %v8361_v22  ;;  %4443 = vmatprep.mubr.f32.mxu0 %v8362_v54 }
 0x393   : > { %4957 = vmatprep.mubr.f32.mxu1 %v8362_v54  ;;  %v8375_v54 = vld [vmem:[%s8879_s23 + $0x2a0] sm:$0xff] }
 0x395   : > { %4444 = vmatmul.mubr.f32.gmra.mrb[222].mxu0 %v8363_v2 }
 0x396   : > { %4958 = vmatmul.mubr.f32.gmra.mrb[222].mxu1 %v8363_v2  ;;  %4449 = vmatprep.mubr.f32.mxu0 %v8364_v30  ;;  %v5318_v2 = vmul.f32 %v10104_v35, %v10104_v35  ;;  %v5327_v35 = vmul.f32 %v10112_v40, %v10112_v40 }
 0x397   : > { %4963 = vmatprep.mubr.f32.mxu1 %v8364_v30 }
 0x399   : > { %4450 = vmatmul.mubr.f32.gmra.mrb[224].mxu0 %v8365_v10 }
 0x39a   : > { %4964 = vmatmul.mubr.f32.gmra.mrb[224].mxu1 %v8365_v10  ;;  %4455 = vmatprep.mubr.f32.mxu0 %v8366_v62 }
 0x39b   : > { %4969 = vmatprep.mubr.f32.mxu1 %v8366_v62 }
 0x39d   : > { %4456 = vmatmul.mubr.f32.gmra.mrb[226].mxu0 %v8367_v56 }
 0x39e   : > { %4970 = vmatmul.mubr.f32.gmra.mrb[226].mxu1 %v8367_v56  ;;  %4461 = vmatprep.mubr.f32.mxu0 %v8368_v48  ;;  %v8376_v56 = vld [vmem:[%s8879_s23 + $0x2c8] sm:$0xff] }
 0x39f   : > { %4975 = vmatprep.mubr.f32.mxu1 %v8368_v48 }
 0x3a1   : > { %4462 = vmatmul.mubr.f32.gmra.mrb[228].mxu0 %v8369_v36 }
 0x3a2   : > { %4976 = vmatmul.mubr.f32.gmra.mrb[228].mxu1 %v8369_v36  ;;  %4467 = vmatprep.mubr.f32.mxu0 %v8370_v14 }
 0x3a3   : > { %4981 = vmatprep.mubr.f32.mxu1 %v8370_v14 }
 0x3a5   : > { %4468 = vmatmul.mubr.f32.gmra.mrb[230].mxu0 %v8371_v16 }
 0x3a6   : > { %4982 = vmatmul.mubr.f32.gmra.mrb[230].mxu1 %v8371_v16  ;;  %4473 = vmatprep.mubr.f32.mxu0 %v8372_v42 }
 0x3a7   : > { %4987 = vmatprep.mubr.f32.mxu1 %v8372_v42  ;;  %v5325_v42 = vmul.f32 %v10110_v39, %v10110_v39  ;;  %v5326_v39 = vmul.f32 %v10114_v41, %v10114_v41 }
 0x3a9   : > { %4474 = vmatmul.mubr.f32.gmra.mrb[232].mxu0 %v8373_v26 }
 0x3aa   : > { %4988 = vmatmul.mubr.f32.gmra.mrb[232].mxu1 %v8373_v26  ;;  %4479 = vmatprep.mubr.f32.mxu0 %v8374_v50 }
 0x3ab   : > { %4993 = vmatprep.mubr.f32.mxu1 %v8374_v50 }
 0x3ac   : > { %v3584_v32 = vpop.f32.mrb[128].mxu0 }
 0x3ad   : > { %v5573_v8 = vmul.f32 %v3584_v32, %v3584_v32  ;;  %v4098_v4 = vpop.f32.mrb[128].mxu1  ;;  %v3586_v22 = vpop.f32.mrb[129].mxu0  ;;  %4480 = vmatmul.mubr.f32.gmra.mrb[234].mxu0 %v8375_v54 }
 0x3ae   : > { %v5575_v30 = vmul.f32 %v4098_v4, %v4098_v4  ;;  %v5574_v10 = vmul.f32 %v3586_v22, %v3586_v22  ;;  %v4100_v62 = vpop.f32.mrb[129].mxu1  ;;  %4994 = vmatmul.mubr.f32.gmra.mrb[234].mxu1 %v8375_v54  ;;  %4485 = vmatprep.mubr.f32.mxu0 %v8376_v56  ;;  %v8378_v4 = vld [vmem:[%s8879_s23 + $0x2e8] sm:$0xff]  ;;  %v5328_v22 = vmul.f32 %v10117_v43, %v10117_v43 }
 0x3af   : > { %v5829_v48 = vadd.f32 %v5573_v8, %v5317_v44  ;;  %v5576_v34 = vmul.f32 %v4100_v62, %v4100_v62  ;;  %4999 = vmatprep.mubr.f32.mxu1 %v8376_v56  ;;  %v8377_v44 = vld [vmem:[%s8879_s23 + $0x2c0] sm:$0xff]  ;;  %v5333_v62 = vmul.f32 %v10120_v45, %v10120_v45  ;;  %v5335_v56 = vmul.f32 %v10122_v46, %v10122_v46 }
 0x3b0   : > { %v5831_v36 = vadd.f32 %v5575_v30, %v5319_v20  ;;  %v5830_v14 = vadd.f32 %v5574_v10, %v5318_v2  ;;  %v3590_v16 = vpop.f32.mrb[130].mxu0  ;;  %v5336_v46 = vmul.f32 %v10127_v49, %v10127_v49 }
 0x3b1   : > { %6085 = vst [vmem:[%s12249_s22] sm:$0xff] %v5829_v48  ;;  %v5832_v37 = vadd.f32 %v5576_v34, %v5320_v33  ;;  %v5581_v26 = vmul.f32 %v3590_v16, %v3590_v16  ;;  %v4104_v50 = vpop.f32.mrb[130].mxu1  ;;  %v3592_v32 = vpop.f32.mrb[131].mxu0  ;;  %4486 = vmatmul.mubr.f32.gmra.mrb[236].mxu0 %v8377_v44 }
 0x3b2   : > { %6087 = vst [vmem:[%s12249_s22 + $0x10] sm:$0xff] %v5831_v36  ;;  %6086 = vst [vmem:[%s12249_s22 + $0x8] sm:$0xff] %v5830_v14  ;;  %v5583_v40 = vmul.f32 %v4104_v50, %v4104_v50  ;;  %v5582_v20 = vmul.f32 %v3592_v32, %v3592_v32  ;;  %v4106_v8 = vpop.f32.mrb[131].mxu1  ;;  %5000 = vmatmul.mubr.f32.gmra.mrb[236].mxu1 %v8377_v44  ;;  %4491 = vmatprep.mubr.f32.mxu0 %v8378_v4  ;;  %v8379_v36 = vld [vmem:[%s8879_s23 + $0x2e0] sm:$0xff] }
 0x3b3   : > { %6088 = vst [vmem:[%s12249_s22 + $0x18] sm:$0xff] %v5832_v37  ;;  %v5837_v54 = vadd.f32 %v5581_v26, %v5325_v42  ;;  %v5584_v2 = vmul.f32 %v4106_v8, %v4106_v8  ;;  %5005 = vmatprep.mubr.f32.mxu1 %v8378_v4  ;;  %v5334_v14 = vmul.f32 %v10124_v47, %v10124_v47  ;;  %v8381_v4 = vld [vmem:[%s8879_s23 + $0x300] sm:$0xff] }
 0x3b4   : > { %v5839_v41 = vadd.f32 %v5583_v40, %v5327_v35  ;;  %v5838_v30 = vadd.f32 %v5582_v20, %v5326_v39  ;;  %v3596_v10 = vpop.f32.mrb[132].mxu0  ;;  %v8380_v35 = vld [vmem:[%s8879_s23 + $0x308] sm:$0xff]  ;;  %v5341_v44 = vmul.f32 %v10130_v51, %v10130_v51  ;;  %v5343_v39 = vmul.f32 %v10132_v52, %v10132_v52 }
 0x3b5   : > { %6093 = vst [vmem:[%s12249_s22 + $0x40] sm:$0xff] %v5837_v54  ;;  %v5840_v33 = vadd.f32 %v5584_v2, %v5328_v22  ;;  %v5589_v43 = vmul.f32 %v3596_v10, %v3596_v10  ;;  %v4110_v48 = vpop.f32.mrb[132].mxu1  ;;  %v3598_v34 = vpop.f32.mrb[133].mxu0  ;;  %4492 = vmatmul.mubr.f32.gmra.mrb[238].mxu0 %v8379_v36  ;;  %v5342_v22 = vmul.f32 %v10134_v53, %v10134_v53 }
 0x3b6   : > { %6095 = vst [vmem:[%s12249_s22 + $0x50] sm:$0xff] %v5839_v41  ;;  %6094 = vst [vmem:[%s12249_s22 + $0x48] sm:$0xff] %v5838_v30  ;;  %v5591_v16 = vmul.f32 %v4110_v48, %v4110_v48  ;;  %v5590_v45 = vmul.f32 %v3598_v34, %v3598_v34  ;;  %v4112_v42 = vpop.f32.mrb[133].mxu1  ;;  %5006 = vmatmul.mubr.f32.gmra.mrb[238].mxu1 %v8379_v36  ;;  %4497 = vmatprep.mubr.f32.mxu0 %v8380_v35  ;;  %v8382_v41 = vld [vmem:[%s8879_s23 + $0x328] sm:$0xff] }
 0x3b7   : > { %6096 = vst [vmem:[%s12249_s22 + $0x58] sm:$0xff] %v5840_v33  ;;  %v5845_v37 = vadd.f32 %v5589_v43, %v5333_v62  ;;  %v5592_v26 = vmul.f32 %v4112_v42, %v4112_v42  ;;  %5011 = vmatprep.mubr.f32.mxu1 %v8380_v35  ;;  %v5344_v52 = vmul.f32 %v10137_v55, %v10137_v55  ;;  %v8384_v35 = vld [vmem:[%s8879_s23 + $0x348] sm:$0xff] }
 0x3b8   : > { %v5847_v47 = vadd.f32 %v5591_v16, %v5335_v56  ;;  %v5846_v50 = vadd.f32 %v5590_v45, %v5334_v14  ;;  %v3602_v32 = vpop.f32.mrb[134].mxu0  ;;  %v5349_v33 = vmul.f32 %v10140_v57, %v10140_v57  ;;  %v5351_v43 = vmul.f32 %v10142_v58, %v10142_v58  ;;  %v8383_v14 = vld [vmem:[%s8879_s23 + $0x320] sm:$0xff] }
 0x3b9   : > { %6101 = vst [vmem:[%s12249_s22 + $0x80] sm:$0xff] %v5845_v37  ;;  %v5848_v40 = vadd.f32 %v5592_v26, %v5336_v46  ;;  %v5597_v49 = vmul.f32 %v3602_v32, %v3602_v32  ;;  %v4116_v20 = vpop.f32.mrb[134].mxu1  ;;  %v3604_v8 = vpop.f32.mrb[135].mxu0  ;;  %4498 = vmatmul.mubr.f32.gmra.mrb[240].mxu0 %v8381_v4  ;;  %v5350_v16 = vmul.f32 %v10144_v59, %v10144_v59 }
 0x3ba   : > { %6103 = vst [vmem:[%s12249_s22 + $0x90] sm:$0xff] %v5847_v47  ;;  %6102 = vst [vmem:[%s12249_s22 + $0x88] sm:$0xff] %v5846_v50  ;;  %v5599_v54 = vmul.f32 %v4116_v20, %v4116_v20  ;;  %v5598_v51 = vmul.f32 %v3604_v8, %v3604_v8  ;;  %v4118_v2 = vpop.f32.mrb[135].mxu1  ;;  %5012 = vmatmul.mubr.f32.gmra.mrb[240].mxu1 %v8381_v4  ;;  %4503 = vmatprep.mubr.f32.mxu0 %v8382_v41 }
 0x3bb   : > { %6104 = vst [vmem:[%s12249_s22 + $0x98] sm:$0xff] %v5848_v40  ;;  %v5853_v30 = vadd.f32 %v5597_v49, %v5341_v44  ;;  %v5600_v10 = vmul.f32 %v4118_v2, %v4118_v2  ;;  %5017 = vmatprep.mubr.f32.mxu1 %v8382_v41  ;;  %v5352_v58 = vmul.f32 %v10147_v61, %v10147_v61  ;;  %v8385_v49 = vld [vmem:[%s8879_s23 + $0x340] sm:$0xff] }
 0x3bc   : > { %v5855_v53 = vadd.f32 %v5599_v54, %v5343_v39  ;;  %v5854_v62 = vadd.f32 %v5598_v51, %v5342_v22  ;;  %v3608_v56 = vpop.f32.mrb[136].mxu0  ;;  %v5357_v50 = vmul.f32 %v10150_v63, %v10150_v63  ;;  %v5359_v32 = vmul.f32 %v10152_v0, %v10152_v0  ;;  %v8386_v22 = vld [vmem:[%s8879_s23 + $0x368] sm:$0xff] }
 0x3bd   : > { %6109 = vst [vmem:[%s12249_s22 + $0xc0] sm:$0xff] %v5853_v30  ;;  %v5856_v48 = vadd.f32 %v5600_v10, %v5344_v52  ;;  %v5605_v55 = vmul.f32 %v3608_v56, %v3608_v56  ;;  %v4122_v34 = vpop.f32.mrb[136].mxu1  ;;  %v3610_v36 = vpop.f32.mrb[137].mxu0  ;;  %4504 = vmatmul.mubr.f32.gmra.mrb[242].mxu0 %v8383_v14  ;;  %v5358_v20 = vmul.f32 %v10154_v1, %v10154_v1  ;;  %v8387_v56 = vld [vmem:[%s8879_s23 + $0x360] sm:$0xff] }
 0x3be   : > { %6111 = vst [vmem:[%s12249_s22 + $0xd0] sm:$0xff] %v5855_v53  ;;  %6110 = vst [vmem:[%s12249_s22 + $0xc8] sm:$0xff] %v5854_v62  ;;  %v5607_v45 = vmul.f32 %v4122_v34, %v4122_v34  ;;  %v5606_v57 = vmul.f32 %v3610_v36, %v3610_v36  ;;  %v4124_v42 = vpop.f32.mrb[137].mxu1  ;;  %5018 = vmatmul.mubr.f32.gmra.mrb[242].mxu1 %v8383_v14  ;;  %4509 = vmatprep.mubr.f32.mxu0 %v8384_v35 }
 0x3bf   : > { %6112 = vst [vmem:[%s12249_s22 + $0xd8] sm:$0xff] %v5856_v48  ;;  %v5861_v46 = vadd.f32 %v5605_v55, %v5349_v33  ;;  %v5608_v37 = vmul.f32 %v4124_v42, %v4124_v42  ;;  %5023 = vmatprep.mubr.f32.mxu1 %v8384_v35  ;;  %v5360_v0 = vmul.f32 %v10157_v3, %v10157_v3  ;;  %v8388_v55 = vld [vmem:[%s8879_s23 + $0x388] sm:$0xff] }
 0x3c0   : > { %v5863_v59 = vadd.f32 %v5607_v45, %v5351_v43  ;;  %v5862_v26 = vadd.f32 %v5606_v57, %v5350_v16  ;;  %v3614_v47 = vpop.f32.mrb[138].mxu0  ;;  %v5365_v52 = vmul.f32 %v10160_v5, %v10160_v5  ;;  %v5367_v30 = vmul.f32 %v10162_v6, %v10162_v6 }
 0x3c1   : > { %6117 = vst [vmem:[%s12249_s22 + $0x100] sm:$0xff] %v5861_v46  ;;  %v5864_v44 = vadd.f32 %v5608_v37, %v5352_v58  ;;  %v5613_v61 = vmul.f32 %v3614_v47, %v3614_v47  ;;  %v4128_v39 = vpop.f32.mrb[138].mxu1  ;;  %v3616_v40 = vpop.f32.mrb[139].mxu0  ;;  %4510 = vmatmul.mubr.f32.gmra.mrb[244].mxu0 %v8385_v49  ;;  %v5366_v33 = vmul.f32 %v10164_v7, %v10164_v7  ;;  %v8389_v46 = vld [vmem:[%s8879_s23 + $0x380] sm:$0xff]  ;;  %v8390_v47 = vld [vmem:[%s8879_s23 + $0x3a8] sm:$0xff] }
 0x3c2   : > { %6119 = vst [vmem:[%s12249_s22 + $0x110] sm:$0xff] %v5863_v59  ;;  %6118 = vst [vmem:[%s12249_s22 + $0x108] sm:$0xff] %v5862_v26  ;;  %v5615_v8 = vmul.f32 %v4128_v39, %v4128_v39  ;;  %v5614_v63 = vmul.f32 %v3616_v40, %v3616_v40  ;;  %v4130_v4 = vpop.f32.mrb[139].mxu1  ;;  %5024 = vmatmul.mubr.f32.gmra.mrb[244].mxu1 %v8385_v49  ;;  %4515 = vmatprep.mubr.f32.mxu0 %v8386_v22 }
 0x3c3   : > { %6120 = vst [vmem:[%s12249_s22 + $0x118] sm:$0xff] %v5864_v44  ;;  %v5869_v54 = vadd.f32 %v5613_v61, %v5357_v50  ;;  %v5616_v51 = vmul.f32 %v4130_v4, %v4130_v4  ;;  %5029 = vmatprep.mubr.f32.mxu1 %v8386_v22  ;;  %v5368_v6 = vmul.f32 %v10167_v9, %v10167_v9 }
 0x3c4   : > { %v5871_v1 = vadd.f32 %v5615_v8, %v5359_v32  ;;  %v5870_v2 = vadd.f32 %v5614_v63, %v5358_v20  ;;  %v3620_v41 = vpop.f32.mrb[140].mxu0  ;;  %v5373_v45 = vmul.f32 %v10170_v11, %v10170_v11  ;;  %v5375_v57 = vmul.f32 %v10172_v12, %v10172_v12  ;;  %v8391_v63 = vld [vmem:[%s8879_s23 + $0x3a0] sm:$0xff] }
 0x3c5   : > { %6125 = vst [vmem:[%s12249_s22 + $0x140] sm:$0xff] %v5869_v54  ;;  %v5872_v10 = vadd.f32 %v5616_v51, %v5360_v0  ;;  %v5621_v3 = vmul.f32 %v3620_v41, %v3620_v41  ;;  %v4134_v53 = vpop.f32.mrb[140].mxu1  ;;  %v3622_v62 = vpop.f32.mrb[141].mxu0  ;;  %4516 = vmatmul.mubr.f32.gmra.mrb[246].mxu0 %v8387_v56  ;;  %v5374_v37 = vmul.f32 %v10174_v13, %v10174_v13  ;;  %v8392_v54 = vld [vmem:[%s8879_s23 + $0x3c8] sm:$0xff] }
 0x3c6   : > { %6127 = vst [vmem:[%s12249_s22 + $0x150] sm:$0xff] %v5871_v1  ;;  %6126 = vst [vmem:[%s12249_s22 + $0x148] sm:$0xff] %v5870_v2  ;;  %v5623_v43 = vmul.f32 %v4134_v53, %v4134_v53  ;;  %v5622_v5 = vmul.f32 %v3622_v62, %v3622_v62  ;;  %v4136_v48 = vpop.f32.mrb[141].mxu1  ;;  %5030 = vmatmul.mubr.f32.gmra.mrb[246].mxu1 %v8387_v56  ;;  %4521 = vmatprep.mubr.f32.mxu0 %v8388_v55  ;;  %v8393_v62 = vld [vmem:[%s8879_s23 + $0x3c0] sm:$0xff] }
 0x3c7   : > { %6128 = vst [vmem:[%s12249_s22 + $0x158] sm:$0xff] %v5872_v10  ;;  %v5877_v34 = vadd.f32 %v5621_v3, %v5365_v52  ;;  %v5624_v36 = vmul.f32 %v4136_v48, %v4136_v48  ;;  %5035 = vmatprep.mubr.f32.mxu1 %v8388_v55  ;;  %v5376_v12 = vmul.f32 %v10177_v15, %v10177_v15 }
 0x3c8   : > { %v5879_v7 = vadd.f32 %v5623_v43, %v5367_v30  ;;  %v5878_v14 = vadd.f32 %v5622_v5, %v5366_v33  ;;  %v3626_v16 = vpop.f32.mrb[142].mxu0  ;;  %v5381_v39 = vmul.f32 %v10180_v17, %v10180_v17  ;;  %v5383_v40 = vmul.f32 %v10182_v18, %v10182_v18  ;;  %v8394_v5 = vld [vmem:[%s8879_s23 + $0x3e8] sm:$0xff] }
 0x3c9   : > { %6133 = vst [vmem:[%s12249_s22 + $0x180] sm:$0xff] %v5877_v34  ;;  %v5880_v42 = vadd.f32 %v5624_v36, %v5368_v6  ;;  %v5629_v9 = vmul.f32 %v3626_v16, %v3626_v16  ;;  %v4140_v35 = vpop.f32.mrb[142].mxu1  ;;  %v3628_v58 = vpop.f32.mrb[143].mxu0  ;;  %4522 = vmatmul.mubr.f32.gmra.mrb[248].mxu0 %v8389_v46  ;;  %v5382_v4 = vmul.f32 %v10184_v19, %v10184_v19 }
 0x3ca   : > { %6135 = vst [vmem:[%s12249_s22 + $0x190] sm:$0xff] %v5879_v7  ;;  %6134 = vst [vmem:[%s12249_s22 + $0x188] sm:$0xff] %v5878_v14  ;;  %v5631_v59 = vmul.f32 %v4140_v35, %v4140_v35  ;;  %v5630_v11 = vmul.f32 %v3628_v58, %v3628_v58  ;;  %v4142_v26 = vpop.f32.mrb[143].mxu1  ;;  %5036 = vmatmul.mubr.f32.gmra.mrb[248].mxu1 %v8389_v46  ;;  %4527 = vmatprep.mubr.f32.mxu0 %v8390_v47  ;;  %v8396_v46 = vld [vmem:[%s8879_s23 + $0x18] sm:$0xff] }
 0x3cb   : > { %6136 = vst [vmem:[%s12249_s22 + $0x198] sm:$0xff] %v5880_v42  ;;  %v5885_v50 = vadd.f32 %v5629_v9, %v5373_v45  ;;  %v5632_v32 = vmul.f32 %v4142_v26, %v4142_v26  ;;  %5041 = vmatprep.mubr.f32.mxu1 %v8390_v47  ;;  %v5384_v18 = vmul.f32 %v10187_v21, %v10187_v21  ;;  %v13423_v42 = vld [vmem:[#allocation5_spill] sm:$0xff] }
 0x3cc   : > { %v5887_v13 = vadd.f32 %v5631_v59, %v5375_v57  ;;  %v5886_v44 = vadd.f32 %v5630_v11, %v5374_v37  ;;  %v3632_v61 = vpop.f32.mrb[144].mxu0  ;;  %v5389_v52 = vmul.f32 %v10190_v23, %v10190_v23  ;;  %v5391_v30 = vmul.f32 %v10192_v24, %v10192_v24  ;;  %v8395_v57 = vld [vmem:[%s8879_s23 + $0x3e0] sm:$0xff] }
 0x3cd   : > { %6141 = vst [vmem:[%s12249_s22 + $0x1c0] sm:$0xff] %v5885_v50  ;;  %v5888_v49 = vadd.f32 %v5632_v32, %v5376_v12  ;;  %v5637_v15 = vmul.f32 %v3632_v61, %v3632_v61  ;;  %v4146_v20 = vpop.f32.mrb[144].mxu1  ;;  %v3634_v8 = vpop.f32.mrb[145].mxu0  ;;  %4528 = vmatmul.mubr.f32.gmra.mrb[250].mxu0 %v8391_v63  ;;  %v5390_v56 = vmul.f32 %v10194_v25, %v10194_v25  ;;  %v13425_v50 = vld [vmem:[#allocation7_spill] sm:$0xff] }
 0x3ce   : > { %6143 = vst [vmem:[%s12249_s22 + $0x1d0] sm:$0xff] %v5887_v13  ;;  %6142 = vst [vmem:[%s12249_s22 + $0x1c8] sm:$0xff] %v5886_v44  ;;  %v5639_v22 = vmul.f32 %v4146_v20, %v4146_v20  ;;  %v5638_v17 = vmul.f32 %v3634_v8, %v3634_v8  ;;  %v4148_v0 = vpop.f32.mrb[145].mxu1  ;;  %5042 = vmatmul.mubr.f32.gmra.mrb[250].mxu1 %v8391_v63  ;;  %4533 = vmatprep.mubr.f32.mxu0 %v8392_v54  ;;  %v13426_v13 = vld [vmem:[#allocation8_spill] sm:$0xff]  ;;  %v13427_v20 = vld [vmem:[#allocation9_spill] sm:$0xff] }
 0x3cf   : > { %6144 = vst [vmem:[%s12249_s22 + $0x1d8] sm:$0xff] %v5888_v49  ;;  %v5893_v51 = vadd.f32 %v5637_v15, %v5381_v39  ;;  %v5640_v1 = vmul.f32 %v4148_v0, %v4148_v0  ;;  %5047 = vmatprep.mubr.f32.mxu1 %v8392_v54  ;;  %v5392_v24 = vmul.f32 %v10197_v27, %v10197_v27  ;;  %v8397_v15 = vld [vmem:[%s8879_s23 + $0x10] sm:$0xff]  ;;  %v13428_v0 = vld [vmem:[#allocation10_spill] sm:$0xff] }
 0x3d0   : > { %v5895_v19 = vadd.f32 %v5639_v22, %v5383_v40  ;;  %v5894_v2 = vadd.f32 %v5638_v17, %v5382_v4  ;;  %v3638_v41 = vpop.f32.mrb[146].mxu0  ;;  %v5397_v36 = vmul.f32 %v10206_v31, %v10206_v31  ;;  %v5399_v7 = vmul.f32 %v10214_v38, %v10214_v38  ;;  %v13424_v38 = vld [vmem:[#allocation6_spill] sm:$0xff]  ;;  %v8398_v17 = vld [vmem:[%s8879_s23 + $0x38] sm:$0xff] }
 0x3d1   : > { %6149 = vst [vmem:[%s12249_s22 + $0x200] sm:$0xff] %v5893_v51  ;;  %v5896_v10 = vadd.f32 %v5640_v1, %v5384_v18  ;;  %v5645_v21 = vmul.f32 %v3638_v41, %v3638_v41  ;;  %v4152_v3 = vpop.f32.mrb[146].mxu1  ;;  %v3640_v53 = vpop.f32.mrb[147].mxu0  ;;  %4534 = vmatmul.mubr.f32.gmra.mrb[252].mxu0 %v8393_v62  ;;  %v5398_v9 = vmul.f32 %v13423_v42, %v13423_v42  ;;  %v13429_v41 = vld [vmem:[#allocation11_spill] sm:$0xff] }
 0x3d2   : > { %6151 = vst [vmem:[%s12249_s22 + $0x210] sm:$0xff] %v5895_v19  ;;  %6150 = vst [vmem:[%s12249_s22 + $0x208] sm:$0xff] %v5894_v2  ;;  %v5647_v33 = vmul.f32 %v4152_v3, %v4152_v3  ;;  %v5646_v23 = vmul.f32 %v3640_v53, %v3640_v53  ;;  %v4154_v43 = vpop.f32.mrb[147].mxu1  ;;  %5048 = vmatmul.mubr.f32.gmra.mrb[252].mxu1 %v8393_v62  ;;  %4539 = vmatprep.mubr.f32.mxu0 %v8394_v5 }
 0x3d3   : > { %6152 = vst [vmem:[%s12249_s22 + $0x218] sm:$0xff] %v5896_v10  ;;  %v5901_v48 = vadd.f32 %v5645_v21, %v5389_v52  ;;  %v5648_v55 = vmul.f32 %v4154_v43, %v4154_v43  ;;  %5053 = vmatprep.mubr.f32.mxu1 %v8394_v5  ;;  %v5400_v37 = vmul.f32 %v13424_v38, %v13424_v38 }
 0x3d4   : > { %v5903_v25 = vadd.f32 %v5647_v33, %v5391_v30  ;;  %v5902_v6 = vadd.f32 %v5646_v23, %v5390_v56  ;;  %v3644_v34 = vpop.f32.mrb[148].mxu0  ;;  %v5405_v32 = vmul.f32 %v13425_v50, %v13425_v50  ;;  %v5407_v44 = vmul.f32 %v13426_v13, %v13426_v13  ;;  %v13430_v30 = vld [vmem:[#allocation12_spill] sm:$0xff]  ;;  %v8399_v56 = vld [vmem:[%s8879_s23 + $0x30] sm:$0xff]  ;;  %v13431_v33 = vld [vmem:[#allocation13_spill] sm:$0xff] }
 0x3d5   : > { %6157 = vst [vmem:[%s12249_s22 + $0x240] sm:$0xff] %v5901_v48  ;;  %v5904_v14 = vadd.f32 %v5648_v55, %v5392_v24  ;;  %v5653_v27 = vmul.f32 %v3644_v34, %v3644_v34  ;;  %v4158_v16 = vpop.f32.mrb[148].mxu1  ;;  %v3646_v45 = vpop.f32.mrb[149].mxu0  ;;  %4540 = vmatmul.mubr.f32.gmra.mrb[254].mxu0 %v8395_v57  ;;  %v5406_v8 = vmul.f32 %v13427_v20, %v13427_v20  ;;  %v8400_v48 = vld [vmem:[%s8879_s23 + $0x58] sm:$0xff]  ;;  %v13432_v55 = vld [vmem:[#allocation14_spill] sm:$0xff] }
 0x3d6   : > { %6159 = vst [vmem:[%s12249_s22 + $0x250] sm:$0xff] %v5903_v25  ;;  %6158 = vst [vmem:[%s12249_s22 + $0x248] sm:$0xff] %v5902_v6  ;;  %v5655_v35 = vmul.f32 %v4158_v16, %v4158_v16  ;;  %v5654_v31 = vmul.f32 %v3646_v45, %v3646_v45  ;;  %v4160_v58 = vpop.f32.mrb[149].mxu1  ;;  %5054 = vmatmul.mubr.f32.gmra.mrb[254].mxu1 %v8395_v57  ;;  %6618 = vmatprep.mubr.msk.f32.mxu0 %vm1108_vm0, %v8396_v46  ;;  %v13434_v45 = vld [vmem:[#allocation16_spill] sm:$0xff] }
 0x3d7   : > { %6160 = vst [vmem:[%s12249_s22 + $0x258] sm:$0xff] %v5904_v14  ;;  %v5909_v59 = vadd.f32 %v5653_v27, %v5397_v36  ;;  %v5656_v11 = vmul.f32 %v4160_v58, %v4160_v58  ;;  %6650 = vmatprep.mubr.msk.f32.mxu1 %vm1108_vm0, %v8396_v46  ;;  %v5408_v54 = vmul.f32 %v13428_v0, %v13428_v0  ;;  %v13433_v27 = vld [vmem:[#allocation15_spill] sm:$0xff]  ;;  %v13435_v46 = vld [vmem:[#allocation17_spill] sm:$0xff] }
 0x3d8   : > { %v5911_v26 = vadd.f32 %v5655_v35, %v5399_v7  ;;  %v5910_v47 = vadd.f32 %v5654_v31, %v5398_v9  ;;  %v3650_v12 = vpop.f32.mrb[150].mxu0  ;;  %v5413_v52 = vmul.f32 %v13429_v41, %v13429_v41  ;;  %v5415_v10 = vmul.f32 %v13430_v30, %v13430_v30  ;;  %v8401_v58 = vld [vmem:[%s8879_s23 + $0x50] sm:$0xff] }
 0x3d9   : > { %6165 = vst [vmem:[%s12249_s22 + $0x280] sm:$0xff] %v5909_v59  ;;  %v5912_v61 = vadd.f32 %v5656_v11, %v5400_v37  ;;  %v5661_v39 = vmul.f32 %v3650_v12, %v3650_v12  ;;  %v4164_v40 = vpop.f32.mrb[150].mxu1  ;;  %v3652_v49 = vpop.f32.mrb[151].mxu0  ;;  %4611 = vmatmul.mubr.f32.vlgmr.msra.gmra.mrb[192].mxu0 %v8397_v15  ;;  %v5414_v23 = vmul.f32 %v13431_v33, %v13431_v33 }
 0x3da   : > { %6167 = vst [vmem:[%s12249_s22 + $0x290] sm:$0xff] %v5911_v26  ;;  %6166 = vst [vmem:[%s12249_s22 + $0x288] sm:$0xff] %v5910_v47  ;;  %v5663_v63 = vmul.f32 %v4164_v40, %v4164_v40  ;;  %v5662_v4 = vmul.f32 %v3652_v49, %v3652_v49  ;;  %v4166_v22 = vpop.f32.mrb[151].mxu1  ;;  %5125 = vmatmul.mubr.f32.vlgmr.msra.gmra.mrb[192].mxu1 %v8397_v15  ;;  %6619 = vmatprep.mubr.msk.f32.mxu0 %vm1108_vm0, %v8398_v17  ;;  %v8402_v26 = vld [vmem:[%s8879_s23 + $0x78] sm:$0xff]  ;;  %v13436_v47 = vld [vmem:[#allocation18_spill] sm:$0xff] }
 0x3db   : > { %6168 = vst [vmem:[%s12249_s22 + $0x298] sm:$0xff] %v5912_v61  ;;  %v5917_v18 = vadd.f32 %v5661_v39, %v5405_v32  ;;  %v5664_v51 = vmul.f32 %v4166_v22, %v4166_v22  ;;  %6651 = vmatprep.mubr.msk.f32.mxu1 %vm1108_vm0, %v8398_v17  ;;  %v5416_v25 = vmul.f32 %v13432_v55, %v13432_v55  ;;  %v13437_v39 = vld [vmem:[#allocation19_spill] sm:$0xff]  ;;  %v13438_v49 = vld [vmem:[#allocation20_spill] sm:$0xff]  ;;  %v13439_v17 = vld [vmem:[#allocation21_spill] sm:$0xff] }
 0x3dc   : > { %v5919_v1 = vadd.f32 %v5663_v63, %v5407_v44  ;;  %v5918_v19 = vadd.f32 %v5662_v4, %v5406_v8  ;;  %v3656_v2 = vpop.f32.mrb[152].mxu0  ;;  %v5421_v16 = vmul.f32 %v13433_v27, %v13433_v27  ;;  %v5423_v57 = vmul.f32 %v13434_v45, %v13434_v45  ;;  %v8403_v22 = vld [vmem:[%s8879_s23 + $0x70] sm:$0xff] }
 0x3dd   : > { %6173 = vst [vmem:[%s12249_s22 + $0x2c0] sm:$0xff] %v5917_v18  ;;  %v5920_v21 = vadd.f32 %v5664_v51, %v5408_v54  ;;  %v5669_v3 = vmul.f32 %v3656_v2, %v3656_v2  ;;  %v4170_v53 = vpop.f32.mrb[152].mxu1  ;;  %v3658_v62 = vpop.f32.mrb[153].mxu0  ;;  %4617 = vmatmul.mubr.f32.gmra.mrb[194].mxu0 %v8399_v56  ;;  %v5422_v38 = vmul.f32 %v13435_v46, %v13435_v46 }
 0x3de   : > { %6175 = vst [vmem:[%s12249_s22 + $0x2d0] sm:$0xff] %v5919_v1  ;;  %6174 = vst [vmem:[%s12249_s22 + $0x2c8] sm:$0xff] %v5918_v19  ;;  %v5671_v43 = vmul.f32 %v4170_v53, %v4170_v53  ;;  %v5670_v5 = vmul.f32 %v3658_v62, %v3658_v62  ;;  %v4172_v24 = vpop.f32.mrb[153].mxu1  ;;  %5131 = vmatmul.mubr.f32.gmra.mrb[194].mxu1 %v8399_v56  ;;  %6620 = vmatprep.mubr.msk.f32.mxu0 %vm1108_vm0, %v8400_v48  ;;  %v8404_v1 = vld [vmem:[%s8879_s23 + $0x98] sm:$0xff]  ;;  %v13440_v19 = vld [vmem:[#allocation22_spill] sm:$0xff] }
 0x3df   : > { %6176 = vst [vmem:[%s12249_s22 + $0x2d8] sm:$0xff] %v5920_v21  ;;  %v5925_v6 = vadd.f32 %v5669_v3, %v5413_v52  ;;  %v5672_v34 = vmul.f32 %v4172_v24, %v4172_v24  ;;  %6652 = vmatprep.mubr.msk.f32.mxu1 %vm1108_vm0, %v8400_v48  ;;  %v5424_v12 = vmul.f32 %v13436_v47, %v13436_v47  ;;  %v13441_v3 = vld [vmem:[#allocation23_spill] sm:$0xff]  ;;  %v13442_v62 = vld [vmem:[#allocation24_spill] sm:$0xff]  ;;  %v13443_v48 = vld [vmem:[#allocation25_spill] sm:$0xff] }
 0x3e0   : > { %v5927_v36 = vadd.f32 %v5671_v43, %v5415_v10  ;;  %v5926_v7 = vadd.f32 %v5670_v5, %v5414_v23  ;;  %v3662_v14 = vpop.f32.mrb[154].mxu0  ;;  %v5429_v40 = vmul.f32 %v13437_v39, %v13437_v39  ;;  %v5431_v15 = vmul.f32 %v13438_v49, %v13438_v49  ;;  %v8405_v24 = vld [vmem:[%s8879_s23 + $0x90] sm:$0xff] }
 0x3e1   : > { %6181 = vst [vmem:[%s12249_s22 + $0x300] sm:$0xff] %v5925_v6  ;;  %v5928_v42 = vadd.f32 %v5672_v34, %v5416_v25  ;;  %v5677_v9 = vmul.f32 %v3662_v14, %v3662_v14  ;;  %v4176_v35 = vpop.f32.mrb[154].mxu1  ;;  %v3664_v31 = vpop.f32.mrb[155].mxu0  ;;  %4623 = vmatmul.mubr.f32.gmra.mrb[196].mxu0 %v8401_v58  ;;  %v5430_v0 = vmul.f32 %v13439_v17, %v13439_v17 }
 0x3e2   : > { %6183 = vst [vmem:[%s12249_s22 + $0x310] sm:$0xff] %v5927_v36  ;;  %6182 = vst [vmem:[%s12249_s22 + $0x308] sm:$0xff] %v5926_v7  ;;  %v5679_v37 = vmul.f32 %v4176_v35, %v4176_v35  ;;  %v5678_v59 = vmul.f32 %v3664_v31, %v3664_v31  ;;  %v4178_v11 = vpop.f32.mrb[155].mxu1  ;;  %5137 = vmatmul.mubr.f32.gmra.mrb[196].mxu1 %v8401_v58  ;;  %6621 = vmatprep.mubr.msk.f32.mxu0 %vm1108_vm0, %v8402_v26  ;;  %v8406_v36 = vld [vmem:[%s8879_s23 + $0xb8] sm:$0xff]  ;;  %v13444_v7 = vld [vmem:[#allocation26_spill] sm:$0xff] }
 0x3e3   : > { %6184 = vst [vmem:[%s12249_s22 + $0x318] sm:$0xff] %v5928_v42  ;;  %v5933_v50 = vadd.f32 %v5677_v9, %v5421_v16  ;;  %v5680_v32 = vmul.f32 %v4178_v11, %v4178_v11  ;;  %6653 = vmatprep.mubr.msk.f32.mxu1 %vm1108_vm0, %v8402_v26  ;;  %v5432_v2 = vmul.f32 %v13440_v19, %v13440_v19  ;;  %v13445_v9 = vld [vmem:[#allocation27_spill] sm:$0xff]  ;;  %v13446_v31 = vld [vmem:[#allocation28_spill] sm:$0xff]  ;;  %v13447_v26 = vld [vmem:[#allocation29_spill] sm:$0xff] }
 0x3e4   : > { %v5935_v13 = vadd.f32 %v5679_v37, %v5423_v57  ;;  %v5934_v44 = vadd.f32 %v5678_v59, %v5422_v38  ;;  %v3668_v61 = vpop.f32.mrb[156].mxu0  ;;  %v5437_v53 = vmul.f32 %v13441_v3, %v13441_v3  ;;  %v5439_v56 = vmul.f32 %v13442_v62, %v13442_v62  ;;  %v8407_v11 = vld [vmem:[%s8879_s23 + $0xb0] sm:$0xff] }
 0x3e5   : > { %6189 = vst [vmem:[%s12249_s22 + $0x340] sm:$0xff] %v5933_v50  ;;  %v5936_v20 = vadd.f32 %v5680_v32, %v5424_v12  ;;  %v5685_v8 = vmul.f32 %v3668_v61, %v3668_v61  ;;  %v4182_v63 = vpop.f32.mrb[156].mxu1  ;;  %v3670_v4 = vpop.f32.mrb[157].mxu0  ;;  %4629 = vmatmul.mubr.f32.gmra.mrb[198].mxu0 %v8403_v22  ;;  %v5438_v55 = vmul.f32 %v13443_v48, %v13443_v48 }
 0x3e6   : > { %6191 = vst [vmem:[%s12249_s22 + $0x350] sm:$0xff] %v5935_v13  ;;  %6190 = vst [vmem:[%s12249_s22 + $0x348] sm:$0xff] %v5934_v44  ;;  %v5687_v54 = vmul.f32 %v4182_v63, %v4182_v63  ;;  %v5686_v18 = vmul.f32 %v3670_v4, %v3670_v4  ;;  %v4184_v51 = vpop.f32.mrb[157].mxu1  ;;  %5143 = vmatmul.mubr.f32.gmra.mrb[198].mxu1 %v8403_v22  ;;  %6622 = vmatprep.mubr.msk.f32.mxu0 %vm1108_vm0, %v8404_v1  ;;  %v8408_v13 = vld [vmem:[%s8879_s23 + $0xd8] sm:$0xff]  ;;  %v13448_v44 = vld [vmem:[#allocation30_spill] sm:$0xff] }
 0x3e7   : > { %6192 = vst [vmem:[%s12249_s22 + $0x358] sm:$0xff] %v5936_v20  ;;  %v5941_v41 = vadd.f32 %v5685_v8, %v5429_v40  ;;  %v5688_v52 = vmul.f32 %v4184_v51, %v4184_v51  ;;  %6654 = vmatprep.mubr.msk.f32.mxu1 %vm1108_vm0, %v8404_v1  ;;  %v5440_v14 = vmul.f32 %v13444_v7, %v13444_v7  ;;  %v13449_v8 = vld [vmem:[#allocation31_spill] sm:$0xff]  ;;  %v13450_v4 = vld [vmem:[#allocation32_spill] sm:$0xff]  ;;  %v13451_v1 = vld [vmem:[#allocation33_spill] sm:$0xff] }
 0x3e8   : > { %v5943_v30 = vadd.f32 %v5687_v54, %v5431_v15  ;;  %v5942_v10 = vadd.f32 %v5686_v18, %v5430_v0  ;;  %v3674_v21 = vpop.f32.mrb[158].mxu0  ;;  %v5445_v35 = vmul.f32 %v13445_v9, %v13445_v9  ;;  %v5447_v58 = vmul.f32 %v13446_v31, %v13446_v31  ;;  %v8409_v51 = vld [vmem:[%s8879_s23 + $0xd0] sm:$0xff] }
 0x3e9   : > { %6197 = vst [vmem:[%s12249_s22 + $0x380] sm:$0xff] %v5941_v41  ;;  %v5944_v33 = vadd.f32 %v5688_v52, %v5432_v2  ;;  %v5693_v23 = vmul.f32 %v3674_v21, %v3674_v21  ;;  %v4188_v43 = vpop.f32.mrb[158].mxu1  ;;  %v3676_v5 = vpop.f32.mrb[159].mxu0  ;;  %4635 = vmatmul.mubr.f32.gmra.mrb[200].mxu0 %v8405_v24  ;;  %v5446_v47 = vmul.f32 %v13447_v26, %v13447_v26 }
 0x3ea   : > { %6199 = vst [vmem:[%s12249_s22 + $0x390] sm:$0xff] %v5943_v30  ;;  %6198 = vst [vmem:[%s12249_s22 + $0x388] sm:$0xff] %v5942_v10  ;;  %v5695_v25 = vmul.f32 %v4188_v43, %v4188_v43  ;;  %v5694_v6 = vmul.f32 %v3676_v5, %v3676_v5  ;;  %v4190_v34 = vpop.f32.mrb[159].mxu1  ;;  %5149 = vmatmul.mubr.f32.gmra.mrb[200].mxu1 %v8405_v24  ;;  %6623 = vmatprep.mubr.msk.f32.mxu0 %vm1108_vm0, %v8406_v36  ;;  %v8410_v30 = vld [vmem:[%s8879_s23 + $0xf8] sm:$0xff]  ;;  %v13452_v10 = vld [vmem:[#allocation34_spill] sm:$0xff] }
 0x3eb   : > { %6200 = vst [vmem:[%s12249_s22 + $0x398] sm:$0xff] %v5944_v33  ;;  %v5949_v27 = vadd.f32 %v5693_v23, %v5437_v53  ;;  %v5696_v16 = vmul.f32 %v4190_v34, %v4190_v34  ;;  %6655 = vmatprep.mubr.msk.f32.mxu1 %vm1108_vm0, %v8406_v36  ;;  %v5448_v61 = vmul.f32 %v13448_v44, %v13448_v44  ;;  %v13453_v23 = vld [vmem:[#allocation35_spill] sm:$0xff]  ;;  %v13454_v5 = vld [vmem:[#allocation36_spill] sm:$0xff]  ;;  %v13455_v36 = vld [vmem:[#allocation37_spill] sm:$0xff] }
 0x3ec   : > { %v5951_v45 = vadd.f32 %v5695_v25, %v5439_v56  ;;  %v5950_v57 = vadd.f32 %v5694_v6, %v5438_v55  ;;  %v3680_v42 = vpop.f32.mrb[160].mxu0  ;;  %v5453_v63 = vmul.f32 %v13449_v8, %v13449_v8  ;;  %v5455_v22 = vmul.f32 %v13450_v4, %v13450_v4  ;;  %v8411_v34 = vld [vmem:[%s8879_s23 + $0xf0] sm:$0xff] }
 0x3ed   : > { %6205 = vst [vmem:[%s12249_s22 + $0x3c0] sm:$0xff] %v5949_v27  ;;  %v5952_v46 = vadd.f32 %v5696_v16, %v5440_v14  ;;  %v5701_v38 = vmul.f32 %v3680_v42, %v3680_v42  ;;  %v4194_v37 = vpop.f32.mrb[160].mxu1  ;;  %v3682_v59 = vpop.f32.mrb[161].mxu0  ;;  %4641 = vmatmul.mubr.f32.gmra.mrb[202].mxu0 %v8407_v11  ;;  %v5454_v19 = vmul.f32 %v13451_v1, %v13451_v1 }
 0x3ee   : > { %6207 = vst [vmem:[%s12249_s22 + $0x3d0] sm:$0xff] %v5951_v45  ;;  %6206 = vst [vmem:[%s12249_s22 + $0x3c8] sm:$0xff] %v5950_v57  ;;  %v5703_v12 = vmul.f32 %v4194_v37, %v4194_v37  ;;  %v5702_v50 = vmul.f32 %v3682_v59, %v3682_v59  ;;  %v4196_v32 = vpop.f32.mrb[161].mxu1  ;;  %5155 = vmatmul.mubr.f32.gmra.mrb[202].mxu1 %v8407_v11  ;;  %6624 = vmatprep.mubr.msk.f32.mxu0 %vm1108_vm0, %v8408_v13  ;;  %v8412_v45 = vld [vmem:[%s8879_s23 + $0x118] sm:$0xff]  ;;  %v13456_v57 = vld [vmem:[#allocation38_spill] sm:$0xff] }
 0x3ef   : > { %6208 = vst [vmem:[%s12249_s22 + $0x3d8] sm:$0xff] %v5952_v46  ;;  %v5957_v39 = vadd.f32 %v5701_v38, %v5445_v35  ;;  %v5704_v40 = vmul.f32 %v4196_v32, %v4196_v32  ;;  %6656 = vmatprep.mubr.msk.f32.mxu1 %vm1108_vm0, %v8408_v13  ;;  %v5456_v21 = vmul.f32 %v13452_v10, %v13452_v10  ;;  %v13457_v38 = vld [vmem:[#allocation39_spill] sm:$0xff]  ;;  %v13458_v59 = vld [vmem:[#allocation40_spill] sm:$0xff]  ;;  %v13459_v13 = vld [vmem:[#allocation41_spill] sm:$0xff] }
 0x3f0   : > { %v5959_v49 = vadd.f32 %v5703_v12, %v5447_v58  ;;  %v5958_v15 = vadd.f32 %v5702_v50, %v5446_v47  ;;  %v3686_v20 = vpop.f32.mrb[162].mxu0  ;;  %v5461_v43 = vmul.f32 %v13453_v23, %v13453_v23  ;;  %v5463_v24 = vmul.f32 %v13454_v5, %v13454_v5  ;;  %v8413_v32 = vld [vmem:[%s8879_s23 + $0x110] sm:$0xff] }
 0x3f1   : > { %6213 = vst [vmem:[%s12249_s22 + $0x400] sm:$0xff] %v5957_v39  ;;  %v5960_v17 = vadd.f32 %v5704_v40, %v5448_v61  ;;  %v5709_v0 = vmul.f32 %v3686_v20, %v3686_v20  ;;  %v4200_v54 = vpop.f32.mrb[162].mxu1  ;;  %v3688_v18 = vpop.f32.mrb[163].mxu0  ;;  %4647 = vmatmul.mubr.f32.gmra.mrb[204].mxu0 %v8409_v51  ;;  %v5462_v7 = vmul.f32 %v13455_v36, %v13455_v36 }
 0x3f2   : > { %6215 = vst [vmem:[%s12249_s22 + $0x410] sm:$0xff] %v5959_v49  ;;  %6214 = vst [vmem:[%s12249_s22 + $0x408] sm:$0xff] %v5958_v15  ;;  %v5711_v2 = vmul.f32 %v4200_v54, %v4200_v54  ;;  %v5710_v41 = vmul.f32 %v3688_v18, %v3688_v18  ;;  %v4202_v52 = vpop.f32.mrb[163].mxu1  ;;  %5161 = vmatmul.mubr.f32.gmra.mrb[204].mxu1 %v8409_v51  ;;  %6625 = vmatprep.mubr.msk.f32.mxu0 %vm1108_vm0, %v8410_v30  ;;  %v8414_v49 = vld [vmem:[%s8879_s23 + $0x138] sm:$0xff]  ;;  %v13460_v15 = vld [vmem:[#allocation42_spill] sm:$0xff] }
 0x3f3   : > { %6216 = vst [vmem:[%s12249_s22 + $0x418] sm:$0xff] %v5960_v17  ;;  %v5965_v3 = vadd.f32 %v5709_v0, %v5453_v63  ;;  %v5712_v53 = vmul.f32 %v4202_v52, %v4202_v52  ;;  %6657 = vmatprep.mubr.msk.f32.mxu1 %vm1108_vm0, %v8410_v30  ;;  %v5464_v42 = vmul.f32 %v13456_v57, %v13456_v57  ;;  %v13461_v0 = vld [vmem:[#allocation43_spill] sm:$0xff]  ;;  %v13462_v18 = vld [vmem:[#allocation44_spill] sm:$0xff]  ;;  %v13463_v30 = vld [vmem:[#allocation45_spill] sm:$0xff] }
 0x3f4   : > { %v5967_v62 = vadd.f32 %v5711_v2, %v5455_v22  ;;  %v5966_v56 = vadd.f32 %v5710_v41, %v5454_v19  ;;  %v3692_v33 = vpop.f32.mrb[164].mxu0  ;;  %v5469_v37 = vmul.f32 %v13457_v38, %v13457_v38  ;;  %v5471_v11 = vmul.f32 %v13458_v59, %v13458_v59  ;;  %v8415_v52 = vld [vmem:[%s8879_s23 + $0x130] sm:$0xff] }
 0x3f5   : > { %6221 = vst [vmem:[%s12249_s22 + $0x440] sm:$0xff] %v5965_v3  ;;  %v5968_v48 = vadd.f32 %v5712_v53, %v5456_v21  ;;  %v5717_v55 = vmul.f32 %v3692_v33, %v3692_v33  ;;  %v4206_v25 = vpop.f32.mrb[164].mxu1  ;;  %v3694_v6 = vpop.f32.mrb[165].mxu0  ;;  %4653 = vmatmul.mubr.f32.gmra.mrb[206].mxu0 %v8411_v34  ;;  %v5470_v44 = vmul.f32 %v13459_v13, %v13459_v13 }
 0x3f6   : > { %6223 = vst [vmem:[%s12249_s22 + $0x450] sm:$0xff] %v5967_v62  ;;  %6222 = vst [vmem:[%s12249_s22 + $0x448] sm:$0xff] %v5966_v56  ;;  %v5719_v14 = vmul.f32 %v4206_v25, %v4206_v25  ;;  %v5718_v27 = vmul.f32 %v3694_v6, %v3694_v6  ;;  %v4208_v16 = vpop.f32.mrb[165].mxu1  ;;  %5167 = vmatmul.mubr.f32.gmra.mrb[206].mxu1 %v8411_v34  ;;  %6626 = vmatprep.mubr.msk.f32.mxu0 %vm1108_vm0, %v8412_v45  ;;  %v8416_v62 = vld [vmem:[%s8879_s23 + $0x158] sm:$0xff]  ;;  %v13464_v56 = vld [vmem:[#allocation46_spill] sm:$0xff] }
 0x3f7   : > { %6224 = vst [vmem:[%s12249_s22 + $0x458] sm:$0xff] %v5968_v48  ;;  %v5973_v9 = vadd.f32 %v5717_v55, %v5461_v43  ;;  %v5720_v35 = vmul.f32 %v4208_v16, %v4208_v16  ;;  %6658 = vmatprep.mubr.msk.f32.mxu1 %vm1108_vm0, %v8412_v45  ;;  %v5472_v20 = vmul.f32 %v13460_v15, %v13460_v15  ;;  %v13465_v55 = vld [vmem:[#allocation47_spill] sm:$0xff]  ;;  %v13466_v6 = vld [vmem:[#allocation48_spill] sm:$0xff]  ;;  %v13467_v45 = vld [vmem:[#allocation49_spill] sm:$0xff] }
 0x3f8   : > { %v5975_v31 = vadd.f32 %v5719_v14, %v5463_v24  ;;  %v5974_v58 = vadd.f32 %v5718_v27, %v5462_v7  ;;  %v3698_v46 = vpop.f32.mrb[166].mxu0  ;;  %v5477_v54 = vmul.f32 %v13461_v0, %v13461_v0  ;;  %v5479_v51 = vmul.f32 %v13462_v18, %v13462_v18  ;;  %v8417_v16 = vld [vmem:[%s8879_s23 + $0x150] sm:$0xff] }
 0x3f9   : > { %6229 = vst [vmem:[%s12249_s22 + $0x480] sm:$0xff] %v5973_v9  ;;  %v5976_v26 = vadd.f32 %v5720_v35, %v5464_v42  ;;  %v5725_v47 = vmul.f32 %v3698_v46, %v3698_v46  ;;  %v4212_v12 = vpop.f32.mrb[166].mxu1  ;;  %v3700_v50 = vpop.f32.mrb[167].mxu0  ;;  %4659 = vmatmul.mubr.f32.gmra.mrb[208].mxu0 %v8413_v32  ;;  %v5478_v10 = vmul.f32 %v13463_v30, %v13463_v30 }
 0x3fa   : > { %6231 = vst [vmem:[%s12249_s22 + $0x490] sm:$0xff] %v5975_v31  ;;  %6230 = vst [vmem:[%s12249_s22 + $0x488] sm:$0xff] %v5974_v58  ;;  %v5727_v61 = vmul.f32 %v4212_v12, %v4212_v12  ;;  %v5726_v39 = vmul.f32 %v3700_v50, %v3700_v50  ;;  %v4214_v40 = vpop.f32.mrb[167].mxu1  ;;  %5173 = vmatmul.mubr.f32.gmra.mrb[208].mxu1 %v8413_v32  ;;  %6627 = vmatprep.mubr.msk.f32.mxu0 %vm1108_vm0, %v8414_v49  ;;  %v8418_v31 = vld [vmem:[%s8879_s23 + $0x178] sm:$0xff]  ;;  %v13468_v58 = vld [vmem:[#allocation50_spill] sm:$0xff] }
 0x3fb   : > { %6232 = vst [vmem:[%s12249_s22 + $0x498] sm:$0xff] %v5976_v26  ;;  %v5981_v8 = vadd.f32 %v5725_v47, %v5469_v37  ;;  %v5728_v63 = vmul.f32 %v4214_v40, %v4214_v40  ;;  %6659 = vmatprep.mubr.msk.f32.mxu1 %vm1108_vm0, %v8414_v49  ;;  %v5480_v33 = vmul.f32 %v13464_v56, %v13464_v56  ;;  %v13469_v47 = vld [vmem:[#allocation51_spill] sm:$0xff]  ;;  %v13470_v50 = vld [vmem:[#allocation52_spill] sm:$0xff]  ;;  %v13471_v49 = vld [vmem:[#allocation53_spill] sm:$0xff] }
 0x3fc   : > { %v5983_v4 = vadd.f32 %v5727_v61, %v5471_v11  ;;  %v5982_v22 = vadd.f32 %v5726_v39, %v5470_v44  ;;  %v3704_v17 = vpop.f32.mrb[168].mxu0  ;;  %v5485_v25 = vmul.f32 %v13465_v55, %v13465_v55  ;;  %v5487_v34 = vmul.f32 %v13466_v6, %v13466_v6  ;;  %v8419_v40 = vld [vmem:[%s8879_s23 + $0x170] sm:$0xff] }
 0x3fd   : > { %6237 = vst [vmem:[%s12249_s22 + $0x4c0] sm:$0xff] %v5981_v8  ;;  %v5984_v1 = vadd.f32 %v5728_v63, %v5472_v20  ;;  %v5733_v19 = vmul.f32 %v3704_v17, %v3704_v17  ;;  %v4218_v2 = vpop.f32.mrb[168].mxu1  ;;  %v3706_v41 = vpop.f32.mrb[169].mxu0  ;;  %4665 = vmatmul.mubr.f32.gmra.mrb[210].mxu0 %v8415_v52  ;;  %v5486_v57 = vmul.f32 %v13467_v45, %v13467_v45 }
 0x3fe   : > { %6239 = vst [vmem:[%s12249_s22 + $0x4d0] sm:$0xff] %v5983_v4  ;;  %6238 = vst [vmem:[%s12249_s22 + $0x4c8] sm:$0xff] %v5982_v22  ;;  %v5735_v21 = vmul.f32 %v4218_v2, %v4218_v2  ;;  %v5734_v3 = vmul.f32 %v3706_v41, %v3706_v41  ;;  %v4220_v53 = vpop.f32.mrb[169].mxu1  ;;  %5179 = vmatmul.mubr.f32.gmra.mrb[210].mxu1 %v8415_v52  ;;  %6628 = vmatprep.mubr.msk.f32.mxu0 %vm1108_vm0, %v8416_v62  ;;  %v8420_v4 = vld [vmem:[%s8879_s23 + $0x198] sm:$0xff]  ;;  %v13472_v22 = vld [vmem:[#allocation54_spill] sm:$0xff] }
 0x3ff   : > { %6240 = vst [vmem:[%s12249_s22 + $0x4d8] sm:$0xff] %v5984_v1  ;;  %v5989_v23 = vadd.f32 %v5733_v19, %v5477_v54  ;;  %v5736_v43 = vmul.f32 %v4220_v53, %v4220_v53  ;;  %6660 = vmatprep.mubr.msk.f32.mxu1 %vm1108_vm0, %v8416_v62  ;;  %v5488_v46 = vmul.f32 %v13468_v58, %v13468_v58  ;;  %v13473_v19 = vld [vmem:[#allocation55_spill] sm:$0xff]  ;;  %v13474_v41 = vld [vmem:[#allocation56_spill] sm:$0xff]  ;;  %v13475_v62 = vld [vmem:[#allocation57_spill] sm:$0xff] }
 0x400   : > { %v5991_v5 = vadd.f32 %v5735_v21, %v5479_v51  ;;  %v5990_v24 = vadd.f32 %v5734_v3, %v5478_v10  ;;  %v3710_v48 = vpop.f32.mrb[170].mxu0  ;;  %v5493_v12 = vmul.f32 %v13469_v47, %v13469_v47  ;;  %v5495_v32 = vmul.f32 %v13470_v50, %v13470_v50  ;;  %v8421_v53 = vld [vmem:[%s8879_s23 + $0x190] sm:$0xff] }
 0x401   : > { %6245 = vst [vmem:[%s12249_s22 + $0x500] sm:$0xff] %v5989_v23  ;;  %v5992_v36 = vadd.f32 %v5736_v43, %v5480_v33  ;;  %v5741_v7 = vmul.f32 %v3710_v48, %v3710_v48  ;;  %v4224_v14 = vpop.f32.mrb[170].mxu1  ;;  %v3712_v27 = vpop.f32.mrb[171].mxu0  ;;  %4671 = vmatmul.mubr.f32.gmra.mrb[212].mxu0 %v8417_v16  ;;  %v5494_v15 = vmul.f32 %v13471_v49, %v13471_v49 }
 0x402   : > { %6247 = vst [vmem:[%s12249_s22 + $0x510] sm:$0xff] %v5991_v5  ;;  %6246 = vst [vmem:[%s12249_s22 + $0x508] sm:$0xff] %v5990_v24  ;;  %v5743_v42 = vmul.f32 %v4224_v14, %v4224_v14  ;;  %v5742_v9 = vmul.f32 %v3712_v27, %v3712_v27  ;;  %v4226_v35 = vpop.f32.mrb[171].mxu1  ;;  %5185 = vmatmul.mubr.f32.gmra.mrb[212].mxu1 %v8417_v16  ;;  %6629 = vmatprep.mubr.msk.f32.mxu0 %vm1108_vm0, %v8418_v31  ;;  %v8422_v5 = vld [vmem:[%s8879_s23 + $0x1b8] sm:$0xff]  ;;  %v13476_v24 = vld [vmem:[#allocation58_spill] sm:$0xff] }
 0x403   : > { %6248 = vst [vmem:[%s12249_s22 + $0x518] sm:$0xff] %v5992_v36  ;;  %v5997_v38 = vadd.f32 %v5741_v7, %v5485_v25  ;;  %v5744_v37 = vmul.f32 %v4226_v35, %v4226_v35  ;;  %6661 = vmatprep.mubr.msk.f32.mxu1 %vm1108_vm0, %v8418_v31  ;;  %v5496_v17 = vmul.f32 %v13472_v22, %v13472_v22  ;;  %v13477_v7 = vld [vmem:[#allocation59_spill] sm:$0xff]  ;;  %v13478_v27 = vld [vmem:[#allocation60_spill] sm:$0xff]  ;;  %v13479_v31 = vld [vmem:[#allocation61_spill] sm:$0xff] }
 0x404   : > { %v5999_v59 = vadd.f32 %v5743_v42, %v5487_v34  ;;  %v5998_v11 = vadd.f32 %v5742_v9, %v5486_v57  ;;  %v3716_v26 = vpop.f32.mrb[172].mxu0  ;;  %v5501_v2 = vmul.f32 %v13473_v19, %v13473_v19  ;;  %v5503_v52 = vmul.f32 %v13474_v41, %v13474_v41  ;;  %v8423_v35 = vld [vmem:[%s8879_s23 + $0x1b0] sm:$0xff] }
 0x405   : > { %6253 = vst [vmem:[%s12249_s22 + $0x540] sm:$0xff] %v5997_v38  ;;  %v6000_v13 = vadd.f32 %v5744_v37, %v5488_v46  ;;  %v5749_v44 = vmul.f32 %v3716_v26, %v3716_v26  ;;  %v4230_v61 = vpop.f32.mrb[172].mxu1  ;;  %v3718_v39 = vpop.f32.mrb[173].mxu0  ;;  %4677 = vmatmul.mubr.f32.gmra.mrb[214].mxu0 %v8419_v40  ;;  %v5502_v56 = vmul.f32 %v13475_v62, %v13475_v62 }
 0x406   : > { %6255 = vst [vmem:[%s12249_s22 + $0x550] sm:$0xff] %v5999_v59  ;;  %6254 = vst [vmem:[%s12249_s22 + $0x548] sm:$0xff] %v5998_v11  ;;  %v5751_v20 = vmul.f32 %v4230_v61, %v4230_v61  ;;  %v5750_v8 = vmul.f32 %v3718_v39, %v3718_v39  ;;  %v4232_v63 = vpop.f32.mrb[173].mxu1  ;;  %5191 = vmatmul.mubr.f32.gmra.mrb[214].mxu1 %v8419_v40  ;;  %6630 = vmatprep.mubr.msk.f32.mxu0 %vm1108_vm0, %v8420_v4  ;;  %v8424_v59 = vld [vmem:[%s8879_s23 + $0x1d8] sm:$0xff]  ;;  %v13480_v11 = vld [vmem:[#allocation62_spill] sm:$0xff] }
 0x407   : > { %6256 = vst [vmem:[%s12249_s22 + $0x558] sm:$0xff] %v6000_v13  ;;  %v6005_v0 = vadd.f32 %v5749_v44, %v5493_v12  ;;  %v5752_v54 = vmul.f32 %v4232_v63, %v4232_v63  ;;  %6662 = vmatprep.mubr.msk.f32.mxu1 %vm1108_vm0, %v8420_v4  ;;  %v5504_v48 = vmul.f32 %v13476_v24, %v13476_v24  ;;  %v13481_v44 = vld [vmem:[#allocation63_spill] sm:$0xff]  ;;  %v13482_v39 = vld [vmem:[#allocation64_spill] sm:$0xff]  ;;  %v13483_v4 = vld [vmem:[#allocation65_spill] sm:$0xff] }
 0x408   : > { %v6007_v18 = vadd.f32 %v5751_v20, %v5495_v32  ;;  %v6006_v51 = vadd.f32 %v5750_v8, %v5494_v15  ;;  %v3722_v1 = vpop.f32.mrb[174].mxu0  ;;  %v5509_v14 = vmul.f32 %v13477_v7, %v13477_v7  ;;  %v5511_v16 = vmul.f32 %v13478_v27, %v13478_v27  ;;  %v8425_v63 = vld [vmem:[%s8879_s23 + $0x1d0] sm:$0xff] }
 0x409   : > { %6261 = vst [vmem:[%s12249_s22 + $0x580] sm:$0xff] %v6005_v0  ;;  %v6008_v30 = vadd.f32 %v5752_v54, %v5496_v17  ;;  %v5757_v10 = vmul.f32 %v3722_v1, %v3722_v1  ;;  %v4236_v21 = vpop.f32.mrb[174].mxu1  ;;  %v3724_v3 = vpop.f32.mrb[175].mxu0  ;;  %4683 = vmatmul.mubr.f32.gmra.mrb[216].mxu0 %v8421_v53  ;;  %v5510_v58 = vmul.f32 %v13479_v31, %v13479_v31 }
 0x40a   : > { %6263 = vst [vmem:[%s12249_s22 + $0x590] sm:$0xff] %v6007_v18  ;;  %6262 = vst [vmem:[%s12249_s22 + $0x588] sm:$0xff] %v6006_v51  ;;  %v5759_v33 = vmul.f32 %v4236_v21, %v4236_v21  ;;  %v5758_v23 = vmul.f32 %v3724_v3, %v3724_v3  ;;  %v4238_v43 = vpop.f32.mrb[175].mxu1  ;;  %5197 = vmatmul.mubr.f32.gmra.mrb[216].mxu1 %v8421_v53  ;;  %6631 = vmatprep.mubr.msk.f32.mxu0 %vm1108_vm0, %v8422_v5  ;;  %v8426_v18 = vld [vmem:[%s8879_s23 + $0x1f8] sm:$0xff]  ;;  %v13484_v51 = vld [vmem:[#allocation66_spill] sm:$0xff] }
 0x40b   : > { %6264 = vst [vmem:[%s12249_s22 + $0x598] sm:$0xff] %v6008_v30  ;;  %v6013_v55 = vadd.f32 %v5757_v10, %v5501_v2  ;;  %v5760_v25 = vmul.f32 %v4238_v43, %v4238_v43  ;;  %6663 = vmatprep.mubr.msk.f32.mxu1 %vm1108_vm0, %v8422_v5  ;;  %v5512_v26 = vmul.f32 %v13480_v11, %v13480_v11  ;;  %v13485_v10 = vld [vmem:[#allocation67_spill] sm:$0xff]  ;;  %v13486_v3 = vld [vmem:[#allocation68_spill] sm:$0xff]  ;;  %v13487_v5 = vld [vmem:[#allocation69_spill] sm:$0xff] }
 0x40c   : > { %v6015_v6 = vadd.f32 %v5759_v33, %v5503_v52  ;;  %v6014_v34 = vadd.f32 %v5758_v23, %v5502_v56  ;;  %v3728_v36 = vpop.f32.mrb[176].mxu0  ;;  %v5517_v61 = vmul.f32 %v13481_v44, %v13481_v44  ;;  %v5519_v40 = vmul.f32 %v13482_v39, %v13482_v39  ;;  %v8427_v43 = vld [vmem:[%s8879_s23 + $0x1f0] sm:$0xff] }
 0x40d   : > { %6269 = vst [vmem:[%s12249_s22 + $0x5c0] sm:$0xff] %v6013_v55  ;;  %v6016_v45 = vadd.f32 %v5760_v25, %v5504_v48  ;;  %v5765_v57 = vmul.f32 %v3728_v36, %v3728_v36  ;;  %v4242_v42 = vpop.f32.mrb[176].mxu1  ;;  %v3730_v9 = vpop.f32.mrb[177].mxu0  ;;  %4689 = vmatmul.mubr.f32.gmra.mrb[218].mxu0 %v8423_v35  ;;  %v5518_v22 = vmul.f32 %v13483_v4, %v13483_v4 }
 0x40e   : > { %6271 = vst [vmem:[%s12249_s22 + $0x5d0] sm:$0xff] %v6015_v6  ;;  %6270 = vst [vmem:[%s12249_s22 + $0x5c8] sm:$0xff] %v6014_v34  ;;  %v5767_v46 = vmul.f32 %v4242_v42, %v4242_v42  ;;  %v5766_v38 = vmul.f32 %v3730_v9, %v3730_v9  ;;  %v4244_v37 = vpop.f32.mrb[177].mxu1  ;;  %5203 = vmatmul.mubr.f32.gmra.mrb[218].mxu1 %v8423_v35  ;;  %6632 = vmatprep.mubr.msk.f32.mxu0 %vm1108_vm0, %v8424_v59  ;;  %v8428_v6 = vld [vmem:[%s8879_s23 + $0x218] sm:$0xff]  ;;  %v13488_v34 = vld [vmem:[#allocation70_spill] sm:$0xff] }
 0x40f   : > { %6272 = vst [vmem:[%s12249_s22 + $0x5d8] sm:$0xff] %v6016_v45  ;;  %v6021_v47 = vadd.f32 %v5765_v57, %v5509_v14  ;;  %v5768_v12 = vmul.f32 %v4244_v37, %v4244_v37  ;;  %6664 = vmatprep.mubr.msk.f32.mxu1 %vm1108_vm0, %v8424_v59  ;;  %v5520_v1 = vmul.f32 %v13484_v51, %v13484_v51  ;;  %v13489_v57 = vld [vmem:[#allocation71_spill] sm:$0xff]  ;;  %v13490_v9 = vld [vmem:[#allocation72_spill] sm:$0xff]  ;;  %v13491_v59 = vld [vmem:[#allocation73_spill] sm:$0xff] }
 0x410   : > { %v6023_v50 = vadd.f32 %v5767_v46, %v5511_v16  ;;  %v6022_v32 = vadd.f32 %v5766_v38, %v5510_v58  ;;  %v3734_v13 = vpop.f32.mrb[178].mxu0  ;;  %v5525_v21 = vmul.f32 %v13485_v10, %v13485_v10  ;;  %v5527_v53 = vmul.f32 %v13486_v3, %v13486_v3  ;;  %v8429_v37 = vld [vmem:[%s8879_s23 + $0x210] sm:$0xff] }
 0x411   : > { %6277 = vst [vmem:[%s12249_s22 + $0x600] sm:$0xff] %v6021_v47  ;;  %v6024_v49 = vadd.f32 %v5768_v12, %v5512_v26  ;;  %v5773_v15 = vmul.f32 %v3734_v13, %v3734_v13  ;;  %v4248_v20 = vpop.f32.mrb[178].mxu1  ;;  %v3736_v8 = vpop.f32.mrb[179].mxu0  ;;  %4695 = vmatmul.mubr.f32.gmra.mrb[220].mxu0 %v8425_v63  ;;  %v5526_v24 = vmul.f32 %v13487_v5, %v13487_v5 }
 0x412   : > { %6279 = vst [vmem:[%s12249_s22 + $0x610] sm:$0xff] %v6023_v50  ;;  %6278 = vst [vmem:[%s12249_s22 + $0x608] sm:$0xff] %v6022_v32  ;;  %v5775_v17 = vmul.f32 %v4248_v20, %v4248_v20  ;;  %v5774_v0 = vmul.f32 %v3736_v8, %v3736_v8  ;;  %v4250_v54 = vpop.f32.mrb[179].mxu1  ;;  %5209 = vmatmul.mubr.f32.gmra.mrb[220].mxu1 %v8425_v63  ;;  %6633 = vmatprep.mubr.msk.f32.mxu0 %vm1108_vm0, %v8426_v18  ;;  %v8430_v50 = vld [vmem:[%s8879_s23 + $0x238] sm:$0xff]  ;;  %v13492_v32 = vld [vmem:[#allocation74_spill] sm:$0xff] }
 0x413   : > { %6280 = vst [vmem:[%s12249_s22 + $0x618] sm:$0xff] %v6024_v49  ;;  %v6029_v19 = vadd.f32 %v5773_v15, %v5517_v61  ;;  %v5776_v2 = vmul.f32 %v4250_v54, %v4250_v54  ;;  %6665 = vmatprep.mubr.msk.f32.mxu1 %vm1108_vm0, %v8426_v18  ;;  %v5528_v36 = vmul.f32 %v13488_v34, %v13488_v34  ;;  %v13493_v15 = vld [vmem:[#allocation75_spill] sm:$0xff]  ;;  %v13494_v8 = vld [vmem:[#allocation76_spill] sm:$0xff]  ;;  %v13495_v18 = vld [vmem:[#allocation77_spill] sm:$0xff] }
 0x414   : > { %v6031_v41 = vadd.f32 %v5775_v17, %v5519_v40  ;;  %v6030_v52 = vadd.f32 %v5774_v0, %v5518_v22  ;;  %v3740_v30 = vpop.f32.mrb[180].mxu0  ;;  %v5533_v42 = vmul.f32 %v13489_v57, %v13489_v57  ;;  %v5535_v35 = vmul.f32 %v13490_v9, %v13490_v9  ;;  %v8431_v54 = vld [vmem:[%s8879_s23 + $0x230] sm:$0xff] }
 0x415   : > { %6285 = vst [vmem:[%s12249_s22 + $0x640] sm:$0xff] %v6029_v19  ;;  %v6032_v62 = vadd.f32 %v5776_v2, %v5520_v1  ;;  %v5781_v56 = vmul.f32 %v3740_v30, %v3740_v30  ;;  %v4254_v33 = vpop.f32.mrb[180].mxu1  ;;  %v3742_v23 = vpop.f32.mrb[181].mxu0  ;;  %4701 = vmatmul.mubr.f32.gmra.mrb[222].mxu0 %v8427_v43  ;;  %v5534_v11 = vmul.f32 %v13491_v59, %v13491_v59 }
 0x416   : > { %6287 = vst [vmem:[%s12249_s22 + $0x650] sm:$0xff] %v6031_v41  ;;  %6286 = vst [vmem:[%s12249_s22 + $0x648] sm:$0xff] %v6030_v52  ;;  %v5783_v48 = vmul.f32 %v4254_v33, %v4254_v33  ;;  %v5782_v55 = vmul.f32 %v3742_v23, %v3742_v23  ;;  %v4256_v25 = vpop.f32.mrb[181].mxu1  ;;  %5215 = vmatmul.mubr.f32.gmra.mrb[222].mxu1 %v8427_v43  ;;  %6634 = vmatprep.mubr.msk.f32.mxu0 %vm1108_vm0, %v8428_v6  ;;  %v8432_v41 = vld [vmem:[%s8879_s23 + $0x258] sm:$0xff]  ;;  %v13496_v52 = vld [vmem:[#allocation78_spill] sm:$0xff] }
 0x417   : > { %6288 = vst [vmem:[%s12249_s22 + $0x658] sm:$0xff] %v6032_v62  ;;  %v6037_v7 = vadd.f32 %v5781_v56, %v5525_v21  ;;  %v5784_v14 = vmul.f32 %v4256_v25, %v4256_v25  ;;  %6666 = vmatprep.mubr.msk.f32.mxu1 %vm1108_vm0, %v8428_v6  ;;  %v5536_v13 = vmul.f32 %v13492_v32, %v13492_v32  ;;  %v13497_v56 = vld [vmem:[#allocation79_spill] sm:$0xff]  ;;  %v13498_v23 = vld [vmem:[#allocation80_spill] sm:$0xff]  ;;  %v13499_v6 = vld [vmem:[#allocation81_spill] sm:$0xff] }
 0x418   : > { %v6039_v27 = vadd.f32 %v5783_v48, %v5527_v53  ;;  %v6038_v16 = vadd.f32 %v5782_v55, %v5526_v24  ;;  %v3746_v45 = vpop.f32.mrb[182].mxu0  ;;  %v5541_v20 = vmul.f32 %v13493_v15, %v13493_v15  ;;  %v5543_v63 = vmul.f32 %v13494_v8, %v13494_v8  ;;  %v8433_v25 = vld [vmem:[%s8879_s23 + $0x250] sm:$0xff] }
 0x419   : > { %6293 = vst [vmem:[%s12249_s22 + $0x680] sm:$0xff] %v6037_v7  ;;  %v6040_v31 = vadd.f32 %v5784_v14, %v5528_v36  ;;  %v5789_v58 = vmul.f32 %v3746_v45, %v3746_v45  ;;  %v4260_v46 = vpop.f32.mrb[182].mxu1  ;;  %v3748_v38 = vpop.f32.mrb[183].mxu0  ;;  %4707 = vmatmul.mubr.f32.gmra.mrb[224].mxu0 %v8429_v37  ;;  %v5542_v51 = vmul.f32 %v13495_v18, %v13495_v18 }
 0x41a   : > { %6295 = vst [vmem:[%s12249_s22 + $0x690] sm:$0xff] %v6039_v27  ;;  %6294 = vst [vmem:[%s12249_s22 + $0x688] sm:$0xff] %v6038_v16  ;;  %v5791_v26 = vmul.f32 %v4260_v46, %v4260_v46  ;;  %v5790_v47 = vmul.f32 %v3748_v38, %v3748_v38  ;;  %v4262_v12 = vpop.f32.mrb[183].mxu1  ;;  %5221 = vmatmul.mubr.f32.gmra.mrb[224].mxu1 %v8429_v37  ;;  %6635 = vmatprep.mubr.msk.f32.mxu0 %vm1108_vm0, %v8430_v50  ;;  %v8434_v27 = vld [vmem:[%s8879_s23 + $0x278] sm:$0xff]  ;;  %v13500_v16 = vld [vmem:[#allocation82_spill] sm:$0xff] }
 0x41b   : > { %6296 = vst [vmem:[%s12249_s22 + $0x698] sm:$0xff] %v6040_v31  ;;  %v6045_v44 = vadd.f32 %v5789_v58, %v5533_v42  ;;  %v5792_v61 = vmul.f32 %v4262_v12, %v4262_v12  ;;  %6667 = vmatprep.mubr.msk.f32.mxu1 %vm1108_vm0, %v8430_v50  ;;  %v5544_v30 = vmul.f32 %v13496_v52, %v13496_v52  ;;  %v13501_v58 = vld [vmem:[#allocation83_spill] sm:$0xff]  ;;  %v13502_v38 = vld [vmem:[#allocation84_spill] sm:$0xff]  ;;  %v13503_v50 = vld [vmem:[#allocation85_spill] sm:$0xff] }
 0x41c   : > { %v6047_v39 = vadd.f32 %v5791_v26, %v5535_v35  ;;  %v6046_v40 = vadd.f32 %v5790_v47, %v5534_v11  ;;  %v3752_v49 = vpop.f32.mrb[184].mxu0  ;;  %v5549_v33 = vmul.f32 %v13497_v56, %v13497_v56  ;;  %v5551_v43 = vmul.f32 %v13498_v23, %v13498_v23  ;;  %v8435_v12 = vld [vmem:[%s8879_s23 + $0x270] sm:$0xff] }
 0x41d   : > { %6301 = vst [vmem:[%s12249_s22 + $0x6c0] sm:$0xff] %v6045_v44  ;;  %v6048_v4 = vadd.f32 %v5792_v61, %v5536_v13  ;;  %v5797_v22 = vmul.f32 %v3752_v49, %v3752_v49  ;;  %v4266_v17 = vpop.f32.mrb[184].mxu1  ;;  %v3754_v0 = vpop.f32.mrb[185].mxu0  ;;  %4713 = vmatmul.mubr.f32.gmra.mrb[226].mxu0 %v8431_v54  ;;  %v5550_v34 = vmul.f32 %v13499_v6, %v13499_v6  ;;  %v8443_v6 = vld [vmem:[%s8879_s23 + $0x2f0] sm:$0xff] }
 0x41e   : > { %6303 = vst [vmem:[%s12249_s22 + $0x6d0] sm:$0xff] %v6047_v39  ;;  %6302 = vst [vmem:[%s12249_s22 + $0x6c8] sm:$0xff] %v6046_v40  ;;  %v5799_v1 = vmul.f32 %v4266_v17, %v4266_v17  ;;  %v5798_v19 = vmul.f32 %v3754_v0, %v3754_v0  ;;  %v4268_v2 = vpop.f32.mrb[185].mxu1  ;;  %5227 = vmatmul.mubr.f32.gmra.mrb[226].mxu1 %v8431_v54  ;;  %6636 = vmatprep.mubr.msk.f32.mxu0 %vm1108_vm0, %v8432_v41  ;;  %v8436_v39 = vld [vmem:[%s8879_s23 + $0x298] sm:$0xff]  ;;  %v13504_v40 = vld [vmem:[#allocation86_spill] sm:$0xff] }
 0x41f   : > { %6304 = vst [vmem:[%s12249_s22 + $0x6d8] sm:$0xff] %v6048_v4  ;;  %v6053_v10 = vadd.f32 %v5797_v22, %v5541_v20  ;;  %v5800_v21 = vmul.f32 %v4268_v2, %v4268_v2  ;;  %6668 = vmatprep.mubr.msk.f32.mxu1 %vm1108_vm0, %v8432_v41  ;;  %v5552_v45 = vmul.f32 %v13500_v16, %v13500_v16  ;;  %v13505_v22 = vld [vmem:[#allocation87_spill] sm:$0xff]  ;;  %v13506_v0 = vld [vmem:[#allocation88_spill] sm:$0xff]  ;;  %v13507_v41 = vld [vmem:[#allocation89_spill] sm:$0xff] }
 0x420   : > { %v6055_v3 = vadd.f32 %v5799_v1, %v5543_v63  ;;  %v6054_v53 = vadd.f32 %v5798_v19, %v5542_v51  ;;  %v3758_v62 = vpop.f32.mrb[186].mxu0  ;;  %v5557_v46 = vmul.f32 %v13501_v58, %v13501_v58  ;;  %v5559_v37 = vmul.f32 %v13502_v38, %v13502_v38  ;;  %v8437_v2 = vld [vmem:[%s8879_s23 + $0x290] sm:$0xff]  ;;  %v8456_v58 = vld [vmem:[%s8879_s23 + $0x3d8] sm:$0xff] }
 0x421   : > { %6309 = vst [vmem:[%s12249_s22 + $0x700] sm:$0xff] %v6053_v10  ;;  %v6056_v5 = vadd.f32 %v5800_v21, %v5544_v30  ;;  %v5805_v24 = vmul.f32 %v3758_v62, %v3758_v62  ;;  %v4272_v48 = vpop.f32.mrb[186].mxu1  ;;  %v3760_v55 = vpop.f32.mrb[187].mxu0  ;;  %4719 = vmatmul.mubr.f32.gmra.mrb[228].mxu0 %v8433_v25  ;;  %v5558_v32 = vmul.f32 %v13503_v50, %v13503_v50  ;;  %v8449_v16 = vld [vmem:[%s8879_s23 + $0x350] sm:$0xff]  ;;  %v8458_v38 = vld [vmem:[%s8879_s23 + $0x3f8] sm:$0xff] }
 0x422   : > { %6311 = vst [vmem:[%s12249_s22 + $0x710] sm:$0xff] %v6055_v3  ;;  %6310 = vst [vmem:[%s12249_s22 + $0x708] sm:$0xff] %v6054_v53  ;;  %v5807_v36 = vmul.f32 %v4272_v48, %v4272_v48  ;;  %v5806_v7 = vmul.f32 %v3760_v55, %v3760_v55  ;;  %v4274_v14 = vpop.f32.mrb[187].mxu1  ;;  %5233 = vmatmul.mubr.f32.gmra.mrb[228].mxu1 %v8433_v25  ;;  %6637 = vmatprep.mubr.msk.f32.mxu0 %vm1108_vm0, %v8434_v27  ;;  %v8438_v3 = vld [vmem:[%s8879_s23 + $0x2b8] sm:$0xff]  ;;  %v13508_v53 = vld [vmem:[#allocation90_spill] sm:$0xff] }
 0x423   : > { %6312 = vst [vmem:[%s12249_s22 + $0x718] sm:$0xff] %v6056_v5  ;;  %v6061_v57 = vadd.f32 %v5805_v24, %v5549_v33  ;;  %v5808_v42 = vmul.f32 %v4274_v14, %v4274_v14  ;;  %6669 = vmatprep.mubr.msk.f32.mxu1 %vm1108_vm0, %v8434_v27  ;;  %v5560_v49 = vmul.f32 %v13504_v40, %v13504_v40  ;;  %v8439_v24 = vld [vmem:[%s8879_s23 + $0x2b0] sm:$0xff]  ;;  %v8440_v48 = vld [vmem:[%s8879_s23 + $0x2d8] sm:$0xff] }
 0x424   : > { %v6063_v9 = vadd.f32 %v5807_v36, %v5551_v43  ;;  %v6062_v35 = vadd.f32 %v5806_v7, %v5550_v34  ;;  %v3764_v31 = vpop.f32.mrb[188].mxu0  ;;  %v5565_v17 = vmul.f32 %v13505_v22, %v13505_v22  ;;  %v5567_v54 = vmul.f32 %v13506_v0, %v13506_v0  ;;  %v8441_v55 = vld [vmem:[%s8879_s23 + $0x2d0] sm:$0xff]  ;;  %v8442_v25 = vld [vmem:[%s8879_s23 + $0x2f8] sm:$0xff] }
 0x425   : > { %6317 = vst [vmem:[%s12249_s22 + $0x740] sm:$0xff] %v6061_v57  ;;  %v6064_v59 = vadd.f32 %v5808_v42, %v5552_v45  ;;  %v5813_v11 = vmul.f32 %v3764_v31, %v3764_v31  ;;  %v4278_v26 = vpop.f32.mrb[188].mxu1  ;;  %v3766_v47 = vpop.f32.mrb[189].mxu0  ;;  %4725 = vmatmul.mubr.f32.gmra.mrb[230].mxu0 %v8435_v12  ;;  %v5566_v52 = vmul.f32 %v13507_v41, %v13507_v41  ;;  %v8444_v34 = vld [vmem:[%s8879_s23 + $0x318] sm:$0xff]  ;;  %v8445_v36 = vld [vmem:[%s8879_s23 + $0x310] sm:$0xff] }
 0x426   : > { %6319 = vst [vmem:[%s12249_s22 + $0x750] sm:$0xff] %v6063_v9  ;;  %6318 = vst [vmem:[%s12249_s22 + $0x748] sm:$0xff] %v6062_v35  ;;  %v5815_v13 = vmul.f32 %v4278_v26, %v4278_v26  ;;  %v5814_v44 = vmul.f32 %v3766_v47, %v3766_v47  ;;  %v4280_v61 = vpop.f32.mrb[189].mxu1  ;;  %5239 = vmatmul.mubr.f32.gmra.mrb[230].mxu1 %v8435_v12  ;;  %6638 = vmatprep.mubr.msk.f32.mxu0 %vm1108_vm0, %v8436_v39  ;;  %v8446_v7 = vld [vmem:[%s8879_s23 + $0x338] sm:$0xff]  ;;  %v8447_v14 = vld [vmem:[%s8879_s23 + $0x330] sm:$0xff] }
 0x427   : > { %6320 = vst [vmem:[%s12249_s22 + $0x758] sm:$0xff] %v6064_v59  ;;  %v6069_v15 = vadd.f32 %v5813_v11, %v5557_v46  ;;  %v5816_v20 = vmul.f32 %v4280_v61, %v4280_v61  ;;  %6670 = vmatprep.mubr.msk.f32.mxu1 %vm1108_vm0, %v8436_v39  ;;  %v5568_v62 = vmul.f32 %v13508_v53, %v13508_v53  ;;  %v8448_v27 = vld [vmem:[%s8879_s23 + $0x358] sm:$0xff]  ;;  %v8451_v57 = vld [vmem:[%s8879_s23 + $0x370] sm:$0xff]  ;;  %v13516_v53 = vld [vmem:[#allocation98_spill] sm:$0xff] }
 0x428   : > { %v6071_v8 = vadd.f32 %v5815_v13, %v5559_v37  ;;  %v6070_v63 = vadd.f32 %v5814_v44, %v5558_v32  ;;  %v3770_v4 = vpop.f32.mrb[190].mxu0  ;;  %v8450_v45 = vld [vmem:[%s8879_s23 + $0x378] sm:$0xff]  ;;  %v8453_v9 = vld [vmem:[%s8879_s23 + $0x390] sm:$0xff]  ;;  %v13511_v44 = vld [vmem:[#allocation93_spill] sm:$0xff] }
 0x429   : > { %6325 = vst [vmem:[%s12249_s22 + $0x780] sm:$0xff] %v6069_v15  ;;  %v6072_v18 = vadd.f32 %v5816_v20, %v5560_v49  ;;  %v5821_v51 = vmul.f32 %v3770_v4, %v3770_v4  ;;  %v4284_v1 = vpop.f32.mrb[190].mxu1  ;;  %v3772_v19 = vpop.f32.mrb[191].mxu0  ;;  %4731 = vmatmul.mubr.f32.gmra.mrb[232].mxu0 %v8437_v2  ;;  %v8452_v42 = vld [vmem:[%s8879_s23 + $0x398] sm:$0xff]  ;;  %v8455_v31 = vld [vmem:[%s8879_s23 + $0x3b0] sm:$0xff]  ;;  %v5322_v61 = vmul.f32 %v13511_v44, %v13511_v44  ;;  %v13512_v15 = vld [vmem:[#allocation94_spill] sm:$0xff] }
 0x42a   : > { %6327 = vst [vmem:[%s12249_s22 + $0x790] sm:$0xff] %v6071_v8  ;;  %6326 = vst [vmem:[%s12249_s22 + $0x788] sm:$0xff] %v6070_v63  ;;  %v5823_v30 = vmul.f32 %v4284_v1, %v4284_v1  ;;  %v5822_v10 = vmul.f32 %v3772_v19, %v3772_v19  ;;  %v4286_v21 = vpop.f32.mrb[191].mxu1  ;;  %5245 = vmatmul.mubr.f32.gmra.mrb[232].mxu1 %v8437_v2  ;;  %6639 = vmatprep.mubr.msk.f32.mxu0 %vm1108_vm0, %v8438_v3  ;;  %v8454_v35 = vld [vmem:[%s8879_s23 + $0x3b8] sm:$0xff]  ;;  %v8457_v46 = vld [vmem:[%s8879_s23 + $0x3d0] sm:$0xff] }
 0x42b   : > { %6328 = vst [vmem:[%s12249_s22 + $0x798] sm:$0xff] %v6072_v18  ;;  %v6077_v56 = vadd.f32 %v5821_v51, %v5565_v17  ;;  %v5824_v33 = vmul.f32 %v4286_v21, %v4286_v21  ;;  %6671 = vmatprep.mubr.msk.f32.mxu1 %vm1108_vm0, %v8438_v3  ;;  %v8459_v37 = vld [vmem:[%s8879_s23 + $0x3f0] sm:$0xff]  ;;  %v13510_v32 = vld [vmem:[#allocation92_spill] sm:$0xff]  ;;  %v5324_v20 = vmul.f32 %v13512_v15, %v13512_v15  ;;  %s6690_s23 = sshll.u32 %s8563_s13, 15 }
 0x42c   : > { %v6079_v23 = vadd.f32 %v5823_v30, %v5567_v54  ;;  %v6078_v43 = vadd.f32 %v5822_v10, %v5566_v52  ;;  %v13509_v11 = vld [vmem:[#allocation91_spill] sm:$0xff]  ;;  %v5323_v13 = vmul.f32 %v13510_v32, %v13510_v32  ;;  %v13514_v2 = vld [vmem:[#allocation96_spill] sm:$0xff]  ;;  %v13515_v52 = vld [vmem:[#allocation97_spill] sm:$0xff]  ;;  %s13155_s3 = scalar_lea.hbm %s13208_s2, %s6690_s23 }
 0x42d   : > { %6333 = vst [vmem:[%s12249_s22 + $0x7c0] sm:$0xff] %v6077_v56  ;;  %v6080_v5 = vadd.f32 %v5824_v33, %v5568_v62  ;;  %4737 = vmatmul.mubr.f32.gmra.mrb[234].mxu0 %v8439_v24  ;;  %v5321_v26 = vmul.f32 %v13509_v11, %v13509_v11  ;;  %v13513_v0 = vld [vmem:[#allocation95_spill] sm:$0xff]  ;;  %v5331_v41 = vmul.f32 %v13514_v2, %v13514_v2 }
 0x42e   : > { %6335 = vst [vmem:[%s12249_s22 + $0x7d0] sm:$0xff] %v6079_v23  ;;  %6334 = vst [vmem:[%s12249_s22 + $0x7c8] sm:$0xff] %v6078_v43  ;;  %5251 = vmatmul.mubr.f32.gmra.mrb[234].mxu1 %v8439_v24  ;;  %6640 = vmatprep.mubr.msk.f32.mxu0 %vm1108_vm0, %v8440_v48  ;;  %v5329_v54 = vmul.f32 %v13513_v0, %v13513_v0  ;;  %v5330_v30 = vmul.f32 %v13515_v52, %v13515_v52  ;;  %v13517_v24 = vld [vmem:[#allocation99_spill] sm:$0xff] }
 0x42f   : > { %6336 = vst [vmem:[%s12249_s22 + $0x7d8] sm:$0xff] %v6080_v5  ;;  %6672 = vmatprep.mubr.msk.f32.mxu1 %vm1108_vm0, %v8440_v48  ;;  %v5332_v62 = vmul.f32 %v13516_v53, %v13516_v53  ;;  %v5337_v48 = vmul.f32 %v13517_v24, %v13517_v24 }
 0x431   : > { %4743 = vmatmul.mubr.f32.gmra.mrb[236].mxu0 %v8441_v55 }
 0x432   : > { %5257 = vmatmul.mubr.f32.gmra.mrb[236].mxu1 %v8441_v55  ;;  %6641 = vmatprep.mubr.msk.f32.mxu0 %vm1108_vm0, %v8442_v25 }
 0x433   : > { %6673 = vmatprep.mubr.msk.f32.mxu1 %vm1108_vm0, %v8442_v25 }
 0x435   : > { %4749 = vmatmul.mubr.f32.gmra.mrb[238].mxu0 %v8443_v6 }
 0x436   : > { %5263 = vmatmul.mubr.f32.gmra.mrb[238].mxu1 %v8443_v6  ;;  %6642 = vmatprep.mubr.msk.f32.mxu0 %vm1108_vm0, %v8444_v34 }
 0x437   : > { %6674 = vmatprep.mubr.msk.f32.mxu1 %vm1108_vm0, %v8444_v34 }
 0x439   : > { %4755 = vmatmul.mubr.f32.gmra.mrb[240].mxu0 %v8445_v36 }
 0x43a   : > { %5269 = vmatmul.mubr.f32.gmra.mrb[240].mxu1 %v8445_v36  ;;  %6643 = vmatprep.mubr.msk.f32.mxu0 %vm1108_vm0, %v8446_v7  ;;  %v13518_v36 = vld [vmem:[#allocation100_spill] sm:$0xff] }
 0x43b   : > { %6675 = vmatprep.mubr.msk.f32.mxu1 %vm1108_vm0, %v8446_v7  ;;  %v5339_v7 = vmul.f32 %v13518_v36, %v13518_v36 }
 0x43d   : > { %4761 = vmatmul.mubr.f32.gmra.mrb[242].mxu0 %v8447_v14 }
 0x43e   : > { %5275 = vmatmul.mubr.f32.gmra.mrb[242].mxu1 %v8447_v14  ;;  %6644 = vmatprep.mubr.msk.f32.mxu0 %vm1108_vm0, %v8448_v27  ;;  %v13519_v14 = vld [vmem:[#allocation101_spill] sm:$0xff] }
 0x43f   : > { %6676 = vmatprep.mubr.msk.f32.mxu1 %vm1108_vm0, %v8448_v27  ;;  %v5338_v27 = vmul.f32 %v13519_v14, %v13519_v14 }
 0x441   : > { %4767 = vmatmul.mubr.f32.gmra.mrb[244].mxu0 %v8449_v16 }
 0x442   : > { %5281 = vmatmul.mubr.f32.gmra.mrb[244].mxu1 %v8449_v16  ;;  %6645 = vmatprep.mubr.msk.f32.mxu0 %vm1108_vm0, %v8450_v45 }
 0x443   : > { %6677 = vmatprep.mubr.msk.f32.mxu1 %vm1108_vm0, %v8450_v45 }
 0x445   : > { %4773 = vmatmul.mubr.f32.gmra.mrb[246].mxu0 %v8451_v57 }
 0x446   : > { %5287 = vmatmul.mubr.f32.gmra.mrb[246].mxu1 %v8451_v57  ;;  %6646 = vmatprep.mubr.msk.f32.mxu0 %vm1108_vm0, %v8452_v42 }
 0x447   : > { %6678 = vmatprep.mubr.msk.f32.mxu1 %vm1108_vm0, %v8452_v42  ;;  %v13520_v42 = vld [vmem:[#allocation102_spill] sm:$0xff] }
 0x449   : > { %4779 = vmatmul.mubr.f32.gmra.mrb[248].mxu0 %v8453_v9 }
 0x44a   : > { %5293 = vmatmul.mubr.f32.gmra.mrb[248].mxu1 %v8453_v9  ;;  %6647 = vmatprep.mubr.msk.f32.mxu0 %vm1108_vm0, %v8454_v35  ;;  %v5340_v9 = vmul.f32 %v13520_v42, %v13520_v42 }
 0x44b   : > { %6679 = vmatprep.mubr.msk.f32.mxu1 %vm1108_vm0, %v8454_v35 }
 0x44d   : > { %4785 = vmatmul.mubr.f32.gmra.mrb[250].mxu0 %v8455_v31 }
 0x44e   : > { %5299 = vmatmul.mubr.f32.gmra.mrb[250].mxu1 %v8455_v31  ;;  %6648 = vmatprep.mubr.msk.f32.mxu0 %vm1108_vm0, %v8456_v58 }
 0x44f   : > { %6680 = vmatprep.mubr.msk.f32.mxu1 %vm1108_vm0, %v8456_v58 }
 0x451   : > { %4791 = vmatmul.mubr.f32.gmra.mrb[252].mxu0 %v8457_v46 }
 0x452   : > { %5305 = vmatmul.mubr.f32.gmra.mrb[252].mxu1 %v8457_v46  ;;  %6649 = vmatprep.mubr.msk.f32.mxu0 %vm1108_vm0, %v8458_v38 }
 0x453   : > { %6681 = vmatprep.mubr.msk.f32.mxu1 %vm1108_vm0, %v8458_v38 }
 0x455   : > { %4797 = vmatmul.mubr.f32.gmra.mrb[254].mxu0 %v8459_v37 }
 0x456   : > { %5311 = vmatmul.mubr.f32.gmra.mrb[254].mxu1 %v8459_v37  ;;  %v13521_v37 = vld [vmem:[#allocation103_spill] sm:$0xff] }
 0x4ac   : > { %v4612_v59 = vpop.f32.mrb[192].mxu0 }
 0x4ad   : > { %v5577_v47 = vmul.f32 %v4612_v59, %v4612_v59  ;;  %v5126_v12 = vpop.f32.mrb[192].mxu1  ;;  %v4614_v50 = vpop.f32.mrb[193].mxu0  ;;  %v5345_v59 = vmul.f32 %v13521_v37, %v13521_v37 }
 0x4ae   : > { %v5579_v39 = vmul.f32 %v5126_v12, %v5126_v12  ;;  %v5578_v40 = vmul.f32 %v4614_v50, %v4614_v50  ;;  %v5128_v49 = vpop.f32.mrb[193].mxu1  ;;  %v13522_v50 = vld [vmem:[#allocation104_spill] sm:$0xff] }
 0x4af   : > { %v5833_v8 = vadd.f32 %v5577_v47, %v5321_v26  ;;  %v5580_v63 = vmul.f32 %v5128_v49, %v5128_v49  ;;  %v5347_v32 = vmul.f32 %v13522_v50, %v13522_v50  ;;  %v13524_v49 = vld [vmem:[#allocation106_spill] sm:$0xff] }
 0x4b0   : > { %v5835_v4 = vadd.f32 %v5579_v39, %v5323_v13  ;;  %v5834_v22 = vadd.f32 %v5578_v40, %v5322_v61  ;;  %v4618_v17 = vpop.f32.mrb[194].mxu0  ;;  %v13523_v13 = vld [vmem:[#allocation105_spill] sm:$0xff]  ;;  %v5348_v15 = vmul.f32 %v13524_v49, %v13524_v49 }
 0x4b1   : > { %6089 = vst [vmem:[%s12249_s22 + $0x20] sm:$0xff] %v5833_v8  ;;  %v5836_v18 = vadd.f32 %v5580_v63, %v5324_v20  ;;  %v5585_v51 = vmul.f32 %v4618_v17, %v4618_v17  ;;  %v5132_v1 = vpop.f32.mrb[194].mxu1  ;;  %v4620_v19 = vpop.f32.mrb[195].mxu0  ;;  %v5346_v44 = vmul.f32 %v13523_v13, %v13523_v13  ;;  %v13525_v17 = vld [vmem:[#allocation107_spill] sm:$0xff] }
 0x4b2   : > { %6091 = vst [vmem:[%s12249_s22 + $0x30] sm:$0xff] %v5835_v4  ;;  %6090 = vst [vmem:[%s12249_s22 + $0x28] sm:$0xff] %v5834_v22  ;;  %v5587_v10 = vmul.f32 %v5132_v1, %v5132_v1  ;;  %v5586_v21 = vmul.f32 %v4620_v19, %v4620_v19  ;;  %v5134_v3 = vpop.f32.mrb[195].mxu1  ;;  %v5353_v0 = vmul.f32 %v13525_v17, %v13525_v17  ;;  %v13526_v19 = vld [vmem:[#allocation108_spill] sm:$0xff] }
 0x4b3   : > { %6092 = vst [vmem:[%s12249_s22 + $0x38] sm:$0xff] %v5836_v18  ;;  %v5841_v56 = vadd.f32 %v5585_v51, %v5329_v54  ;;  %v5588_v33 = vmul.f32 %v5134_v3, %v5134_v3  ;;  %v5355_v2 = vmul.f32 %v13526_v19, %v13526_v19  ;;  %v13528_v3 = vld [vmem:[#allocation110_spill] sm:$0xff] }
 0x4b4   : > { %v5843_v23 = vadd.f32 %v5587_v10, %v5331_v41  ;;  %v5842_v43 = vadd.f32 %v5586_v21, %v5330_v30  ;;  %v4624_v5 = vpop.f32.mrb[196].mxu0  ;;  %v13527_v41 = vld [vmem:[#allocation109_spill] sm:$0xff]  ;;  %v5356_v53 = vmul.f32 %v13528_v3, %v13528_v3 }
 0x4b5   : > { %6097 = vst [vmem:[%s12249_s22 + $0x60] sm:$0xff] %v5841_v56  ;;  %v5844_v55 = vadd.f32 %v5588_v33, %v5332_v62  ;;  %v5593_v25 = vmul.f32 %v4624_v5, %v4624_v5  ;;  %v5138_v6 = vpop.f32.mrb[196].mxu1  ;;  %v4626_v34 = vpop.f32.mrb[197].mxu0  ;;  %v5354_v52 = vmul.f32 %v13527_v41, %v13527_v41  ;;  %v13529_v5 = vld [vmem:[#allocation111_spill] sm:$0xff] }
 0x4b6   : > { %6099 = vst [vmem:[%s12249_s22 + $0x70] sm:$0xff] %v5843_v23  ;;  %6098 = vst [vmem:[%s12249_s22 + $0x68] sm:$0xff] %v5842_v43  ;;  %v5595_v16 = vmul.f32 %v5138_v6, %v5138_v6  ;;  %v5594_v45 = vmul.f32 %v4626_v34, %v4626_v34  ;;  %v5140_v57 = vpop.f32.mrb[197].mxu1  ;;  %v5361_v24 = vmul.f32 %v13529_v5, %v13529_v5  ;;  %v13530_v34 = vld [vmem:[#allocation112_spill] sm:$0xff] }
 0x4b7   : > { %6100 = vst [vmem:[%s12249_s22 + $0x78] sm:$0xff] %v5844_v55  ;;  %v5849_v35 = vadd.f32 %v5593_v25, %v5337_v48  ;;  %v5596_v31 = vmul.f32 %v5140_v57, %v5140_v57  ;;  %v5363_v36 = vmul.f32 %v13530_v34, %v13530_v34  ;;  %v13532_v57 = vld [vmem:[#allocation114_spill] sm:$0xff] }
 0x4b8   : > { %v5851_v58 = vadd.f32 %v5595_v16, %v5339_v7  ;;  %v5850_v46 = vadd.f32 %v5594_v45, %v5338_v27  ;;  %v4630_v38 = vpop.f32.mrb[198].mxu0  ;;  %v13531_v7 = vld [vmem:[#allocation113_spill] sm:$0xff]  ;;  %v5364_v42 = vmul.f32 %v13532_v57, %v13532_v57 }
 0x4b9   : > { %6105 = vst [vmem:[%s12249_s22 + $0xa0] sm:$0xff] %v5849_v35  ;;  %v5852_v11 = vadd.f32 %v5596_v31, %v5340_v9  ;;  %v5601_v26 = vmul.f32 %v4630_v38, %v4630_v38  ;;  %v5144_v47 = vpop.f32.mrb[198].mxu1  ;;  %v4632_v12 = vpop.f32.mrb[199].mxu0  ;;  %v5362_v14 = vmul.f32 %v13531_v7, %v13531_v7  ;;  %v13533_v38 = vld [vmem:[#allocation115_spill] sm:$0xff] }
 0x4ba   : > { %6107 = vst [vmem:[%s12249_s22 + $0xb0] sm:$0xff] %v5851_v58  ;;  %6106 = vst [vmem:[%s12249_s22 + $0xa8] sm:$0xff] %v5850_v46  ;;  %v5603_v61 = vmul.f32 %v5144_v47, %v5144_v47  ;;  %v5602_v39 = vmul.f32 %v4632_v12, %v4632_v12  ;;  %v5146_v40 = vpop.f32.mrb[199].mxu1  ;;  %v5369_v37 = vmul.f32 %v13533_v38, %v13533_v38  ;;  %v13534_v12 = vld [vmem:[#allocation116_spill] sm:$0xff] }
 0x4bb   : > { %6108 = vst [vmem:[%s12249_s22 + $0xb8] sm:$0xff] %v5852_v11  ;;  %v5857_v20 = vadd.f32 %v5601_v26, %v5345_v59  ;;  %v5604_v8 = vmul.f32 %v5146_v40, %v5146_v40  ;;  %v5371_v50 = vmul.f32 %v13534_v12, %v13534_v12  ;;  %v13536_v40 = vld [vmem:[#allocation118_spill] sm:$0xff] }
 0x4bc   : > { %v5859_v63 = vadd.f32 %v5603_v61, %v5347_v32  ;;  %v5858_v4 = vadd.f32 %v5602_v39, %v5346_v44  ;;  %v4636_v22 = vpop.f32.mrb[200].mxu0  ;;  %v13535_v32 = vld [vmem:[#allocation117_spill] sm:$0xff]  ;;  %v5372_v49 = vmul.f32 %v13536_v40, %v13536_v40 }
 0x4bd   : > { %6113 = vst [vmem:[%s12249_s22 + $0xe0] sm:$0xff] %v5857_v20  ;;  %v5860_v54 = vadd.f32 %v5604_v8, %v5348_v15  ;;  %v5609_v18 = vmul.f32 %v4636_v22, %v4636_v22  ;;  %v5150_v51 = vpop.f32.mrb[200].mxu1  ;;  %v4638_v1 = vpop.f32.mrb[201].mxu0  ;;  %v5370_v13 = vmul.f32 %v13535_v32, %v13535_v32  ;;  %v13537_v22 = vld [vmem:[#allocation119_spill] sm:$0xff] }
 0x4be   : > { %6115 = vst [vmem:[%s12249_s22 + $0xf0] sm:$0xff] %v5859_v63  ;;  %6114 = vst [vmem:[%s12249_s22 + $0xe8] sm:$0xff] %v5858_v4  ;;  %v5611_v30 = vmul.f32 %v5150_v51, %v5150_v51  ;;  %v5610_v10 = vmul.f32 %v4638_v1, %v4638_v1  ;;  %v5152_v21 = vpop.f32.mrb[201].mxu1  ;;  %v5377_v17 = vmul.f32 %v13537_v22, %v13537_v22  ;;  %v13538_v1 = vld [vmem:[#allocation120_spill] sm:$0xff] }
 0x4bf   : > { %6116 = vst [vmem:[%s12249_s22 + $0xf8] sm:$0xff] %v5860_v54  ;;  %v5865_v62 = vadd.f32 %v5609_v18, %v5353_v0  ;;  %v5612_v56 = vmul.f32 %v5152_v21, %v5152_v21  ;;  %v5379_v19 = vmul.f32 %v13538_v1, %v13538_v1  ;;  %v13540_v21 = vld [vmem:[#allocation122_spill] sm:$0xff] }
 0x4c0   : > { %v5867_v33 = vadd.f32 %v5611_v30, %v5355_v2  ;;  %v5866_v23 = vadd.f32 %v5610_v10, %v5354_v52  ;;  %v4642_v43 = vpop.f32.mrb[202].mxu0  ;;  %v13539_v2 = vld [vmem:[#allocation121_spill] sm:$0xff]  ;;  %v5380_v3 = vmul.f32 %v13540_v21, %v13540_v21 }
 0x4c1   : > { %6121 = vst [vmem:[%s12249_s22 + $0x120] sm:$0xff] %v5865_v62  ;;  %v5868_v48 = vadd.f32 %v5612_v56, %v5356_v53  ;;  %v5617_v55 = vmul.f32 %v4642_v43, %v4642_v43  ;;  %v5156_v25 = vpop.f32.mrb[202].mxu1  ;;  %v4644_v6 = vpop.f32.mrb[203].mxu0  ;;  %v5378_v41 = vmul.f32 %v13539_v2, %v13539_v2  ;;  %v13541_v43 = vld [vmem:[#allocation123_spill] sm:$0xff] }
 0x4c2   : > { %6123 = vst [vmem:[%s12249_s22 + $0x130] sm:$0xff] %v5867_v33  ;;  %6122 = vst [vmem:[%s12249_s22 + $0x128] sm:$0xff] %v5866_v23  ;;  %v5619_v27 = vmul.f32 %v5156_v25, %v5156_v25  ;;  %v5618_v16 = vmul.f32 %v4644_v6, %v4644_v6  ;;  %v5158_v45 = vpop.f32.mrb[203].mxu1  ;;  %v5385_v5 = vmul.f32 %v13541_v43, %v13541_v43  ;;  %v13542_v6 = vld [vmem:[#allocation124_spill] sm:$0xff] }
 0x4c3   : > { %6124 = vst [vmem:[%s12249_s22 + $0x138] sm:$0xff] %v5868_v48  ;;  %v5873_v9 = vadd.f32 %v5617_v55, %v5361_v24  ;;  %v5620_v35 = vmul.f32 %v5158_v45, %v5158_v45  ;;  %v5387_v34 = vmul.f32 %v13542_v6, %v13542_v6  ;;  %v13544_v45 = vld [vmem:[#allocation126_spill] sm:$0xff] }
 0x4c4   : > { %v5875_v31 = vadd.f32 %v5619_v27, %v5363_v36  ;;  %v5874_v58 = vadd.f32 %v5618_v16, %v5362_v14  ;;  %v4648_v46 = vpop.f32.mrb[204].mxu0  ;;  %v13543_v36 = vld [vmem:[#allocation125_spill] sm:$0xff]  ;;  %v5388_v57 = vmul.f32 %v13544_v45, %v13544_v45 }
 0x4c5   : > { %6129 = vst [vmem:[%s12249_s22 + $0x160] sm:$0xff] %v5873_v9  ;;  %v5876_v59 = vadd.f32 %v5620_v35, %v5364_v42  ;;  %v5625_v11 = vmul.f32 %v4648_v46, %v4648_v46  ;;  %v5162_v26 = vpop.f32.mrb[204].mxu1  ;;  %v4650_v47 = vpop.f32.mrb[205].mxu0  ;;  %v5386_v7 = vmul.f32 %v13543_v36, %v13543_v36  ;;  %v13545_v46 = vld [vmem:[#allocation127_spill] sm:$0xff] }
 0x4c6   : > { %6131 = vst [vmem:[%s12249_s22 + $0x170] sm:$0xff] %v5875_v31  ;;  %6130 = vst [vmem:[%s12249_s22 + $0x168] sm:$0xff] %v5874_v58  ;;  %v5627_v44 = vmul.f32 %v5162_v26, %v5162_v26  ;;  %v5626_v61 = vmul.f32 %v4650_v47, %v4650_v47  ;;  %v5164_v39 = vpop.f32.mrb[205].mxu1  ;;  %v5393_v38 = vmul.f32 %v13545_v46, %v13545_v46  ;;  %v13546_v47 = vld [vmem:[#allocation128_spill] sm:$0xff] }
 0x4c7   : > { %6132 = vst [vmem:[%s12249_s22 + $0x178] sm:$0xff] %v5876_v59  ;;  %v5881_v15 = vadd.f32 %v5625_v11, %v5369_v37  ;;  %v5628_v20 = vmul.f32 %v5164_v39, %v5164_v39  ;;  %v5395_v12 = vmul.f32 %v13546_v47, %v13546_v47  ;;  %v13548_v39 = vld [vmem:[#allocation130_spill] sm:$0xff] }
 0x4c8   : > { %v5883_v8 = vadd.f32 %v5627_v44, %v5371_v50  ;;  %v5882_v63 = vadd.f32 %v5626_v61, %v5370_v13  ;;  %v4654_v4 = vpop.f32.mrb[206].mxu0  ;;  %v13547_v50 = vld [vmem:[#allocation129_spill] sm:$0xff]  ;;  %v5396_v40 = vmul.f32 %v13548_v39, %v13548_v39 }
 0x4c9   : > { %6137 = vst [vmem:[%s12249_s22 + $0x1a0] sm:$0xff] %v5881_v15  ;;  %v5884_v0 = vadd.f32 %v5628_v20, %v5372_v49  ;;  %v5633_v54 = vmul.f32 %v4654_v4, %v4654_v4  ;;  %v5168_v18 = vpop.f32.mrb[206].mxu1  ;;  %v4656_v51 = vpop.f32.mrb[207].mxu0  ;;  %v5394_v32 = vmul.f32 %v13547_v50, %v13547_v50  ;;  %v13549_v4 = vld [vmem:[#allocation131_spill] sm:$0xff] }
 0x4ca   : > { %6139 = vst [vmem:[%s12249_s22 + $0x1b0] sm:$0xff] %v5883_v8  ;;  %6138 = vst [vmem:[%s12249_s22 + $0x1a8] sm:$0xff] %v5882_v63  ;;  %v5635_v52 = vmul.f32 %v5168_v18, %v5168_v18  ;;  %v5634_v30 = vmul.f32 %v4656_v51, %v4656_v51  ;;  %v5170_v10 = vpop.f32.mrb[207].mxu1  ;;  %v5401_v22 = vmul.f32 %v13549_v4, %v13549_v4  ;;  %v13550_v51 = vld [vmem:[#allocation132_spill] sm:$0xff] }
 0x4cb   : > { %6140 = vst [vmem:[%s12249_s22 + $0x1b8] sm:$0xff] %v5884_v0  ;;  %v5889_v53 = vadd.f32 %v5633_v54, %v5377_v17  ;;  %v5636_v62 = vmul.f32 %v5170_v10, %v5170_v10  ;;  %v5403_v1 = vmul.f32 %v13550_v51, %v13550_v51  ;;  %v13552_v10 = vld [vmem:[#allocation134_spill] sm:$0xff] }
 0x4cc   : > { %v5891_v56 = vadd.f32 %v5635_v52, %v5379_v19  ;;  %v5890_v33 = vadd.f32 %v5634_v30, %v5378_v41  ;;  %v4660_v23 = vpop.f32.mrb[208].mxu0  ;;  %v13551_v19 = vld [vmem:[#allocation133_spill] sm:$0xff]  ;;  %v5404_v21 = vmul.f32 %v13552_v10, %v13552_v10 }
 0x4cd   : > { %6145 = vst [vmem:[%s12249_s22 + $0x1e0] sm:$0xff] %v5889_v53  ;;  %v5892_v24 = vadd.f32 %v5636_v62, %v5380_v3  ;;  %v5641_v48 = vmul.f32 %v4660_v23, %v4660_v23  ;;  %v5174_v55 = vpop.f32.mrb[208].mxu1  ;;  %v4662_v25 = vpop.f32.mrb[209].mxu0  ;;  %v5402_v2 = vmul.f32 %v13551_v19, %v13551_v19  ;;  %v13553_v23 = vld [vmem:[#allocation135_spill] sm:$0xff] }
 0x4ce   : > { %6147 = vst [vmem:[%s12249_s22 + $0x1f0] sm:$0xff] %v5891_v56  ;;  %6146 = vst [vmem:[%s12249_s22 + $0x1e8] sm:$0xff] %v5890_v33  ;;  %v5643_v14 = vmul.f32 %v5174_v55, %v5174_v55  ;;  %v5642_v27 = vmul.f32 %v4662_v25, %v4662_v25  ;;  %v5176_v16 = vpop.f32.mrb[209].mxu1  ;;  %v5409_v43 = vmul.f32 %v13553_v23, %v13553_v23  ;;  %v13554_v25 = vld [vmem:[#allocation136_spill] sm:$0xff] }
 0x4cf   : > { %6148 = vst [vmem:[%s12249_s22 + $0x1f8] sm:$0xff] %v5892_v24  ;;  %v5897_v42 = vadd.f32 %v5641_v48, %v5385_v5  ;;  %v5644_v9 = vmul.f32 %v5176_v16, %v5176_v16  ;;  %v5411_v6 = vmul.f32 %v13554_v25, %v13554_v25  ;;  %v13556_v16 = vld [vmem:[#allocation138_spill] sm:$0xff] }
 0x4d0   : > { %v5899_v35 = vadd.f32 %v5643_v14, %v5387_v34  ;;  %v5898_v31 = vadd.f32 %v5642_v27, %v5386_v7  ;;  %v4666_v58 = vpop.f32.mrb[210].mxu0  ;;  %v13555_v34 = vld [vmem:[#allocation137_spill] sm:$0xff]  ;;  %v5412_v45 = vmul.f32 %v13556_v16, %v13556_v16 }
 0x4d1   : > { %6153 = vst [vmem:[%s12249_s22 + $0x220] sm:$0xff] %v5897_v42  ;;  %v5900_v37 = vadd.f32 %v5644_v9, %v5388_v57  ;;  %v5649_v59 = vmul.f32 %v4666_v58, %v4666_v58  ;;  %v5180_v11 = vpop.f32.mrb[210].mxu1  ;;  %v4668_v26 = vpop.f32.mrb[211].mxu0  ;;  %v5410_v36 = vmul.f32 %v13555_v34, %v13555_v34  ;;  %v13557_v58 = vld [vmem:[#allocation139_spill] sm:$0xff] }
 0x4d2   : > { %6155 = vst [vmem:[%s12249_s22 + $0x230] sm:$0xff] %v5899_v35  ;;  %6154 = vst [vmem:[%s12249_s22 + $0x228] sm:$0xff] %v5898_v31  ;;  %v5651_v13 = vmul.f32 %v5180_v11, %v5180_v11  ;;  %v5650_v44 = vmul.f32 %v4668_v26, %v4668_v26  ;;  %v5182_v61 = vpop.f32.mrb[211].mxu1  ;;  %v5417_v46 = vmul.f32 %v13557_v58, %v13557_v58  ;;  %v13558_v26 = vld [vmem:[#allocation140_spill] sm:$0xff] }
 0x4d3   : > { %6156 = vst [vmem:[%s12249_s22 + $0x238] sm:$0xff] %v5900_v37  ;;  %v5905_v49 = vadd.f32 %v5649_v59, %v5393_v38  ;;  %v5652_v15 = vmul.f32 %v5182_v61, %v5182_v61  ;;  %v5419_v47 = vmul.f32 %v13558_v26, %v13558_v26  ;;  %v13560_v61 = vld [vmem:[#allocation142_spill] sm:$0xff] }
 0x4d4   : > { %v5907_v20 = vadd.f32 %v5651_v13, %v5395_v12  ;;  %v5906_v8 = vadd.f32 %v5650_v44, %v5394_v32  ;;  %v4672_v63 = vpop.f32.mrb[212].mxu0  ;;  %v13559_v12 = vld [vmem:[#allocation141_spill] sm:$0xff]  ;;  %v5420_v39 = vmul.f32 %v13560_v61, %v13560_v61 }
 0x4d5   : > { %6161 = vst [vmem:[%s12249_s22 + $0x260] sm:$0xff] %v5905_v49  ;;  %v5908_v17 = vadd.f32 %v5652_v15, %v5396_v40  ;;  %v5657_v0 = vmul.f32 %v4672_v63, %v4672_v63  ;;  %v5186_v54 = vpop.f32.mrb[212].mxu1  ;;  %v4674_v18 = vpop.f32.mrb[213].mxu0  ;;  %v5418_v50 = vmul.f32 %v13559_v12, %v13559_v12  ;;  %v13561_v63 = vld [vmem:[#allocation143_spill] sm:$0xff] }
 0x4d6   : > { %6163 = vst [vmem:[%s12249_s22 + $0x270] sm:$0xff] %v5907_v20  ;;  %6162 = vst [vmem:[%s12249_s22 + $0x268] sm:$0xff] %v5906_v8  ;;  %v5659_v41 = vmul.f32 %v5186_v54, %v5186_v54  ;;  %v5658_v52 = vmul.f32 %v4674_v18, %v4674_v18  ;;  %v5188_v30 = vpop.f32.mrb[213].mxu1  ;;  %v5425_v4 = vmul.f32 %v13561_v63, %v13561_v63  ;;  %v13562_v18 = vld [vmem:[#allocation144_spill] sm:$0xff] }
 0x4d7   : > { %6164 = vst [vmem:[%s12249_s22 + $0x278] sm:$0xff] %v5908_v17  ;;  %v5913_v3 = vadd.f32 %v5657_v0, %v5401_v22  ;;  %v5660_v53 = vmul.f32 %v5188_v30, %v5188_v30  ;;  %v5427_v51 = vmul.f32 %v13562_v18, %v13562_v18  ;;  %v13564_v30 = vld [vmem:[#allocation146_spill] sm:$0xff] }
 0x4d8   : > { %v5915_v62 = vadd.f32 %v5659_v41, %v5403_v1  ;;  %v5914_v56 = vadd.f32 %v5658_v52, %v5402_v2  ;;  %v4678_v33 = vpop.f32.mrb[214].mxu0  ;;  %v13563_v1 = vld [vmem:[#allocation145_spill] sm:$0xff]  ;;  %v5428_v10 = vmul.f32 %v13564_v30, %v13564_v30 }
 0x4d9   : > { %6169 = vst [vmem:[%s12249_s22 + $0x2a0] sm:$0xff] %v5913_v3  ;;  %v5916_v5 = vadd.f32 %v5660_v53, %v5404_v21  ;;  %v5665_v24 = vmul.f32 %v4678_v33, %v4678_v33  ;;  %v5192_v48 = vpop.f32.mrb[214].mxu1  ;;  %v4680_v55 = vpop.f32.mrb[215].mxu0  ;;  %v5426_v19 = vmul.f32 %v13563_v1, %v13563_v1  ;;  %v13565_v33 = vld [vmem:[#allocation147_spill] sm:$0xff] }
 0x4da   : > { %6171 = vst [vmem:[%s12249_s22 + $0x2b0] sm:$0xff] %v5915_v62  ;;  %6170 = vst [vmem:[%s12249_s22 + $0x2a8] sm:$0xff] %v5914_v56  ;;  %v5667_v7 = vmul.f32 %v5192_v48, %v5192_v48  ;;  %v5666_v14 = vmul.f32 %v4680_v55, %v4680_v55  ;;  %v5194_v27 = vpop.f32.mrb[215].mxu1  ;;  %v5433_v23 = vmul.f32 %v13565_v33, %v13565_v33  ;;  %v13566_v55 = vld [vmem:[#allocation148_spill] sm:$0xff] }
 0x4db   : > { %6172 = vst [vmem:[%s12249_s22 + $0x2b8] sm:$0xff] %v5916_v5  ;;  %v5921_v57 = vadd.f32 %v5665_v24, %v5409_v43  ;;  %v5668_v42 = vmul.f32 %v5194_v27, %v5194_v27  ;;  %v5435_v25 = vmul.f32 %v13566_v55, %v13566_v55  ;;  %v13568_v27 = vld [vmem:[#allocation150_spill] sm:$0xff] }
 0x4dc   : > { %v5923_v9 = vadd.f32 %v5667_v7, %v5411_v6  ;;  %v5922_v35 = vadd.f32 %v5666_v14, %v5410_v36  ;;  %v4684_v31 = vpop.f32.mrb[216].mxu0  ;;  %v13567_v6 = vld [vmem:[#allocation149_spill] sm:$0xff]  ;;  %v5436_v16 = vmul.f32 %v13568_v27, %v13568_v27 }
 0x4dd   : > { %6177 = vst [vmem:[%s12249_s22 + $0x2e0] sm:$0xff] %v5921_v57  ;;  %v5924_v38 = vadd.f32 %v5668_v42, %v5412_v45  ;;  %v5673_v37 = vmul.f32 %v4684_v31, %v4684_v31  ;;  %v5198_v59 = vpop.f32.mrb[216].mxu1  ;;  %v4686_v11 = vpop.f32.mrb[217].mxu0  ;;  %v5434_v34 = vmul.f32 %v13567_v6, %v13567_v6  ;;  %v13569_v31 = vld [vmem:[#allocation151_spill] sm:$0xff] }
 0x4de   : > { %6179 = vst [vmem:[%s12249_s22 + $0x2f0] sm:$0xff] %v5923_v9  ;;  %6178 = vst [vmem:[%s12249_s22 + $0x2e8] sm:$0xff] %v5922_v35  ;;  %v5675_v32 = vmul.f32 %v5198_v59, %v5198_v59  ;;  %v5674_v13 = vmul.f32 %v4686_v11, %v4686_v11  ;;  %v5200_v44 = vpop.f32.mrb[217].mxu1  ;;  %v5441_v58 = vmul.f32 %v13569_v31, %v13569_v31  ;;  %v13570_v11 = vld [vmem:[#allocation152_spill] sm:$0xff] }
 0x4df   : > { %6180 = vst [vmem:[%s12249_s22 + $0x2f8] sm:$0xff] %v5924_v38  ;;  %v5929_v40 = vadd.f32 %v5673_v37, %v5417_v46  ;;  %v5676_v49 = vmul.f32 %v5200_v44, %v5200_v44  ;;  %v5443_v26 = vmul.f32 %v13570_v11, %v13570_v11  ;;  %v13572_v44 = vld [vmem:[#allocation154_spill] sm:$0xff] }
 0x4e0   : > { %v5931_v15 = vadd.f32 %v5675_v32, %v5419_v47  ;;  %v5930_v20 = vadd.f32 %v5674_v13, %v5418_v50  ;;  %v4690_v8 = vpop.f32.mrb[218].mxu0  ;;  %v13571_v47 = vld [vmem:[#allocation153_spill] sm:$0xff]  ;;  %v5444_v61 = vmul.f32 %v13572_v44, %v13572_v44 }
 0x4e1   : > { %6185 = vst [vmem:[%s12249_s22 + $0x320] sm:$0xff] %v5929_v40  ;;  %v5932_v22 = vadd.f32 %v5676_v49, %v5420_v39  ;;  %v5681_v17 = vmul.f32 %v4690_v8, %v4690_v8  ;;  %v5204_v0 = vpop.f32.mrb[218].mxu1  ;;  %v4692_v54 = vpop.f32.mrb[219].mxu0  ;;  %v5442_v12 = vmul.f32 %v13571_v47, %v13571_v47  ;;  %v13573_v8 = vld [vmem:[#allocation155_spill] sm:$0xff] }
 0x4e2   : > { %6187 = vst [vmem:[%s12249_s22 + $0x330] sm:$0xff] %v5931_v15  ;;  %6186 = vst [vmem:[%s12249_s22 + $0x328] sm:$0xff] %v5930_v20  ;;  %v5683_v2 = vmul.f32 %v5204_v0, %v5204_v0  ;;  %v5682_v41 = vmul.f32 %v4692_v54, %v4692_v54  ;;  %v5206_v52 = vpop.f32.mrb[219].mxu1  ;;  %v5449_v63 = vmul.f32 %v13573_v8, %v13573_v8  ;;  %v13574_v54 = vld [vmem:[#allocation156_spill] sm:$0xff] }
 0x4e3   : > { %6188 = vst [vmem:[%s12249_s22 + $0x338] sm:$0xff] %v5932_v22  ;;  %v5937_v21 = vadd.f32 %v5681_v17, %v5425_v4  ;;  %v5684_v3 = vmul.f32 %v5206_v52, %v5206_v52  ;;  %v5451_v18 = vmul.f32 %v13574_v54, %v13574_v54  ;;  %v13576_v52 = vld [vmem:[#allocation158_spill] sm:$0xff] }
 0x4e4   : > { %v5939_v53 = vadd.f32 %v5683_v2, %v5427_v51  ;;  %v5938_v62 = vadd.f32 %v5682_v41, %v5426_v19  ;;  %v4696_v56 = vpop.f32.mrb[220].mxu0  ;;  %v13575_v51 = vld [vmem:[#allocation157_spill] sm:$0xff]  ;;  %v5452_v30 = vmul.f32 %v13576_v52, %v13576_v52 }
 0x4e5   : > { %6193 = vst [vmem:[%s12249_s22 + $0x360] sm:$0xff] %v5937_v21  ;;  %v5940_v43 = vadd.f32 %v5684_v3, %v5428_v10  ;;  %v5689_v5 = vmul.f32 %v4696_v56, %v4696_v56  ;;  %v5210_v24 = vpop.f32.mrb[220].mxu1  ;;  %v4698_v48 = vpop.f32.mrb[221].mxu0  ;;  %v5450_v1 = vmul.f32 %v13575_v51, %v13575_v51  ;;  %v13577_v56 = vld [vmem:[#allocation159_spill] sm:$0xff] }
 0x4e6   : > { %6195 = vst [vmem:[%s12249_s22 + $0x370] sm:$0xff] %v5939_v53  ;;  %6194 = vst [vmem:[%s12249_s22 + $0x368] sm:$0xff] %v5938_v62  ;;  %v5691_v36 = vmul.f32 %v5210_v24, %v5210_v24  ;;  %v5690_v7 = vmul.f32 %v4698_v48, %v4698_v48  ;;  %v5212_v14 = vpop.f32.mrb[221].mxu1  ;;  %v5457_v33 = vmul.f32 %v13577_v56, %v13577_v56  ;;  %v13578_v48 = vld [vmem:[#allocation160_spill] sm:$0xff] }
 0x4e7   : > { %6196 = vst [vmem:[%s12249_s22 + $0x378] sm:$0xff] %v5940_v43  ;;  %v5945_v45 = vadd.f32 %v5689_v5, %v5433_v23  ;;  %v5692_v57 = vmul.f32 %v5212_v14, %v5212_v14  ;;  %v5459_v55 = vmul.f32 %v13578_v48, %v13578_v48  ;;  %v13580_v14 = vld [vmem:[#allocation162_spill] sm:$0xff] }
 0x4e8   : > { %v5947_v42 = vadd.f32 %v5691_v36, %v5435_v25  ;;  %v5946_v9 = vadd.f32 %v5690_v7, %v5434_v34  ;;  %v4702_v35 = vpop.f32.mrb[222].mxu0  ;;  %v13579_v25 = vld [vmem:[#allocation161_spill] sm:$0xff]  ;;  %v5460_v27 = vmul.f32 %v13580_v14, %v13580_v14 }
 0x4e9   : > { %6201 = vst [vmem:[%s12249_s22 + $0x3a0] sm:$0xff] %v5945_v45  ;;  %v5948_v46 = vadd.f32 %v5692_v57, %v5436_v16  ;;  %v5697_v38 = vmul.f32 %v4702_v35, %v4702_v35  ;;  %v5216_v37 = vpop.f32.mrb[222].mxu1  ;;  %v4704_v59 = vpop.f32.mrb[223].mxu0  ;;  %v5458_v6 = vmul.f32 %v13579_v25, %v13579_v25  ;;  %v13581_v35 = vld [vmem:[#allocation163_spill] sm:$0xff] }
 0x4ea   : > { %6203 = vst [vmem:[%s12249_s22 + $0x3b0] sm:$0xff] %v5947_v42  ;;  %6202 = vst [vmem:[%s12249_s22 + $0x3a8] sm:$0xff] %v5946_v9  ;;  %v5699_v50 = vmul.f32 %v5216_v37, %v5216_v37  ;;  %v5698_v32 = vmul.f32 %v4704_v59, %v4704_v59  ;;  %v5218_v13 = vpop.f32.mrb[223].mxu1  ;;  %v5465_v31 = vmul.f32 %v13581_v35, %v13581_v35  ;;  %v13582_v59 = vld [vmem:[#allocation164_spill] sm:$0xff] }
 0x4eb   : > { %6204 = vst [vmem:[%s12249_s22 + $0x3b8] sm:$0xff] %v5948_v46  ;;  %v5953_v39 = vadd.f32 %v5697_v38, %v5441_v58  ;;  %v5700_v40 = vmul.f32 %v5218_v13, %v5218_v13  ;;  %v5467_v11 = vmul.f32 %v13582_v59, %v13582_v59  ;;  %v13584_v13 = vld [vmem:[#allocation166_spill] sm:$0xff] }
 0x4ec   : > { %v5955_v49 = vadd.f32 %v5699_v50, %v5443_v26  ;;  %v5954_v15 = vadd.f32 %v5698_v32, %v5442_v12  ;;  %v4708_v20 = vpop.f32.mrb[224].mxu0  ;;  %v13583_v26 = vld [vmem:[#allocation165_spill] sm:$0xff]  ;;  %v5468_v44 = vmul.f32 %v13584_v13, %v13584_v13 }
 0x4ed   : > { %6209 = vst [vmem:[%s12249_s22 + $0x3e0] sm:$0xff] %v5953_v39  ;;  %v5956_v4 = vadd.f32 %v5700_v40, %v5444_v61  ;;  %v5705_v22 = vmul.f32 %v4708_v20, %v4708_v20  ;;  %v5222_v17 = vpop.f32.mrb[224].mxu1  ;;  %v4710_v0 = vpop.f32.mrb[225].mxu0  ;;  %v5466_v47 = vmul.f32 %v13583_v26, %v13583_v26  ;;  %v13585_v20 = vld [vmem:[#allocation167_spill] sm:$0xff] }
 0x4ee   : > { %6211 = vst [vmem:[%s12249_s22 + $0x3f0] sm:$0xff] %v5955_v49  ;;  %6210 = vst [vmem:[%s12249_s22 + $0x3e8] sm:$0xff] %v5954_v15  ;;  %v5707_v19 = vmul.f32 %v5222_v17, %v5222_v17  ;;  %v5706_v2 = vmul.f32 %v4710_v0, %v4710_v0  ;;  %v5224_v41 = vpop.f32.mrb[225].mxu1  ;;  %v5473_v8 = vmul.f32 %v13585_v20, %v13585_v20  ;;  %v13586_v0 = vld [vmem:[#allocation168_spill] sm:$0xff] }
 0x4ef   : > { %6212 = vst [vmem:[%s12249_s22 + $0x3f8] sm:$0xff] %v5956_v4  ;;  %v5961_v10 = vadd.f32 %v5705_v22, %v5449_v63  ;;  %v5708_v21 = vmul.f32 %v5224_v41, %v5224_v41  ;;  %v5475_v54 = vmul.f32 %v13586_v0, %v13586_v0  ;;  %v13588_v41 = vld [vmem:[#allocation170_spill] sm:$0xff] }
 0x4f0   : > { %v5963_v3 = vadd.f32 %v5707_v19, %v5451_v18  ;;  %v5962_v53 = vadd.f32 %v5706_v2, %v5450_v1  ;;  %v4714_v62 = vpop.f32.mrb[226].mxu0  ;;  %v13587_v18 = vld [vmem:[#allocation169_spill] sm:$0xff]  ;;  %v5476_v52 = vmul.f32 %v13588_v41, %v13588_v41 }
 0x4f1   : > { %6217 = vst [vmem:[%s12249_s22 + $0x420] sm:$0xff] %v5961_v10  ;;  %v5964_v23 = vadd.f32 %v5708_v21, %v5452_v30  ;;  %v5713_v43 = vmul.f32 %v4714_v62, %v4714_v62  ;;  %v5228_v5 = vpop.f32.mrb[226].mxu1  ;;  %v4716_v24 = vpop.f32.mrb[227].mxu0  ;;  %v5474_v51 = vmul.f32 %v13587_v18, %v13587_v18  ;;  %v13589_v62 = vld [vmem:[#allocation171_spill] sm:$0xff] }
 0x4f2   : > { %6219 = vst [vmem:[%s12249_s22 + $0x430] sm:$0xff] %v5963_v3  ;;  %6218 = vst [vmem:[%s12249_s22 + $0x428] sm:$0xff] %v5962_v53  ;;  %v5715_v34 = vmul.f32 %v5228_v5, %v5228_v5  ;;  %v5714_v36 = vmul.f32 %v4716_v24, %v4716_v24  ;;  %v5230_v7 = vpop.f32.mrb[227].mxu1  ;;  %v5481_v56 = vmul.f32 %v13589_v62, %v13589_v62  ;;  %v13590_v24 = vld [vmem:[#allocation172_spill] sm:$0xff] }
 0x4f3   : > { %6220 = vst [vmem:[%s12249_s22 + $0x438] sm:$0xff] %v5964_v23  ;;  %v5969_v16 = vadd.f32 %v5713_v43, %v5457_v33  ;;  %v5716_v45 = vmul.f32 %v5230_v7, %v5230_v7  ;;  %v5483_v48 = vmul.f32 %v13590_v24, %v13590_v24  ;;  %v13592_v7 = vld [vmem:[#allocation174_spill] sm:$0xff] }
 0x4f4   : > { %v5971_v57 = vadd.f32 %v5715_v34, %v5459_v55  ;;  %v5970_v42 = vadd.f32 %v5714_v36, %v5458_v6  ;;  %v4720_v9 = vpop.f32.mrb[228].mxu0  ;;  %v13591_v55 = vld [vmem:[#allocation173_spill] sm:$0xff]  ;;  %v5484_v14 = vmul.f32 %v13592_v7, %v13592_v7 }
 0x4f5   : > { %6225 = vst [vmem:[%s12249_s22 + $0x460] sm:$0xff] %v5969_v16  ;;  %v5972_v58 = vadd.f32 %v5716_v45, %v5460_v27  ;;  %v5721_v46 = vmul.f32 %v4720_v9, %v4720_v9  ;;  %v5234_v38 = vpop.f32.mrb[228].mxu1  ;;  %v4722_v37 = vpop.f32.mrb[229].mxu0  ;;  %v5482_v25 = vmul.f32 %v13591_v55, %v13591_v55  ;;  %v13593_v9 = vld [vmem:[#allocation175_spill] sm:$0xff] }
 0x4f6   : > { %6227 = vst [vmem:[%s12249_s22 + $0x470] sm:$0xff] %v5971_v57  ;;  %6226 = vst [vmem:[%s12249_s22 + $0x468] sm:$0xff] %v5970_v42  ;;  %v5723_v12 = vmul.f32 %v5234_v38, %v5234_v38  ;;  %v5722_v50 = vmul.f32 %v4722_v37, %v4722_v37  ;;  %v5236_v32 = vpop.f32.mrb[229].mxu1  ;;  %v5489_v35 = vmul.f32 %v13593_v9, %v13593_v9  ;;  %v13594_v37 = vld [vmem:[#allocation176_spill] sm:$0xff] }
 0x4f7   : > { %6228 = vst [vmem:[%s12249_s22 + $0x478] sm:$0xff] %v5972_v58  ;;  %v5977_v61 = vadd.f32 %v5721_v46, %v5465_v31  ;;  %v5724_v39 = vmul.f32 %v5236_v32, %v5236_v32  ;;  %v5491_v59 = vmul.f32 %v13594_v37, %v13594_v37  ;;  %v13596_v32 = vld [vmem:[#allocation178_spill] sm:$0xff] }
 0x4f8   : > { %v5979_v40 = vadd.f32 %v5723_v12, %v5467_v11  ;;  %v5978_v49 = vadd.f32 %v5722_v50, %v5466_v47  ;;  %v4726_v15 = vpop.f32.mrb[230].mxu0  ;;  %v13595_v11 = vld [vmem:[#allocation177_spill] sm:$0xff]  ;;  %v5492_v13 = vmul.f32 %v13596_v32, %v13596_v32 }
 0x4f9   : > { %6233 = vst [vmem:[%s12249_s22 + $0x4a0] sm:$0xff] %v5977_v61  ;;  %v5980_v63 = vadd.f32 %v5724_v39, %v5468_v44  ;;  %v5729_v4 = vmul.f32 %v4726_v15, %v4726_v15  ;;  %v5240_v22 = vpop.f32.mrb[230].mxu1  ;;  %v4728_v17 = vpop.f32.mrb[231].mxu0  ;;  %v5490_v26 = vmul.f32 %v13595_v11, %v13595_v11  ;;  %v13597_v15 = vld [vmem:[#allocation179_spill] sm:$0xff] }
 0x4fa   : > { %6235 = vst [vmem:[%s12249_s22 + $0x4b0] sm:$0xff] %v5979_v40  ;;  %6234 = vst [vmem:[%s12249_s22 + $0x4a8] sm:$0xff] %v5978_v49  ;;  %v5731_v1 = vmul.f32 %v5240_v22, %v5240_v22  ;;  %v5730_v19 = vmul.f32 %v4728_v17, %v4728_v17  ;;  %v5242_v2 = vpop.f32.mrb[231].mxu1  ;;  %v5497_v20 = vmul.f32 %v13597_v15, %v13597_v15  ;;  %v13598_v17 = vld [vmem:[#allocation180_spill] sm:$0xff] }
 0x4fb   : > { %6236 = vst [vmem:[%s12249_s22 + $0x4b8] sm:$0xff] %v5980_v63  ;;  %v5985_v30 = vadd.f32 %v5729_v4, %v5473_v8  ;;  %v5732_v10 = vmul.f32 %v5242_v2, %v5242_v2  ;;  %v5499_v0 = vmul.f32 %v13598_v17, %v13598_v17  ;;  %v13600_v2 = vld [vmem:[#allocation182_spill] sm:$0xff] }
 0x4fc   : > { %v5987_v21 = vadd.f32 %v5731_v1, %v5475_v54  ;;  %v5986_v3 = vadd.f32 %v5730_v19, %v5474_v51  ;;  %v4732_v53 = vpop.f32.mrb[232].mxu0  ;;  %v13599_v54 = vld [vmem:[#allocation181_spill] sm:$0xff]  ;;  %v5500_v41 = vmul.f32 %v13600_v2, %v13600_v2 }
 0x4fd   : > { %6241 = vst [vmem:[%s12249_s22 + $0x4e0] sm:$0xff] %v5985_v30  ;;  %v5988_v33 = vadd.f32 %v5732_v10, %v5476_v52  ;;  %v5737_v23 = vmul.f32 %v4732_v53, %v4732_v53  ;;  %v5246_v43 = vpop.f32.mrb[232].mxu1  ;;  %v4734_v5 = vpop.f32.mrb[233].mxu0  ;;  %v5498_v18 = vmul.f32 %v13599_v54, %v13599_v54  ;;  %v13601_v53 = vld [vmem:[#allocation183_spill] sm:$0xff] }
 0x4fe   : > { %6243 = vst [vmem:[%s12249_s22 + $0x4f0] sm:$0xff] %v5987_v21  ;;  %6242 = vst [vmem:[%s12249_s22 + $0x4e8] sm:$0xff] %v5986_v3  ;;  %v5739_v6 = vmul.f32 %v5246_v43, %v5246_v43  ;;  %v5738_v34 = vmul.f32 %v4734_v5, %v4734_v5  ;;  %v5248_v36 = vpop.f32.mrb[233].mxu1  ;;  %v5505_v62 = vmul.f32 %v13601_v53, %v13601_v53  ;;  %v13602_v5 = vld [vmem:[#allocation184_spill] sm:$0xff] }
 0x4ff   : > { %6244 = vst [vmem:[%s12249_s22 + $0x4f8] sm:$0xff] %v5988_v33  ;;  %v5993_v27 = vadd.f32 %v5737_v23, %v5481_v56  ;;  %v5740_v16 = vmul.f32 %v5248_v36, %v5248_v36  ;;  %v5507_v24 = vmul.f32 %v13602_v5, %v13602_v5  ;;  %v13604_v36 = vld [vmem:[#allocation186_spill] sm:$0xff] }
 0x500   : > { %v5995_v45 = vadd.f32 %v5739_v6, %v5483_v48  ;;  %v5994_v57 = vadd.f32 %v5738_v34, %v5482_v25  ;;  %v4738_v42 = vpop.f32.mrb[234].mxu0  ;;  %v13603_v48 = vld [vmem:[#allocation185_spill] sm:$0xff]  ;;  %v5508_v7 = vmul.f32 %v13604_v36, %v13604_v36 }
 0x501   : > { %6249 = vst [vmem:[%s12249_s22 + $0x520] sm:$0xff] %v5993_v27  ;;  %v5996_v31 = vadd.f32 %v5740_v16, %v5484_v14  ;;  %v5745_v58 = vmul.f32 %v4738_v42, %v4738_v42  ;;  %v5252_v46 = vpop.f32.mrb[234].mxu1  ;;  %v4740_v38 = vpop.f32.mrb[235].mxu0  ;;  %v5506_v55 = vmul.f32 %v13603_v48, %v13603_v48  ;;  %v13605_v42 = vld [vmem:[#allocation187_spill] sm:$0xff] }
 0x502   : > { %6251 = vst [vmem:[%s12249_s22 + $0x530] sm:$0xff] %v5995_v45  ;;  %6250 = vst [vmem:[%s12249_s22 + $0x528] sm:$0xff] %v5994_v57  ;;  %v5747_v47 = vmul.f32 %v5252_v46, %v5252_v46  ;;  %v5746_v12 = vmul.f32 %v4740_v38, %v4740_v38  ;;  %v5254_v50 = vpop.f32.mrb[235].mxu1  ;;  %v5513_v9 = vmul.f32 %v13605_v42, %v13605_v42  ;;  %v13606_v38 = vld [vmem:[#allocation188_spill] sm:$0xff] }
 0x503   : > { %6252 = vst [vmem:[%s12249_s22 + $0x538] sm:$0xff] %v5996_v31  ;;  %v6001_v44 = vadd.f32 %v5745_v58, %v5489_v35  ;;  %v5748_v61 = vmul.f32 %v5254_v50, %v5254_v50  ;;  %v5515_v37 = vmul.f32 %v13606_v38, %v13606_v38  ;;  %v13608_v50 = vld [vmem:[#allocation190_spill] sm:$0xff]  ;;  %v13617_v38 = vld [vmem:[#allocation199_spill] sm:$0xff] }
 0x504   : > { %v6003_v39 = vadd.f32 %v5747_v47, %v5491_v59  ;;  %v6002_v40 = vadd.f32 %v5746_v12, %v5490_v26  ;;  %v4744_v49 = vpop.f32.mrb[236].mxu0  ;;  %v13607_v59 = vld [vmem:[#allocation189_spill] sm:$0xff]  ;;  %v5516_v32 = vmul.f32 %v13608_v50, %v13608_v50  ;;  %v13618_v50 = vld [vmem:[#allocation200_spill] sm:$0xff] }
 0x505   : > { %6257 = vst [vmem:[%s12249_s22 + $0x560] sm:$0xff] %v6001_v44  ;;  %v6004_v8 = vadd.f32 %v5748_v61, %v5492_v13  ;;  %v5753_v63 = vmul.f32 %v4744_v49, %v4744_v49  ;;  %v5258_v4 = vpop.f32.mrb[236].mxu1  ;;  %v4746_v22 = vpop.f32.mrb[237].mxu0  ;;  %v5514_v11 = vmul.f32 %v13607_v59, %v13607_v59  ;;  %v13609_v49 = vld [vmem:[#allocation191_spill] sm:$0xff] }
 0x506   : > { %6259 = vst [vmem:[%s12249_s22 + $0x570] sm:$0xff] %v6003_v39  ;;  %6258 = vst [vmem:[%s12249_s22 + $0x568] sm:$0xff] %v6002_v40  ;;  %v5755_v51 = vmul.f32 %v5258_v4, %v5258_v4  ;;  %v5754_v1 = vmul.f32 %v4746_v22, %v4746_v22  ;;  %v5260_v19 = vpop.f32.mrb[237].mxu1  ;;  %v5521_v15 = vmul.f32 %v13609_v49, %v13609_v49  ;;  %v13610_v22 = vld [vmem:[#allocation192_spill] sm:$0xff] }
 0x507   : > { %6260 = vst [vmem:[%s12249_s22 + $0x578] sm:$0xff] %v6004_v8  ;;  %v6009_v52 = vadd.f32 %v5753_v63, %v5497_v20  ;;  %v5756_v30 = vmul.f32 %v5260_v19, %v5260_v19  ;;  %v5523_v17 = vmul.f32 %v13610_v22, %v13610_v22  ;;  %v13612_v19 = vld [vmem:[#allocation194_spill] sm:$0xff]  ;;  %v13621_v22 = vld [vmem:[#allocation203_spill] sm:$0xff] }
 0x508   : > { %v6011_v10 = vadd.f32 %v5755_v51, %v5499_v0  ;;  %v6010_v21 = vadd.f32 %v5754_v1, %v5498_v18  ;;  %v4750_v3 = vpop.f32.mrb[238].mxu0  ;;  %v13611_v0 = vld [vmem:[#allocation193_spill] sm:$0xff]  ;;  %v5524_v2 = vmul.f32 %v13612_v19, %v13612_v19  ;;  %v13622_v19 = vld [vmem:[#allocation204_spill] sm:$0xff] }
 0x509   : > { %6265 = vst [vmem:[%s12249_s22 + $0x5a0] sm:$0xff] %v6009_v52  ;;  %v6012_v56 = vadd.f32 %v5756_v30, %v5500_v41  ;;  %v5761_v33 = vmul.f32 %v4750_v3, %v4750_v3  ;;  %v5264_v23 = vpop.f32.mrb[238].mxu1  ;;  %v4752_v43 = vpop.f32.mrb[239].mxu0  ;;  %v5522_v54 = vmul.f32 %v13611_v0, %v13611_v0  ;;  %v5529_v3 = vmul.f32 %v11848_v29, %v11848_v29 }
 0x50a   : > { %6267 = vst [vmem:[%s12249_s22 + $0x5b0] sm:$0xff] %v6011_v10  ;;  %6266 = vst [vmem:[%s12249_s22 + $0x5a8] sm:$0xff] %v6010_v21  ;;  %v5763_v25 = vmul.f32 %v5264_v23, %v5264_v23  ;;  %v5762_v6 = vmul.f32 %v4752_v43, %v4752_v43  ;;  %v5266_v34 = vpop.f32.mrb[239].mxu1  ;;  %v5531_v23 = vmul.f32 %v11850_v28, %v11850_v28 }
 0x50b   : > { %6268 = vst [vmem:[%s12249_s22 + $0x5b8] sm:$0xff] %v6012_v56  ;;  %v6017_v14 = vadd.f32 %v5761_v33, %v5505_v62  ;;  %v5764_v27 = vmul.f32 %v5266_v34, %v5266_v34  ;;  %v5530_v43 = vmul.f32 %v11852_v60, %v11852_v60 }
 0x50c   : > { %v6019_v16 = vadd.f32 %v5763_v25, %v5507_v24  ;;  %v6018_v45 = vadd.f32 %v5762_v6, %v5506_v55  ;;  %v4756_v57 = vpop.f32.mrb[240].mxu0  ;;  %v13613_v55 = vld [vmem:[#allocation195_spill] sm:$0xff] }
 0x50d   : > { %6273 = vst [vmem:[%s12249_s22 + $0x5e0] sm:$0xff] %v6017_v14  ;;  %v6020_v35 = vadd.f32 %v5764_v27, %v5508_v7  ;;  %v5769_v31 = vmul.f32 %v4756_v57, %v4756_v57  ;;  %v5270_v58 = vpop.f32.mrb[240].mxu1  ;;  %v4758_v46 = vpop.f32.mrb[241].mxu0  ;;  %v5532_v29 = vmul.f32 %v13613_v55, %v13613_v55  ;;  %v13614_v7 = vld [vmem:[#allocation196_spill] sm:$0xff]  ;;  %v13615_v57 = vld [vmem:[#allocation197_spill] sm:$0xff] }
 0x50e   : > { %6275 = vst [vmem:[%s12249_s22 + $0x5f0] sm:$0xff] %v6019_v16  ;;  %6274 = vst [vmem:[%s12249_s22 + $0x5e8] sm:$0xff] %v6018_v45  ;;  %v5771_v26 = vmul.f32 %v5270_v58, %v5270_v58  ;;  %v5770_v47 = vmul.f32 %v4758_v46, %v4758_v46  ;;  %v5272_v12 = vpop.f32.mrb[241].mxu1  ;;  %v5537_v60 = vmul.f32 %v13614_v7, %v13614_v7 }
 0x50f   : > { %6276 = vst [vmem:[%s12249_s22 + $0x5f8] sm:$0xff] %v6020_v35  ;;  %v6025_v13 = vadd.f32 %v5769_v31, %v5513_v9  ;;  %v5772_v44 = vmul.f32 %v5272_v12, %v5272_v12  ;;  %v5539_v42 = vmul.f32 %v13615_v57, %v13615_v57  ;;  %v13616_v9 = vld [vmem:[#allocation198_spill] sm:$0xff] }
 0x510   : > { %v6027_v61 = vadd.f32 %v5771_v26, %v5515_v37  ;;  %v6026_v39 = vadd.f32 %v5770_v47, %v5514_v11  ;;  %v4762_v40 = vpop.f32.mrb[242].mxu0  ;;  %v5538_v35 = vmul.f32 %v13616_v9, %v13616_v9  ;;  %v5540_v37 = vmul.f32 %v13617_v38, %v13617_v38 }
 0x511   : > { %6281 = vst [vmem:[%s12249_s22 + $0x620] sm:$0xff] %v6025_v13  ;;  %v6028_v20 = vadd.f32 %v5772_v44, %v5516_v32  ;;  %v5777_v8 = vmul.f32 %v4762_v40, %v4762_v40  ;;  %v5276_v63 = vpop.f32.mrb[242].mxu1  ;;  %v4764_v4 = vpop.f32.mrb[243].mxu0  ;;  %v5545_v32 = vmul.f32 %v13618_v50, %v13618_v50  ;;  %v13619_v40 = vld [vmem:[#allocation201_spill] sm:$0xff] }
 0x512   : > { %6283 = vst [vmem:[%s12249_s22 + $0x630] sm:$0xff] %v6027_v61  ;;  %6282 = vst [vmem:[%s12249_s22 + $0x628] sm:$0xff] %v6026_v39  ;;  %v5779_v18 = vmul.f32 %v5276_v63, %v5276_v63  ;;  %v5778_v51 = vmul.f32 %v4764_v4, %v4764_v4  ;;  %v5278_v1 = vpop.f32.mrb[243].mxu1  ;;  %v5547_v49 = vmul.f32 %v13619_v40, %v13619_v40 }
 0x513   : > { %6284 = vst [vmem:[%s12249_s22 + $0x638] sm:$0xff] %v6028_v20  ;;  %v6033_v41 = vadd.f32 %v5777_v8, %v5521_v15  ;;  %v5780_v52 = vmul.f32 %v5278_v1, %v5278_v1  ;;  %v13620_v15 = vld [vmem:[#allocation202_spill] sm:$0xff] }
 0x514   : > { %v6035_v30 = vadd.f32 %v5779_v18, %v5523_v17  ;;  %v6034_v10 = vadd.f32 %v5778_v51, %v5522_v54  ;;  %v4768_v21 = vpop.f32.mrb[244].mxu0  ;;  %v5546_v20 = vmul.f32 %v13620_v15, %v13620_v15  ;;  %v5548_v17 = vmul.f32 %v13621_v22, %v13621_v22 }
 0x515   : > { %6289 = vst [vmem:[%s12249_s22 + $0x660] sm:$0xff] %v6033_v41  ;;  %v6036_v53 = vadd.f32 %v5780_v52, %v5524_v2  ;;  %v5785_v62 = vmul.f32 %v4768_v21, %v4768_v21  ;;  %v5282_v56 = vpop.f32.mrb[244].mxu1  ;;  %v4770_v33 = vpop.f32.mrb[245].mxu0  ;;  %v5553_v2 = vmul.f32 %v13622_v19, %v13622_v19  ;;  %v13623_v21 = vld [vmem:[#allocation205_spill] sm:$0xff] }
 0x516   : > { %6291 = vst [vmem:[%s12249_s22 + $0x670] sm:$0xff] %v6035_v30  ;;  %6290 = vst [vmem:[%s12249_s22 + $0x668] sm:$0xff] %v6034_v10  ;;  %v5787_v5 = vmul.f32 %v5282_v56, %v5282_v56  ;;  %v5786_v24 = vmul.f32 %v4770_v33, %v4770_v33  ;;  %v5284_v48 = vpop.f32.mrb[245].mxu1 }
 0x517   : > { %6292 = vst [vmem:[%s12249_s22 + $0x678] sm:$0xff] %v6036_v53  ;;  %v6041_v25 = vadd.f32 %v5785_v62, %v5529_v3  ;;  %v5788_v6 = vmul.f32 %v5284_v48, %v5284_v48  ;;  %v5555_v3 = vmul.f32 %v13623_v21, %v13623_v21  ;;  %v13624_v53 = vld [vmem:[#allocation206_spill] sm:$0xff] }
 0x518   : > { %v6043_v34 = vadd.f32 %v5787_v5, %v5531_v23  ;;  %v6042_v36 = vadd.f32 %v5786_v24, %v5530_v43  ;;  %v4774_v28 = vpop.f32.mrb[246].mxu0  ;;  %v5554_v62 = vmul.f32 %v13624_v53, %v13624_v53  ;;  %v13625_v43 = vld [vmem:[#allocation207_spill] sm:$0xff] }
 0x519   : > { %6297 = vst [vmem:[%s12249_s22 + $0x6a0] sm:$0xff] %v6041_v25  ;;  %v6044_v14 = vadd.f32 %v5788_v6, %v5532_v29  ;;  %v5793_v27 = vmul.f32 %v4774_v28, %v4774_v28  ;;  %v5288_v16 = vpop.f32.mrb[246].mxu1  ;;  %v4776_v45 = vpop.f32.mrb[247].mxu0  ;;  %v5556_v5 = vmul.f32 %v13625_v43, %v13625_v43  ;;  %v13626_v6 = vld [vmem:[#allocation208_spill] sm:$0xff] }
 0x51a   : > { %6299 = vst [vmem:[%s12249_s22 + $0x6b0] sm:$0xff] %v6043_v34  ;;  %6298 = vst [vmem:[%s12249_s22 + $0x6a8] sm:$0xff] %v6042_v36  ;;  %v5795_v31 = vmul.f32 %v5288_v16, %v5288_v16  ;;  %v5794_v58 = vmul.f32 %v4776_v45, %v4776_v45  ;;  %v5290_v46 = vpop.f32.mrb[247].mxu1  ;;  %v5561_v34 = vmul.f32 %v13626_v6, %v13626_v6  ;;  %v13628_v16 = vld [vmem:[#allocation210_spill] sm:$0xff] }
 0x51b   : > { %6300 = vst [vmem:[%s12249_s22 + $0x6b8] sm:$0xff] %v6044_v14  ;;  %v6049_v59 = vadd.f32 %v5793_v27, %v5537_v60  ;;  %v5796_v11 = vmul.f32 %v5290_v46, %v5290_v46  ;;  %v13627_v14 = vld [vmem:[#allocation209_spill] sm:$0xff]  ;;  %v5562_v45 = vmul.f32 %v13628_v16, %v13628_v16 }
 0x51c   : > { %v6051_v26 = vadd.f32 %v5795_v31, %v5539_v42  ;;  %v6050_v47 = vadd.f32 %v5794_v58, %v5538_v35  ;;  %v4780_v12 = vpop.f32.mrb[248].mxu0  ;;  %v5563_v27 = vmul.f32 %v13627_v14, %v13627_v14  ;;  %v13629_v35 = vld [vmem:[#allocation211_spill] sm:$0xff] }
 0x51d   : > { %6305 = vst [vmem:[%s12249_s22 + $0x6e0] sm:$0xff] %v6049_v59  ;;  %v6052_v13 = vadd.f32 %v5796_v11, %v5540_v37  ;;  %v5801_v44 = vmul.f32 %v4780_v12, %v4780_v12  ;;  %v5294_v61 = vpop.f32.mrb[248].mxu1  ;;  %v4782_v39 = vpop.f32.mrb[249].mxu0  ;;  %v5564_v31 = vmul.f32 %v13629_v35, %v13629_v35  ;;  %v13630_v11 = vld [vmem:[#allocation212_spill] sm:$0xff] }
 0x51e   : > { %6307 = vst [vmem:[%s12249_s22 + $0x6f0] sm:$0xff] %v6051_v26  ;;  %6306 = vst [vmem:[%s12249_s22 + $0x6e8] sm:$0xff] %v6050_v47  ;;  %v5803_v8 = vmul.f32 %v5294_v61, %v5294_v61  ;;  %v5802_v63 = vmul.f32 %v4782_v39, %v4782_v39  ;;  %v5296_v4 = vpop.f32.mrb[249].mxu1  ;;  %v5569_v26 = vmul.f32 %v13630_v11, %v13630_v11  ;;  %v13632_v61 = vld [vmem:[#allocation214_spill] sm:$0xff] }
 0x51f   : > { %6308 = vst [vmem:[%s12249_s22 + $0x6f8] sm:$0xff] %v6052_v13  ;;  %v6057_v0 = vadd.f32 %v5801_v44, %v5545_v32  ;;  %v5804_v54 = vmul.f32 %v5296_v4, %v5296_v4  ;;  %v13631_v13 = vld [vmem:[#allocation213_spill] sm:$0xff]  ;;  %v5570_v39 = vmul.f32 %v13632_v61, %v13632_v61 }
 0x520   : > { %v6059_v18 = vadd.f32 %v5803_v8, %v5547_v49  ;;  %v6058_v51 = vadd.f32 %v5802_v63, %v5546_v20  ;;  %v4786_v1 = vpop.f32.mrb[250].mxu0  ;;  %v5571_v44 = vmul.f32 %v13631_v13, %v13631_v13  ;;  %v13633_v20 = vld [vmem:[#allocation215_spill] sm:$0xff] }
 0x521   : > { %6313 = vst [vmem:[%s12249_s22 + $0x720] sm:$0xff] %v6057_v0  ;;  %v6060_v41 = vadd.f32 %v5804_v54, %v5548_v17  ;;  %v5809_v52 = vmul.f32 %v4786_v1, %v4786_v1  ;;  %v5300_v30 = vpop.f32.mrb[250].mxu1  ;;  %v4788_v10 = vpop.f32.mrb[251].mxu0  ;;  %v5572_v8 = vmul.f32 %v13633_v20, %v13633_v20 }
 0x522   : > { %6315 = vst [vmem:[%s12249_s22 + $0x730] sm:$0xff] %v6059_v18  ;;  %6314 = vst [vmem:[%s12249_s22 + $0x728] sm:$0xff] %v6058_v51  ;;  %v5811_v56 = vmul.f32 %v5300_v30, %v5300_v30  ;;  %v5810_v33 = vmul.f32 %v4788_v10, %v4788_v10  ;;  %v5302_v23 = vpop.f32.mrb[251].mxu1 }
 0x523   : > { %6316 = vst [vmem:[%s12249_s22 + $0x738] sm:$0xff] %v6060_v41  ;;  %v6065_v24 = vadd.f32 %v5809_v52, %v5553_v2  ;;  %v5812_v48 = vmul.f32 %v5302_v23, %v5302_v23 }
 0x524   : > { %v6067_v55 = vadd.f32 %v5811_v56, %v5555_v3  ;;  %v6066_v29 = vadd.f32 %v5810_v33, %v5554_v62  ;;  %v4792_v25 = vpop.f32.mrb[252].mxu0 }
 0x525   : > { %6321 = vst [vmem:[%s12249_s22 + $0x760] sm:$0xff] %v6065_v24  ;;  %v6068_v36 = vadd.f32 %v5812_v48, %v5556_v5  ;;  %v5817_v28 = vmul.f32 %v4792_v25, %v4792_v25  ;;  %v5306_v7 = vpop.f32.mrb[252].mxu1  ;;  %v4794_v60 = vpop.f32.mrb[253].mxu0 }
 0x526   : > { %6323 = vst [vmem:[%s12249_s22 + $0x770] sm:$0xff] %v6067_v55  ;;  %6322 = vst [vmem:[%s12249_s22 + $0x768] sm:$0xff] %v6066_v29  ;;  %v5819_v57 = vmul.f32 %v5306_v7, %v5306_v7  ;;  %v5818_v42 = vmul.f32 %v4794_v60, %v4794_v60  ;;  %v5308_v9 = vpop.f32.mrb[253].mxu1 }
 0x527   : > { %6324 = vst [vmem:[%s12249_s22 + $0x778] sm:$0xff] %v6068_v36  ;;  %v6073_v58 = vadd.f32 %v5817_v28, %v5561_v34  ;;  %v5820_v46 = vmul.f32 %v5308_v9, %v5308_v9 }
 0x528   : > { %v6075_v38 = vadd.f32 %v5819_v57, %v5563_v27  ;;  %v6074_v37 = vadd.f32 %v5818_v42, %v5562_v45  ;;  %v4798_v59 = vpop.f32.mrb[254].mxu0 }
 0x529   : > { %6329 = vst [vmem:[%s12249_s22 + $0x7a0] sm:$0xff] %v6073_v58  ;;  %v6076_v47 = vadd.f32 %v5820_v46, %v5564_v31  ;;  %v5825_v12 = vmul.f32 %v4798_v59, %v4798_v59  ;;  %v5312_v50 = vpop.f32.mrb[254].mxu1  ;;  %v4800_v32 = vpop.f32.mrb[255].mxu0 }
 0x52a   : > { %6331 = vst [vmem:[%s12249_s22 + $0x7b0] sm:$0xff] %v6075_v38  ;;  %6330 = vst [vmem:[%s12249_s22 + $0x7a8] sm:$0xff] %v6074_v37  ;;  %v5827_v40 = vmul.f32 %v5312_v50, %v5312_v50  ;;  %v5826_v49 = vmul.f32 %v4800_v32, %v4800_v32  ;;  %v5314_v15 = vpop.f32.mrb[255].mxu1 }
 0x52b   : > { %6332 = vst [vmem:[%s12249_s22 + $0x7b8] sm:$0xff] %v6076_v47  ;;  %v6081_v63 = vadd.f32 %v5825_v12, %v5569_v26  ;;  %v5828_v4 = vmul.f32 %v5314_v15, %v5314_v15 }
 0x52c   : > { %v6083_v22 = vadd.f32 %v5827_v40, %v5571_v44  ;;  %v6082_v17 = vadd.f32 %v5826_v49, %v5570_v39 }
 0x52d   : > { %6337 = vst [vmem:[%s12249_s22 + $0x7e0] sm:$0xff] %v6081_v63  ;;  %v6084_v0 = vadd.f32 %v5828_v4, %v5572_v8 }
 0x52e   : > { %6339 = vst [vmem:[%s12249_s22 + $0x7f0] sm:$0xff] %v6083_v22  ;;  %6338 = vst [vmem:[%s12249_s22 + $0x7e8] sm:$0xff] %v6082_v17 }
 0x52f   : > { %6340 = vst [vmem:[%s12249_s22 + $0x7f8] sm:$0xff] %v6084_v0 }
 0x530   : > { %8473 = shalt.err (!%p8470_p3)
}
 0x531   : > { %s8474_s16 = scalar_lea.hbm %s13155_s3, 32768  ;;  %s8478_s24 = scalar_lea.hbm %s13208_s2, 131072 }
 0x532   : > { %p8475_p4 = scmp.ne.s32.totalorder %s13155_s3, %s8474_s16  ;;  %p8479_p9 = scmp.lt.u32.totalorder %s13155_s3, %s13208_s2 }
 0x533   : > { %p8480_p10 = scmp.lt.u32.totalorder %s8478_s24, %s8474_s16  ;;  %p8482_p12 = scmp.lt.u32.totalorder %s8474_s16, %s13155_s3 }
 0x534   : > { %p8476_p7 = pnand %p8475_p4, %p8580_p5 }
 0x535   : > { %p8481_p11 = por %p8480_p10, %p8479_p9 }
 0x536   : > { %p8477_p8 = pneg %p8476_p7 }
 0x537   : > { %p8483_p13 = por %p8482_p12, %p8481_p11 }
 0x539   : > { %p8484_p0 = pnand %p8483_p13, %p8477_p8 }
 0x53b   : > { %8487 = shalt.err (!%p8484_p0)
}
 0x53c   : > { %s8525_s28 = smov 1024   ;;  %s8526_s29 = smov 64  }
 0x53d   : > { %8035 = dma.vmem_to_hbm [thread:$0]  (%p8580_p5), %s13157_s5, 32768, %s13155_s3, %s13165_s4, %s8525_s28, %s8525_s28, %s8526_s29  }
 0x53e PF: > { %p8041_p1 = scmp.ge.s32.totalorder %s8522_s12, 2  ;;  %s6371_s30 = sand.u32 1, %s8510_s9  }
 0x53f   : > { %s6372_s22 = scalar_lea.sflag [#allocation3], %s6371_s30 }
 0x540   : > { %p8038_p2 = pnand %p8041_p1, %p8584_p6 }
 0x542   : > { %8505 = dma.done.wait (!%p8038_p2), %s6372_s22, 32768  }
 0x543   : > { %8507 = vsyncadd (!%p8038_p2), %s6372_s22, 4294934528  ;;  %p12_p3 = scmp.ge.s32.totalorder %s8567_s15, 6   ;;  %s13634_s9 = smov %s8514_s10 }
 0x544   : > { %s13635_s10 = smov %s8518_s11  ;;  %s13636_s11 = smov %s8578_s18 }
 0x545   : > { %s13637_s12 = smov %s8567_s15  ;;  %14 = sbr.rel (!%p12_p3) target bundleno = 3 (0x3), region = 63 }
 0x54c   :  { %6377 = vsyncpa [#allocation3], 1 }
 0x54d   :  { %6379 = vsyncpa [#allocation3 + $0x1], 1 }

</bundles_post_ra>
